<compile_context>
chip_gen: v6e
topology: v6e:2x2x1
jax: 0.10.0
libtpu: 0.0.40
codegen_flags: <defaults>
</compile_context>

<pallas_src>
import functools

import jax
import jax.numpy as jnp
from jax import lax
from jax.experimental import pallas as pl
from jax.experimental.pallas import tpu as pltpu

NEG_SLOPE = 0.01   # nn.LeakyReLU / F.leaky_relu default negative_slope
IN_EPS = 1e-5      # nn.InstanceNorm2d default eps


def _round_up(x, m):
    return (x + m - 1) // m * m


# ----------------------------------------------------------------------------
# Pallas kernel 1: single-shot matmul tile (full-K reduction in one grid step),
# f32 MXU accumulation, fused bias + optional LeakyReLU, stored as out dtype.
# ----------------------------------------------------------------------------
def _matmul_kernel(a_ref, b_ref, bias_ref, o_ref, *, apply_lrelu):
    y = jnp.dot(a_ref[...], b_ref[...], preferred_element_type=jnp.float32)
    y = y + bias_ref[...]                        # (1, tn) broadcast over rows
    if apply_lrelu:
        y = jnp.maximum(y, NEG_SLOPE * y)        # LeakyReLU as a single max
    o_ref[...] = y.astype(o_ref.dtype)


def matmul_bias_act(a, b, bias, *, apply_lrelu, out_dtype):
    """a: (M, K) bf16, b: (K, N) bf16, bias: (1, N) f32 -> (M, N) out_dtype.

    Caller guarantees N % 128 == 0, K % 128 == 0, M % 8 == 0 (and M % 256 == 0
    when M > 512).  tk == K: the reduction is not tiled, so each (i, j) output
    block is produced by exactly one grid step (no k-loop, no accumulator RMW).
    """
    M, K = a.shape
    K2, N = b.shape
    assert K == K2 and bias.shape == (1, N)
    assert M % 8 == 0 and N % 128 == 0 and K % 128 == 0

    tm = M if M <= 512 else (512 if M % 512 == 0 else 256)
    assert M % tm == 0
    tn = 256 if N % 256 == 0 else 128            # 256 matches v6e/v7x MXU width
    tk = K                                       # collapse the reduction axis

    out_itemsize = jnp.dtype(out_dtype).itemsize
    vmem_needed = 2 * (tm * tk * 2 + tk * tn * 2 + tn * 4 + tm * tn * out_itemsize)
    vmem_limit = max(vmem_needed + (8 << 20), 32 << 20)

    # TODO(synk): on v7x, if a layer's (M//tm, N//tn) grid collapses to (1, 1),
    # split tm so both TensorCores get a parallel tile.
    kernel = functools.partial(_matmul_kernel, apply_lrelu=apply_lrelu)
    return pl.pallas_call(
        kernel,
        out_shape=jax.ShapeDtypeStruct((M, N), out_dtype),
        grid_spec=pltpu.PrefetchScalarGridSpec(
            num_scalar_prefetch=0,
            grid=(M // tm, N // tn),
            in_specs=[
                pl.BlockSpec((tm, tk), lambda i, j: (i, 0)),
                pl.BlockSpec((tk, tn), lambda i, j: (0, j)),
                pl.BlockSpec((1, tn), lambda i, j: (0, j)),
            ],
            out_specs=pl.BlockSpec((tm, tn), lambda i, j: (i, j)),
        ),
        compiler_params=pltpu.CompilerParams(
            dimension_semantics=("parallel", "parallel"),
            vmem_limit_bytes=vmem_limit),
    )(a, b, bias)


# ----------------------------------------------------------------------------
# Pallas kernel 2: InstanceNorm2d (no affine, biased var) + LeakyReLU.
# bf16 in / bf16 out, statistics and normalization in f32.  repeats=2 fuses
# the duplicated norm->lrelu->norm->lrelu after layer4 into one invocation.
# ----------------------------------------------------------------------------
def _instnorm_lrelu_kernel(x_ref, o_ref, *, repeats):
    y = x_ref[...].astype(jnp.float32)            # (1, HW, C)
    inv_hw = 1.0 / y.shape[1]
    for _ in range(repeats):
        s = jnp.sum(y, axis=1, keepdims=True)
        ss = jnp.sum(y * y, axis=1, keepdims=True)
        mean = s * inv_hw
        var = jnp.maximum(ss * inv_hw - mean * mean, 0.0)
        yn = (y - mean) * lax.rsqrt(var + IN_EPS)
        y = jnp.maximum(yn, NEG_SLOPE * yn)
    o_ref[...] = y.astype(o_ref.dtype)


def instnorm_lrelu_pallas(x, repeats):
    """x: (N, HW, C) bf16 -> same shape bf16, normalized per (n, c) over HW."""
    # TODO(synk): tile HW (two-pass partial sum / sum-of-squares into a small
    # scratch) for production resolutions so the (1, HW, C) block never has to
    # fit VMEM whole (matters on v7x's 64 MiB VMEM / v5e's 16 MiB scoped
    # default); not needed at these sizes.
    N, HW, C = x.shape
    kernel = functools.partial(_instnorm_lrelu_kernel, repeats=repeats)
    return pl.pallas_call(
        kernel,
        out_shape=jax.ShapeDtypeStruct((N, HW, C), x.dtype),
        grid_spec=pltpu.PrefetchScalarGridSpec(
            num_scalar_prefetch=0,
            grid=(N,),
            in_specs=[pl.BlockSpec((1, HW, C), lambda n: (n, 0, 0))],
            out_specs=pl.BlockSpec((1, HW, C), lambda n: (n, 0, 0)),
        ),
        compiler_params=pltpu.CompilerParams(
            dimension_semantics=("parallel",),
            vmem_limit_bytes=32 * 1024 * 1024),
    )(x)


# ----------------------------------------------------------------------------
# Glue: im2col, spectral norm (parameter preprocessing), parameter init
# ----------------------------------------------------------------------------
def im2col(x, k, stride, pad):
    """x: (N, H, W, C) -> (N, Ho, Wo, k*k*C) with (kh, kw, cin) feature order."""
    # TODO(synk): fuse patch extraction into the matmul kernel for the stride-1
    # layers (per-tap accumulation over shifted windows) to avoid the 16x
    # im2col HBM expansion at production resolutions.
    xp = jnp.pad(x, ((0, 0), (pad, pad), (pad, pad), (0, 0)))
    N, Hp, Wp, C = xp.shape
    Ho = (Hp - k) // stride + 1
    Wo = (Wp - k) // stride + 1
    patches = []
    for di in range(k):
        for dj in range(k):
            patches.append(
                xp[:, di:di + stride * Ho:stride, dj:dj + stride * Wo:stride, :])
    cols = jnp.stack(patches, axis=3)                   # (N, Ho, Wo, k*k, C)
    return cols.reshape(N, Ho, Wo, k * k * C), Ho, Wo


def spectral_normalize(w_ocihw, key, n_iter=5):
    """PyTorch spectral_norm semantics: divide W by its top singular value."""
    cout = w_ocihw.shape[0]
    wm = w_ocihw.reshape(cout, -1)
    u = jax.random.normal(key, (cout,), jnp.float32)
    u = u / (jnp.linalg.norm(u) + 1e-12)
    v = None
    for _ in range(n_iter):
        v = wm.T @ u
        v = v / (jnp.linalg.norm(v) + 1e-12)
        u = wm @ v
        u = u / (jnp.linalg.norm(u) + 1e-12)
    sigma = u @ (wm @ v)
    return w_ocihw / sigma


def conv_weight_to_matmul(w_ocihw):
    """(Cout, Cin, kh, kw) -> (kh*kw*Cin, Cout) matching im2col feature order."""
    cout = w_ocihw.shape[0]
    return jnp.transpose(w_ocihw, (2, 3, 1, 0)).reshape(-1, cout)


def init_params(key):
    """Deterministic synthetic parameters matching the module's shapes."""
    specs = [
        ("layer1", 4, 64),
        ("layer2", 64, 128),
        ("layer3", 128, 256),
        ("layer4", 256, 512),
        ("conv", 512, 1),
    ]
    params = {}
    for name, cin, cout in specs:
        key, kw, ku = jax.random.split(key, 3)
        fan_in = cin * 4 * 4
        w = jax.random.normal(kw, (cout, cin, 4, 4), jnp.float32) / jnp.sqrt(fan_in)
        w = spectral_normalize(w, ku)
        params[name + "_w"] = conv_weight_to_matmul(w)   # (k*k*cin, cout) f32
    key, kb = jax.random.split(key)
    params["conv_b"] = jax.random.normal(kb, (1,), jnp.float32) * 0.01
    return params


# ----------------------------------------------------------------------------
# Forward pass (mirrors Discriminator.forward)
# ----------------------------------------------------------------------------
def conv_block(x, w, bias, cout, *, stride, fuse_lrelu, out_dtype):
    """x: (N,H,W,Cin) bf16, w: (k*k*Cin, cout) f32, bias: (cout,) f32 or None."""
    N = x.shape[0]
    cols, Ho, Wo = im2col(x, 4, stride, 1)
    M = N * Ho * Wo
    K = cols.shape[-1]
    a = cols.reshape(M, K)

    # Pad to lane/tile-friendly sizes (zeros contribute nothing to the dot),
    # skipping pads that are no-ops.
    K_pad = _round_up(K, 128)
    N_pad = _round_up(cout, 128)
    M_pad = _round_up(M, 8) if M <= 512 else _round_up(M, 256)

    if (M_pad, K_pad) != (M, K):
        a = jnp.pad(a, ((0, M_pad - M), (0, K_pad - K)))
    wb = w
    if (K_pad, N_pad) != w.shape:
        wb = jnp.pad(w, ((0, K_pad - K), (0, N_pad - cout)))
    wb = wb.astype(jnp.bfloat16)
    if bias is None:
        b = jnp.zeros((1, N_pad), jnp.float32)
    else:
        b = bias.astype(jnp.float32)
        if N_pad != cout:
            b = jnp.pad(b, (0, N_pad - cout))
        b = b.reshape(1, N_pad)

    y = matmul_bias_act(a, wb, b, apply_lrelu=fuse_lrelu, out_dtype=out_dtype)
    if M_pad != M or N_pad != cout:
        # Padded M rows MUST be dropped before InstanceNorm (stat pollution);
        # channel padding is dropped here too.
        y = y[:M, :cout]
    return y.reshape(N, Ho, Wo, cout)


def instnorm_lrelu(x, repeats=1):
    N, H, W, C = x.shape
    y = instnorm_lrelu_pallas(x.reshape(N, H * W, C), repeats)
    return y.reshape(N, H, W, C)


def discriminator_forward(params, img, seg):
    # img: (N, H, W, 3), seg: (N, H, W, 1)  [NHWC version of NCHW torch.cat dim=1]
    x = jnp.concatenate([img, seg], axis=-1).astype(jnp.bfloat16)
    # layer1: spectral_norm conv(4->64, s2) + LeakyReLU (fused epilogue)
    x = conv_block(x, params["layer1_w"], None, 64, stride=2,
                   fuse_lrelu=True, out_dtype=jnp.bfloat16)
    # layer2..3: spectral_norm conv + InstanceNorm + LeakyReLU
    x = conv_block(x, params["layer2_w"], None, 128, stride=2,
                   fuse_lrelu=False, out_dtype=jnp.bfloat16)
    x = instnorm_lrelu(x, repeats=1)
    x = conv_block(x, params["layer3_w"], None, 256, stride=2,
                   fuse_lrelu=False, out_dtype=jnp.bfloat16)
    x = instnorm_lrelu(x, repeats=1)
    # layer4 (stride 1) + its InstanceNorm+LeakyReLU, then the forward's extra
    # F.leaky_relu(inst_norm(x)) -- both norm+lrelu pairs fused (repeats=2).
    x = conv_block(x, params["layer4_w"], None, 512, stride=1,
                   fuse_lrelu=False, out_dtype=jnp.bfloat16)
    x = instnorm_lrelu(x, repeats=2)
    # final spectral_norm conv(512->1, s1, p1, bias=True); Cout padded to 128
    # inside conv_block for a lane-dense output, sliced back to 1; f32 output.
    x = conv_block(x, params["conv_w"], params["conv_b"], 1, stride=1,
                   fuse_lrelu=False, out_dtype=jnp.float32)
    # torch .squeeze(): drop size-1 dims (here the channel axis).
    return jnp.squeeze(x)


# ----------------------------------------------------------------------------
if __name__ == "__main__":
    key = jax.random.PRNGKey(0)
    kp, ki, ks = jax.random.split(key, 3)

    params = init_params(kp)

    # Small but non-degenerate spatial size (keeps InstanceNorm well-defined
    # through layer4: 32 -> 16 -> 8 -> 4 -> 3 -> 2).
    N, H, W = 2, 32, 32
    img = jax.random.normal(ki, (N, H, W, 3), jnp.float32)
    seg = jax.random.normal(ks, (N, H, W, 1), jnp.float32)

    fwd = jax.jit(discriminator_forward)
    out = fwd(params, img, seg)
    out = jax.block_until_ready(out)
    assert out.shape == (N, 2, 2), out.shape
    assert bool(jnp.all(jnp.isfinite(out)))
    print("KERNEL_OK")
</pallas_src>

<mosaic_0001>
module attributes {stable_mosaic.version = 11 : i64} {
  func.func @_matmul_kernel(%arg0: i32, %arg1: i32, %arg2: memref<512x128xbf16, #tpu.memory_space<vmem>>, %arg3: memref<128x128xbf16, #tpu.memory_space<vmem>>, %arg4: memref<1x128xf32, #tpu.memory_space<vmem>>, %arg5: memref<512x128xbf16, #tpu.memory_space<vmem>>) attributes {dimension_semantics = [#tpu.dimension_semantics<parallel>, #tpu.dimension_semantics<parallel>], iteration_bounds = array<i64: 1, 1>, scalar_prefetch = 0 : i64, scratch_operands = 0 : i64, tpu.core_type = #tpu.core_type<tc>, window_params = [{transform_indices = @transform_0, window_bounds = array<i64: 512, 128>}, {transform_indices = @transform_1, window_bounds = array<i64: 128, 128>}, {transform_indices = @transform_2, window_bounds = array<i64: 1, 128>}, {transform_indices = @transform_3, window_bounds = array<i64: 512, 128>}]} {
    %c0 = arith.constant 0 : index
    %c0_0 = arith.constant 0 : index
    %0 = vector.load %arg2[%c0, %c0_0] : memref<512x128xbf16, #tpu.memory_space<vmem>>, vector<512x128xbf16>
    %c0_1 = arith.constant 0 : index
    %c0_2 = arith.constant 0 : index
    %1 = vector.load %arg3[%c0_1, %c0_2] : memref<128x128xbf16, #tpu.memory_space<vmem>>, vector<128x128xbf16>
    %cst = arith.constant dense<0.000000e+00> : vector<512x128xf32>
    %2 = tpu.matmul %0, %1, %cst {dimension_numbers = #tpu.dot_dimension_numbers<[1], [0], [0], [1], [0, 0, 1, 1], [], []>} : vector<512x128xbf16>, vector<128x128xbf16>, vector<512x128xf32> -> vector<512x128xf32>
    %c0_3 = arith.constant 0 : index
    %c0_4 = arith.constant 0 : index
    %3 = vector.load %arg4[%c0_3, %c0_4] : memref<1x128xf32, #tpu.memory_space<vmem>>, vector<1x128xf32>
    %4 = vector.broadcast %3 : vector<1x128xf32> to vector<512x128xf32>
    %5 = arith.addf %2, %4 : vector<512x128xf32>
    %cst_5 = arith.constant 0.00999999977 : f32
    %6 = vector.broadcast %cst_5 : f32 to vector<512x128xf32>
    %7 = arith.mulf %6, %5 : vector<512x128xf32>
    %8 = arith.maximumf %5, %7 : vector<512x128xf32>
    %9 = arith.truncf %8 : vector<512x128xf32> to vector<512x128xbf16>
    %c0_6 = arith.constant 0 : index
    %c0_7 = arith.constant 0 : index
    %10 = vector.load %arg5[%c0_6, %c0_7] : memref<512x128xbf16, #tpu.memory_space<vmem>>, vector<512x128xbf16>
    tpu.vector_store %arg5[%c0_6, %c0_7], %9 {strides = array<i32>} : memref<512x128xbf16, #tpu.memory_space<vmem>>, vector<512x128xbf16>,
    return
  }
  func.func @transform_0(%arg0: i32, %arg1: i32) -> (i32, i32) {
    %c0_i32 = arith.constant 0 : i32
    %c0_i32_0 = arith.constant 0 : i32
    return %arg0, %c0_i32 : i32, i32
  }
  func.func @transform_1(%arg0: i32, %arg1: i32) -> (i32, i32) {
    %c0_i32 = arith.constant 0 : i32
    %c0_i32_0 = arith.constant 0 : i32
    return %c0_i32, %arg1 : i32, i32
  }
  func.func @transform_2(%arg0: i32, %arg1: i32) -> (i32, i32) {
    %c0_i32 = arith.constant 0 : i32
    %c0_i32_0 = arith.constant 0 : i32
    return %c0_i32, %arg1 : i32, i32
  }
  func.func @transform_3(%arg0: i32, %arg1: i32) -> (i32, i32) {
    %c0_i32 = arith.constant 0 : i32
    return %arg0, %arg1 : i32, i32
  }
}

module attributes {stable_mosaic.version = 11 : i64} {
  func.func @_matmul_kernel(%arg0: i32, %arg1: i32, %arg2: memref<128x1024xbf16, #tpu.memory_space<vmem>>, %arg3: memref<1024x128xbf16, #tpu.memory_space<vmem>>, %arg4: memref<1x128xf32, #tpu.memory_space<vmem>>, %arg5: memref<128x128xbf16, #tpu.memory_space<vmem>>) attributes {dimension_semantics = [#tpu.dimension_semantics<parallel>, #tpu.dimension_semantics<parallel>], iteration_bounds = array<i64: 1, 1>, scalar_prefetch = 0 : i64, scratch_operands = 0 : i64, tpu.core_type = #tpu.core_type<tc>, window_params = [{transform_indices = @transform_0, window_bounds = array<i64: 128, 1024>}, {transform_indices = @transform_1, window_bounds = array<i64: 1024, 128>}, {transform_indices = @transform_2, window_bounds = array<i64: 1, 128>}, {transform_indices = @transform_3, window_bounds = array<i64: 128, 128>}]} {
    %c0 = arith.constant 0 : index
    %c0_0 = arith.constant 0 : index
    %0 = vector.load %arg2[%c0, %c0_0] : memref<128x1024xbf16, #tpu.memory_space<vmem>>, vector<128x1024xbf16>
    %c0_1 = arith.constant 0 : index
    %c0_2 = arith.constant 0 : index
    %1 = vector.load %arg3[%c0_1, %c0_2] : memref<1024x128xbf16, #tpu.memory_space<vmem>>, vector<1024x128xbf16>
    %cst = arith.constant dense<0.000000e+00> : vector<128x128xf32>
    %2 = tpu.matmul %0, %1, %cst {dimension_numbers = #tpu.dot_dimension_numbers<[1], [0], [0], [1], [0, 0, 1, 1], [], []>} : vector<128x1024xbf16>, vector<1024x128xbf16>, vector<128x128xf32> -> vector<128x128xf32>
    %c0_3 = arith.constant 0 : index
    %c0_4 = arith.constant 0 : index
    %3 = vector.load %arg4[%c0_3, %c0_4] : memref<1x128xf32, #tpu.memory_space<vmem>>, vector<1x128xf32>
    %4 = vector.broadcast %3 : vector<1x128xf32> to vector<128x128xf32>
    %5 = arith.addf %2, %4 : vector<128x128xf32>
    %6 = arith.truncf %5 : vector<128x128xf32> to vector<128x128xbf16>
    %c0_5 = arith.constant 0 : index
    %c0_6 = arith.constant 0 : index
    %7 = vector.load %arg5[%c0_5, %c0_6] : memref<128x128xbf16, #tpu.memory_space<vmem>>, vector<128x128xbf16>
    tpu.vector_store %arg5[%c0_5, %c0_6], %6 {strides = array<i32>} : memref<128x128xbf16, #tpu.memory_space<vmem>>, vector<128x128xbf16>,
    return
  }
  func.func @transform_0(%arg0: i32, %arg1: i32) -> (i32, i32) {
    %c0_i32 = arith.constant 0 : i32
    %c0_i32_0 = arith.constant 0 : i32
    return %arg0, %c0_i32 : i32, i32
  }
  func.func @transform_1(%arg0: i32, %arg1: i32) -> (i32, i32) {
    %c0_i32 = arith.constant 0 : i32
    %c0_i32_0 = arith.constant 0 : i32
    return %c0_i32, %arg1 : i32, i32
  }
  func.func @transform_2(%arg0: i32, %arg1: i32) -> (i32, i32) {
    %c0_i32 = arith.constant 0 : i32
    %c0_i32_0 = arith.constant 0 : i32
    return %c0_i32, %arg1 : i32, i32
  }
  func.func @transform_3(%arg0: i32, %arg1: i32) -> (i32, i32) {
    %c0_i32 = arith.constant 0 : i32
    return %arg0, %arg1 : i32, i32
  }
}

module attributes {stable_mosaic.version = 11 : i64} {
  func.func @_instnorm_lrelu_kernel(%arg0: i32, %arg1: memref<1x64x128xbf16, #tpu.memory_space<vmem>>, %arg2: memref<1x64x128xbf16, #tpu.memory_space<vmem>>) attributes {dimension_semantics = [#tpu.dimension_semantics<parallel>], iteration_bounds = array<i64: 2>, scalar_prefetch = 0 : i64, scratch_operands = 0 : i64, tpu.core_type = #tpu.core_type<tc>, window_params = [{transform_indices = @transform_0, window_bounds = array<i64: 1, 64, 128>}, {transform_indices = @transform_1, window_bounds = array<i64: 1, 64, 128>}]} {
    %c0 = arith.constant 0 : index
    %c0_0 = arith.constant 0 : index
    %c0_1 = arith.constant 0 : index
    %0 = vector.load %arg1[%c0, %c0_0, %c0_1] : memref<1x64x128xbf16, #tpu.memory_space<vmem>>, vector<1x64x128xbf16>
    %1 = arith.extf %0 : vector<1x64x128xbf16> to vector<1x64x128xf32>
    %cst = arith.constant dense<0.000000e+00> : vector<1x128xf32>
    %2 = vector.multi_reduction <add>, %1, %cst [1] : vector<1x64x128xf32> to vector<1x128xf32>
    %3 = vector.shape_cast %2 : vector<1x128xf32> to vector<1x1x128xf32>
    %4 = arith.mulf %1, %1 : vector<1x64x128xf32>
    %cst_2 = arith.constant dense<0.000000e+00> : vector<1x128xf32>
    %5 = vector.multi_reduction <add>, %4, %cst_2 [1] : vector<1x64x128xf32> to vector<1x128xf32>
    %6 = vector.shape_cast %5 : vector<1x128xf32> to vector<1x1x128xf32>
    %cst_3 = arith.constant 1.562500e-02 : f32
    %7 = vector.broadcast %cst_3 : f32 to vector<1x1x128xf32>
    %8 = arith.mulf %3, %7 : vector<1x1x128xf32>
    %cst_4 = arith.constant 1.562500e-02 : f32
    %9 = vector.broadcast %cst_4 : f32 to vector<1x1x128xf32>
    %10 = arith.mulf %6, %9 : vector<1x1x128xf32>
    %11 = arith.mulf %8, %8 : vector<1x1x128xf32>
    %12 = arith.subf %10, %11 : vector<1x1x128xf32>
    %cst_5 = arith.constant 0.000000e+00 : f32
    %13 = vector.broadcast %cst_5 : f32 to vector<1x1x128xf32>
    %14 = arith.maximumf %12, %13 : vector<1x1x128xf32>
    %15 = vector.broadcast %8 : vector<1x1x128xf32> to vector<1x64x128xf32>
    %16 = arith.subf %1, %15 : vector<1x64x128xf32>
    %cst_6 = arith.constant 9.99999974E-6 : f32
    %17 = vector.broadcast %cst_6 : f32 to vector<1x1x128xf32>
    %18 = arith.addf %14, %17 : vector<1x1x128xf32>
    %19 = math.rsqrt %18 : vector<1x1x128xf32>
    %20 = vector.broadcast %19 : vector<1x1x128xf32> to vector<1x64x128xf32>
    %21 = arith.mulf %16, %20 : vector<1x64x128xf32>
    %cst_7 = arith.constant 0.00999999977 : f32
    %22 = vector.broadcast %cst_7 : f32 to vector<1x64x128xf32>
    %23 = arith.mulf %22, %21 : vector<1x64x128xf32>
    %24 = arith.maximumf %21, %23 : vector<1x64x128xf32>
    %25 = arith.truncf %24 : vector<1x64x128xf32> to vector<1x64x128xbf16>
    %c0_8 = arith.constant 0 : index
    %c0_9 = arith.constant 0 : index
    %c0_10 = arith.constant 0 : index
    %26 = vector.load %arg2[%c0_8, %c0_9, %c0_10] : memref<1x64x128xbf16, #tpu.memory_space<vmem>>, vector<1x64x128xbf16>
    tpu.vector_store %arg2[%c0_8, %c0_9, %c0_10], %25 {strides = array<i32>} : memref<1x64x128xbf16, #tpu.memory_space<vmem>>, vector<1x64x128xbf16>,
    return
  }
  func.func @transform_0(%arg0: i32) -> (i32, i32, i32) {
    %c0_i32 = arith.constant 0 : i32
    %c0_i32_0 = arith.constant 0 : i32
    %c0_i32_1 = arith.constant 0 : i32
    return %arg0, %c0_i32, %c0_i32_0 : i32, i32, i32
  }
  func.func @transform_1(%arg0: i32) -> (i32, i32, i32) {
    %c0_i32 = arith.constant 0 : i32
    %c0_i32_0 = arith.constant 0 : i32
    %c0_i32_1 = arith.constant 0 : i32
    return %arg0, %c0_i32, %c0_i32_0 : i32, i32, i32
  }
}

module attributes {stable_mosaic.version = 11 : i64} {
  func.func @_instnorm_lrelu_kernel(%arg0: i32, %arg1: memref<1x16x256xbf16, #tpu.memory_space<vmem>>, %arg2: memref<1x16x256xbf16, #tpu.memory_space<vmem>>) attributes {dimension_semantics = [#tpu.dimension_semantics<parallel>], iteration_bounds = array<i64: 2>, scalar_prefetch = 0 : i64, scratch_operands = 0 : i64, tpu.core_type = #tpu.core_type<tc>, window_params = [{transform_indices = @transform_0, window_bounds = array<i64: 1, 16, 256>}, {transform_indices = @transform_1, window_bounds = array<i64: 1, 16, 256>}]} {
    %c0 = arith.constant 0 : index
    %c0_0 = arith.constant 0 : index
    %c0_1 = arith.constant 0 : index
    %0 = vector.load %arg1[%c0, %c0_0, %c0_1] : memref<1x16x256xbf16, #tpu.memory_space<vmem>>, vector<1x16x256xbf16>
    %1 = arith.extf %0 : vector<1x16x256xbf16> to vector<1x16x256xf32>
    %cst = arith.constant dense<0.000000e+00> : vector<1x256xf32>
    %2 = vector.multi_reduction <add>, %1, %cst [1] : vector<1x16x256xf32> to vector<1x256xf32>
    %3 = vector.shape_cast %2 : vector<1x256xf32> to vector<1x1x256xf32>
    %4 = arith.mulf %1, %1 : vector<1x16x256xf32>
    %cst_2 = arith.constant dense<0.000000e+00> : vector<1x256xf32>
    %5 = vector.multi_reduction <add>, %4, %cst_2 [1] : vector<1x16x256xf32> to vector<1x256xf32>
    %6 = vector.shape_cast %5 : vector<1x256xf32> to vector<1x1x256xf32>
    %cst_3 = arith.constant 6.250000e-02 : f32
    %7 = vector.broadcast %cst_3 : f32 to vector<1x1x256xf32>
    %8 = arith.mulf %3, %7 : vector<1x1x256xf32>
    %cst_4 = arith.constant 6.250000e-02 : f32
    %9 = vector.broadcast %cst_4 : f32 to vector<1x1x256xf32>
    %10 = arith.mulf %6, %9 : vector<1x1x256xf32>
    %11 = arith.mulf %8, %8 : vector<1x1x256xf32>
    %12 = arith.subf %10, %11 : vector<1x1x256xf32>
    %cst_5 = arith.constant 0.000000e+00 : f32
    %13 = vector.broadcast %cst_5 : f32 to vector<1x1x256xf32>
    %14 = arith.maximumf %12, %13 : vector<1x1x256xf32>
    %15 = vector.broadcast %8 : vector<1x1x256xf32> to vector<1x16x256xf32>
    %16 = arith.subf %1, %15 : vector<1x16x256xf32>
    %cst_6 = arith.constant 9.99999974E-6 : f32
    %17 = vector.broadcast %cst_6 : f32 to vector<1x1x256xf32>
    %18 = arith.addf %14, %17 : vector<1x1x256xf32>
    %19 = math.rsqrt %18 : vector<1x1x256xf32>
    %20 = vector.broadcast %19 : vector<1x1x256xf32> to vector<1x16x256xf32>
    %21 = arith.mulf %16, %20 : vector<1x16x256xf32>
    %cst_7 = arith.constant 0.00999999977 : f32
    %22 = vector.broadcast %cst_7 : f32 to vector<1x16x256xf32>
    %23 = arith.mulf %22, %21 : vector<1x16x256xf32>
    %24 = arith.maximumf %21, %23 : vector<1x16x256xf32>
    %25 = arith.truncf %24 : vector<1x16x256xf32> to vector<1x16x256xbf16>
    %c0_8 = arith.constant 0 : index
    %c0_9 = arith.constant 0 : index
    %c0_10 = arith.constant 0 : index
    %26 = vector.load %arg2[%c0_8, %c0_9, %c0_10] : memref<1x16x256xbf16, #tpu.memory_space<vmem>>, vector<1x16x256xbf16>
    tpu.vector_store %arg2[%c0_8, %c0_9, %c0_10], %25 {strides = array<i32>} : memref<1x16x256xbf16, #tpu.memory_space<vmem>>, vector<1x16x256xbf16>,
    return
  }
  func.func @transform_0(%arg0: i32) -> (i32, i32, i32) {
    %c0_i32 = arith.constant 0 : i32
    %c0_i32_0 = arith.constant 0 : i32
    %c0_i32_1 = arith.constant 0 : i32
    return %arg0, %c0_i32, %c0_i32_0 : i32, i32, i32
  }
  func.func @transform_1(%arg0: i32) -> (i32, i32, i32) {
    %c0_i32 = arith.constant 0 : i32
    %c0_i32_0 = arith.constant 0 : i32
    %c0_i32_1 = arith.constant 0 : i32
    return %arg0, %c0_i32, %c0_i32_0 : i32, i32, i32
  }
}

module attributes {stable_mosaic.version = 11 : i64} {
  func.func @_matmul_kernel(%arg0: i32, %arg1: i32, %arg2: memref<32x2048xbf16, #tpu.memory_space<vmem>>, %arg3: memref<2048x256xbf16, #tpu.memory_space<vmem>>, %arg4: memref<1x256xf32, #tpu.memory_space<vmem>>, %arg5: memref<32x256xbf16, #tpu.memory_space<vmem>>) attributes {dimension_semantics = [#tpu.dimension_semantics<parallel>, #tpu.dimension_semantics<parallel>], iteration_bounds = array<i64: 1, 1>, scalar_prefetch = 0 : i64, scratch_operands = 0 : i64, tpu.core_type = #tpu.core_type<tc>, window_params = [{transform_indices = @transform_0, window_bounds = array<i64: 32, 2048>}, {transform_indices = @transform_1, window_bounds = array<i64: 2048, 256>}, {transform_indices = @transform_2, window_bounds = array<i64: 1, 256>}, {transform_indices = @transform_3, window_bounds = array<i64: 32, 256>}]} {
    %c0 = arith.constant 0 : index
    %c0_0 = arith.constant 0 : index
    %0 = vector.load %arg2[%c0, %c0_0] : memref<32x2048xbf16, #tpu.memory_space<vmem>>, vector<32x2048xbf16>
    %c0_1 = arith.constant 0 : index
    %c0_2 = arith.constant 0 : index
    %1 = vector.load %arg3[%c0_1, %c0_2] : memref<2048x256xbf16, #tpu.memory_space<vmem>>, vector<2048x256xbf16>
    %cst = arith.constant dense<0.000000e+00> : vector<32x256xf32>
    %2 = tpu.matmul %0, %1, %cst {dimension_numbers = #tpu.dot_dimension_numbers<[1], [0], [0], [1], [0, 0, 1, 1], [], []>} : vector<32x2048xbf16>, vector<2048x256xbf16>, vector<32x256xf32> -> vector<32x256xf32>
    %c0_3 = arith.constant 0 : index
    %c0_4 = arith.constant 0 : index
    %3 = vector.load %arg4[%c0_3, %c0_4] : memref<1x256xf32, #tpu.memory_space<vmem>>, vector<1x256xf32>
    %4 = vector.broadcast %3 : vector<1x256xf32> to vector<32x256xf32>
    %5 = arith.addf %2, %4 : vector<32x256xf32>
    %6 = arith.truncf %5 : vector<32x256xf32> to vector<32x256xbf16>
    %c0_5 = arith.constant 0 : index
    %c0_6 = arith.constant 0 : index
    %7 = vector.load %arg5[%c0_5, %c0_6] : memref<32x256xbf16, #tpu.memory_space<vmem>>, vector<32x256xbf16>
    tpu.vector_store %arg5[%c0_5, %c0_6], %6 {strides = array<i32>} : memref<32x256xbf16, #tpu.memory_space<vmem>>, vector<32x256xbf16>,
    return
  }
  func.func @transform_0(%arg0: i32, %arg1: i32) -> (i32, i32) {
    %c0_i32 = arith.constant 0 : i32
    %c0_i32_0 = arith.constant 0 : i32
    return %arg0, %c0_i32 : i32, i32
  }
  func.func @transform_1(%arg0: i32, %arg1: i32) -> (i32, i32) {
    %c0_i32 = arith.constant 0 : i32
    %c0_i32_0 = arith.constant 0 : i32
    return %c0_i32, %arg1 : i32, i32
  }
  func.func @transform_2(%arg0: i32, %arg1: i32) -> (i32, i32) {
    %c0_i32 = arith.constant 0 : i32
    %c0_i32_0 = arith.constant 0 : i32
    return %c0_i32, %arg1 : i32, i32
  }
  func.func @transform_3(%arg0: i32, %arg1: i32) -> (i32, i32) {
    %c0_i32 = arith.constant 0 : i32
    return %arg0, %arg1 : i32, i32
  }
}

module attributes {stable_mosaic.version = 11 : i64} {
  func.func @_matmul_kernel(%arg0: i32, %arg1: i32, %arg2: memref<24x4096xbf16, #tpu.memory_space<vmem>>, %arg3: memref<4096x256xbf16, #tpu.memory_space<vmem>>, %arg4: memref<1x256xf32, #tpu.memory_space<vmem>>, %arg5: memref<24x256xbf16, #tpu.memory_space<vmem>>) attributes {dimension_semantics = [#tpu.dimension_semantics<parallel>, #tpu.dimension_semantics<parallel>], iteration_bounds = array<i64: 1, 2>, scalar_prefetch = 0 : i64, scratch_operands = 0 : i64, tpu.core_type = #tpu.core_type<tc>, window_params = [{transform_indices = @transform_0, window_bounds = array<i64: 24, 4096>}, {transform_indices = @transform_1, window_bounds = array<i64: 4096, 256>}, {transform_indices = @transform_2, window_bounds = array<i64: 1, 256>}, {transform_indices = @transform_3, window_bounds = array<i64: 24, 256>}]} {
    %c0 = arith.constant 0 : index
    %c0_0 = arith.constant 0 : index
    %0 = vector.load %arg2[%c0, %c0_0] : memref<24x4096xbf16, #tpu.memory_space<vmem>>, vector<24x4096xbf16>
    %c0_1 = arith.constant 0 : index
    %c0_2 = arith.constant 0 : index
    %1 = vector.load %arg3[%c0_1, %c0_2] : memref<4096x256xbf16, #tpu.memory_space<vmem>>, vector<4096x256xbf16>
    %cst = arith.constant dense<0.000000e+00> : vector<24x256xf32>
    %2 = tpu.matmul %0, %1, %cst {dimension_numbers = #tpu.dot_dimension_numbers<[1], [0], [0], [1], [0, 0, 1, 1], [], []>} : vector<24x4096xbf16>, vector<4096x256xbf16>, vector<24x256xf32> -> vector<24x256xf32>
    %c0_3 = arith.constant 0 : index
    %c0_4 = arith.constant 0 : index
    %3 = vector.load %arg4[%c0_3, %c0_4] : memref<1x256xf32, #tpu.memory_space<vmem>>, vector<1x256xf32>
    %4 = vector.broadcast %3 : vector<1x256xf32> to vector<24x256xf32>
    %5 = arith.addf %2, %4 : vector<24x256xf32>
    %6 = arith.truncf %5 : vector<24x256xf32> to vector<24x256xbf16>
    %c0_5 = arith.constant 0 : index
    %c0_6 = arith.constant 0 : index
    %7 = vector.load %arg5[%c0_5, %c0_6] : memref<24x256xbf16, #tpu.memory_space<vmem>>, vector<24x256xbf16>
    tpu.vector_store %arg5[%c0_5, %c0_6], %6 {strides = array<i32>} : memref<24x256xbf16, #tpu.memory_space<vmem>>, vector<24x256xbf16>,
    return
  }
  func.func @transform_0(%arg0: i32, %arg1: i32) -> (i32, i32) {
    %c0_i32 = arith.constant 0 : i32
    %c0_i32_0 = arith.constant 0 : i32
    return %arg0, %c0_i32 : i32, i32
  }
  func.func @transform_1(%arg0: i32, %arg1: i32) -> (i32, i32) {
    %c0_i32 = arith.constant 0 : i32
    %c0_i32_0 = arith.constant 0 : i32
    return %c0_i32, %arg1 : i32, i32
  }
  func.func @transform_2(%arg0: i32, %arg1: i32) -> (i32, i32) {
    %c0_i32 = arith.constant 0 : i32
    %c0_i32_0 = arith.constant 0 : i32
    return %c0_i32, %arg1 : i32, i32
  }
  func.func @transform_3(%arg0: i32, %arg1: i32) -> (i32, i32) {
    %c0_i32 = arith.constant 0 : i32
    return %arg0, %arg1 : i32, i32
  }
}

module attributes {stable_mosaic.version = 11 : i64} {
  func.func @_instnorm_lrelu_kernel(%arg0: i32, %arg1: memref<1x9x512xbf16, #tpu.memory_space<vmem>>, %arg2: memref<1x9x512xbf16, #tpu.memory_space<vmem>>) attributes {dimension_semantics = [#tpu.dimension_semantics<parallel>], iteration_bounds = array<i64: 2>, scalar_prefetch = 0 : i64, scratch_operands = 0 : i64, tpu.core_type = #tpu.core_type<tc>, window_params = [{transform_indices = @transform_0, window_bounds = array<i64: 1, 9, 512>}, {transform_indices = @transform_1, window_bounds = array<i64: 1, 9, 512>}]} {
    %c0 = arith.constant 0 : index
    %c0_0 = arith.constant 0 : index
    %c0_1 = arith.constant 0 : index
    %0 = vector.load %arg1[%c0, %c0_0, %c0_1] : memref<1x9x512xbf16, #tpu.memory_space<vmem>>, vector<1x9x512xbf16>
    %1 = arith.extf %0 : vector<1x9x512xbf16> to vector<1x9x512xf32>
    %cst = arith.constant dense<0.000000e+00> : vector<1x512xf32>
    %2 = vector.multi_reduction <add>, %1, %cst [1] : vector<1x9x512xf32> to vector<1x512xf32>
    %3 = vector.shape_cast %2 : vector<1x512xf32> to vector<1x1x512xf32>
    %4 = arith.mulf %1, %1 : vector<1x9x512xf32>
    %cst_2 = arith.constant dense<0.000000e+00> : vector<1x512xf32>
    %5 = vector.multi_reduction <add>, %4, %cst_2 [1] : vector<1x9x512xf32> to vector<1x512xf32>
    %6 = vector.shape_cast %5 : vector<1x512xf32> to vector<1x1x512xf32>
    %cst_3 = arith.constant 0.111111112 : f32
    %7 = vector.broadcast %cst_3 : f32 to vector<1x1x512xf32>
    %8 = arith.mulf %3, %7 : vector<1x1x512xf32>
    %cst_4 = arith.constant 0.111111112 : f32
    %9 = vector.broadcast %cst_4 : f32 to vector<1x1x512xf32>
    %10 = arith.mulf %6, %9 : vector<1x1x512xf32>
    %11 = arith.mulf %8, %8 : vector<1x1x512xf32>
    %12 = arith.subf %10, %11 : vector<1x1x512xf32>
    %cst_5 = arith.constant 0.000000e+00 : f32
    %13 = vector.broadcast %cst_5 : f32 to vector<1x1x512xf32>
    %14 = arith.maximumf %12, %13 : vector<1x1x512xf32>
    %15 = vector.broadcast %8 : vector<1x1x512xf32> to vector<1x9x512xf32>
    %16 = arith.subf %1, %15 : vector<1x9x512xf32>
    %cst_6 = arith.constant 9.99999974E-6 : f32
    %17 = vector.broadcast %cst_6 : f32 to vector<1x1x512xf32>
    %18 = arith.addf %14, %17 : vector<1x1x512xf32>
    %19 = math.rsqrt %18 : vector<1x1x512xf32>
    %20 = vector.broadcast %19 : vector<1x1x512xf32> to vector<1x9x512xf32>
    %21 = arith.mulf %16, %20 : vector<1x9x512xf32>
    %cst_7 = arith.constant 0.00999999977 : f32
    %22 = vector.broadcast %cst_7 : f32 to vector<1x9x512xf32>
    %23 = arith.mulf %22, %21 : vector<1x9x512xf32>
    %24 = arith.maximumf %21, %23 : vector<1x9x512xf32>
    %cst_8 = arith.constant dense<0.000000e+00> : vector<1x512xf32>
    %25 = vector.multi_reduction <add>, %24, %cst_8 [1] : vector<1x9x512xf32> to vector<1x512xf32>
    %26 = vector.shape_cast %25 : vector<1x512xf32> to vector<1x1x512xf32>
    %27 = arith.mulf %24, %24 : vector<1x9x512xf32>
    %cst_9 = arith.constant dense<0.000000e+00> : vector<1x512xf32>
    %28 = vector.multi_reduction <add>, %27, %cst_9 [1] : vector<1x9x512xf32> to vector<1x512xf32>
    %29 = vector.shape_cast %28 : vector<1x512xf32> to vector<1x1x512xf32>
    %cst_10 = arith.constant 0.111111112 : f32
    %30 = vector.broadcast %cst_10 : f32 to vector<1x1x512xf32>
    %31 = arith.mulf %26, %30 : vector<1x1x512xf32>
    %cst_11 = arith.constant 0.111111112 : f32
    %32 = vector.broadcast %cst_11 : f32 to vector<1x1x512xf32>
    %33 = arith.mulf %29, %32 : vector<1x1x512xf32>
    %34 = arith.mulf %31, %31 : vector<1x1x512xf32>
    %35 = arith.subf %33, %34 : vector<1x1x512xf32>
    %cst_12 = arith.constant 0.000000e+00 : f32
    %36 = vector.broadcast %cst_12 : f32 to vector<1x1x512xf32>
    %37 = arith.maximumf %35, %36 : vector<1x1x512xf32>
    %38 = vector.broadcast %31 : vector<1x1x512xf32> to vector<1x9x512xf32>
    %39 = arith.subf %24, %38 : vector<1x9x512xf32>
    %cst_13 = arith.constant 9.99999974E-6 : f32
    %40 = vector.broadcast %cst_13 : f32 to vector<1x1x512xf32>
    %41 = arith.addf %37, %40 : vector<1x1x512xf32>
    %42 = math.rsqrt %41 : vector<1x1x512xf32>
    %43 = vector.broadcast %42 : vector<1x1x512xf32> to vector<1x9x512xf32>
    %44 = arith.mulf %39, %43 : vector<1x9x512xf32>
    %cst_14 = arith.constant 0.00999999977 : f32
    %45 = vector.broadcast %cst_14 : f32 to vector<1x9x512xf32>
    %46 = arith.mulf %45, %44 : vector<1x9x512xf32>
    %47 = arith.maximumf %44, %46 : vector<1x9x512xf32>
    %48 = arith.truncf %47 : vector<1x9x512xf32> to vector<1x9x512xbf16>
    %c0_15 = arith.constant 0 : index
    %c0_16 = arith.constant 0 : index
    %c0_17 = arith.constant 0 : index
    %49 = vector.load %arg2[%c0_15, %c0_16, %c0_17] : memref<1x9x512xbf16, #tpu.memory_space<vmem>>, vector<1x9x512xbf16>
    tpu.vector_store %arg2[%c0_15, %c0_16, %c0_17], %48 {strides = array<i32>} : memref<1x9x512xbf16, #tpu.memory_space<vmem>>, vector<1x9x512xbf16>,
    return
  }
  func.func @transform_0(%arg0: i32) -> (i32, i32, i32) {
    %c0_i32 = arith.constant 0 : i32
    %c0_i32_0 = arith.constant 0 : i32
    %c0_i32_1 = arith.constant 0 : i32
    return %arg0, %c0_i32, %c0_i32_0 : i32, i32, i32
  }
  func.func @transform_1(%arg0: i32) -> (i32, i32, i32) {
    %c0_i32 = arith.constant 0 : i32
    %c0_i32_0 = arith.constant 0 : i32
    %c0_i32_1 = arith.constant 0 : i32
    return %arg0, %c0_i32, %c0_i32_0 : i32, i32, i32
  }
}

module attributes {stable_mosaic.version = 11 : i64} {
  func.func @_matmul_kernel(%arg0: i32, %arg1: i32, %arg2: memref<8x8192xbf16, #tpu.memory_space<vmem>>, %arg3: memref<8192x128xbf16, #tpu.memory_space<vmem>>, %arg4: memref<1x128xf32, #tpu.memory_space<vmem>>, %arg5: memref<8x128xf32, #tpu.memory_space<vmem>>) attributes {dimension_semantics = [#tpu.dimension_semantics<parallel>, #tpu.dimension_semantics<parallel>], iteration_bounds = array<i64: 1, 1>, scalar_prefetch = 0 : i64, scratch_operands = 0 : i64, tpu.core_type = #tpu.core_type<tc>, window_params = [{transform_indices = @transform_0, window_bounds = array<i64: 8, 8192>}, {transform_indices = @transform_1, window_bounds = array<i64: 8192, 128>}, {transform_indices = @transform_2, window_bounds = array<i64: 1, 128>}, {transform_indices = @transform_3, window_bounds = array<i64: 8, 128>}]} {
    %c0 = arith.constant 0 : index
    %c0_0 = arith.constant 0 : index
    %0 = vector.load %arg2[%c0, %c0_0] : memref<8x8192xbf16, #tpu.memory_space<vmem>>, vector<8x8192xbf16>
    %c0_1 = arith.constant 0 : index
    %c0_2 = arith.constant 0 : index
    %1 = vector.load %arg3[%c0_1, %c0_2] : memref<8192x128xbf16, #tpu.memory_space<vmem>>, vector<8192x128xbf16>
    %cst = arith.constant dense<0.000000e+00> : vector<8x128xf32>
    %2 = tpu.matmul %0, %1, %cst {dimension_numbers = #tpu.dot_dimension_numbers<[1], [0], [0], [1], [0, 0, 1, 1], [], []>} : vector<8x8192xbf16>, vector<8192x128xbf16>, vector<8x128xf32> -> vector<8x128xf32>
    %c0_3 = arith.constant 0 : index
    %c0_4 = arith.constant 0 : index
    %3 = vector.load %arg4[%c0_3, %c0_4] : memref<1x128xf32, #tpu.memory_space<vmem>>, vector<1x128xf32>
    %4 = vector.broadcast %3 : vector<1x128xf32> to vector<8x128xf32>
    %5 = arith.addf %2, %4 : vector<8x128xf32>
    %c0_5 = arith.constant 0 : index
    %c0_6 = arith.constant 0 : index
    %6 = vector.load %arg5[%c0_5, %c0_6] : memref<8x128xf32, #tpu.memory_space<vmem>>, vector<8x128xf32>
    tpu.vector_store %arg5[%c0_5, %c0_6], %5 {strides = array<i32>} : memref<8x128xf32, #tpu.memory_space<vmem>>, vector<8x128xf32>,
    return
  }
  func.func @transform_0(%arg0: i32, %arg1: i32) -> (i32, i32) {
    %c0_i32 = arith.constant 0 : i32
    %c0_i32_0 = arith.constant 0 : i32
    return %arg0, %c0_i32 : i32, i32
  }
  func.func @transform_1(%arg0: i32, %arg1: i32) -> (i32, i32) {
    %c0_i32 = arith.constant 0 : i32
    %c0_i32_0 = arith.constant 0 : i32
    return %c0_i32, %arg1 : i32, i32
  }
  func.func @transform_2(%arg0: i32, %arg1: i32) -> (i32, i32) {
    %c0_i32 = arith.constant 0 : i32
    %c0_i32_0 = arith.constant 0 : i32
    return %c0_i32, %arg1 : i32, i32
  }
  func.func @transform_3(%arg0: i32, %arg1: i32) -> (i32, i32) {
    %c0_i32 = arith.constant 0 : i32
    return %arg0, %arg1 : i32, i32
  }
}

</mosaic_0001>

<bundles_post_ra>
// kernel: discriminator_forward.8
= control target key start
LH: loop header
LB: loop body
LE: loop exit
PB: predicated region body
PF: predicated region fallthrough
CT: control target
= control target key end

     0   :  { %s1924_s1 = inlined_call_operand.vmem [shape: bf16[128,128], index: 1, kind: input, shape index: {}]   ;;  %s1925_s0 = inlined_call_operand.vmem [shape: bf16[512,128], index: 0, kind: input, shape index: {}]   ;;  %s1926_s2 = inlined_call_operand.vmem [shape: f32[1,128], index: 2, kind: input, shape index: {}]   ;;  %s1927_s3 = inlined_call_operand.vmem [shape: bf16[512,128], index: 3, kind: output, shape index: {}]  }
   0x1   :  { %v1579_v0 = vld [vmem:[%s1924_s1 + $0x38] sm:$0xff]   ;;  %v1580_v1 = vld [vmem:[%s1924_s1 + $0x30] sm:$0xff]   ;;  %v1581_v2 = vld [vmem:[%s1924_s1 + $0x28] sm:$0xff]  }
   0x2   :  { %1483 = vmatprep.subr.bf16.mxu0 %v1579_v0  ;;  %1563 = vmatprep.subr.bf16.mxu1 %v1579_v0  ;;  %v1582_v3 = vld [vmem:[%s1924_s1 + $0x20] sm:$0xff]   ;;  %v1583_v6 = vld [vmem:[%s1924_s1 + $0x18] sm:$0xff]   ;;  %v1584_v7 = vld [vmem:[%s1924_s1 + $0x10] sm:$0xff]  }
   0x3   :  { %1484 = vmatpush3.bf16.msra.mxu0 %v1579_v0  ;;  %1571 = vmatpush3.bf16.msra.mxu1 %v1579_v0  ;;  %v1587_v4 = vld [vmem:[%s1925_s0] sm:$0xff]   ;;  %v1585_v8 = vld [vmem:[%s1924_s1 + $0x8] sm:$0xff]   ;;  %v1591_v12 = vld [vmem:[%s1925_s0 + $0x10] sm:$0xff]  }
   0x4   :  { %1485 = vmatprep.subr.bf16.mxu0 %v1580_v1  ;;  %1564 = vmatprep.subr.bf16.mxu1 %v1580_v1  ;;  %v1588_v5 = vld [vmem:[%s1925_s0 + $0x80] sm:$0xff]   ;;  %v1589_v10 = vld [vmem:[%s1925_s0 + $0x8] sm:$0xff]   ;;  %v1592_v13 = vld [vmem:[%s1925_s0 + $0x90] sm:$0xff]  }
   0x5   :  { %1499 = vmatprep.mubr.bf16.mxu0 %v1587_v4  ;;  %1531 = vmatprep.mubr.bf16.mxu1 %v1588_v5  ;;  %v1586_v9 = vld [vmem:[%s1924_s1] sm:$0xff]   ;;  %v1590_v11 = vld [vmem:[%s1925_s0 + $0x88] sm:$0xff]   ;;  %v1593_v14 = vld [vmem:[%s1925_s0 + $0x18] sm:$0xff]  }
   0x6   :  { %v1594_v15 = vld [vmem:[%s1925_s0 + $0x98] sm:$0xff]   ;;  %v1595_v16 = vld [vmem:[%s1925_s0 + $0x20] sm:$0xff]   ;;  %v1597_v18 = vld [vmem:[%s1925_s0 + $0x28] sm:$0xff]  }
   0x7   :  { %1486 = vmatpush3.bf16.msra.mxu0 %v1580_v1  ;;  %1572 = vmatpush3.bf16.msra.mxu1 %v1580_v1  ;;  %v1596_v17 = vld [vmem:[%s1925_s0 + $0xa0] sm:$0xff]   ;;  %v1598_v19 = vld [vmem:[%s1925_s0 + $0xa8] sm:$0xff]   ;;  %v1599_v20 = vld [vmem:[%s1925_s0 + $0x30] sm:$0xff]  }
   0x8   :  { %1487 = vmatprep.subr.bf16.mxu0 %v1581_v2  ;;  %1565 = vmatprep.subr.bf16.mxu1 %v1581_v2  ;;  %v1600_v21 = vld [vmem:[%s1925_s0 + $0xb0] sm:$0xff]   ;;  %v1601_v22 = vld [vmem:[%s1925_s0 + $0x38] sm:$0xff]   ;;  %v1603_v24 = vld [vmem:[%s1925_s0 + $0x40] sm:$0xff]  }
   0x9   :  { %v1602_v23 = vld [vmem:[%s1925_s0 + $0xb8] sm:$0xff]   ;;  %v1604_v25 = vld [vmem:[%s1925_s0 + $0xc0] sm:$0xff]   ;;  %v1605_v26 = vld [vmem:[%s1925_s0 + $0x48] sm:$0xff]  }
   0xa   :  { %v1606_v27 = vld [vmem:[%s1925_s0 + $0xc8] sm:$0xff]   ;;  %v1607_v28 = vld [vmem:[%s1925_s0 + $0x50] sm:$0xff]   ;;  %v1609_v30 = vld [vmem:[%s1925_s0 + $0x58] sm:$0xff]  }
   0xb   :  { %1488 = vmatpush3.bf16.msra.mxu0 %v1581_v2  ;;  %1573 = vmatpush3.bf16.msra.mxu1 %v1581_v2  ;;  %v1608_v29 = vld [vmem:[%s1925_s0 + $0xd0] sm:$0xff]   ;;  %v1610_v31 = vld [vmem:[%s1925_s0 + $0xd8] sm:$0xff]   ;;  %v1611_v32 = vld [vmem:[%s1925_s0 + $0x60] sm:$0xff]  }
   0xc   :  { %1489 = vmatprep.subr.bf16.mxu0 %v1582_v3  ;;  %1566 = vmatprep.subr.bf16.mxu1 %v1582_v3  ;;  %v1612_v33 = vld [vmem:[%s1925_s0 + $0xe0] sm:$0xff]   ;;  %v1613_v34 = vld [vmem:[%s1925_s0 + $0x68] sm:$0xff]   ;;  %v1615_v36 = vld [vmem:[%s1925_s0 + $0x70] sm:$0xff]  }
   0xd   :  { %v1614_v35 = vld [vmem:[%s1925_s0 + $0xe8] sm:$0xff]   ;;  %v1616_v37 = vld [vmem:[%s1925_s0 + $0xf0] sm:$0xff]   ;;  %v1617_v38 = vld [vmem:[%s1925_s0 + $0x78] sm:$0xff]  }
   0xe   :  { %v1618_v39 = vld [vmem:[%s1925_s0 + $0xf8] sm:$0xff]   ;;  %v1762_v40 = vld [vmem:[%s1926_s2] ss:$0 sm:$0xff] }
   0xf   :  { %1490 = vmatpush3.bf16.msra.mxu0 %v1582_v3  ;;  %1574 = vmatpush3.bf16.msra.mxu1 %v1582_v3 }
  0x10   :  { %1491 = vmatprep.subr.bf16.mxu0 %v1583_v6  ;;  %1567 = vmatprep.subr.bf16.mxu1 %v1583_v6 }
  0x13   :  { %1492 = vmatpush3.bf16.msra.mxu0 %v1583_v6  ;;  %1575 = vmatpush3.bf16.msra.mxu1 %v1583_v6 }
  0x14   :  { %1493 = vmatprep.subr.bf16.mxu0 %v1584_v7  ;;  %1568 = vmatprep.subr.bf16.mxu1 %v1584_v7 }
  0x17   :  { %1494 = vmatpush3.bf16.msra.mxu0 %v1584_v7  ;;  %1576 = vmatpush3.bf16.msra.mxu1 %v1584_v7 }
  0x18   :  { %1495 = vmatprep.subr.bf16.mxu0 %v1585_v8  ;;  %1569 = vmatprep.subr.bf16.mxu1 %v1585_v8 }
  0x1b   :  { %1496 = vmatpush3.bf16.msra.mxu0 %v1585_v8  ;;  %1577 = vmatpush3.bf16.msra.mxu1 %v1585_v8 }
  0x1c   :  { %1497 = vmatprep.subr.bf16.mxu0 %v1586_v9  ;;  %1570 = vmatprep.subr.bf16.mxu1 %v1586_v9 }
  0x1f   :  { %1498 = vmatpush3.bf16.msra.mxu0 %v1586_v9  ;;  %1578 = vmatpush3.bf16.msra.mxu1 %v1586_v9 }
  0x22   :  { %1500 = vmatmul.mubr.bf16.vlgmr.msra.gmra.mxu0 %v1589_v10  ;;  %1532 = vmatmul.mubr.bf16.vlgmr.msra.gmra.mxu1 %v1590_v11 }
  0x23   :  { %1503 = vmatprep.mubr.bf16.mxu0 %v1591_v12  ;;  %1535 = vmatprep.mubr.bf16.mxu1 %v1592_v13 }
  0x2a   :  { %1504 = vmatmul.mubr.bf16.gmra.mxu0 %v1593_v14  ;;  %1536 = vmatmul.mubr.bf16.gmra.mxu1 %v1594_v15 }
  0x2b   :  { %1507 = vmatprep.mubr.bf16.mxu0 %v1595_v16  ;;  %1539 = vmatprep.mubr.bf16.mxu1 %v1596_v17 }
  0x32   :  { %1508 = vmatmul.mubr.bf16.gmra.mxu0 %v1597_v18  ;;  %1540 = vmatmul.mubr.bf16.gmra.mxu1 %v1598_v19 }
  0x33   :  { %1511 = vmatprep.mubr.bf16.mxu0 %v1599_v20  ;;  %1543 = vmatprep.mubr.bf16.mxu1 %v1600_v21 }
  0x3a   :  { %1512 = vmatmul.mubr.bf16.gmra.mxu0 %v1601_v22  ;;  %1544 = vmatmul.mubr.bf16.gmra.mxu1 %v1602_v23 }
  0x3b   :  { %1515 = vmatprep.mubr.bf16.mxu0 %v1603_v24  ;;  %1547 = vmatprep.mubr.bf16.mxu1 %v1604_v25 }
  0x42   :  { %1516 = vmatmul.mubr.bf16.gmra.mxu0 %v1605_v26  ;;  %1548 = vmatmul.mubr.bf16.gmra.mxu1 %v1606_v27 }
  0x43   :  { %1519 = vmatprep.mubr.bf16.mxu0 %v1607_v28  ;;  %1551 = vmatprep.mubr.bf16.mxu1 %v1608_v29 }
  0x4a   :  { %1520 = vmatmul.mubr.bf16.gmra.mxu0 %v1609_v30  ;;  %1552 = vmatmul.mubr.bf16.gmra.mxu1 %v1610_v31 }
  0x4b   :  { %1523 = vmatprep.mubr.bf16.mxu0 %v1611_v32  ;;  %1555 = vmatprep.mubr.bf16.mxu1 %v1612_v33 }
  0x52   :  { %1524 = vmatmul.mubr.bf16.gmra.mxu0 %v1613_v34  ;;  %1556 = vmatmul.mubr.bf16.gmra.mxu1 %v1614_v35 }
  0x53   :  { %1527 = vmatprep.mubr.bf16.mxu0 %v1615_v36  ;;  %1559 = vmatprep.mubr.bf16.mxu1 %v1616_v37 }
  0x5a   :  { %1528 = vmatmul.mubr.bf16.gmra.mxu0 %v1617_v38  ;;  %1560 = vmatmul.mubr.bf16.gmra.mxu1 %v1618_v39 }
  0xe2   :  { %v1501_v41 = vpop.f32.mrf.mxu0  ;;  %v1533_v42 = vpop.f32.mrf.mxu1 }
  0xe3   :  { %v385_v43 = vadd.f32 %v1501_v41, %v1762_v40  ;;  %v513_v44 = vadd.f32 %v1533_v42, %v1762_v40 }
  0xe4   :  { %v376_v45 = vpop.f32.mrf.mxu0  ;;  %v504_v46 = vpop.f32.mrf.mxu1 }
  0xe5   :  { %v377_v47 = vadd.f32 %v1762_v40, %v376_v45  ;;  %v505_v48 = vadd.f32 %v1762_v40, %v504_v46  ;;  %v633_v51 = vmul.f32 0.01, %v385_v43  ;;  %v665_v52 = vmul.f32 0.01, %v513_v44 }
  0xe6   :  { %v1502_v49 = vpop.f32.mrf.mxu0  ;;  %v1534_v50 = vpop.f32.mrf.mxu1 }
  0xe7   :  { %v388_v53 = vadd.f32 %v1502_v49, %v1762_v40  ;;  %v516_v54 = vadd.f32 %v1534_v50, %v1762_v40  ;;  %v631_v57 = vmul.f32 0.01, %v377_v47  ;;  %v663_v58 = vmul.f32 0.01, %v505_v48 }
  0xe8   :  { %v379_v55 = vpop.f32.mrf.mxu0  ;;  %v507_v56 = vpop.f32.mrf.mxu1  ;;  %v697_v1 = vmax.f32 %v385_v43, %v633_v51  ;;  %v729_v2 = vmax.f32 %v513_v44, %v665_v52 }
  0xe9   :  { %v380_v59 = vadd.f32 %v1762_v40, %v379_v55  ;;  %v508_v60 = vadd.f32 %v1762_v40, %v507_v56  ;;  %v634_v61 = vmul.f32 0.01, %v388_v53  ;;  %v666_v62 = vmul.f32 0.01, %v516_v54 }
  0xea   :  { %v1505_v63 = vpop.f32.mrf.mxu0  ;;  %v1537_v0 = vpop.f32.mrf.mxu1  ;;  %v695_v11 = vmax.f32 %v377_v47, %v631_v57  ;;  %v727_v12 = vmax.f32 %v505_v48, %v663_v58 }
  0xeb   :  { %v632_v3 = vmul.f32 0.01, %v380_v59  ;;  %v664_v4 = vmul.f32 0.01, %v508_v60  ;;  %v698_v5 = vmax.f32 %v388_v53, %v634_v61  ;;  %v730_v6 = vmax.f32 %v516_v54, %v666_v62 }
  0xec   :  { %v401_v7 = vadd.f32 %v1505_v63, %v1762_v40  ;;  %v529_v8 = vadd.f32 %v1537_v0, %v1762_v40  ;;  %v392_v9 = vpop.f32.mrf.mxu0  ;;  %v520_v10 = vpop.f32.mrf.mxu1 }
  0xed   :  { %v696_v13 = vmax.f32 %v380_v59, %v632_v3  ;;  %v728_v14 = vmax.f32 %v508_v60, %v664_v4  ;;  %v1260_v15 = vpack.c.bf16 %v698_v5, %v697_v1  ;;  %v1340_v16 = vpack.c.bf16 %v730_v6, %v729_v2 }
  0xee   :  { %v393_v17 = vadd.f32 %v1762_v40, %v392_v9  ;;  %v521_v18 = vadd.f32 %v1762_v40, %v520_v10  ;;  %v1506_v19 = vpop.f32.mrf.mxu0  ;;  %v1538_v20 = vpop.f32.mrf.mxu1  ;;  %v637_v23 = vmul.f32 0.01, %v401_v7  ;;  %v669_v24 = vmul.f32 0.01, %v529_v8 }
  0xef   :  { %v1255_v21 = vpack.c.bf16 %v696_v13, %v695_v11  ;;  %v1335_v22 = vpack.c.bf16 %v728_v14, %v727_v12  ;;  %1412 = vst [vmem:[%s1927_s3 + $0x8] sm:$0xff] %v1260_v15   ;;  %1428 = vst [vmem:[%s1927_s3 + $0x88] sm:$0xff] %v1340_v16   ;;  %v404_v25 = vadd.f32 %v1506_v19, %v1762_v40 }
  0xf0   :  { %v532_v26 = vadd.f32 %v1538_v20, %v1762_v40  ;;  %v395_v27 = vpop.f32.mrf.mxu0  ;;  %v523_v28 = vpop.f32.mrf.mxu1  ;;  %v635_v29 = vmul.f32 0.01, %v393_v17  ;;  %v667_v30 = vmul.f32 0.01, %v521_v18  ;;  %v701_v42 = vmax.f32 %v401_v7, %v637_v23 }
  0xf1   :  { %1256 = vst [vmem:[%s1927_s3] sm:$0xff] %v1255_v21   ;;  %1427 = vst [vmem:[%s1927_s3 + $0x80] sm:$0xff] %v1335_v22   ;;  %v396_v31 = vadd.f32 %v1762_v40, %v395_v27  ;;  %v524_v32 = vadd.f32 %v1762_v40, %v523_v28  ;;  %v638_v33 = vmul.f32 0.01, %v404_v25  ;;  %v733_v43 = vmax.f32 %v529_v8, %v669_v24 }
  0xf2   :  { %v670_v34 = vmul.f32 0.01, %v532_v26  ;;  %v1509_v35 = vpop.f32.mrf.mxu0  ;;  %v1541_v36 = vpop.f32.mrf.mxu1  ;;  %v699_v48 = vmax.f32 %v393_v17, %v635_v29  ;;  %v731_v49 = vmax.f32 %v521_v18, %v667_v30 }
  0xf3   :  { %v636_v37 = vmul.f32 0.01, %v396_v31  ;;  %v668_v38 = vmul.f32 0.01, %v524_v32  ;;  %v417_v39 = vadd.f32 %v1509_v35, %v1762_v40  ;;  %v545_v41 = vadd.f32 %v1541_v36, %v1762_v40 }
  0xf4   :  { %v702_v44 = vmax.f32 %v404_v25, %v638_v33  ;;  %v734_v45 = vmax.f32 %v532_v26, %v670_v34  ;;  %v408_v46 = vpop.f32.mrf.mxu0  ;;  %v536_v47 = vpop.f32.mrf.mxu1 }
  0xf5   :  { %v700_v50 = vmax.f32 %v396_v31, %v636_v37  ;;  %v732_v51 = vmax.f32 %v524_v32, %v668_v38  ;;  %v409_v54 = vadd.f32 %v1762_v40, %v408_v46  ;;  %v537_v55 = vadd.f32 %v1762_v40, %v536_v47 }
  0xf6   :  { %v1270_v52 = vpack.c.bf16 %v702_v44, %v701_v42  ;;  %v1350_v53 = vpack.c.bf16 %v734_v45, %v733_v43  ;;  %v1510_v56 = vpop.f32.mrf.mxu0  ;;  %v1542_v57 = vpop.f32.mrf.mxu1  ;;  %v641_v60 = vmul.f32 0.01, %v417_v39  ;;  %v673_v61 = vmul.f32 0.01, %v545_v41 }
  0xf7   :  { %v1265_v58 = vpack.c.bf16 %v700_v50, %v699_v48  ;;  %v1345_v59 = vpack.c.bf16 %v732_v51, %v731_v49  ;;  %v420_v62 = vadd.f32 %v1510_v56, %v1762_v40  ;;  %v548_v63 = vadd.f32 %v1542_v57, %v1762_v40 }
  0xf8   :  { %1414 = vst [vmem:[%s1927_s3 + $0x18] sm:$0xff] %v1270_v52   ;;  %1430 = vst [vmem:[%s1927_s3 + $0x98] sm:$0xff] %v1350_v53   ;;  %v411_v0 = vpop.f32.mrf.mxu0  ;;  %v539_v1 = vpop.f32.mrf.mxu1  ;;  %v639_v2 = vmul.f32 0.01, %v409_v54  ;;  %v671_v3 = vmul.f32 0.01, %v537_v55  ;;  %v705_v10 = vmax.f32 %v417_v39, %v641_v60  ;;  %v737_v11 = vmax.f32 %v545_v41, %v673_v61 }
  0xf9   :  { %1413 = vst [vmem:[%s1927_s3 + $0x10] sm:$0xff] %v1265_v58   ;;  %1429 = vst [vmem:[%s1927_s3 + $0x90] sm:$0xff] %v1345_v59   ;;  %v412_v4 = vadd.f32 %v1762_v40, %v411_v0  ;;  %v540_v5 = vadd.f32 %v1762_v40, %v539_v1  ;;  %v642_v6 = vmul.f32 0.01, %v420_v62  ;;  %v674_v7 = vmul.f32 0.01, %v548_v63 }
  0xfa   :  { %v1513_v8 = vpop.f32.mrf.mxu0  ;;  %v1545_v9 = vpop.f32.mrf.mxu1  ;;  %v703_v20 = vmax.f32 %v409_v54, %v639_v2  ;;  %v735_v21 = vmax.f32 %v537_v55, %v671_v3 }
  0xfb   :  { %v640_v12 = vmul.f32 0.01, %v412_v4  ;;  %v672_v13 = vmul.f32 0.01, %v540_v5  ;;  %v706_v14 = vmax.f32 %v420_v62, %v642_v6  ;;  %v738_v15 = vmax.f32 %v548_v63, %v674_v7 }
  0xfc   :  { %v433_v16 = vadd.f32 %v1513_v8, %v1762_v40  ;;  %v561_v17 = vadd.f32 %v1545_v9, %v1762_v40  ;;  %v424_v18 = vpop.f32.mrf.mxu0  ;;  %v552_v19 = vpop.f32.mrf.mxu1 }
  0xfd   :  { %v704_v22 = vmax.f32 %v412_v4, %v640_v12  ;;  %v736_v23 = vmax.f32 %v540_v5, %v672_v13  ;;  %v1280_v24 = vpack.c.bf16 %v706_v14, %v705_v10  ;;  %v1360_v25 = vpack.c.bf16 %v738_v15, %v737_v11 }
  0xfe   :  { %v425_v26 = vadd.f32 %v1762_v40, %v424_v18  ;;  %v553_v27 = vadd.f32 %v1762_v40, %v552_v19  ;;  %v1514_v28 = vpop.f32.mrf.mxu0  ;;  %v1546_v29 = vpop.f32.mrf.mxu1  ;;  %v645_v32 = vmul.f32 0.01, %v433_v16  ;;  %v677_v33 = vmul.f32 0.01, %v561_v17 }
  0xff   :  { %v1275_v30 = vpack.c.bf16 %v704_v22, %v703_v20  ;;  %v1355_v31 = vpack.c.bf16 %v736_v23, %v735_v21  ;;  %1416 = vst [vmem:[%s1927_s3 + $0x28] sm:$0xff] %v1280_v24   ;;  %1432 = vst [vmem:[%s1927_s3 + $0xa8] sm:$0xff] %v1360_v25   ;;  %v436_v34 = vadd.f32 %v1514_v28, %v1762_v40 }
 0x100   :  { %v564_v35 = vadd.f32 %v1546_v29, %v1762_v40  ;;  %v427_v36 = vpop.f32.mrf.mxu0  ;;  %v555_v37 = vpop.f32.mrf.mxu1  ;;  %v643_v38 = vmul.f32 0.01, %v425_v26  ;;  %v675_v39 = vmul.f32 0.01, %v553_v27  ;;  %v709_v51 = vmax.f32 %v433_v16, %v645_v32 }
 0x101   :  { %1415 = vst [vmem:[%s1927_s3 + $0x20] sm:$0xff] %v1275_v30   ;;  %1431 = vst [vmem:[%s1927_s3 + $0xa0] sm:$0xff] %v1355_v31   ;;  %v428_v41 = vadd.f32 %v1762_v40, %v427_v36  ;;  %v556_v42 = vadd.f32 %v1762_v40, %v555_v37  ;;  %v646_v43 = vmul.f32 0.01, %v436_v34  ;;  %v741_v52 = vmax.f32 %v561_v17, %v677_v33 }
 0x102   :  { %v678_v44 = vmul.f32 0.01, %v564_v35  ;;  %v1517_v45 = vpop.f32.mrf.mxu0  ;;  %v1549_v46 = vpop.f32.mrf.mxu1  ;;  %v707_v57 = vmax.f32 %v425_v26, %v643_v38  ;;  %v739_v58 = vmax.f32 %v553_v27, %v675_v39 }
 0x103   :  { %v644_v47 = vmul.f32 0.01, %v428_v41  ;;  %v676_v48 = vmul.f32 0.01, %v556_v42  ;;  %v449_v49 = vadd.f32 %v1517_v45, %v1762_v40  ;;  %v577_v50 = vadd.f32 %v1549_v46, %v1762_v40 }
 0x104   :  { %v710_v53 = vmax.f32 %v436_v34, %v646_v43  ;;  %v742_v54 = vmax.f32 %v564_v35, %v678_v44  ;;  %v440_v55 = vpop.f32.mrf.mxu0  ;;  %v568_v56 = vpop.f32.mrf.mxu1 }
 0x105   :  { %v708_v59 = vmax.f32 %v428_v41, %v644_v47  ;;  %v740_v60 = vmax.f32 %v556_v42, %v676_v48  ;;  %v441_v63 = vadd.f32 %v1762_v40, %v440_v55  ;;  %v569_v0 = vadd.f32 %v1762_v40, %v568_v56 }
 0x106   :  { %v1290_v61 = vpack.c.bf16 %v710_v53, %v709_v51  ;;  %v1370_v62 = vpack.c.bf16 %v742_v54, %v741_v52  ;;  %v1518_v1 = vpop.f32.mrf.mxu0  ;;  %v1550_v2 = vpop.f32.mrf.mxu1  ;;  %v649_v5 = vmul.f32 0.01, %v449_v49  ;;  %v681_v6 = vmul.f32 0.01, %v577_v50 }
 0x107   :  { %v1285_v3 = vpack.c.bf16 %v708_v59, %v707_v57  ;;  %v1365_v4 = vpack.c.bf16 %v740_v60, %v739_v58  ;;  %v452_v7 = vadd.f32 %v1518_v1, %v1762_v40  ;;  %v580_v8 = vadd.f32 %v1550_v2, %v1762_v40 }
 0x108   :  { %1418 = vst [vmem:[%s1927_s3 + $0x38] sm:$0xff] %v1290_v61   ;;  %1434 = vst [vmem:[%s1927_s3 + $0xb8] sm:$0xff] %v1370_v62   ;;  %v443_v9 = vpop.f32.mrf.mxu0  ;;  %v571_v10 = vpop.f32.mrf.mxu1  ;;  %v647_v11 = vmul.f32 0.01, %v441_v63  ;;  %v679_v12 = vmul.f32 0.01, %v569_v0  ;;  %v713_v19 = vmax.f32 %v449_v49, %v649_v5  ;;  %v745_v20 = vmax.f32 %v577_v50, %v681_v6 }
 0x109   :  { %1417 = vst [vmem:[%s1927_s3 + $0x30] sm:$0xff] %v1285_v3   ;;  %1433 = vst [vmem:[%s1927_s3 + $0xb0] sm:$0xff] %v1365_v4   ;;  %v444_v13 = vadd.f32 %v1762_v40, %v443_v9  ;;  %v572_v14 = vadd.f32 %v1762_v40, %v571_v10  ;;  %v650_v15 = vmul.f32 0.01, %v452_v7  ;;  %v682_v16 = vmul.f32 0.01, %v580_v8 }
 0x10a   :  { %v1521_v17 = vpop.f32.mrf.mxu0  ;;  %v1553_v18 = vpop.f32.mrf.mxu1  ;;  %v711_v29 = vmax.f32 %v441_v63, %v647_v11  ;;  %v743_v30 = vmax.f32 %v569_v0, %v679_v12 }
 0x10b   :  { %v648_v21 = vmul.f32 0.01, %v444_v13  ;;  %v680_v22 = vmul.f32 0.01, %v572_v14  ;;  %v714_v23 = vmax.f32 %v452_v7, %v650_v15  ;;  %v746_v24 = vmax.f32 %v580_v8, %v682_v16 }
 0x10c   :  { %v465_v25 = vadd.f32 %v1521_v17, %v1762_v40  ;;  %v593_v26 = vadd.f32 %v1553_v18, %v1762_v40  ;;  %v456_v27 = vpop.f32.mrf.mxu0  ;;  %v584_v28 = vpop.f32.mrf.mxu1 }
 0x10d   :  { %v712_v31 = vmax.f32 %v444_v13, %v648_v21  ;;  %v744_v32 = vmax.f32 %v572_v14, %v680_v22  ;;  %v1300_v33 = vpack.c.bf16 %v714_v23, %v713_v19  ;;  %v1380_v34 = vpack.c.bf16 %v746_v24, %v745_v20 }
 0x10e   :  { %v457_v35 = vadd.f32 %v1762_v40, %v456_v27  ;;  %v585_v36 = vadd.f32 %v1762_v40, %v584_v28  ;;  %v1522_v37 = vpop.f32.mrf.mxu0  ;;  %v1554_v38 = vpop.f32.mrf.mxu1  ;;  %v653_v42 = vmul.f32 0.01, %v465_v25  ;;  %v685_v43 = vmul.f32 0.01, %v593_v26 }
 0x10f   :  { %v1295_v39 = vpack.c.bf16 %v712_v31, %v711_v29  ;;  %v1375_v41 = vpack.c.bf16 %v744_v32, %v743_v30  ;;  %1420 = vst [vmem:[%s1927_s3 + $0x48] sm:$0xff] %v1300_v33   ;;  %1436 = vst [vmem:[%s1927_s3 + $0xc8] sm:$0xff] %v1380_v34   ;;  %v468_v44 = vadd.f32 %v1522_v37, %v1762_v40 }
 0x110   :  { %v596_v45 = vadd.f32 %v1554_v38, %v1762_v40  ;;  %v459_v46 = vpop.f32.mrf.mxu0  ;;  %v587_v47 = vpop.f32.mrf.mxu1  ;;  %v651_v48 = vmul.f32 0.01, %v457_v35  ;;  %v683_v49 = vmul.f32 0.01, %v585_v36  ;;  %v717_v60 = vmax.f32 %v465_v25, %v653_v42 }
 0x111   :  { %1419 = vst [vmem:[%s1927_s3 + $0x40] sm:$0xff] %v1295_v39   ;;  %1435 = vst [vmem:[%s1927_s3 + $0xc0] sm:$0xff] %v1375_v41   ;;  %v460_v50 = vadd.f32 %v1762_v40, %v459_v46  ;;  %v588_v51 = vadd.f32 %v1762_v40, %v587_v47  ;;  %v654_v52 = vmul.f32 0.01, %v468_v44  ;;  %v749_v61 = vmax.f32 %v593_v26, %v685_v43 }
 0x112   :  { %v686_v53 = vmul.f32 0.01, %v596_v45  ;;  %v1525_v54 = vpop.f32.mrf.mxu0  ;;  %v1557_v55 = vpop.f32.mrf.mxu1  ;;  %v715_v2 = vmax.f32 %v457_v35, %v651_v48  ;;  %v747_v3 = vmax.f32 %v585_v36, %v683_v49 }
 0x113   :  { %v652_v56 = vmul.f32 0.01, %v460_v50  ;;  %v684_v57 = vmul.f32 0.01, %v588_v51  ;;  %v481_v58 = vadd.f32 %v1525_v54, %v1762_v40  ;;  %v609_v59 = vadd.f32 %v1557_v55, %v1762_v40 }
 0x114   :  { %v718_v62 = vmax.f32 %v468_v44, %v654_v52  ;;  %v750_v63 = vmax.f32 %v596_v45, %v686_v53  ;;  %v472_v0 = vpop.f32.mrf.mxu0  ;;  %v600_v1 = vpop.f32.mrf.mxu1 }
 0x115   :  { %v716_v4 = vmax.f32 %v460_v50, %v652_v56  ;;  %v748_v5 = vmax.f32 %v588_v51, %v684_v57  ;;  %v473_v8 = vadd.f32 %v1762_v40, %v472_v0  ;;  %v601_v9 = vadd.f32 %v1762_v40, %v600_v1 }
 0x116   :  { %v1310_v6 = vpack.c.bf16 %v718_v62, %v717_v60  ;;  %v1390_v7 = vpack.c.bf16 %v750_v63, %v749_v61  ;;  %v1526_v10 = vpop.f32.mrf.mxu0  ;;  %v1558_v11 = vpop.f32.mrf.mxu1  ;;  %v657_v14 = vmul.f32 0.01, %v481_v58  ;;  %v689_v15 = vmul.f32 0.01, %v609_v59 }
 0x117   :  { %v1305_v12 = vpack.c.bf16 %v716_v4, %v715_v2  ;;  %v1385_v13 = vpack.c.bf16 %v748_v5, %v747_v3  ;;  %v484_v16 = vadd.f32 %v1526_v10, %v1762_v40  ;;  %v612_v17 = vadd.f32 %v1558_v11, %v1762_v40 }
 0x118   :  { %1422 = vst [vmem:[%s1927_s3 + $0x58] sm:$0xff] %v1310_v6   ;;  %1438 = vst [vmem:[%s1927_s3 + $0xd8] sm:$0xff] %v1390_v7   ;;  %v475_v18 = vpop.f32.mrf.mxu0  ;;  %v603_v19 = vpop.f32.mrf.mxu1  ;;  %v655_v20 = vmul.f32 0.01, %v473_v8  ;;  %v687_v21 = vmul.f32 0.01, %v601_v9  ;;  %v721_v28 = vmax.f32 %v481_v58, %v657_v14  ;;  %v753_v29 = vmax.f32 %v609_v59, %v689_v15 }
 0x119   :  { %1421 = vst [vmem:[%s1927_s3 + $0x50] sm:$0xff] %v1305_v12   ;;  %1437 = vst [vmem:[%s1927_s3 + $0xd0] sm:$0xff] %v1385_v13   ;;  %v476_v22 = vadd.f32 %v1762_v40, %v475_v18  ;;  %v604_v23 = vadd.f32 %v1762_v40, %v603_v19  ;;  %v658_v24 = vmul.f32 0.01, %v484_v16  ;;  %v690_v25 = vmul.f32 0.01, %v612_v17 }
 0x11a   :  { %v1529_v26 = vpop.f32.mrf.mxu0  ;;  %v1561_v27 = vpop.f32.mrf.mxu1  ;;  %v719_v38 = vmax.f32 %v473_v8, %v655_v20  ;;  %v751_v39 = vmax.f32 %v601_v9, %v687_v21 }
 0x11b   :  { %v656_v30 = vmul.f32 0.01, %v476_v22  ;;  %v688_v31 = vmul.f32 0.01, %v604_v23  ;;  %v722_v32 = vmax.f32 %v484_v16, %v658_v24  ;;  %v754_v33 = vmax.f32 %v612_v17, %v690_v25 }
 0x11c   :  { %v497_v34 = vadd.f32 %v1529_v26, %v1762_v40  ;;  %v625_v35 = vadd.f32 %v1561_v27, %v1762_v40  ;;  %v488_v36 = vpop.f32.mrf.mxu0  ;;  %v616_v37 = vpop.f32.mrf.mxu1 }
 0x11d   :  { %v720_v41 = vmax.f32 %v476_v22, %v656_v30  ;;  %v752_v42 = vmax.f32 %v604_v23, %v688_v31  ;;  %v1320_v43 = vpack.c.bf16 %v722_v32, %v721_v28  ;;  %v1400_v44 = vpack.c.bf16 %v754_v33, %v753_v29 }
 0x11e   :  { %v489_v45 = vadd.f32 %v1762_v40, %v488_v36  ;;  %v617_v46 = vadd.f32 %v1762_v40, %v616_v37  ;;  %v1530_v47 = vpop.f32.mrf.mxu0  ;;  %v1562_v48 = vpop.f32.mrf.mxu1  ;;  %v661_v51 = vmul.f32 0.01, %v497_v34  ;;  %v693_v52 = vmul.f32 0.01, %v625_v35 }
 0x11f   :  { %v1315_v49 = vpack.c.bf16 %v720_v41, %v719_v38  ;;  %v1395_v50 = vpack.c.bf16 %v752_v42, %v751_v39  ;;  %1424 = vst [vmem:[%s1927_s3 + $0x68] sm:$0xff] %v1320_v43   ;;  %1440 = vst [vmem:[%s1927_s3 + $0xe8] sm:$0xff] %v1400_v44   ;;  %v500_v53 = vadd.f32 %v1530_v47, %v1762_v40 }
 0x120   :  { %v628_v54 = vadd.f32 %v1562_v48, %v1762_v40  ;;  %v491_v55 = vpop.f32.mrf.mxu0  ;;  %v619_v56 = vpop.f32.mrf.mxu1  ;;  %v659_v57 = vmul.f32 0.01, %v489_v45  ;;  %v691_v58 = vmul.f32 0.01, %v617_v46  ;;  %v725_v1 = vmax.f32 %v497_v34, %v661_v51 }
 0x121   :  { %1423 = vst [vmem:[%s1927_s3 + $0x60] sm:$0xff] %v1315_v49   ;;  %1439 = vst [vmem:[%s1927_s3 + $0xe0] sm:$0xff] %v1395_v50   ;;  %v492_v59 = vadd.f32 %v1762_v40, %v491_v55  ;;  %v620_v60 = vadd.f32 %v1762_v40, %v619_v56  ;;  %v662_v61 = vmul.f32 0.01, %v500_v53  ;;  %v757_v2 = vmax.f32 %v625_v35, %v693_v52 }
 0x122   :  { %v694_v62 = vmul.f32 0.01, %v628_v54  ;;  %v723_v5 = vmax.f32 %v489_v45, %v659_v57  ;;  %v755_v6 = vmax.f32 %v617_v46, %v691_v58 }
 0x123   :  { %v660_v63 = vmul.f32 0.01, %v492_v59  ;;  %v692_v0 = vmul.f32 0.01, %v620_v60  ;;  %v726_v3 = vmax.f32 %v500_v53, %v662_v61 }
 0x124   :  { %v758_v4 = vmax.f32 %v628_v54, %v694_v62 }
 0x125   :  { %v724_v7 = vmax.f32 %v492_v59, %v660_v63  ;;  %v756_v8 = vmax.f32 %v620_v60, %v692_v0  ;;  %v1330_v9 = vpack.c.bf16 %v726_v3, %v725_v1 }
 0x126   :  { %v1410_v10 = vpack.c.bf16 %v758_v4, %v757_v2 }
 0x127   :  { %v1325_v11 = vpack.c.bf16 %v724_v7, %v723_v5  ;;  %v1405_v12 = vpack.c.bf16 %v756_v8, %v755_v6  ;;  %1426 = vst [vmem:[%s1927_s3 + $0x78] sm:$0xff] %v1330_v9  }
 0x128   :  { %1442 = vst [vmem:[%s1927_s3 + $0xf8] sm:$0xff] %v1410_v10  }
 0x129   :  { %1425 = vst [vmem:[%s1927_s3 + $0x70] sm:$0xff] %v1325_v11   ;;  %1441 = vst [vmem:[%s1927_s3 + $0xf0] sm:$0xff] %v1405_v12  }

// kernel: discriminator_forward.9
= control target key start
LH: loop header
LB: loop body
LE: loop exit
PB: predicated region body
PF: predicated region fallthrough
CT: control target
= control target key end

     0   :  { %s2487_s1 = inlined_call_operand.vmem [shape: bf16[1024,128], index: 1, kind: input, shape index: {}]   ;;  %s2488_s0 = inlined_call_operand.vmem [shape: bf16[128,1024], index: 0, kind: input, shape index: {}]   ;;  %s2489_s2 = inlined_call_operand.vmem [shape: f32[1,128], index: 2, kind: input, shape index: {}]   ;;  %s2490_s3 = inlined_call_operand.vmem [shape: bf16[128,128], index: 3, kind: output, shape index: {}]  }
   0x1   :  { %v1854_v0 = vld [vmem:[%s2487_s1 + $0x78] sm:$0xff]   ;;  %v1858_v4 = vld [vmem:[%s2487_s1 + $0x70] sm:$0xff]   ;;  %v1862_v8 = vld [vmem:[%s2487_s1 + $0x68] sm:$0xff]  }
   0x2   :  { %v1855_v1 = vld [vmem:[%s2487_s1 + $0xf8] sm:$0xff]   ;;  %1598 = vmatprep.subr.bf16.mxu0 %v1854_v0  ;;  %v1859_v5 = vld [vmem:[%s2487_s1 + $0xf0] sm:$0xff]   ;;  %v1863_v9 = vld [vmem:[%s2487_s1 + $0xe8] sm:$0xff]  }
   0x3   :  { %v1856_v2 = vld [vmem:[%s2487_s1 + $0x38] sm:$0xff]   ;;  %1662 = vmatprep.subr.bf16.mxu1 %v1855_v1  ;;  %v1860_v6 = vld [vmem:[%s2487_s1 + $0x30] sm:$0xff]   ;;  %v1864_v10 = vld [vmem:[%s2487_s1 + $0x28] sm:$0xff]  }
   0x4   :  { %v1857_v3 = vld [vmem:[%s2487_s1 + $0xb8] sm:$0xff]   ;;  %1599 = vmatpush3.bf16.msra.mxu0 %v1856_v2  ;;  %v1861_v7 = vld [vmem:[%s2487_s1 + $0xb0] sm:$0xff]   ;;  %v1865_v11 = vld [vmem:[%s2487_s1 + $0xa8] sm:$0xff]  }
   0x5   :  { %1663 = vmatpush3.bf16.msra.mxu1 %v1857_v3  ;;  %1600 = vmatprep.subr.bf16.mxu0 %v1858_v4  ;;  %v1866_v12 = vld [vmem:[%s2487_s1 + $0x60] sm:$0xff]   ;;  %v1870_v16 = vld [vmem:[%s2487_s1 + $0x58] sm:$0xff]   ;;  %v1874_v20 = vld [vmem:[%s2487_s1 + $0x50] sm:$0xff]  }
   0x6   :  { %1664 = vmatprep.subr.bf16.mxu1 %v1859_v5  ;;  %v1867_v13 = vld [vmem:[%s2487_s1 + $0xe0] sm:$0xff]   ;;  %v1871_v17 = vld [vmem:[%s2487_s1 + $0xd8] sm:$0xff]   ;;  %v1875_v21 = vld [vmem:[%s2487_s1 + $0xd0] sm:$0xff]  }
   0x7   :  { %v1868_v14 = vld [vmem:[%s2487_s1 + $0x20] sm:$0xff]   ;;  %v1872_v18 = vld [vmem:[%s2487_s1 + $0x18] sm:$0xff]   ;;  %v1876_v22 = vld [vmem:[%s2487_s1 + $0x10] sm:$0xff]  }
   0x8   :  { %1601 = vmatpush3.bf16.msra.mxu0 %v1860_v6  ;;  %v1869_v15 = vld [vmem:[%s2487_s1 + $0xa0] sm:$0xff]   ;;  %v1873_v19 = vld [vmem:[%s2487_s1 + $0x98] sm:$0xff]   ;;  %v1877_v23 = vld [vmem:[%s2487_s1 + $0x90] sm:$0xff]  }
   0x9   :  { %1665 = vmatpush3.bf16.msra.mxu1 %v1861_v7  ;;  %1602 = vmatprep.subr.bf16.mxu0 %v1862_v8  ;;  %v1878_v24 = vld [vmem:[%s2487_s1 + $0x48] sm:$0xff]   ;;  %v1882_v28 = vld [vmem:[%s2487_s1 + $0x40] sm:$0xff]   ;;  %v1886_v40 = vld [vmem:[%s2487_s1 + $0x178] sm:$0xff]  }
   0xa   :  { %1666 = vmatprep.subr.bf16.mxu1 %v1863_v9  ;;  %v1879_v25 = vld [vmem:[%s2487_s1 + $0xc8] sm:$0xff]   ;;  %v1883_v29 = vld [vmem:[%s2487_s1 + $0xc0] sm:$0xff]   ;;  %v1887_v41 = vld [vmem:[%s2487_s1 + $0x138] sm:$0xff]  }
   0xb   :  { %v1880_v26 = vld [vmem:[%s2487_s1 + $0x8] sm:$0xff]   ;;  %v1884_v30 = vld [vmem:[%s2487_s1] sm:$0xff]   ;;  %v1888_v42 = vld [vmem:[%s2487_s1 + $0x1f8] sm:$0xff]  }
   0xc   :  { %1603 = vmatpush3.bf16.msra.mxu0 %v1864_v10  ;;  %v1881_v27 = vld [vmem:[%s2487_s1 + $0x88] sm:$0xff]   ;;  %v1885_v31 = vld [vmem:[%s2487_s1 + $0x80] sm:$0xff]   ;;  %v1889_v43 = vld [vmem:[%s2487_s1 + $0x1b8] sm:$0xff]  }
   0xd   :  { %1667 = vmatpush3.bf16.msra.mxu1 %v1865_v11  ;;  %1604 = vmatprep.subr.bf16.mxu0 %v1866_v12  ;;  %v15_v32 = vld [vmem:[%s2488_s0] sm:$0xff]  ;;  %v16_v34 = vld [vmem:[%s2488_s0 + $0x8] sm:$0xff]  ;;  %v1890_v50 = vld [vmem:[%s2487_s1 + $0x170] sm:$0xff]  }
   0xe   :  { %1668 = vmatprep.subr.bf16.mxu1 %v1867_v13  ;;  %v19_v33 = vld [vmem:[%s2488_s0 + $0x20] sm:$0xff]  ;;  %v20_v37 = vld [vmem:[%s2488_s0 + $0x28] sm:$0xff]  ;;  %v1891_v52 = vld [vmem:[%s2487_s1 + $0x130] sm:$0xff]  }
   0xf   :  { %v1391_v35 = vcombine.low %v15_v32, %v19_v33  ;;  %v1392_v36 = vcombine.high %v15_v32, %v19_v33  ;;  %v1393_v38 = vcombine.low %v16_v34, %v20_v37  ;;  %v1394_v39 = vcombine.high %v16_v34, %v20_v37  ;;  %v23_v44 = vld [vmem:[%s2488_s0 + $0x40] sm:$0xff]  ;;  %v24_v47 = vld [vmem:[%s2488_s0 + $0x48] sm:$0xff]  ;;  %v1892_v54 = vld [vmem:[%s2487_s1 + $0x1f0] sm:$0xff]  }
  0x10   :  { %1605 = vmatpush3.bf16.msra.mxu0 %v1868_v14  ;;  %v27_v45 = vld [vmem:[%s2488_s0 + $0x60] sm:$0xff]  ;;  %v28_v48 = vld [vmem:[%s2488_s0 + $0x68] sm:$0xff]  ;;  %v1893_v55 = vld [vmem:[%s2487_s1 + $0x1b0] sm:$0xff]  }
  0x11   :  { %1669 = vmatpush3.bf16.msra.mxu1 %v1869_v15  ;;  %1606 = vmatprep.subr.bf16.mxu0 %v1870_v16  ;;  %v1400_v46 = vcombine.high %v23_v44, %v27_v45  ;;  %v1402_v49 = vcombine.high %v24_v47, %v28_v48  ;;  %v1399_v51 = vcombine.low %v23_v44, %v27_v45  ;;  %v31_v56 = vld [vmem:[%s2488_s0 + $0x80] sm:$0xff]  ;;  %v32_v58 = vld [vmem:[%s2488_s0 + $0x88] sm:$0xff]  ;;  %v1908_v32 = vld [vmem:[%s2487_s1 + $0x1d0] sm:$0xff]  }
  0x12   :  { %1670 = vmatprep.subr.bf16.mxu1 %v1871_v17  ;;  %950 = vmatprep.mubr.bf16.mxu0 %v1392_v36  ;;  %v1401_v53 = vcombine.low %v24_v47, %v28_v48  ;;  %v35_v57 = vld [vmem:[%s2488_s0 + $0xa0] sm:$0xff]  ;;  %v36_v59 = vld [vmem:[%s2488_s0 + $0xa8] sm:$0xff]  ;;  %v1909_v33 = vld [vmem:[%s2487_s1 + $0x190] sm:$0xff]  }
  0x13   :  { %1047 = vmatprep.mubr.bf16.mxu1 %v1394_v39  ;;  %v1408_v60 = vcombine.high %v31_v56, %v35_v57  ;;  %v1410_v61 = vcombine.high %v32_v58, %v36_v59  ;;  %v1894_v62 = vld [vmem:[%s2487_s1 + $0x168] sm:$0xff]   ;;  %v1407_v2 = vcombine.low %v31_v56, %v35_v57  ;;  %v39_v3 = vld [vmem:[%s2488_s0 + $0xc0] sm:$0xff]  ;;  %v1409_v6 = vcombine.low %v32_v58, %v36_v59 }
  0x14   :  { %1607 = vmatpush3.bf16.msra.mxu0 %v1872_v18  ;;  %v1895_v63 = vld [vmem:[%s2487_s1 + $0x128] sm:$0xff]   ;;  %v43_v4 = vld [vmem:[%s2488_s0 + $0xe0] sm:$0xff]  ;;  %v1902_v18 = vld [vmem:[%s2487_s1 + $0x158] sm:$0xff]  }
  0x15   :  { %1671 = vmatpush3.bf16.msra.mxu1 %v1873_v19  ;;  %1608 = vmatprep.subr.bf16.mxu0 %v1874_v20  ;;  %v1896_v0 = vld [vmem:[%s2487_s1 + $0x1e8] sm:$0xff]   ;;  %v1416_v7 = vcombine.high %v39_v3, %v43_v4  ;;  %v1898_v10 = vld [vmem:[%s2487_s1 + $0x160] sm:$0xff]   ;;  %v1415_v19 = vcombine.low %v39_v3, %v43_v4  ;;  %v1903_v20 = vld [vmem:[%s2487_s1 + $0x118] sm:$0xff]  }
  0x16   :  { %1672 = vmatprep.subr.bf16.mxu1 %v1875_v21  ;;  %v1897_v1 = vld [vmem:[%s2487_s1 + $0x1a8] sm:$0xff]   ;;  %v1899_v11 = vld [vmem:[%s2487_s1 + $0x120] sm:$0xff]  }
  0x17   :  { %v40_v5 = vld [vmem:[%s2488_s0 + $0xc8] sm:$0xff]  ;;  %v1900_v12 = vld [vmem:[%s2487_s1 + $0x1e0] sm:$0xff]  }
  0x18   :  { %1609 = vmatpush3.bf16.msra.mxu0 %v1876_v22  ;;  %v44_v8 = vld [vmem:[%s2488_s0 + $0xe8] sm:$0xff]  ;;  %v1901_v13 = vld [vmem:[%s2487_s1 + $0x1a0] sm:$0xff]  }
  0x19   :  { %1673 = vmatpush3.bf16.msra.mxu1 %v1877_v23  ;;  %1610 = vmatprep.subr.bf16.mxu0 %v1878_v24  ;;  %v1418_v9 = vcombine.high %v40_v5, %v44_v8  ;;  %v47_v14 = vld [vmem:[%s2488_s0 + $0x100] sm:$0xff]  ;;  %v48_v16 = vld [vmem:[%s2488_s0 + $0x108] sm:$0xff]  ;;  %v1417_v21 = vcombine.low %v40_v5, %v44_v8  ;;  %v1904_v23 = vld [vmem:[%s2487_s1 + $0x1d8] sm:$0xff]  }
  0x1a   :  { %1674 = vmatprep.subr.bf16.mxu1 %v1879_v25  ;;  %v51_v15 = vld [vmem:[%s2488_s0 + $0x120] sm:$0xff]  ;;  %v52_v17 = vld [vmem:[%s2488_s0 + $0x128] sm:$0xff]  ;;  %v1905_v25 = vld [vmem:[%s2487_s1 + $0x198] sm:$0xff]  }
  0x1b   :  { %v1424_v22 = vcombine.high %v47_v14, %v51_v15  ;;  %v1426_v24 = vcombine.high %v48_v16, %v52_v17  ;;  %v1423_v34 = vcombine.low %v47_v14, %v51_v15  ;;  %v1911_v39 = vld [vmem:[%s2487_s1 + $0x108] sm:$0xff]   ;;  %v1915_v48 = vld [vmem:[%s2487_s1 + $0x100] sm:$0xff]   ;;  %v26_v8 = vld [vmem:[%s2488_s0 + $0x58] sm:$0xff] }
  0x1c   :  { %1611 = vmatpush3.bf16.msra.mxu0 %v1880_v26  ;;  %v55_v26 = vld [vmem:[%s2488_s0 + $0x140] sm:$0xff]  ;;  %v64_v44 = vld [vmem:[%s2488_s0 + $0x188] sm:$0xff]  ;;  %v33_v14 = vld [vmem:[%s2488_s0 + $0x90] sm:$0xff] }
  0x1d   :  { %1675 = vmatpush3.bf16.msra.mxu1 %v1881_v27  ;;  %1612 = vmatprep.subr.bf16.mxu0 %v1882_v28  ;;  %v59_v27 = vld [vmem:[%s2488_s0 + $0x160] sm:$0xff]  ;;  %v1906_v28 = vld [vmem:[%s2487_s1 + $0x150] sm:$0xff]   ;;  %v68_v45 = vld [vmem:[%s2488_s0 + $0x1a8] sm:$0xff] }
  0x1e   :  { %1676 = vmatprep.subr.bf16.mxu1 %v1883_v29  ;;  %v56_v29 = vld [vmem:[%s2488_s0 + $0x148] sm:$0xff]  ;;  %v1432_v36 = vcombine.high %v55_v26, %v59_v27  ;;  %v1431_v47 = vcombine.low %v55_v26, %v59_v27  ;;  %v1441_v59 = vcombine.low %v64_v44, %v68_v45  ;;  %v37_v15 = vld [vmem:[%s2488_s0 + $0xb0] sm:$0xff] }
  0x1f   :  { %v72_v56 = vld [vmem:[%s2488_s0 + $0x1c8] sm:$0xff]  ;;  %v1411_v26 = vcombine.low %v33_v14, %v37_v15 }
  0x20   :  { %1613 = vmatpush3.bf16.msra.mxu0 %v1884_v30  ;;  %v60_v30 = vld [vmem:[%s2488_s0 + $0x168] sm:$0xff] }
  0x21   :  { %1677 = vmatpush3.bf16.msra.mxu1 %v1885_v31  ;;  %1726 = vmatprep.subr.bf16.mxu0 %v1886_v40  ;;  %v1907_v31 = vld [vmem:[%s2487_s1 + $0x110] sm:$0xff]   ;;  %v1434_v37 = vcombine.high %v56_v29, %v60_v30  ;;  %v1912_v40 = vld [vmem:[%s2487_s1 + $0x1c8] sm:$0xff]  }
  0x22   :  { %1790 = vmatprep.subr.bf16.mxu1 %v1888_v42  ;;  %v67_v42 = vld [vmem:[%s2488_s0 + $0x1a0] sm:$0xff]  ;;  %v76_v57 = vld [vmem:[%s2488_s0 + $0x1e8] sm:$0xff] }
  0x23   :  { %951 = vmatmul.mubr.bf16.vlgmr.msra.gmra.mxu0 %v1391_v35  ;;  %v1425_v35 = vcombine.low %v48_v16, %v52_v17  ;;  %v1449_v3 = vcombine.low %v72_v56, %v76_v57  ;;  %v34_v16 = vld [vmem:[%s2488_s0 + $0x98] sm:$0xff] }
  0x24   :  { %1048 = vmatmul.mubr.bf16.vlgmr.msra.gmra.mxu1 %v1393_v38  ;;  %1727 = vmatpush3.bf16.msra.mxu0 %v1887_v41  ;;  %v1910_v38 = vld [vmem:[%s2487_s1 + $0x148] sm:$0xff]   ;;  %v63_v41 = vld [vmem:[%s2488_s0 + $0x180] sm:$0xff]  ;;  %v38_v17 = vld [vmem:[%s2488_s0 + $0xb8] sm:$0xff] }
  0x25   :  { %1791 = vmatpush3.bf16.msra.mxu1 %v1889_v43  ;;  %958 = vmatprep.mubr.bf16.mxu0 %v1400_v46  ;;  %v1913_v43 = vld [vmem:[%s2487_s1 + $0x188] sm:$0xff]   ;;  %v1914_v46 = vld [vmem:[%s2487_s1 + $0x140] sm:$0xff]   ;;  %v1439_v58 = vcombine.low %v63_v41, %v67_v42  ;;  %v1413_v27 = vcombine.low %v34_v16, %v38_v17 }
  0x26   :  { %1055 = vmatprep.mubr.bf16.mxu1 %v1402_v49  ;;  %1728 = vmatprep.subr.bf16.mxu0 %v1890_v50  ;;  %v1433_v49 = vcombine.low %v56_v29, %v60_v30  ;;  %v1440_v50 = vcombine.high %v63_v41, %v67_v42  ;;  %v49_v30 = vld [vmem:[%s2488_s0 + $0x110] sm:$0xff]  ;;  %v62_v41 = vld [vmem:[%s2488_s0 + $0x178] sm:$0xff] }
  0x27   :  { %1792 = vmatprep.subr.bf16.mxu1 %v1892_v54  ;;  %v71_v54 = vld [vmem:[%s2488_s0 + $0x1c0] sm:$0xff] }
  0x28   :  { %1729 = vmatpush3.bf16.msra.mxu0 %v1891_v52  ;;  %v1442_v52 = vcombine.high %v64_v44, %v68_v45 }
  0x29   :  { %1793 = vmatpush3.bf16.msra.mxu1 %v1893_v55  ;;  %1730 = vmatprep.subr.bf16.mxu0 %v1894_v62  ;;  %v75_v55 = vld [vmem:[%s2488_s0 + $0x1e0] sm:$0xff]  ;;  %v17_v62 = vld [vmem:[%s2488_s0 + $0x10] sm:$0xff] }
  0x2a   :  { %1794 = vmatprep.subr.bf16.mxu1 %v1896_v0  ;;  %v18_v0 = vld [vmem:[%s2488_s0 + $0x18] sm:$0xff] }
  0x2b   :  { %959 = vmatmul.mubr.bf16.gmra.mxu0 %v1399_v51  ;;  %v1916_v51 = vld [vmem:[%s2487_s1 + $0x1c0] sm:$0xff]  }
  0x2c   :  { %1056 = vmatmul.mubr.bf16.gmra.mxu1 %v1401_v53  ;;  %966 = vmatprep.mubr.bf16.mxu0 %v1408_v60  ;;  %v1917_v53 = vld [vmem:[%s2487_s1 + $0x180] sm:$0xff]   ;;  %v1448_v60 = vcombine.high %v71_v54, %v75_v55 }
  0x2d   :  { %1063 = vmatprep.mubr.bf16.mxu1 %v1410_v61  ;;  %1731 = vmatpush3.bf16.msra.mxu0 %v1895_v63  ;;  %v1450_v61 = vcombine.high %v72_v56, %v76_v57  ;;  %v21_v63 = vld [vmem:[%s2488_s0 + $0x30] sm:$0xff]  ;;  %v74_v56 = vld [vmem:[%s2488_s0 + $0x1d8] sm:$0xff] }
  0x2e   :  { %1795 = vmatpush3.bf16.msra.mxu1 %v1897_v1  ;;  %1732 = vmatprep.subr.bf16.mxu0 %v1898_v10  ;;  %v22_v1 = vld [vmem:[%s2488_s0 + $0x38] sm:$0xff]  ;;  %v1396_v4 = vcombine.high %v17_v62, %v21_v63  ;;  %v1395_v10 = vcombine.low %v17_v62, %v21_v63 }
  0x2f   :  { %1796 = vmatprep.subr.bf16.mxu1 %v1900_v12  ;;  %v1398_v5 = vcombine.high %v18_v0, %v22_v1  ;;  %v78_v57 = vld [vmem:[%s2488_s0 + $0x1f8] sm:$0xff] }
  0x30   :  { %v1453_v63 = vcombine.low %v74_v56, %v78_v57 }
  0x31   :  { %1733 = vmatpush3.bf16.msra.mxu0 %v1899_v11  ;;  %v1397_v11 = vcombine.low %v18_v0, %v22_v1 }
  0x32   :  { %1797 = vmatpush3.bf16.msra.mxu1 %v1901_v13  ;;  %1734 = vmatprep.subr.bf16.mxu0 %v1902_v18 }
  0x33   :  { %967 = vmatmul.mubr.bf16.gmra.mxu0 %v1407_v2  ;;  %1798 = vmatprep.subr.bf16.mxu1 %v1904_v23  ;;  %v1447_v2 = vcombine.low %v71_v54, %v75_v55  ;;  %v45_v23 = vld [vmem:[%s2488_s0 + $0xf0] sm:$0xff] }
  0x34   :  { %1064 = vmatmul.mubr.bf16.gmra.mxu1 %v1409_v6  ;;  %974 = vmatprep.mubr.bf16.mxu0 %v1416_v7  ;;  %v25_v6 = vld [vmem:[%s2488_s0 + $0x50] sm:$0xff] }
  0x35   :  { %1071 = vmatprep.mubr.bf16.mxu1 %v1418_v9  ;;  %1735 = vmatpush3.bf16.msra.mxu0 %v1903_v20  ;;  %v29_v7 = vld [vmem:[%s2488_s0 + $0x70] sm:$0xff]  ;;  %v30_v9 = vld [vmem:[%s2488_s0 + $0x78] sm:$0xff]  ;;  %v1412_v20 = vcombine.high %v33_v14, %v37_v15 }
  0x36   :  { %1799 = vmatpush3.bf16.msra.mxu1 %v1905_v25  ;;  %1736 = vmatprep.subr.bf16.mxu0 %v1906_v28  ;;  %v1404_v12 = vcombine.high %v25_v6, %v29_v7  ;;  %v1406_v13 = vcombine.high %v26_v8, %v30_v9  ;;  %v1403_v18 = vcombine.low %v25_v6, %v29_v7  ;;  %v46_v25 = vld [vmem:[%s2488_s0 + $0xf8] sm:$0xff]  ;;  %v73_v54 = vld [vmem:[%s2488_s0 + $0x1d0] sm:$0xff] }
  0x37   :  { %1800 = vmatprep.subr.bf16.mxu1 %v1908_v32  ;;  %v50_v32 = vld [vmem:[%s2488_s0 + $0x118] sm:$0xff]  ;;  %v77_v55 = vld [vmem:[%s2488_s0 + $0x1f0] sm:$0xff] }
  0x38   :  { %v1451_v62 = vcombine.low %v73_v54, %v77_v55 }
  0x39   :  { %1737 = vmatpush3.bf16.msra.mxu0 %v1907_v31  ;;  %v53_v31 = vld [vmem:[%s2488_s0 + $0x130] sm:$0xff] }
  0x3a   :  { %1801 = vmatpush3.bf16.msra.mxu1 %v1909_v33  ;;  %1738 = vmatprep.subr.bf16.mxu0 %v1910_v38  ;;  %v54_v33 = vld [vmem:[%s2488_s0 + $0x138] sm:$0xff]  ;;  %v57_v38 = vld [vmem:[%s2488_s0 + $0x150] sm:$0xff]  ;;  %v1427_v42 = vcombine.low %v49_v30, %v53_v31 }
  0x3b   :  { %975 = vmatmul.mubr.bf16.gmra.mxu0 %v1415_v19  ;;  %1802 = vmatprep.subr.bf16.mxu1 %v1912_v40  ;;  %v1405_v19 = vcombine.low %v26_v8, %v30_v9  ;;  %v58_v40 = vld [vmem:[%s2488_s0 + $0x158] sm:$0xff] }
  0x3c   :  { %1072 = vmatmul.mubr.bf16.gmra.mxu1 %v1417_v21  ;;  %982 = vmatprep.mubr.bf16.mxu0 %v1424_v22  ;;  %v1414_v21 = vcombine.high %v34_v16, %v38_v17  ;;  %v41_v22 = vld [vmem:[%s2488_s0 + $0xd0] sm:$0xff]  ;;  %v1438_v45 = vcombine.high %v58_v40, %v62_v41 }
  0x3d   :  { %1079 = vmatprep.mubr.bf16.mxu1 %v1426_v24  ;;  %1739 = vmatpush3.bf16.msra.mxu0 %v1911_v39  ;;  %v42_v24 = vld [vmem:[%s2488_s0 + $0xd8] sm:$0xff]  ;;  %v1420_v28 = vcombine.high %v41_v22, %v45_v23  ;;  %v61_v39 = vld [vmem:[%s2488_s0 + $0x170] sm:$0xff] }
  0x3e   :  { %1803 = vmatpush3.bf16.msra.mxu1 %v1913_v43  ;;  %1740 = vmatprep.subr.bf16.mxu0 %v1914_v46  ;;  %v1422_v29 = vcombine.high %v42_v24, %v46_v25  ;;  %v1429_v43 = vcombine.low %v50_v32, %v54_v33  ;;  %v1436_v44 = vcombine.high %v57_v38, %v61_v39  ;;  %v65_v46 = vld [vmem:[%s2488_s0 + $0x190] sm:$0xff] }
  0x3f   :  { %1804 = vmatprep.subr.bf16.mxu1 %v1916_v51  ;;  %v1437_v51 = vcombine.low %v58_v40, %v62_v41 }
  0x41   :  { %1741 = vmatpush3.bf16.msra.mxu0 %v1915_v48  ;;  %v66_v48 = vld [vmem:[%s2488_s0 + $0x198] sm:$0xff] }
  0x42   :  { %1805 = vmatpush3.bf16.msra.mxu1 %v1917_v53 }
  0x43   :  { %983 = vmatmul.mubr.bf16.gmra.mxu0 %v1423_v34  ;;  %v1419_v34 = vcombine.low %v41_v22, %v45_v23 }
  0x44   :  { %1080 = vmatmul.mubr.bf16.gmra.mxu1 %v1425_v35  ;;  %990 = vmatprep.mubr.bf16.mxu0 %v1432_v36  ;;  %v1421_v35 = vcombine.low %v42_v24, %v46_v25  ;;  %v1428_v36 = vcombine.high %v49_v30, %v53_v31 }
  0x45   :  { %1087 = vmatprep.mubr.bf16.mxu1 %v1434_v37  ;;  %v1430_v37 = vcombine.high %v50_v32, %v54_v33 }
  0x4b   :  { %991 = vmatmul.mubr.bf16.gmra.mxu0 %v1431_v47  ;;  %v69_v47 = vld [vmem:[%s2488_s0 + $0x1b0] sm:$0xff] }
  0x4c   :  { %1088 = vmatmul.mubr.bf16.gmra.mxu1 %v1433_v49  ;;  %998 = vmatprep.mubr.bf16.mxu0 %v1440_v50  ;;  %v70_v49 = vld [vmem:[%s2488_s0 + $0x1b8] sm:$0xff]  ;;  %v1435_v50 = vcombine.low %v57_v38, %v61_v39 }
  0x4d   :  { %1095 = vmatprep.mubr.bf16.mxu1 %v1442_v52  ;;  %v1444_v52 = vcombine.high %v65_v46, %v69_v47  ;;  %v1446_v53 = vcombine.high %v66_v48, %v70_v49 }
  0x53   :  { %999 = vmatmul.mubr.bf16.gmra.mxu0 %v1439_v58  ;;  %v1443_v58 = vcombine.low %v65_v46, %v69_v47 }
  0x54   :  { %1096 = vmatmul.mubr.bf16.gmra.mxu1 %v1441_v59  ;;  %1006 = vmatprep.mubr.bf16.mxu0 %v1448_v60  ;;  %v1445_v59 = vcombine.low %v66_v48, %v70_v49  ;;  %v1452_v60 = vcombine.high %v73_v54, %v77_v55 }
  0x55   :  { %1103 = vmatprep.mubr.bf16.mxu1 %v1450_v61  ;;  %v1454_v61 = vcombine.high %v74_v56, %v78_v57 }
  0x5b   :  { %1007 = vmatmul.mubr.bf16.gmra.mxu0 %v1447_v2  ;;  %v2325_v2 = vld [vmem:[%s2489_s2] ss:$0 sm:$0xff] }
  0x5c   :  { %1104 = vmatmul.mubr.bf16.gmra.mxu1 %v1449_v3  ;;  %1144 = vmatprep.mubr.bf16.mxu0 %v1396_v4 }
  0x5d   :  { %1241 = vmatprep.mubr.bf16.mxu1 %v1398_v5 }
  0x63   :  { %1145 = vmatmul.mubr.bf16.vlgmr.msra.gmra.mxu0 %v1395_v10 }
  0x64   :  { %1242 = vmatmul.mubr.bf16.vlgmr.msra.gmra.mxu1 %v1397_v11  ;;  %1152 = vmatprep.mubr.bf16.mxu0 %v1404_v12 }
  0x65   :  { %1249 = vmatprep.mubr.bf16.mxu1 %v1406_v13 }
  0x6b   :  { %1153 = vmatmul.mubr.bf16.gmra.mxu0 %v1403_v18 }
  0x6c   :  { %1250 = vmatmul.mubr.bf16.gmra.mxu1 %v1405_v19  ;;  %1160 = vmatprep.mubr.bf16.mxu0 %v1412_v20 }
  0x6d   :  { %1257 = vmatprep.mubr.bf16.mxu1 %v1414_v21 }
  0x73   :  { %1161 = vmatmul.mubr.bf16.gmra.mxu0 %v1411_v26 }
  0x74   :  { %1258 = vmatmul.mubr.bf16.gmra.mxu1 %v1413_v27  ;;  %1168 = vmatprep.mubr.bf16.mxu0 %v1420_v28 }
  0x75   :  { %1265 = vmatprep.mubr.bf16.mxu1 %v1422_v29 }
  0x7b   :  { %1169 = vmatmul.mubr.bf16.gmra.mxu0 %v1419_v34 }
  0x7c   :  { %1266 = vmatmul.mubr.bf16.gmra.mxu1 %v1421_v35  ;;  %1176 = vmatprep.mubr.bf16.mxu0 %v1428_v36 }
  0x7d   :  { %1273 = vmatprep.mubr.bf16.mxu1 %v1430_v37 }
  0x83   :  { %1177 = vmatmul.mubr.bf16.gmra.mxu0 %v1427_v42 }
  0x84   :  { %1274 = vmatmul.mubr.bf16.gmra.mxu1 %v1429_v43  ;;  %1184 = vmatprep.mubr.bf16.mxu0 %v1436_v44 }
  0x85   :  { %1281 = vmatprep.mubr.bf16.mxu1 %v1438_v45 }
  0x8b   :  { %1185 = vmatmul.mubr.bf16.gmra.mxu0 %v1435_v50 }
  0x8c   :  { %1282 = vmatmul.mubr.bf16.gmra.mxu1 %v1437_v51  ;;  %1192 = vmatprep.mubr.bf16.mxu0 %v1444_v52 }
  0x8d   :  { %1289 = vmatprep.mubr.bf16.mxu1 %v1446_v53 }
  0x93   :  { %1193 = vmatmul.mubr.bf16.gmra.mxu0 %v1443_v58 }
  0x94   :  { %1290 = vmatmul.mubr.bf16.gmra.mxu1 %v1445_v59  ;;  %1200 = vmatprep.mubr.bf16.mxu0 %v1452_v60 }
  0x95   :  { %1297 = vmatprep.mubr.bf16.mxu1 %v1454_v61 }
  0x9b   :  { %1201 = vmatmul.mubr.bf16.gmra.mxu0 %v1451_v62 }
  0x9c   :  { %1298 = vmatmul.mubr.bf16.gmra.mxu1 %v1453_v63 }
  0xe3   :  { %v1614_v0 = vpop.f32.mrf.mxu0 }
  0xe4   :  { %v1678_v1 = vpop.f32.mrf.mxu1 }
  0xe5   :  { %v1615_v3 = vpop.f32.mrf.mxu0 }
  0xe6   :  { %v1616_v4 = vadd.f32 %v1615_v3, %v1614_v0  ;;  %v1679_v5 = vpop.f32.mrf.mxu1 }
  0xe7   :  { %v1680_v6 = vadd.f32 %v1679_v5, %v1678_v1  ;;  %v2327_v7 = vpop.f32.mrf.mxu0 }
  0xe8   :  { %v953_v8 = vadd.f32 %v1616_v4, %v2325_v2  ;;  %v2330_v9 = vpop.f32.mrf.mxu1 }
  0xe9   :  { %v2332_v10 = vpop.f32.mrf.mxu0 }
  0xea   :  { %v2334_v11 = vadd.f32 %v1680_v6, %v953_v8  ;;  %v2336_v12 = vpop.f32.mrf.mxu1 }
  0xeb   :  { %v1620_v13 = vpop.f32.mrf.mxu0 }
  0xec   :  { %v1684_v14 = vpop.f32.mrf.mxu1 }
  0xed   :  { %v1621_v15 = vpop.f32.mrf.mxu0 }
  0xee   :  { %v1622_v16 = vadd.f32 %v1621_v15, %v1620_v13  ;;  %v1685_v17 = vpop.f32.mrf.mxu1 }
  0xef   :  { %v1686_v18 = vadd.f32 %v1685_v17, %v1684_v14  ;;  %v2338_v19 = vpop.f32.mrf.mxu0 }
  0xf0   :  { %v961_v20 = vadd.f32 %v1622_v16, %v2325_v2  ;;  %v2341_v21 = vpop.f32.mrf.mxu1 }
  0xf1   :  { %v2343_v22 = vpop.f32.mrf.mxu0 }
  0xf2   :  { %v2345_v23 = vadd.f32 %v1686_v18, %v961_v20  ;;  %v2347_v24 = vpop.f32.mrf.mxu1 }
  0xf3   :  { %v1626_v25 = vpop.f32.mrf.mxu0 }
  0xf4   :  { %v1690_v26 = vpop.f32.mrf.mxu1 }
  0xf5   :  { %v1627_v27 = vpop.f32.mrf.mxu0 }
  0xf6   :  { %v1628_v28 = vadd.f32 %v1627_v27, %v1626_v25  ;;  %v1691_v29 = vpop.f32.mrf.mxu1 }
  0xf7   :  { %v1692_v30 = vadd.f32 %v1691_v29, %v1690_v26  ;;  %v2349_v31 = vpop.f32.mrf.mxu0 }
  0xf8   :  { %v969_v32 = vadd.f32 %v1628_v28, %v2325_v2  ;;  %v2352_v33 = vpop.f32.mrf.mxu1 }
  0xf9   :  { %v2354_v34 = vpop.f32.mrf.mxu0 }
  0xfa   :  { %v2356_v35 = vadd.f32 %v1692_v30, %v969_v32  ;;  %v2358_v36 = vpop.f32.mrf.mxu1 }
  0xfb   :  { %v1632_v37 = vpop.f32.mrf.mxu0 }
  0xfc   :  { %v1696_v38 = vpop.f32.mrf.mxu1 }
  0xfd   :  { %v1633_v39 = vpop.f32.mrf.mxu0 }
  0xfe   :  { %v1634_v40 = vadd.f32 %v1633_v39, %v1632_v37  ;;  %v1697_v41 = vpop.f32.mrf.mxu1 }
  0xff   :  { %v1698_v42 = vadd.f32 %v1697_v41, %v1696_v38  ;;  %v2360_v43 = vpop.f32.mrf.mxu0 }
 0x100   :  { %v977_v44 = vadd.f32 %v1634_v40, %v2325_v2  ;;  %v2363_v45 = vpop.f32.mrf.mxu1 }
 0x101   :  { %v2365_v46 = vpop.f32.mrf.mxu0 }
 0x102   :  { %v2367_v47 = vadd.f32 %v1698_v42, %v977_v44  ;;  %v2369_v48 = vpop.f32.mrf.mxu1 }
 0x103   :  { %v1638_v49 = vpop.f32.mrf.mxu0 }
 0x104   :  { %v1702_v50 = vpop.f32.mrf.mxu1 }
 0x105   :  { %v1639_v51 = vpop.f32.mrf.mxu0 }
 0x106   :  { %v1640_v52 = vadd.f32 %v1639_v51, %v1638_v49  ;;  %v1703_v53 = vpop.f32.mrf.mxu1 }
 0x107   :  { %v1704_v54 = vadd.f32 %v1703_v53, %v1702_v50  ;;  %v2371_v55 = vpop.f32.mrf.mxu0 }
 0x108   :  { %v985_v56 = vadd.f32 %v1640_v52, %v2325_v2  ;;  %v2374_v57 = vpop.f32.mrf.mxu1  ;;  %v1619_v52 = vadd.f32 %v2332_v10, %v2327_v7  ;;  %v1625_v7 = vadd.f32 %v2343_v22, %v2338_v19  ;;  %v1689_v19 = vadd.f32 %v2347_v24, %v2341_v21 }
 0x109   :  { %v2376_v58 = vpop.f32.mrf.mxu0 }
 0x10a   :  { %v2378_v59 = vadd.f32 %v1704_v54, %v985_v56  ;;  %v2380_v60 = vpop.f32.mrf.mxu1 }
 0x10b   :  { %v1644_v61 = vpop.f32.mrf.mxu0 }
 0x10c   :  { %v1708_v62 = vpop.f32.mrf.mxu1 }
 0x10d   :  { %v1645_v63 = vpop.f32.mrf.mxu0 }
 0x10e   :  { %v1646_v0 = vadd.f32 %v1645_v63, %v1644_v61  ;;  %v1709_v1 = vpop.f32.mrf.mxu1  ;;  %v956_v63 = vadd.f32 %v1619_v52, %v2325_v2 }
 0x10f   :  { %v1710_v3 = vadd.f32 %v1709_v1, %v1708_v62  ;;  %v2382_v4 = vpop.f32.mrf.mxu0 }
 0x110   :  { %v993_v5 = vadd.f32 %v1646_v0, %v2325_v2  ;;  %v2385_v6 = vpop.f32.mrf.mxu1 }
 0x111   :  { %v2387_v8 = vpop.f32.mrf.mxu0 }
 0x112   :  { %v2389_v13 = vadd.f32 %v1710_v3, %v993_v5  ;;  %v2391_v14 = vpop.f32.mrf.mxu1  ;;  %v1683_v5 = vadd.f32 %v2336_v12, %v2330_v9 }
 0x113   :  { %v1650_v15 = vpop.f32.mrf.mxu0 }
 0x114   :  { %v1714_v16 = vpop.f32.mrf.mxu1 }
 0x115   :  { %v1651_v17 = vpop.f32.mrf.mxu0 }
 0x116   :  { %v1652_v18 = vadd.f32 %v1651_v17, %v1650_v15  ;;  %v1715_v20 = vpop.f32.mrf.mxu1  ;;  %v1053_v17 = vadd.f32 %v1683_v5, %v956_v63 }
 0x117   :  { %v1716_v25 = vadd.f32 %v1715_v20, %v1714_v16  ;;  %v2393_v26 = vpop.f32.mrf.mxu0 }
 0x118   :  { %v1001_v27 = vadd.f32 %v1652_v18, %v2325_v2  ;;  %v2396_v28 = vpop.f32.mrf.mxu1 }
 0x119   :  { %v2398_v29 = vpop.f32.mrf.mxu0 }
 0x11a   :  { %v2400_v30 = vadd.f32 %v1716_v25, %v1001_v27  ;;  %v2402_v32 = vpop.f32.mrf.mxu1 }
 0x11b   :  { %v1656_v37 = vpop.f32.mrf.mxu0 }
 0x11c   :  { %v1720_v38 = vpop.f32.mrf.mxu1 }
 0x11d   :  { %v1657_v39 = vpop.f32.mrf.mxu0 }
 0x11e   :  { %v1658_v40 = vadd.f32 %v1657_v39, %v1656_v37  ;;  %v1721_v41 = vpop.f32.mrf.mxu1 }
 0x11f   :  { %v1722_v42 = vadd.f32 %v1721_v41, %v1720_v38  ;;  %v2404_v44 = vpop.f32.mrf.mxu0  ;;  %v964_v41 = vadd.f32 %v1625_v7, %v2325_v2 }
 0x120   :  { %v1009_v49 = vadd.f32 %v1658_v40, %v2325_v2  ;;  %v2407_v50 = vpop.f32.mrf.mxu1 }
 0x121   :  { %v2409_v51 = vpop.f32.mrf.mxu0 }
 0x122   :  { %v2413_v53 = vadd.f32 %v1722_v42, %v1009_v49  ;;  %v2415_v54 = vpop.f32.mrf.mxu1 }
 0x123   :  { %v1742_v56 = vpop.f32.mrf.mxu0 }
 0x124   :  { %v1806_v61 = vpop.f32.mrf.mxu1 }
 0x125   :  { %v1743_v62 = vpop.f32.mrf.mxu0 }
 0x126   :  { %v1744_v0 = vadd.f32 %v1743_v62, %v1742_v56  ;;  %v1807_v1 = vpop.f32.mrf.mxu1  ;;  %v1061_v62 = vadd.f32 %v1689_v19, %v964_v41 }
 0x127   :  { %v1745_v3 = vpop.f32.mrf.mxu0  ;;  %v1808_v27 = vadd.f32 %v1807_v1, %v1806_v61  ;;  %v1631_v61 = vadd.f32 %v2354_v34, %v2349_v31 }
 0x128   :  { %v1809_v15 = vpop.f32.mrf.mxu1  ;;  %v1147_v10 = vadd.f32 %v1744_v0, %v2334_v11 }
 0x129   :  { %v1746_v16 = vpop.f32.mrf.mxu0 }
 0x12a   :  { %v1747_v18 = vadd.f32 %v1746_v16, %v1745_v3  ;;  %v1810_v20 = vpop.f32.mrf.mxu1  ;;  %v1244_v42 = vadd.f32 %v1808_v27, %v1147_v10 }
 0x12b   :  { %v1748_v25 = vpop.f32.mrf.mxu0  ;;  %v1811_v38 = vadd.f32 %v1810_v20, %v1809_v15  ;;  %v1695_v20 = vadd.f32 %v2358_v36, %v2352_v33 }
 0x12c   :  { %v1150_v37 = vadd.f32 %v1747_v18, %v1053_v17  ;;  %v1812_v39 = vpop.f32.mrf.mxu1  ;;  %v972_v17 = vadd.f32 %v1631_v61, %v2325_v2 }
 0x12d   :  { %v1749_v40 = vpop.f32.mrf.mxu0 }
 0x12e   :  { %v1247_v9 = vadd.f32 %v1811_v38, %v1150_v37  ;;  %v1750_v12 = vadd.f32 %v1749_v40, %v1748_v25  ;;  %v1813_v49 = vpop.f32.mrf.mxu1  ;;  %v1069_v37 = vadd.f32 %v1695_v20, %v972_v17  ;;  %v1637_v38 = vadd.f32 %v2365_v46, %v2360_v43 }
 0x12f   :  { %v1751_v52 = vpop.f32.mrf.mxu0  ;;  %v1814_v5 = vadd.f32 %v1813_v49, %v1812_v39 }
 0x130   :  { %v1554_v22 = vpack.c.bf16 %v1247_v9, %v1244_v42  ;;  %v1815_v11 = vpop.f32.mrf.mxu1  ;;  %v1155_v63 = vadd.f32 %v1750_v12, %v2345_v23 }
 0x131   :  { %v1752_v56 = vpop.f32.mrf.mxu0 }
 0x132   :  { %1555 = vst [vmem:[%s2490_s3] sm:$0xff] %v1554_v22   ;;  %v1753_v0 = vadd.f32 %v1752_v56, %v1751_v52  ;;  %v1816_v1 = vpop.f32.mrf.mxu1  ;;  %v1252_v7 = vadd.f32 %v1814_v5, %v1155_v63  ;;  %v980_v52 = vadd.f32 %v1637_v38, %v2325_v2  ;;  %v1701_v56 = vadd.f32 %v2369_v48, %v2363_v45 }
 0x133   :  { %v1754_v3 = vpop.f32.mrf.mxu0  ;;  %v1817_v16 = vadd.f32 %v1816_v1, %v1815_v11 }
 0x134   :  { %v1158_v15 = vadd.f32 %v1753_v0, %v1061_v62  ;;  %v1818_v21 = vpop.f32.mrf.mxu1  ;;  %v1077_v63 = vadd.f32 %v1701_v56, %v980_v52  ;;  %v1643_v0 = vadd.f32 %v2376_v58, %v2371_v55 }
 0x135   :  { %v1755_v24 = vpop.f32.mrf.mxu0 }
 0x136   :  { %v1255_v10 = vadd.f32 %v1817_v16, %v1158_v15  ;;  %v1756_v18 = vadd.f32 %v1755_v24, %v1754_v3  ;;  %v1819_v31 = vpop.f32.mrf.mxu1  ;;  %v988_v17 = vadd.f32 %v1643_v0, %v2325_v2 }
 0x137   :  { %v1757_v34 = vpop.f32.mrf.mxu0  ;;  %v1820_v9 = vadd.f32 %v1819_v31, %v1818_v21  ;;  %v1707_v31 = vadd.f32 %v2380_v60, %v2374_v57 }
 0x138   :  { %v1559_v25 = vpack.c.bf16 %v1255_v10, %v1252_v7  ;;  %v1821_v23 = vpop.f32.mrf.mxu1  ;;  %v1163_v39 = vadd.f32 %v1756_v18, %v2356_v35 }
 0x139   :  { %v1758_v27 = vpop.f32.mrf.mxu0 }
 0x13a   :  { %1591 = vst [vmem:[%s2490_s3 + $0x8] sm:$0xff] %v1559_v25   ;;  %v1759_v40 = vadd.f32 %v1758_v27, %v1757_v34  ;;  %v1822_v41 = vpop.f32.mrf.mxu1  ;;  %v1260_v19 = vadd.f32 %v1820_v9, %v1163_v39  ;;  %v1085_v25 = vadd.f32 %v1707_v31, %v988_v17 }
 0x13b   :  { %v1760_v42 = vpop.f32.mrf.mxu0  ;;  %v1823_v49 = vadd.f32 %v1822_v41, %v1821_v23  ;;  %v1649_v23 = vadd.f32 %v2387_v8, %v2382_v4 }
 0x13c   :  { %v1166_v12 = vadd.f32 %v1759_v40, %v1069_v37  ;;  %v1824_v33 = vpop.f32.mrf.mxu1 }
 0x13d   :  { %v1761_v36 = vpop.f32.mrf.mxu0  ;;  %v996_v9 = vadd.f32 %v1649_v23, %v2325_v2 }
 0x13e   :  { %v1263_v22 = vadd.f32 %v1823_v49, %v1166_v12  ;;  %v1762_v11 = vadd.f32 %v1761_v36, %v1760_v42  ;;  %v1825_v43 = vpop.f32.mrf.mxu1  ;;  %v1713_v36 = vadd.f32 %v2391_v14, %v2385_v6 }
 0x13f   :  { %v1763_v46 = vpop.f32.mrf.mxu0  ;;  %v1826_v16 = vadd.f32 %v1825_v43, %v1824_v33 }
 0x140   :  { %v1564_v62 = vpack.c.bf16 %v1263_v22, %v1260_v19  ;;  %v1827_v35 = vpop.f32.mrf.mxu1  ;;  %v1171_v1 = vadd.f32 %v1762_v11, %v2367_v47  ;;  %v1093_v22 = vadd.f32 %v1713_v36, %v996_v9  ;;  %v1655_v11 = vadd.f32 %v2398_v29, %v2393_v26 }
 0x141   :  { %v1764_v61 = vpop.f32.mrf.mxu0 }
 0x142   :  { %1592 = vst [vmem:[%s2490_s3 + $0x10] sm:$0xff] %v1564_v62   ;;  %v1765_v3 = vadd.f32 %v1764_v61, %v1763_v46  ;;  %v1828_v5 = vpop.f32.mrf.mxu1  ;;  %v1268_v7 = vadd.f32 %v1826_v16, %v1171_v1  ;;  %v1004_v0 = vadd.f32 %v1655_v11, %v2325_v2 }
 0x143   :  { %v1766_v15 = vpop.f32.mrf.mxu0  ;;  %v1829_v24 = vadd.f32 %v1828_v5, %v1827_v35 }
 0x144   :  { %v1174_v21 = vadd.f32 %v1765_v3, %v1077_v63  ;;  %v1830_v45 = vpop.f32.mrf.mxu1 }
 0x145   :  { %v1767_v48 = vpop.f32.mrf.mxu0 }
 0x146   :  { %v1271_v10 = vadd.f32 %v1829_v24, %v1174_v21  ;;  %v1768_v18 = vadd.f32 %v1767_v48, %v1766_v15  ;;  %v1831_v55 = vpop.f32.mrf.mxu1  ;;  %v1719_v15 = vadd.f32 %v2402_v32, %v2396_v28 }
 0x147   :  { %v1769_v58 = vpop.f32.mrf.mxu0  ;;  %v1832_v40 = vadd.f32 %v1831_v55, %v1830_v45  ;;  %v1661_v45 = vadd.f32 %v2409_v51, %v2404_v44 }
 0x148   :  { %v1569_v34 = vpack.c.bf16 %v1271_v10, %v1268_v7  ;;  %v1833_v47 = vpop.f32.mrf.mxu1  ;;  %v1179_v27 = vadd.f32 %v1768_v18, %v2378_v59  ;;  %v1101_v24 = vadd.f32 %v1719_v15, %v1004_v0 }
 0x149   :  { %v1770_v20 = vpop.f32.mrf.mxu0  ;;  %v1012_v31 = vadd.f32 %v1661_v45, %v2325_v2 }
 0x14a   :  { %1593 = vst [vmem:[%s2490_s3 + $0x18] sm:$0xff] %v1569_v34   ;;  %v1771_v37 = vadd.f32 %v1770_v20, %v1769_v58  ;;  %v1834_v38 = vpop.f32.mrf.mxu1  ;;  %v1276_v12 = vadd.f32 %v1832_v40, %v1179_v27 }
 0x14b   :  { %v1772_v39 = vpop.f32.mrf.mxu0  ;;  %v1835_v42 = vadd.f32 %v1834_v38, %v1833_v47 }
 0x14c   :  { %v1182_v41 = vadd.f32 %v1771_v37, %v1085_v25  ;;  %v1836_v57 = vpop.f32.mrf.mxu1  ;;  %v1725_v25 = vadd.f32 %v2415_v54, %v2407_v50 }
 0x14d   :  { %v1773_v60 = vpop.f32.mrf.mxu0 }
 0x14e   :  { %v1279_v49 = vadd.f32 %v1835_v42, %v1182_v41  ;;  %v1774_v33 = vadd.f32 %v1773_v60, %v1772_v39  ;;  %v1837_v4 = vpop.f32.mrf.mxu1  ;;  %v1109_v37 = vadd.f32 %v1725_v25, %v1012_v31 }
 0x14f   :  { %v1775_v8 = vpop.f32.mrf.mxu0  ;;  %v1838_v35 = vadd.f32 %v1837_v4, %v1836_v57 }
 0x150   :  { %v1574_v52 = vpack.c.bf16 %v1279_v49, %v1276_v12  ;;  %v1839_v59 = vpop.f32.mrf.mxu1  ;;  %v1187_v43 = vadd.f32 %v1774_v33, %v2389_v13 }
 0x151   :  { %v1776_v19 = vpop.f32.mrf.mxu0 }
 0x152   :  { %1594 = vst [vmem:[%s2490_s3 + $0x20] sm:$0xff] %v1574_v52   ;;  %v1777_v46 = vadd.f32 %v1776_v19, %v1775_v8  ;;  %v1840_v56 = vpop.f32.mrf.mxu1  ;;  %v1284_v1 = vadd.f32 %v1838_v35, %v1187_v43 }
 0x153   :  { %v1778_v62 = vpop.f32.mrf.mxu0  ;;  %v1841_v63 = vadd.f32 %v1840_v56, %v1839_v59 }
 0x154   :  { %v1190_v61 = vadd.f32 %v1777_v46, %v1093_v22  ;;  %v1842_v6 = vpop.f32.mrf.mxu1 }
 0x155   :  { %v1779_v14 = vpop.f32.mrf.mxu0 }
 0x156   :  { %v1287_v3 = vadd.f32 %v1841_v63, %v1190_v61  ;;  %v1780_v5 = vadd.f32 %v1779_v14, %v1778_v62  ;;  %v1843_v26 = vpop.f32.mrf.mxu1 }
 0x157   :  { %v1781_v29 = vpop.f32.mrf.mxu0  ;;  %v1844_v18 = vadd.f32 %v1843_v26, %v1842_v6 }
 0x158   :  { %v1579_v16 = vpack.c.bf16 %v1287_v3, %v1284_v1  ;;  %v1845_v13 = vpop.f32.mrf.mxu1  ;;  %v1195_v48 = vadd.f32 %v1780_v5, %v2400_v30 }
 0x159   :  { %v1782_v21 = vpop.f32.mrf.mxu0 }
 0x15a   :  { %1595 = vst [vmem:[%s2490_s3 + $0x28] sm:$0xff] %v1579_v16   ;;  %v1783_v17 = vadd.f32 %v1782_v21, %v1781_v29  ;;  %v1846_v7 = vpop.f32.mrf.mxu1  ;;  %v1292_v34 = vadd.f32 %v1844_v18, %v1195_v48 }
 0x15b   :  { %v1784_v10 = vpop.f32.mrf.mxu0  ;;  %v1847_v58 = vadd.f32 %v1846_v7, %v1845_v13 }
 0x15c   :  { %v1198_v55 = vadd.f32 %v1783_v17, %v1101_v24  ;;  %v1848_v28 = vpop.f32.mrf.mxu1 }
 0x15d   :  { %v1785_v32 = vpop.f32.mrf.mxu0 }
 0x15e   :  { %v1295_v47 = vadd.f32 %v1847_v58, %v1198_v55  ;;  %v1786_v20 = vadd.f32 %v1785_v32, %v1784_v10  ;;  %v1849_v44 = vpop.f32.mrf.mxu1 }
 0x15f   :  { %v1787_v51 = vpop.f32.mrf.mxu0  ;;  %v1850_v40 = vadd.f32 %v1849_v44, %v1848_v28 }
 0x160   :  { %v1584_v23 = vpack.c.bf16 %v1295_v47, %v1292_v34  ;;  %v1851_v30 = vpop.f32.mrf.mxu1  ;;  %v1203_v38 = vadd.f32 %v1786_v20, %v2413_v53 }
 0x161   :  { %v1788_v27 = vpop.f32.mrf.mxu0 }
 0x162   :  { %1596 = vst [vmem:[%s2490_s3 + $0x30] sm:$0xff] %v1584_v23   ;;  %v1789_v39 = vadd.f32 %v1788_v27, %v1787_v51  ;;  %v1852_v2 = vpop.f32.mrf.mxu1  ;;  %v1300_v57 = vadd.f32 %v1850_v40, %v1203_v38 }
 0x163   :  { %v1853_v42 = vadd.f32 %v1852_v2, %v1851_v30 }
 0x164   :  { %v1206_v41 = vadd.f32 %v1789_v39, %v1109_v37 }
 0x166   :  { %v1303_v60 = vadd.f32 %v1853_v42, %v1206_v41 }
 0x168   :  { %v1589_v9 = vpack.c.bf16 %v1303_v60, %v1300_v57 }
 0x16a   :  { %1597 = vst [vmem:[%s2490_s3 + $0x38] sm:$0xff] %v1589_v9  }

// kernel: discriminator_forward.10
= control target key start
LH: loop header
LB: loop body
LE: loop exit
PB: predicated region body
PF: predicated region fallthrough
CT: control target
= control target key end

     0   :  { %s400_s6 = smov 0   ;;  %s424_s0 = inlined_call_operand.vmem [shape: bf16[2,64,128], index: 0, kind: input, shape index: {}]   ;;  %s425_s1 = inlined_call_operand.vmem [shape: bf16[2,64,128], index: 1, kind: output, shape index: {}]  }
   0x1 LB: > { %s301_s7 = sadd.s32 4294967295, %s388_s6   ;;  %p305_p0 = scmp.ge.s32.totalorder %s388_s6, 1  ;;  %s388_s6 = sphi %s400_s6, %s11_s6  }
   0x2   : > { %p87_p1 = scmp.lt.s32.totalorder %s388_s6, 3 }
   0x4   : > { %p88_p2 = pnand %p305_p0, %p87_p1 }
   0x5   : > { %p107_p3 = scmp.lt.s32.totalorder (!%p88_p2), %s301_s7, 1 }
   0x6   : > { %91 = sbr.rel (%p88_p2) target bundleno = 79 (0x4f), region = 24 }
   0xb   : > { %s427_s7 = smov (!%p107_p3, %s301_s7), 1 }
   0xc   : > { %s320_s8 = sshll.u32 %s427_s7, 5 }
   0xd   : > { %s111_s11 = scalar_lea.vmem %s424_s0, %s320_s8  ;;  %s116_s14 = scalar_lea.vmem %s425_s1, %s320_s8 }
   0xe   : > { %v331_v0 = vld [vmem:[%s111_s11] sm:$0xff]   ;;  %v366_v1 = vld [vmem:[%s111_s11 + $0x8] sm:$0xff]   ;;  %v367_v2 = vld [vmem:[%s111_s11 + $0x10] sm:$0xff]  }
   0xf   : > { %v332_v3 = vunpack.c.l.bf16 %v331_v0  ;;  %v333_v4 = vunpack.c.h.bf16 %v331_v0  ;;  %v336_v5 = vunpack.c.l.bf16 %v366_v1  ;;  %v337_v6 = vunpack.c.h.bf16 %v366_v1  ;;  %v368_v12 = vld [vmem:[%s111_s11 + $0x18] sm:$0xff]  }
  0x10   : > { %v340_v7 = vunpack.c.l.bf16 %v367_v2  ;;  %v341_v13 = vunpack.c.h.bf16 %v367_v2  ;;  %v344_v17 = vunpack.c.l.bf16 %v368_v12  ;;  %v345_v21 = vunpack.c.h.bf16 %v368_v12 }
  0x11   : > { %v133_v8 = vadd.f32 %v333_v4, %v332_v3  ;;  %v146_v9 = vmul.f32 %v332_v3, %v332_v3  ;;  %v147_v10 = vmul.f32 %v333_v4, %v333_v4  ;;  %v148_v11 = vmul.f32 %v336_v5, %v336_v5 }
  0x12   : > { %v149_v15 = vmul.f32 %v337_v6, %v337_v6  ;;  %v150_v19 = vmul.f32 %v340_v7, %v340_v7  ;;  %v151_v23 = vmul.f32 %v341_v13, %v341_v13  ;;  %v152_v26 = vmul.f32 %v344_v17, %v344_v17 }
  0x13   : > { %v134_v14 = vadd.f32 %v336_v5, %v133_v8  ;;  %v154_v16 = vadd.f32 %v147_v10, %v146_v9  ;;  %v153_v29 = vmul.f32 %v345_v21, %v345_v21 }
  0x15   : > { %v135_v18 = vadd.f32 %v337_v6, %v134_v14  ;;  %v155_v20 = vadd.f32 %v154_v16, %v148_v11 }
  0x17   : > { %v136_v22 = vadd.f32 %v340_v7, %v135_v18  ;;  %v156_v24 = vadd.f32 %v155_v20, %v149_v15 }
  0x19   : > { %v137_v25 = vadd.f32 %v341_v13, %v136_v22  ;;  %v157_v27 = vadd.f32 %v156_v24, %v150_v19 }
  0x1b   : > { %v138_v28 = vadd.f32 %v344_v17, %v137_v25  ;;  %v158_v30 = vadd.f32 %v157_v27, %v151_v23 }
  0x1d   : > { %v139_v31 = vadd.f32 %v345_v21, %v138_v28  ;;  %v159_v32 = vadd.f32 %v158_v30, %v152_v26 }
  0x1f   : > { %v140_v33 = vrot.slane %v139_v31, 4  ;;  %v160_v34 = vadd.f32 %v159_v32, %v153_v29 }
  0x21   : > { %v141_v35 = vadd.f32 %v140_v33, %v139_v31  ;;  %v161_v36 = vrot.slane %v160_v34, 4 }
  0x23   : > { %v142_v37 = vrot.slane %v141_v35, 2  ;;  %v162_v38 = vadd.f32 %v161_v36, %v160_v34 }
  0x25   : > { %v143_v39 = vadd.f32 %v142_v37, %v141_v35  ;;  %v163_v40 = vrot.slane %v162_v38, 2 }
  0x27   : > { %v144_v41 = vrot.slane %v143_v39, 1  ;;  %v164_v42 = vadd.f32 %v163_v40, %v162_v38 }
  0x29   : > { %v145_v43 = vadd.f32 %v144_v41, %v143_v39  ;;  %v165_v44 = vrot.slane %v164_v42, 1 }
  0x2b   : > { %v166_v45 = vadd.f32 %v165_v44, %v164_v42  ;;  %v167_v46 = vmul.f32 0.015625, %v145_v43 }
  0x2d   : > { %v168_v47 = vmul.f32 0.015625, %v166_v45  ;;  %v169_v48 = vmul.f32 %v167_v46, %v167_v46  ;;  %v172_v52 = vsub.f32 %v332_v3, %v167_v46  ;;  %v173_v53 = vsub.f32 %v333_v4, %v167_v46 }
  0x2e   : > { %v174_v54 = vsub.f32 %v336_v5, %v167_v46  ;;  %v175_v55 = vsub.f32 %v337_v6, %v167_v46  ;;  %v176_v56 = vsub.f32 %v340_v7, %v167_v46  ;;  %v177_v57 = vsub.f32 %v341_v13, %v167_v46 }
  0x2f   : > { %v170_v49 = vsub.f32 %v168_v47, %v169_v48  ;;  %v178_v58 = vsub.f32 %v344_v17, %v167_v46  ;;  %v179_v59 = vsub.f32 %v345_v21, %v167_v46 }
  0x31   : > { %v171_v50 = vmax.f32 %v170_v49, 0.0 }
  0x33   : > { %v180_v51 = vadd.f32 1e-05, %v171_v50 }
  0x35   : > { %380 = vrsqrt.f32 %v180_v51 }
  0x42   : > { %v381_v60 = vpop.eup %380 }
  0x43   : > { %v182_v61 = vmul.f32 %v381_v60, %v172_v52  ;;  %v183_v62 = vmul.f32 %v381_v60, %v173_v53  ;;  %v184_v63 = vmul.f32 %v381_v60, %v174_v54  ;;  %v185_v0 = vmul.f32 %v381_v60, %v175_v55 }
  0x44   : > { %v186_v1 = vmul.f32 %v381_v60, %v176_v56  ;;  %v187_v2 = vmul.f32 %v381_v60, %v177_v57  ;;  %v188_v8 = vmul.f32 %v381_v60, %v178_v58  ;;  %v189_v9 = vmul.f32 %v381_v60, %v179_v59 }
  0x45   : > { %v190_v10 = vmul.f32 0.01, %v182_v61  ;;  %v191_v11 = vmul.f32 0.01, %v183_v62  ;;  %v192_v3 = vmul.f32 0.01, %v184_v63 }
  0x46   : > { %v193_v4 = vmul.f32 0.01, %v185_v0  ;;  %v194_v5 = vmul.f32 0.01, %v186_v1  ;;  %v195_v6 = vmul.f32 0.01, %v187_v2 }
  0x47   : > { %v198_v7 = vmax.f32 %v182_v61, %v190_v10  ;;  %v199_v12 = vmax.f32 %v183_v62, %v191_v11  ;;  %v200_v13 = vmax.f32 %v184_v63, %v192_v3  ;;  %v196_v14 = vmul.f32 0.01, %v188_v8 }
  0x48   : > { %v201_v15 = vmax.f32 %v185_v0, %v193_v4  ;;  %v202_v16 = vmax.f32 %v186_v1, %v194_v5  ;;  %v203_v17 = vmax.f32 %v187_v2, %v195_v6  ;;  %v197_v18 = vmul.f32 0.01, %v189_v9 }
  0x49   : > { %v349_v19 = vpack.c.bf16 %v199_v12, %v198_v7  ;;  %v204_v20 = vmax.f32 %v188_v8, %v196_v14 }
  0x4a   : > { %v354_v21 = vpack.c.bf16 %v201_v15, %v200_v13  ;;  %v359_v22 = vpack.c.bf16 %v203_v17, %v202_v16  ;;  %v205_v23 = vmax.f32 %v189_v9, %v197_v18 }
  0x4b   : > { %350 = vst [vmem:[%s116_s14] sm:$0xff] %v349_v19  }
  0x4c   : > { %369 = vst [vmem:[%s116_s14 + $0x8] sm:$0xff] %v354_v21   ;;  %370 = vst [vmem:[%s116_s14 + $0x10] sm:$0xff] %v359_v22   ;;  %v364_v24 = vpack.c.bf16 %v205_v23, %v204_v20 }
  0x4e   : > { %371 = vst [vmem:[%s116_s14 + $0x18] sm:$0xff] %v364_v24  }
  0x4f PF: > { %s11_s6 = sadd.s32 1, %s388_s6  }
  0x50   : > { %p8_p4 = scmp.ge.s32.totalorder %s11_s6, 4  }
  0x52   :  { %10 = sbr.rel (!%p8_p4) target bundleno = 1 (0x1), region = 54 }

// kernel: discriminator_forward.12
= control target key start
LH: loop header
LB: loop body
LE: loop exit
PB: predicated region body
PF: predicated region fallthrough
CT: control target
= control target key end

     0   :  { %s301_s6 = smov 0   ;;  %s325_s0 = inlined_call_operand.vmem [shape: bf16[2,16,256], index: 0, kind: input, shape index: {}]   ;;  %s326_s1 = inlined_call_operand.vmem [shape: bf16[2,16,256], index: 1, kind: output, shape index: {}]  }
   0x1 LB: > { %s254_s7 = sadd.s32 4294967295, %s289_s6   ;;  %p258_p0 = scmp.ge.s32.totalorder %s289_s6, 1  ;;  %s289_s6 = sphi %s301_s6, %s11_s6  }
   0x2   : > { %p87_p1 = scmp.lt.s32.totalorder %s289_s6, 3 }
   0x4   : > { %p88_p2 = pnand %p258_p0, %p87_p1 }
   0x5   : > { %p107_p3 = scmp.lt.s32.totalorder (!%p88_p2), %s254_s7, 1 }
   0x6   : > { %91 = sbr.rel (%p88_p2) target bundleno = 66 (0x42), region = 24 }
   0xb   : > { %s328_s7 = smov (!%p107_p3, %s254_s7), 1 }
   0xc   : > { %s267_s8 = sshll.u32 %s328_s7, 4 }
   0xd   : > { %s111_s11 = scalar_lea.vmem %s325_s0, %s267_s8  ;;  %s116_s14 = scalar_lea.vmem %s326_s1, %s267_s8 }
   0xe   : > { %v117_v0 = vld [vmem:[%s111_s11] sm:$0xff]  ;;  %v118_v1 = vld [vmem:[%s111_s11 + $0x8] sm:$0xff] }
   0xf   : > { %v119_v2 = vunpack.c.l.bf16 %v117_v0  ;;  %v120_v3 = vunpack.c.h.bf16 %v117_v0  ;;  %v121_v4 = vunpack.c.l.bf16 %v118_v1  ;;  %v122_v5 = vunpack.c.h.bf16 %v118_v1 }
  0x11   : > { %v123_v6 = vadd.f32 %v121_v4, %v119_v2  ;;  %v130_v7 = vadd.f32 %v122_v5, %v120_v3  ;;  %v137_v8 = vmul.f32 %v119_v2, %v119_v2  ;;  %v138_v9 = vmul.f32 %v120_v3, %v120_v3 }
  0x12   : > { %v139_v10 = vmul.f32 %v121_v4, %v121_v4  ;;  %v140_v11 = vmul.f32 %v122_v5, %v122_v5 }
  0x13   : > { %v124_v12 = vrot.slane %v123_v6, 4  ;;  %v131_v13 = vrot.slane %v130_v7, 4 }
  0x14   : > { %v141_v14 = vadd.f32 %v139_v10, %v137_v8  ;;  %v148_v15 = vadd.f32 %v140_v11, %v138_v9 }
  0x15   : > { %v125_v16 = vadd.f32 %v124_v12, %v123_v6  ;;  %v132_v17 = vadd.f32 %v131_v13, %v130_v7 }
  0x16   : > { %v142_v18 = vrot.slane %v141_v14, 4  ;;  %v149_v19 = vrot.slane %v148_v15, 4 }
  0x17   : > { %v126_v20 = vrot.slane %v125_v16, 2  ;;  %v133_v21 = vrot.slane %v132_v17, 2 }
  0x18   : > { %v143_v22 = vadd.f32 %v142_v18, %v141_v14  ;;  %v150_v23 = vadd.f32 %v149_v19, %v148_v15 }
  0x19   : > { %v127_v24 = vadd.f32 %v126_v20, %v125_v16  ;;  %v134_v25 = vadd.f32 %v133_v21, %v132_v17 }
  0x1a   : > { %v144_v26 = vrot.slane %v143_v22, 2  ;;  %v151_v27 = vrot.slane %v150_v23, 2 }
  0x1b   : > { %v128_v28 = vrot.slane %v127_v24, 1  ;;  %v135_v29 = vrot.slane %v134_v25, 1 }
  0x1c   : > { %v145_v30 = vadd.f32 %v144_v26, %v143_v22  ;;  %v152_v31 = vadd.f32 %v151_v27, %v150_v23 }
  0x1d   : > { %v129_v32 = vadd.f32 %v128_v28, %v127_v24  ;;  %v136_v33 = vadd.f32 %v135_v29, %v134_v25 }
  0x1e   : > { %v146_v34 = vrot.slane %v145_v30, 1  ;;  %v153_v35 = vrot.slane %v152_v31, 1 }
  0x1f   : > { %v155_v36 = vmul.f32 0.0625, %v129_v32  ;;  %v156_v37 = vmul.f32 0.0625, %v136_v33 }
  0x20   : > { %v147_v38 = vadd.f32 %v146_v34, %v145_v30  ;;  %v154_v39 = vadd.f32 %v153_v35, %v152_v31 }
  0x21   : > { %v159_v40 = vmul.f32 %v155_v36, %v155_v36  ;;  %v160_v41 = vmul.f32 %v156_v37, %v156_v37  ;;  %v165_v50 = vsub.f32 %v119_v2, %v155_v36  ;;  %v167_v51 = vsub.f32 %v121_v4, %v155_v36 }
  0x22   : > { %v157_v42 = vmul.f32 0.0625, %v147_v38  ;;  %v158_v43 = vmul.f32 0.0625, %v154_v39  ;;  %v166_v52 = vsub.f32 %v120_v3, %v156_v37  ;;  %v168_v53 = vsub.f32 %v122_v5, %v156_v37 }
  0x24   : > { %v161_v44 = vsub.f32 %v157_v42, %v159_v40  ;;  %v162_v45 = vsub.f32 %v158_v43, %v160_v41 }
  0x26   : > { %v163_v46 = vmax.f32 %v161_v44, 0.0  ;;  %v164_v47 = vmax.f32 %v162_v45, 0.0 }
  0x28   : > { %v169_v48 = vadd.f32 1e-05, %v163_v46  ;;  %v170_v49 = vadd.f32 1e-05, %v164_v47 }
  0x2a   : > { %279 = vrsqrt.f32 %v169_v48 }
  0x2b   : > { %281 = vrsqrt.f32 %v170_v49 }
  0x37   : > { %v280_v54 = vpop.eup %279 }
  0x38   : > { %v282_v55 = vpop.eup %281  ;;  %v173_v56 = vmul.f32 %v280_v54, %v165_v50  ;;  %v175_v57 = vmul.f32 %v280_v54, %v167_v51 }
  0x39   : > { %v174_v58 = vmul.f32 %v282_v55, %v166_v52  ;;  %v176_v59 = vmul.f32 %v282_v55, %v168_v53 }
  0x3a   : > { %v177_v60 = vmul.f32 0.01, %v173_v56  ;;  %v179_v61 = vmul.f32 0.01, %v175_v57 }
  0x3b   : > { %v178_v62 = vmul.f32 0.01, %v174_v58  ;;  %v180_v63 = vmul.f32 0.01, %v176_v59 }
  0x3c   : > { %v181_v0 = vmax.f32 %v173_v56, %v177_v60  ;;  %v183_v1 = vmax.f32 %v175_v57, %v179_v61 }
  0x3d   : > { %v182_v6 = vmax.f32 %v174_v58, %v178_v62  ;;  %v184_v7 = vmax.f32 %v176_v59, %v180_v63 }
  0x3f   : > { %v269_v2 = vpack.c.bf16 %v182_v6, %v181_v0  ;;  %v270_v3 = vpack.c.bf16 %v184_v7, %v183_v1 }
  0x41   : > { %197 = vst [vmem:[%s116_s14] sm:$0xff] %v269_v2  ;;  %198 = vst [vmem:[%s116_s14 + $0x8] sm:$0xff] %v270_v3 }
  0x42 PF: > { %s11_s6 = sadd.s32 1, %s289_s6  }
  0x43   : > { %p8_p4 = scmp.ge.s32.totalorder %s11_s6, 4  }
  0x45   :  { %10 = sbr.rel (!%p8_p4) target bundleno = 1 (0x1), region = 54 }

// kernel: discriminator_forward.11
= control target key start
LH: loop header
LB: loop body
LE: loop exit
PB: predicated region body
PF: predicated region fallthrough
CT: control target
= control target key end

     0   :  { %s3858_s1 = inlined_call_operand.vmem [shape: bf16[2048,256], index: 1, kind: input, shape index: {}]   ;;  %s3859_s0 = inlined_call_operand.vmem [shape: bf16[32,2048], index: 0, kind: input, shape index: {}]   ;;  %s3860_s2 = inlined_call_operand.vmem [shape: f32[1,256], index: 2, kind: input, shape index: {}]   ;;  %s3861_s3 = inlined_call_operand.vmem [shape: bf16[32,256], index: 3, kind: output, shape index: {}]  }
   0x1   :  { %v2506_v0 = vld [vmem:[%s3858_s1 + $0x74] ss:$8 sps:$4 sm:$0xff]   ;;  %v2510_v2 = vld [vmem:[%s3858_s1 + $0x70] ss:$8 sps:$4 sm:$0xff]   ;;  %v2512_v4 = vld [vmem:[%s3858_s1 + $0x64] ss:$8 sps:$4 sm:$0xff]  }
   0x2   :  { %v2508_v1 = vld [vmem:[%s3858_s1 + $0x174] ss:$8 sps:$4 sm:$0xff]   ;;  %1754 = vmatprep.subr.bf16.mxu0 %v2506_v0  ;;  %v2511_v3 = vld [vmem:[%s3858_s1 + $0x170] ss:$8 sps:$4 sm:$0xff]   ;;  %v2514_v5 = vld [vmem:[%s3858_s1 + $0x164] ss:$8 sps:$4 sm:$0xff]  }
   0x3   :  { %1807 = vmatprep.subr.bf16.mxu1 %v2508_v1  ;;  %1755 = vmatpush1.bf16.msra.mxu0 %v2510_v2  ;;  %v2516_v6 = vld [vmem:[%s3858_s1 + $0x60] ss:$8 sps:$4 sm:$0xff]   ;;  %v2518_v8 = vld [vmem:[%s3858_s1 + $0x54] ss:$8 sps:$4 sm:$0xff]   ;;  %v2522_v10 = vld [vmem:[%s3858_s1 + $0x50] ss:$8 sps:$4 sm:$0xff]  }
   0x4   :  { %1808 = vmatpush1.bf16.msra.mxu1 %v2511_v3  ;;  %1756 = vmatprep.subr.bf16.mxu0 %v2512_v4  ;;  %v2517_v7 = vld [vmem:[%s3858_s1 + $0x160] ss:$8 sps:$4 sm:$0xff]   ;;  %v2520_v9 = vld [vmem:[%s3858_s1 + $0x154] ss:$8 sps:$4 sm:$0xff]   ;;  %v2523_v11 = vld [vmem:[%s3858_s1 + $0x150] ss:$8 sps:$4 sm:$0xff]  }
   0x5   :  { %1809 = vmatprep.subr.bf16.mxu1 %v2514_v5  ;;  %v2524_v12 = vld [vmem:[%s3858_s1 + $0x44] ss:$8 sps:$4 sm:$0xff]   ;;  %v2528_v14 = vld [vmem:[%s3858_s1 + $0x40] ss:$8 sps:$4 sm:$0xff]   ;;  %v2530_v16 = vld [vmem:[%s3858_s1 + $0x34] ss:$8 sps:$4 sm:$0xff]  }
   0x6   :  { %v2526_v13 = vld [vmem:[%s3858_s1 + $0x144] ss:$8 sps:$4 sm:$0xff]   ;;  %v2529_v15 = vld [vmem:[%s3858_s1 + $0x140] ss:$8 sps:$4 sm:$0xff]   ;;  %v2532_v17 = vld [vmem:[%s3858_s1 + $0x134] ss:$8 sps:$4 sm:$0xff]  }
   0x7   :  { %1757 = vmatpush1.bf16.msra.mxu0 %v2516_v6  ;;  %v2534_v18 = vld [vmem:[%s3858_s1 + $0x30] ss:$8 sps:$4 sm:$0xff]   ;;  %v2536_v20 = vld [vmem:[%s3858_s1 + $0x24] ss:$8 sps:$4 sm:$0xff]   ;;  %v2540_v22 = vld [vmem:[%s3858_s1 + $0x20] ss:$8 sps:$4 sm:$0xff]  }
   0x8   :  { %1810 = vmatpush1.bf16.msra.mxu1 %v2517_v7  ;;  %1758 = vmatprep.subr.bf16.mxu0 %v2518_v8  ;;  %v2535_v19 = vld [vmem:[%s3858_s1 + $0x130] ss:$8 sps:$4 sm:$0xff]   ;;  %v2538_v21 = vld [vmem:[%s3858_s1 + $0x124] ss:$8 sps:$4 sm:$0xff]   ;;  %v2541_v23 = vld [vmem:[%s3858_s1 + $0x120] ss:$8 sps:$4 sm:$0xff]  }
   0x9   :  { %1811 = vmatprep.subr.bf16.mxu1 %v2520_v9  ;;  %v2542_v24 = vld [vmem:[%s3858_s1 + $0x14] ss:$8 sps:$4 sm:$0xff]   ;;  %v2546_v26 = vld [vmem:[%s3858_s1 + $0x10] ss:$8 sps:$4 sm:$0xff]   ;;  %v2548_v28 = vld [vmem:[%s3858_s1 + $0x4] ss:$8 sps:$4 sm:$0xff]  }
   0xa   :  { %v2544_v25 = vld [vmem:[%s3858_s1 + $0x114] ss:$8 sps:$4 sm:$0xff]   ;;  %v2547_v27 = vld [vmem:[%s3858_s1 + $0x110] ss:$8 sps:$4 sm:$0xff]   ;;  %v2550_v29 = vld [vmem:[%s3858_s1 + $0x104] ss:$8 sps:$4 sm:$0xff]  }
   0xb   :  { %1759 = vmatpush1.bf16.msra.mxu0 %v2522_v10  ;;  %v2552_v30 = vld [vmem:[%s3858_s1] ss:$8 sps:$4 sm:$0xff]   ;;  %v2554_v32 = vld [vmem:[%s3858_s1 + $0xf4] ss:$8 sps:$4 sm:$0xff]   ;;  %v2558_v34 = vld [vmem:[%s3858_s1 + $0xf0] ss:$8 sps:$4 sm:$0xff]  }
   0xc   :  { %1812 = vmatpush1.bf16.msra.mxu1 %v2523_v11  ;;  %1760 = vmatprep.subr.bf16.mxu0 %v2524_v12  ;;  %v2553_v31 = vld [vmem:[%s3858_s1 + $0x100] ss:$8 sps:$4 sm:$0xff]   ;;  %v2556_v33 = vld [vmem:[%s3858_s1 + $0x1f4] ss:$8 sps:$4 sm:$0xff]   ;;  %v2559_v35 = vld [vmem:[%s3858_s1 + $0x1f0] ss:$8 sps:$4 sm:$0xff]  }
   0xd   :  { %1813 = vmatprep.subr.bf16.mxu1 %v2526_v13  ;;  %v2560_v36 = vld [vmem:[%s3858_s1 + $0xe4] ss:$8 sps:$4 sm:$0xff]   ;;  %v2564_v38 = vld [vmem:[%s3858_s1 + $0xe0] ss:$8 sps:$4 sm:$0xff]   ;;  %v2566_v40 = vld [vmem:[%s3858_s1 + $0xd4] ss:$8 sps:$4 sm:$0xff]  }
   0xe   :  { %v2562_v37 = vld [vmem:[%s3858_s1 + $0x1e4] ss:$8 sps:$4 sm:$0xff]   ;;  %v2565_v39 = vld [vmem:[%s3858_s1 + $0x1e0] ss:$8 sps:$4 sm:$0xff]   ;;  %v2568_v41 = vld [vmem:[%s3858_s1 + $0x1d4] ss:$8 sps:$4 sm:$0xff]  }
   0xf   :  { %1761 = vmatpush1.bf16.msra.mxu0 %v2528_v14  ;;  %v2570_v42 = vld [vmem:[%s3858_s1 + $0xd0] ss:$8 sps:$4 sm:$0xff]   ;;  %v2572_v44 = vld [vmem:[%s3858_s1 + $0xc4] ss:$8 sps:$4 sm:$0xff]   ;;  %v2576_v46 = vld [vmem:[%s3858_s1 + $0xc0] ss:$8 sps:$4 sm:$0xff]  }
  0x10   :  { %1814 = vmatpush1.bf16.msra.mxu1 %v2529_v15  ;;  %1762 = vmatprep.subr.bf16.mxu0 %v2530_v16  ;;  %v2571_v43 = vld [vmem:[%s3858_s1 + $0x1d0] ss:$8 sps:$4 sm:$0xff]   ;;  %v2574_v45 = vld [vmem:[%s3858_s1 + $0x1c4] ss:$8 sps:$4 sm:$0xff]   ;;  %v2577_v47 = vld [vmem:[%s3858_s1 + $0x1c0] ss:$8 sps:$4 sm:$0xff]  }
  0x11   :  { %1815 = vmatprep.subr.bf16.mxu1 %v2532_v17  ;;  %v14_v48 = vld [vmem:[%s3859_s0] sm:$0xff]  ;;  %v15_v50 = vld [vmem:[%s3859_s0 + $0x8] sm:$0xff]  ;;  %v2578_v52 = vld [vmem:[%s3858_s1 + $0xb4] ss:$8 sps:$4 sm:$0xff]  }
  0x12   :  { %v22_v49 = vld [vmem:[%s3859_s0 + $0x40] sm:$0xff]  ;;  %v23_v51 = vld [vmem:[%s3859_s0 + $0x48] sm:$0xff]  ;;  %v2580_v54 = vld [vmem:[%s3858_s1 + $0x1b4] ss:$8 sps:$4 sm:$0xff]  }
  0x13   :  { %1763 = vmatpush1.bf16.msra.mxu0 %v2534_v18  ;;  %v2211_v53 = vcombine.high %v14_v48, %v22_v49  ;;  %v2213_v55 = vcombine.high %v15_v50, %v23_v51  ;;  %v2582_v56 = vld [vmem:[%s3858_s1 + $0xb0] ss:$8 sps:$4 sm:$0xff]   ;;  %v2584_v58 = vld [vmem:[%s3858_s1 + $0xa4] ss:$8 sps:$4 sm:$0xff]   ;;  %v2588_v60 = vld [vmem:[%s3858_s1 + $0xa0] ss:$8 sps:$4 sm:$0xff]   ;;  %v2210_v8 = vcombine.low %v14_v48, %v22_v49  ;;  %v2212_v9 = vcombine.low %v15_v50, %v23_v51 }
  0x14   :  { %1816 = vmatpush1.bf16.msra.mxu1 %v2535_v19  ;;  %1764 = vmatprep.subr.bf16.mxu0 %v2536_v20  ;;  %v2583_v57 = vld [vmem:[%s3858_s1 + $0x1b0] ss:$8 sps:$4 sm:$0xff]   ;;  %v2586_v59 = vld [vmem:[%s3858_s1 + $0x1a4] ss:$8 sps:$4 sm:$0xff]   ;;  %v2589_v61 = vld [vmem:[%s3858_s1 + $0x1a0] ss:$8 sps:$4 sm:$0xff]  }
  0x15   :  { %1817 = vmatprep.subr.bf16.mxu1 %v2538_v21  ;;  %1786 = vmatprep.mubr.bf16.mxu0 %v2211_v53  ;;  %v2590_v62 = vld [vmem:[%s3858_s1 + $0x94] ss:$8 sps:$4 sm:$0xff]   ;;  %v2594_v0 = vld [vmem:[%s3858_s1 + $0x90] ss:$8 sps:$4 sm:$0xff]   ;;  %v2596_v2 = vld [vmem:[%s3858_s1 + $0x84] ss:$8 sps:$4 sm:$0xff]  }
  0x16   :  { %1839 = vmatprep.mubr.bf16.mxu1 %v2213_v55  ;;  %v2592_v63 = vld [vmem:[%s3858_s1 + $0x194] ss:$8 sps:$4 sm:$0xff]   ;;  %v2595_v1 = vld [vmem:[%s3858_s1 + $0x190] ss:$8 sps:$4 sm:$0xff]   ;;  %v2598_v3 = vld [vmem:[%s3858_s1 + $0x184] ss:$8 sps:$4 sm:$0xff]  }
  0x17   :  { %1765 = vmatpush1.bf16.msra.mxu0 %v2540_v22  ;;  %v2600_v4 = vld [vmem:[%s3858_s1 + $0x80] ss:$8 sps:$4 sm:$0xff]   ;;  %v2604_v6 = vld [vmem:[%s3858_s1 + $0x274] ss:$8 sps:$4 sm:$0xff]   ;;  %v2602_v10 = vld [vmem:[%s3858_s1 + $0x270] ss:$8 sps:$4 sm:$0xff]  }
  0x18   :  { %1818 = vmatpush1.bf16.msra.mxu1 %v2541_v23  ;;  %1766 = vmatprep.subr.bf16.mxu0 %v2542_v24  ;;  %v2601_v5 = vld [vmem:[%s3858_s1 + $0x180] ss:$8 sps:$4 sm:$0xff]   ;;  %v2607_v7 = vld [vmem:[%s3858_s1 + $0x374] ss:$8 sps:$4 sm:$0xff]   ;;  %v2605_v11 = vld [vmem:[%s3858_s1 + $0x370] ss:$8 sps:$4 sm:$0xff]  }
  0x19   :  { %1819 = vmatprep.subr.bf16.mxu1 %v2544_v25  ;;  %v2610_v12 = vld [vmem:[%s3858_s1 + $0x264] ss:$8 sps:$4 sm:$0xff]   ;;  %v2608_v14 = vld [vmem:[%s3858_s1 + $0x260] ss:$8 sps:$4 sm:$0xff]   ;;  %v2616_v16 = vld [vmem:[%s3858_s1 + $0x254] ss:$8 sps:$4 sm:$0xff]  }
  0x1a   :  { %v2613_v13 = vld [vmem:[%s3858_s1 + $0x364] ss:$8 sps:$4 sm:$0xff]   ;;  %v2611_v15 = vld [vmem:[%s3858_s1 + $0x360] ss:$8 sps:$4 sm:$0xff]   ;;  %v2619_v17 = vld [vmem:[%s3858_s1 + $0x354] ss:$8 sps:$4 sm:$0xff]  }
  0x1b   :  { %1767 = vmatpush1.bf16.msra.mxu0 %v2546_v26  ;;  %v2614_v18 = vld [vmem:[%s3858_s1 + $0x250] ss:$8 sps:$4 sm:$0xff]   ;;  %v2622_v20 = vld [vmem:[%s3858_s1 + $0x244] ss:$8 sps:$4 sm:$0xff]   ;;  %v2620_v22 = vld [vmem:[%s3858_s1 + $0x240] ss:$8 sps:$4 sm:$0xff]  }
  0x1c   :  { %1820 = vmatpush1.bf16.msra.mxu1 %v2547_v27  ;;  %1768 = vmatprep.subr.bf16.mxu0 %v2548_v28  ;;  %v2617_v19 = vld [vmem:[%s3858_s1 + $0x350] ss:$8 sps:$4 sm:$0xff]   ;;  %v2625_v21 = vld [vmem:[%s3858_s1 + $0x344] ss:$8 sps:$4 sm:$0xff]   ;;  %v2623_v23 = vld [vmem:[%s3858_s1 + $0x340] ss:$8 sps:$4 sm:$0xff]  }
  0x1d   :  { %1821 = vmatprep.subr.bf16.mxu1 %v2550_v29  ;;  %v2628_v24 = vld [vmem:[%s3858_s1 + $0x234] ss:$8 sps:$4 sm:$0xff]   ;;  %v2626_v26 = vld [vmem:[%s3858_s1 + $0x230] ss:$8 sps:$4 sm:$0xff]   ;;  %v30_v28 = vld [vmem:[%s3859_s0 + $0x80] sm:$0xff] }
  0x1e   :  { %v2631_v25 = vld [vmem:[%s3858_s1 + $0x334] ss:$8 sps:$4 sm:$0xff]   ;;  %v2629_v27 = vld [vmem:[%s3858_s1 + $0x330] ss:$8 sps:$4 sm:$0xff]   ;;  %v38_v29 = vld [vmem:[%s3859_s0 + $0xc0] sm:$0xff] }
  0x1f   :  { %1769 = vmatpush1.bf16.msra.mxu0 %v2552_v30  ;;  %v31_v30 = vld [vmem:[%s3859_s0 + $0x88] sm:$0xff]  ;;  %v3229_v48 = vld [vmem:[%s3859_s0 + $0x18] sm:$0xff] }
  0x20   :  { %1822 = vmatpush1.bf16.msra.mxu1 %v2553_v31  ;;  %1770 = vmatprep.subr.bf16.mxu0 %v2554_v32  ;;  %v39_v31 = vld [vmem:[%s3859_s0 + $0xc8] sm:$0xff]  ;;  %v3236_v50 = vld [vmem:[%s3859_s0 + $0x58] sm:$0xff] }
  0x21   :  { %1823 = vmatprep.subr.bf16.mxu1 %v2556_v33  ;;  %v2634_v32 = vld [vmem:[%s3858_s1 + $0x224] ss:$8 sps:$4 sm:$0xff]   ;;  %v2227_v33 = vcombine.high %v30_v28, %v38_v29  ;;  %v2217_v51 = vcombine.high %v3229_v48, %v3236_v50  ;;  %v2647_v53 = vld [vmem:[%s3858_s1 + $0x300] ss:$8 sps:$4 sm:$0xff]   ;;  %v2655_v55 = vld [vmem:[%s3858_s1 + $0x3f4] ss:$8 sps:$4 sm:$0xff]  }
  0x23   :  { %1771 = vmatpush2.bf16.msra.mxu0 %v2558_v34  ;;  %v2226_v34 = vcombine.low %v30_v28, %v38_v29  ;;  %v2216_v29 = vcombine.low %v3229_v48, %v3236_v50  ;;  %v2718_v48 = vld [vmem:[%s3858_s1 + $0x444] ss:$8 sps:$4 sm:$0xff]  }
  0x24   :  { %1824 = vmatpush2.bf16.msra.mxu1 %v2559_v35  ;;  %1772 = vmatprep.subr.bf16.mxu0 %v2560_v36  ;;  %v2229_v35 = vcombine.high %v31_v30, %v39_v31  ;;  %v2637_v36 = vld [vmem:[%s3858_s1 + $0x324] ss:$8 sps:$4 sm:$0xff]  }
  0x25   :  { %1825 = vmatprep.subr.bf16.mxu1 %v2562_v37  ;;  %v2228_v37 = vcombine.low %v31_v30, %v39_v31  ;;  %v33_v30 = vld [vmem:[%s3859_s0 + $0x98] sm:$0xff] }
  0x26   :  { %v41_v31 = vld [vmem:[%s3859_s0 + $0xd8] sm:$0xff] }
  0x27   :  { %1773 = vmatpush2.bf16.msra.mxu0 %v2564_v38  ;;  %v2632_v38 = vld [vmem:[%s3858_s1 + $0x220] ss:$8 sps:$4 sm:$0xff]  }
  0x28   :  { %1826 = vmatpush2.bf16.msra.mxu1 %v2565_v39  ;;  %1774 = vmatprep.subr.bf16.mxu0 %v2566_v40  ;;  %v2635_v39 = vld [vmem:[%s3858_s1 + $0x320] ss:$8 sps:$4 sm:$0xff]   ;;  %v2640_v40 = vld [vmem:[%s3858_s1 + $0x214] ss:$8 sps:$4 sm:$0xff]  }
  0x29   :  { %1827 = vmatprep.subr.bf16.mxu1 %v2568_v41  ;;  %v2643_v41 = vld [vmem:[%s3858_s1 + $0x314] ss:$8 sps:$4 sm:$0xff]  }
  0x2b   :  { %1775 = vmatpush2.bf16.msra.mxu0 %v2570_v42  ;;  %v2638_v42 = vld [vmem:[%s3858_s1 + $0x210] ss:$8 sps:$4 sm:$0xff]  }
  0x2c   :  { %1828 = vmatpush2.bf16.msra.mxu1 %v2571_v43  ;;  %1776 = vmatprep.subr.bf16.mxu0 %v2572_v44  ;;  %v2641_v43 = vld [vmem:[%s3858_s1 + $0x310] ss:$8 sps:$4 sm:$0xff]   ;;  %v2646_v44 = vld [vmem:[%s3858_s1 + $0x204] ss:$8 sps:$4 sm:$0xff]  }
  0x2d   :  { %1829 = vmatprep.subr.bf16.mxu1 %v2574_v45  ;;  %v2649_v45 = vld [vmem:[%s3858_s1 + $0x304] ss:$8 sps:$4 sm:$0xff]  }
  0x2f   :  { %1777 = vmatpush2.bf16.msra.mxu0 %v2576_v46  ;;  %v3219_v46 = vld [vmem:[%s3859_s0 + $0x10] sm:$0xff] }
  0x30   :  { %1830 = vmatpush2.bf16.msra.mxu1 %v2577_v47  ;;  %1778 = vmatprep.subr.bf16.mxu0 %v2578_v52  ;;  %v3224_v47 = vld [vmem:[%s3859_s0 + $0x50] sm:$0xff]  ;;  %v2644_v52 = vld [vmem:[%s3858_s1 + $0x200] ss:$8 sps:$4 sm:$0xff]  }
  0x31   :  { %1831 = vmatprep.subr.bf16.mxu1 %v2580_v54  ;;  %v2215_v49 = vcombine.high %v3219_v46, %v3224_v47  ;;  %v2652_v54 = vld [vmem:[%s3858_s1 + $0x2f4] ss:$8 sps:$4 sm:$0xff]   ;;  %v2214_v28 = vcombine.low %v3219_v46, %v3224_v47  ;;  %v3407_v46 = vld [vmem:[%s3859_s0 + $0x28] sm:$0xff] }
  0x32   :  { %v3412_v47 = vld [vmem:[%s3859_s0 + $0x68] sm:$0xff] }
  0x33   :  { %1779 = vmatpush2.bf16.msra.mxu0 %v2582_v56  ;;  %v2650_v56 = vld [vmem:[%s3858_s1 + $0x2f0] ss:$8 sps:$4 sm:$0xff]  }
  0x34   :  { %1832 = vmatpush2.bf16.msra.mxu1 %v2583_v57  ;;  %1780 = vmatprep.subr.bf16.mxu0 %v2584_v58  ;;  %v2653_v57 = vld [vmem:[%s3858_s1 + $0x3f0] ss:$8 sps:$4 sm:$0xff]   ;;  %v2658_v58 = vld [vmem:[%s3858_s1 + $0x2e4] ss:$8 sps:$4 sm:$0xff]  }
  0x35   :  { %1833 = vmatprep.subr.bf16.mxu1 %v2586_v59  ;;  %v2661_v59 = vld [vmem:[%s3858_s1 + $0x3e4] ss:$8 sps:$4 sm:$0xff]  }
  0x37   :  { %1781 = vmatpush2.bf16.msra.mxu0 %v2588_v60  ;;  %v2656_v60 = vld [vmem:[%s3858_s1 + $0x2e0] ss:$8 sps:$4 sm:$0xff]  }
  0x38   :  { %1834 = vmatpush2.bf16.msra.mxu1 %v2589_v61  ;;  %1782 = vmatprep.subr.bf16.mxu0 %v2590_v62  ;;  %v2659_v61 = vld [vmem:[%s3858_s1 + $0x3e0] ss:$8 sps:$4 sm:$0xff]   ;;  %v2664_v62 = vld [vmem:[%s3858_s1 + $0x2d4] ss:$8 sps:$4 sm:$0xff]  }
  0x39   :  { %1835 = vmatprep.subr.bf16.mxu1 %v2592_v63  ;;  %v2667_v63 = vld [vmem:[%s3858_s1 + $0x3d4] ss:$8 sps:$4 sm:$0xff]  }
  0x3b   :  { %1783 = vmatpush2.bf16.msra.mxu0 %v2594_v0  ;;  %v2662_v0 = vld [vmem:[%s3858_s1 + $0x2d0] ss:$8 sps:$4 sm:$0xff]  }
  0x3c   :  { %1836 = vmatpush2.bf16.msra.mxu1 %v2595_v1  ;;  %1784 = vmatprep.subr.bf16.mxu0 %v2596_v2  ;;  %v2665_v1 = vld [vmem:[%s3858_s1 + $0x3d0] ss:$8 sps:$4 sm:$0xff]   ;;  %v2670_v2 = vld [vmem:[%s3858_s1 + $0x2c4] ss:$8 sps:$4 sm:$0xff]  }
  0x3d   :  { %1837 = vmatprep.subr.bf16.mxu1 %v2598_v3  ;;  %v2673_v3 = vld [vmem:[%s3858_s1 + $0x3c4] ss:$8 sps:$4 sm:$0xff]  }
  0x3f   :  { %1785 = vmatpush2.bf16.msra.mxu0 %v2600_v4  ;;  %v2668_v4 = vld [vmem:[%s3858_s1 + $0x2c0] ss:$8 sps:$4 sm:$0xff]  }
  0x40   :  { %1838 = vmatpush2.bf16.msra.mxu1 %v2601_v5  ;;  %1860 = vmatprep.subr.bf16.mxu0 %v2604_v6  ;;  %v2671_v5 = vld [vmem:[%s3858_s1 + $0x3c0] ss:$8 sps:$4 sm:$0xff]   ;;  %v2676_v6 = vld [vmem:[%s3858_s1 + $0x2b4] ss:$8 sps:$4 sm:$0xff]  }
  0x41   :  { %1913 = vmatprep.subr.bf16.mxu1 %v2607_v7  ;;  %v2679_v7 = vld [vmem:[%s3858_s1 + $0x3b4] ss:$8 sps:$4 sm:$0xff]  }
  0x42   :  { %1787 = vmatmul.mubr.bf16.vlgmr.msra.gmra.mxu0 %v2210_v8  ;;  %v2674_v8 = vld [vmem:[%s3858_s1 + $0x2b0] ss:$8 sps:$4 sm:$0xff]  }
  0x43   :  { %1840 = vmatmul.mubr.bf16.vlgmr.msra.gmra.mxu1 %v2212_v9  ;;  %1861 = vmatpush1.bf16.msra.mxu0 %v2602_v10  ;;  %v2677_v9 = vld [vmem:[%s3858_s1 + $0x3b0] ss:$8 sps:$4 sm:$0xff]   ;;  %v2682_v10 = vld [vmem:[%s3858_s1 + $0x2a4] ss:$8 sps:$4 sm:$0xff]  }
  0x44   :  { %1914 = vmatpush1.bf16.msra.mxu1 %v2605_v11  ;;  %1862 = vmatprep.subr.bf16.mxu0 %v2610_v12  ;;  %v2685_v11 = vld [vmem:[%s3858_s1 + $0x3a4] ss:$8 sps:$4 sm:$0xff]   ;;  %v2680_v12 = vld [vmem:[%s3858_s1 + $0x2a0] ss:$8 sps:$4 sm:$0xff]  }
  0x45   :  { %1915 = vmatprep.subr.bf16.mxu1 %v2613_v13  ;;  %1796 = vmatprep.mubr.bf16.mxu0 %v2227_v33  ;;  %v2683_v13 = vld [vmem:[%s3858_s1 + $0x3a0] ss:$8 sps:$4 sm:$0xff]   ;;  %v2709_v33 = vld [vmem:[%s3858_s1 + $0x564] ss:$8 sps:$4 sm:$0xff]  }
  0x46   :  { %1849 = vmatprep.mubr.bf16.mxu1 %v2229_v35  ;;  %v2233_v35 = vcombine.high %v33_v30, %v41_v31 }
  0x47   :  { %1863 = vmatpush1.bf16.msra.mxu0 %v2608_v14  ;;  %v2688_v14 = vld [vmem:[%s3858_s1 + $0x294] ss:$8 sps:$4 sm:$0xff]  }
  0x48   :  { %1916 = vmatpush1.bf16.msra.mxu1 %v2611_v15  ;;  %1864 = vmatprep.subr.bf16.mxu0 %v2616_v16  ;;  %v2691_v15 = vld [vmem:[%s3858_s1 + $0x394] ss:$8 sps:$4 sm:$0xff]   ;;  %v2686_v16 = vld [vmem:[%s3858_s1 + $0x290] ss:$8 sps:$4 sm:$0xff]  }
  0x49   :  { %1917 = vmatprep.subr.bf16.mxu1 %v2619_v17  ;;  %v2689_v17 = vld [vmem:[%s3858_s1 + $0x390] ss:$8 sps:$4 sm:$0xff]  }
  0x4a   :  { %1797 = vmatmul.mubr.bf16.gmra.mxu0 %v2226_v34 }
  0x4b   :  { %1865 = vmatpush1.bf16.msra.mxu0 %v2614_v18  ;;  %1850 = vmatmul.mubr.bf16.gmra.mxu1 %v2228_v37  ;;  %v2694_v18 = vld [vmem:[%s3858_s1 + $0x284] ss:$8 sps:$4 sm:$0xff]   ;;  %v2707_v37 = vld [vmem:[%s3858_s1 + $0x560] ss:$8 sps:$4 sm:$0xff]  }
  0x4c   :  { %1918 = vmatpush1.bf16.msra.mxu1 %v2617_v19  ;;  %1866 = vmatprep.subr.bf16.mxu0 %v2622_v20  ;;  %v2697_v19 = vld [vmem:[%s3858_s1 + $0x384] ss:$8 sps:$4 sm:$0xff]   ;;  %v2692_v20 = vld [vmem:[%s3858_s1 + $0x280] ss:$8 sps:$4 sm:$0xff]  }
  0x4d   :  { %1919 = vmatprep.subr.bf16.mxu1 %v2625_v21  ;;  %1892 = vmatprep.mubr.bf16.mxu0 %v2215_v49  ;;  %v2695_v21 = vld [vmem:[%s3858_s1 + $0x380] ss:$8 sps:$4 sm:$0xff]   ;;  %v2721_v49 = vld [vmem:[%s3858_s1 + $0x544] ss:$8 sps:$4 sm:$0xff]  }
  0x4e   :  { %1945 = vmatprep.mubr.bf16.mxu1 %v2217_v51  ;;  %v2221_v51 = vcombine.high %v3407_v46, %v3412_v47 }
  0x4f   :  { %1867 = vmatpush1.bf16.msra.mxu0 %v2620_v22  ;;  %v2700_v22 = vld [vmem:[%s3858_s1 + $0x474] ss:$8 sps:$4 sm:$0xff]  }
  0x50   :  { %1920 = vmatpush1.bf16.msra.mxu1 %v2623_v23  ;;  %1868 = vmatprep.subr.bf16.mxu0 %v2628_v24  ;;  %v2703_v23 = vld [vmem:[%s3858_s1 + $0x574] ss:$8 sps:$4 sm:$0xff]   ;;  %v2698_v24 = vld [vmem:[%s3858_s1 + $0x470] ss:$8 sps:$4 sm:$0xff]  }
  0x51   :  { %1921 = vmatprep.subr.bf16.mxu1 %v2631_v25  ;;  %v2701_v25 = vld [vmem:[%s3858_s1 + $0x570] ss:$8 sps:$4 sm:$0xff]  }
  0x53   :  { %1869 = vmatpush1.bf16.msra.mxu0 %v2626_v26  ;;  %v32_v26 = vld [vmem:[%s3859_s0 + $0x90] sm:$0xff] }
  0x54   :  { %1922 = vmatpush1.bf16.msra.mxu1 %v2629_v27  ;;  %1870 = vmatprep.subr.bf16.mxu0 %v2634_v32  ;;  %v40_v27 = vld [vmem:[%s3859_s0 + $0xd0] sm:$0xff]  ;;  %v2706_v32 = vld [vmem:[%s3858_s1 + $0x464] ss:$8 sps:$4 sm:$0xff]  }
  0x55   :  { %1923 = vmatprep.subr.bf16.mxu1 %v2637_v36  ;;  %v2231_v34 = vcombine.high %v32_v26, %v40_v27  ;;  %v2704_v36 = vld [vmem:[%s3858_s1 + $0x460] ss:$8 sps:$4 sm:$0xff]  }
  0x57   :  { %1871 = vmatpush1.bf16.msra.mxu0 %v2632_v38  ;;  %v2712_v38 = vld [vmem:[%s3858_s1 + $0x454] ss:$8 sps:$4 sm:$0xff]  }
  0x58   :  { %1924 = vmatpush1.bf16.msra.mxu1 %v2635_v39  ;;  %1872 = vmatprep.subr.bf16.mxu0 %v2640_v40  ;;  %v2715_v39 = vld [vmem:[%s3858_s1 + $0x554] ss:$8 sps:$4 sm:$0xff]   ;;  %v2710_v40 = vld [vmem:[%s3858_s1 + $0x450] ss:$8 sps:$4 sm:$0xff]  }
  0x59   :  { %1925 = vmatprep.subr.bf16.mxu1 %v2643_v41  ;;  %v2713_v41 = vld [vmem:[%s3858_s1 + $0x550] ss:$8 sps:$4 sm:$0xff]  }
  0x5b   :  { %1873 = vmatpush1.bf16.msra.mxu0 %v2638_v42  ;;  %v3397_v42 = vld [vmem:[%s3859_s0 + $0x20] sm:$0xff] }
  0x5c   :  { %1926 = vmatpush1.bf16.msra.mxu1 %v2641_v43  ;;  %1874 = vmatprep.subr.bf16.mxu0 %v2646_v44  ;;  %v3402_v43 = vld [vmem:[%s3859_s0 + $0x60] sm:$0xff]  ;;  %v2230_v44 = vcombine.low %v32_v26, %v40_v27 }
  0x5d   :  { %1927 = vmatprep.subr.bf16.mxu1 %v2649_v45  ;;  %v2232_v45 = vcombine.low %v33_v30, %v41_v31  ;;  %v2219_v50 = vcombine.high %v3397_v42, %v3402_v43  ;;  %v2778_v26 = vld [vmem:[%s3858_s1 + $0x4a4] ss:$8 sps:$4 sm:$0xff]   ;;  %v2784_v30 = vld [vmem:[%s3858_s1 + $0x494] ss:$8 sps:$4 sm:$0xff]  }
  0x5e   :  { %v2781_v27 = vld [vmem:[%s3858_s1 + $0x5a4] ss:$8 sps:$4 sm:$0xff]   ;;  %v2787_v31 = vld [vmem:[%s3858_s1 + $0x594] ss:$8 sps:$4 sm:$0xff]  }
  0x5f   :  { %1875 = vmatpush1.bf16.msra.mxu0 %v2644_v52  ;;  %v2716_v52 = vld [vmem:[%s3858_s1 + $0x440] ss:$8 sps:$4 sm:$0xff]  }
  0x60   :  { %1928 = vmatpush1.bf16.msra.mxu1 %v2647_v53  ;;  %1876 = vmatprep.subr.bf16.mxu0 %v2652_v54  ;;  %v2719_v53 = vld [vmem:[%s3858_s1 + $0x540] ss:$8 sps:$4 sm:$0xff]   ;;  %v2724_v54 = vld [vmem:[%s3858_s1 + $0x434] ss:$8 sps:$4 sm:$0xff]  }
  0x61   :  { %1929 = vmatprep.subr.bf16.mxu1 %v2655_v55  ;;  %v2727_v55 = vld [vmem:[%s3858_s1 + $0x534] ss:$8 sps:$4 sm:$0xff]  }
  0x63   :  { %1877 = vmatpush2.bf16.msra.mxu0 %v2650_v56  ;;  %v2722_v56 = vld [vmem:[%s3858_s1 + $0x430] ss:$8 sps:$4 sm:$0xff]  }
  0x64   :  { %1930 = vmatpush2.bf16.msra.mxu1 %v2653_v57  ;;  %1878 = vmatprep.subr.bf16.mxu0 %v2658_v58  ;;  %v2725_v57 = vld [vmem:[%s3858_s1 + $0x530] ss:$8 sps:$4 sm:$0xff]   ;;  %v2730_v58 = vld [vmem:[%s3858_s1 + $0x424] ss:$8 sps:$4 sm:$0xff]  }
  0x65   :  { %1931 = vmatprep.subr.bf16.mxu1 %v2661_v59  ;;  %v2733_v59 = vld [vmem:[%s3858_s1 + $0x524] ss:$8 sps:$4 sm:$0xff]  }
  0x67   :  { %1879 = vmatpush2.bf16.msra.mxu0 %v2656_v60  ;;  %v2728_v60 = vld [vmem:[%s3858_s1 + $0x420] ss:$8 sps:$4 sm:$0xff]  }
  0x68   :  { %1932 = vmatpush2.bf16.msra.mxu1 %v2659_v61  ;;  %1880 = vmatprep.subr.bf16.mxu0 %v2664_v62  ;;  %v2731_v61 = vld [vmem:[%s3858_s1 + $0x520] ss:$8 sps:$4 sm:$0xff]   ;;  %v2736_v62 = vld [vmem:[%s3858_s1 + $0x414] ss:$8 sps:$4 sm:$0xff]  }
  0x69   :  { %1933 = vmatprep.subr.bf16.mxu1 %v2667_v63  ;;  %v2739_v63 = vld [vmem:[%s3858_s1 + $0x514] ss:$8 sps:$4 sm:$0xff]  }
  0x6b   :  { %1881 = vmatpush2.bf16.msra.mxu0 %v2662_v0  ;;  %v2734_v0 = vld [vmem:[%s3858_s1 + $0x410] ss:$8 sps:$4 sm:$0xff]  }
  0x6c   :  { %1934 = vmatpush2.bf16.msra.mxu1 %v2665_v1  ;;  %1882 = vmatprep.subr.bf16.mxu0 %v2670_v2  ;;  %v2737_v1 = vld [vmem:[%s3858_s1 + $0x510] ss:$8 sps:$4 sm:$0xff]   ;;  %v2742_v2 = vld [vmem:[%s3858_s1 + $0x404] ss:$8 sps:$4 sm:$0xff]  }
  0x6d   :  { %1935 = vmatprep.subr.bf16.mxu1 %v2673_v3  ;;  %v2745_v3 = vld [vmem:[%s3858_s1 + $0x504] ss:$8 sps:$4 sm:$0xff]  }
  0x6f   :  { %1883 = vmatpush2.bf16.msra.mxu0 %v2668_v4  ;;  %v2740_v4 = vld [vmem:[%s3858_s1 + $0x400] ss:$8 sps:$4 sm:$0xff]  }
  0x70   :  { %1936 = vmatpush2.bf16.msra.mxu1 %v2671_v5  ;;  %1884 = vmatprep.subr.bf16.mxu0 %v2676_v6  ;;  %v2743_v5 = vld [vmem:[%s3858_s1 + $0x500] ss:$8 sps:$4 sm:$0xff]   ;;  %v2748_v6 = vld [vmem:[%s3858_s1 + $0x4f4] ss:$8 sps:$4 sm:$0xff]  }
  0x71   :  { %1937 = vmatprep.subr.bf16.mxu1 %v2679_v7  ;;  %v2751_v7 = vld [vmem:[%s3858_s1 + $0x5f4] ss:$8 sps:$4 sm:$0xff]  }
  0x73   :  { %1885 = vmatpush2.bf16.msra.mxu0 %v2674_v8  ;;  %v2746_v8 = vld [vmem:[%s3858_s1 + $0x4f0] ss:$8 sps:$4 sm:$0xff]  }
  0x74   :  { %1938 = vmatpush2.bf16.msra.mxu1 %v2677_v9  ;;  %1886 = vmatprep.subr.bf16.mxu0 %v2682_v10  ;;  %v2749_v9 = vld [vmem:[%s3858_s1 + $0x5f0] ss:$8 sps:$4 sm:$0xff]   ;;  %v2754_v10 = vld [vmem:[%s3858_s1 + $0x4e4] ss:$8 sps:$4 sm:$0xff]  }
  0x75   :  { %1939 = vmatprep.subr.bf16.mxu1 %v2685_v11  ;;  %v2757_v11 = vld [vmem:[%s3858_s1 + $0x5e4] ss:$8 sps:$4 sm:$0xff]  }
  0x77   :  { %1887 = vmatpush2.bf16.msra.mxu0 %v2680_v12  ;;  %v2752_v12 = vld [vmem:[%s3858_s1 + $0x4e0] ss:$8 sps:$4 sm:$0xff]  }
  0x78   :  { %1940 = vmatpush2.bf16.msra.mxu1 %v2683_v13  ;;  %1888 = vmatprep.subr.bf16.mxu0 %v2688_v14  ;;  %v2755_v13 = vld [vmem:[%s3858_s1 + $0x5e0] ss:$8 sps:$4 sm:$0xff]   ;;  %v2760_v14 = vld [vmem:[%s3858_s1 + $0x4d4] ss:$8 sps:$4 sm:$0xff]  }
  0x79   :  { %1941 = vmatprep.subr.bf16.mxu1 %v2691_v15  ;;  %v2763_v15 = vld [vmem:[%s3858_s1 + $0x5d4] ss:$8 sps:$4 sm:$0xff]  }
  0x7b   :  { %1889 = vmatpush2.bf16.msra.mxu0 %v2686_v16  ;;  %v2758_v16 = vld [vmem:[%s3858_s1 + $0x4d0] ss:$8 sps:$4 sm:$0xff]  }
  0x7c   :  { %1942 = vmatpush2.bf16.msra.mxu1 %v2689_v17  ;;  %1890 = vmatprep.subr.bf16.mxu0 %v2694_v18  ;;  %v2761_v17 = vld [vmem:[%s3858_s1 + $0x5d0] ss:$8 sps:$4 sm:$0xff]   ;;  %v2766_v18 = vld [vmem:[%s3858_s1 + $0x4c4] ss:$8 sps:$4 sm:$0xff]  }
  0x7d   :  { %1943 = vmatprep.subr.bf16.mxu1 %v2697_v19  ;;  %v2769_v19 = vld [vmem:[%s3858_s1 + $0x5c4] ss:$8 sps:$4 sm:$0xff]  }
  0x7f   :  { %1891 = vmatpush2.bf16.msra.mxu0 %v2692_v20  ;;  %v2764_v20 = vld [vmem:[%s3858_s1 + $0x4c0] ss:$8 sps:$4 sm:$0xff]  }
  0x80   :  { %1944 = vmatpush2.bf16.msra.mxu1 %v2695_v21  ;;  %1966 = vmatprep.subr.bf16.mxu0 %v2700_v22  ;;  %v2767_v21 = vld [vmem:[%s3858_s1 + $0x5c0] ss:$8 sps:$4 sm:$0xff]   ;;  %v2772_v22 = vld [vmem:[%s3858_s1 + $0x4b4] ss:$8 sps:$4 sm:$0xff]  }
  0x81   :  { %2019 = vmatprep.subr.bf16.mxu1 %v2703_v23  ;;  %v2775_v23 = vld [vmem:[%s3858_s1 + $0x5b4] ss:$8 sps:$4 sm:$0xff]  }
  0x82   :  { %1893 = vmatmul.mubr.bf16.vlgmr.msra.gmra.mxu0 %v2214_v28  ;;  %v2776_v28 = vld [vmem:[%s3858_s1 + $0x4a0] ss:$8 sps:$4 sm:$0xff]  }
  0x83   :  { %1946 = vmatmul.mubr.bf16.vlgmr.msra.gmra.mxu1 %v2216_v29  ;;  %1967 = vmatpush1.bf16.msra.mxu0 %v2698_v24  ;;  %v2770_v24 = vld [vmem:[%s3858_s1 + $0x4b0] ss:$8 sps:$4 sm:$0xff]   ;;  %v2779_v29 = vld [vmem:[%s3858_s1 + $0x5a0] ss:$8 sps:$4 sm:$0xff]  }
  0x84   :  { %2020 = vmatpush1.bf16.msra.mxu1 %v2701_v25  ;;  %1968 = vmatprep.subr.bf16.mxu0 %v2706_v32  ;;  %v2773_v25 = vld [vmem:[%s3858_s1 + $0x5b0] ss:$8 sps:$4 sm:$0xff]  }
  0x85   :  { %2021 = vmatprep.subr.bf16.mxu1 %v2709_v33  ;;  %1902 = vmatprep.mubr.bf16.mxu0 %v2231_v34  ;;  %v2782_v32 = vld [vmem:[%s3858_s1 + $0x490] ss:$8 sps:$4 sm:$0xff]   ;;  %v2790_v34 = vld [vmem:[%s3858_s1 + $0x484] ss:$8 sps:$4 sm:$0xff]  }
  0x86   :  { %1955 = vmatprep.mubr.bf16.mxu1 %v2233_v35  ;;  %v2785_v33 = vld [vmem:[%s3858_s1 + $0x590] ss:$8 sps:$4 sm:$0xff]   ;;  %v2793_v35 = vld [vmem:[%s3858_s1 + $0x584] ss:$8 sps:$4 sm:$0xff]  }
  0x87   :  { %1969 = vmatpush1.bf16.msra.mxu0 %v2704_v36  ;;  %v2788_v36 = vld [vmem:[%s3858_s1 + $0x480] ss:$8 sps:$4 sm:$0xff]  }
  0x88   :  { %2022 = vmatpush1.bf16.msra.mxu1 %v2707_v37  ;;  %1970 = vmatprep.subr.bf16.mxu0 %v2712_v38  ;;  %v2791_v37 = vld [vmem:[%s3858_s1 + $0x580] ss:$8 sps:$4 sm:$0xff]   ;;  %v2796_v38 = vld [vmem:[%s3858_s1 + $0x674] ss:$8 sps:$4 sm:$0xff]  }
  0x89   :  { %2023 = vmatprep.subr.bf16.mxu1 %v2715_v39  ;;  %v2799_v39 = vld [vmem:[%s3858_s1 + $0x774] ss:$8 sps:$4 sm:$0xff]  }
  0x8a   :  { %1903 = vmatmul.mubr.bf16.gmra.mxu0 %v2230_v44  ;;  %v2220_v44 = vcombine.low %v3407_v46, %v3412_v47  ;;  %v2802_v46 = vld [vmem:[%s3858_s1 + $0x664] ss:$8 sps:$4 sm:$0xff]  }
  0x8b   :  { %1956 = vmatmul.mubr.bf16.gmra.mxu1 %v2232_v45  ;;  %1971 = vmatpush1.bf16.msra.mxu0 %v2710_v40  ;;  %v34_v40 = vld [vmem:[%s3859_s0 + $0xa0] sm:$0xff] }
  0x8c   :  { %2024 = vmatpush1.bf16.msra.mxu1 %v2713_v41  ;;  %1972 = vmatprep.subr.bf16.mxu0 %v2718_v48  ;;  %v2218_v41 = vcombine.low %v3397_v42, %v3402_v43  ;;  %v42_v45 = vld [vmem:[%s3859_s0 + $0xe0] sm:$0xff]  ;;  %v35_v48 = vld [vmem:[%s3859_s0 + $0xa8] sm:$0xff]  ;;  %v2794_v42 = vld [vmem:[%s3858_s1 + $0x670] ss:$8 sps:$4 sm:$0xff]  }
  0x8d   :  { %2025 = vmatprep.subr.bf16.mxu1 %v2721_v49  ;;  %1998 = vmatprep.mubr.bf16.mxu0 %v2219_v50  ;;  %v43_v49 = vld [vmem:[%s3859_s0 + $0xe8] sm:$0xff]  ;;  %v2797_v43 = vld [vmem:[%s3858_s1 + $0x770] ss:$8 sps:$4 sm:$0xff]   ;;  %v2235_v50 = vcombine.high %v34_v40, %v42_v45 }
  0x8e   :  { %2051 = vmatprep.mubr.bf16.mxu1 %v2221_v51  ;;  %v2805_v47 = vld [vmem:[%s3858_s1 + $0x764] ss:$8 sps:$4 sm:$0xff]   ;;  %v2237_v51 = vcombine.high %v35_v48, %v43_v49 }
  0x8f   :  { %1973 = vmatpush1.bf16.msra.mxu0 %v2716_v52  ;;  %v2800_v52 = vld [vmem:[%s3858_s1 + $0x660] ss:$8 sps:$4 sm:$0xff]  }
  0x90   :  { %2026 = vmatpush1.bf16.msra.mxu1 %v2719_v53  ;;  %1974 = vmatprep.subr.bf16.mxu0 %v2724_v54  ;;  %v2803_v53 = vld [vmem:[%s3858_s1 + $0x760] ss:$8 sps:$4 sm:$0xff]   ;;  %v2808_v54 = vld [vmem:[%s3858_s1 + $0x654] ss:$8 sps:$4 sm:$0xff]  }
  0x91   :  { %2027 = vmatprep.subr.bf16.mxu1 %v2727_v55  ;;  %v2811_v55 = vld [vmem:[%s3858_s1 + $0x754] ss:$8 sps:$4 sm:$0xff]  }
  0x93   :  { %1975 = vmatpush1.bf16.msra.mxu0 %v2722_v56  ;;  %v3623_v56 = vld [vmem:[%s3859_s0 + $0x30] sm:$0xff] }
  0x94   :  { %2028 = vmatpush1.bf16.msra.mxu1 %v2725_v57  ;;  %1976 = vmatprep.subr.bf16.mxu0 %v2730_v58  ;;  %v2234_v57 = vcombine.low %v34_v40, %v42_v45  ;;  %v2236_v58 = vcombine.low %v35_v48, %v43_v49  ;;  %v2866_v40 = vld [vmem:[%s3858_s1 + $0x6b0] ss:$8 sps:$4 sm:$0xff]   ;;  %v2877_v45 = vld [vmem:[%s3858_s1 + $0x7a4] ss:$8 sps:$4 sm:$0xff]   ;;  %v2872_v48 = vld [vmem:[%s3858_s1 + $0x6a0] ss:$8 sps:$4 sm:$0xff]  }
  0x95   :  { %2029 = vmatprep.subr.bf16.mxu1 %v2733_v59  ;;  %v3628_v59 = vld [vmem:[%s3859_s0 + $0x70] sm:$0xff]  ;;  %v2875_v49 = vld [vmem:[%s3858_s1 + $0x7a0] ss:$8 sps:$4 sm:$0xff]  }
  0x97   :  { %1977 = vmatpush1.bf16.msra.mxu0 %v2728_v60  ;;  %v3633_v60 = vld [vmem:[%s3859_s0 + $0x38] sm:$0xff] }
  0x98   :  { %2030 = vmatpush1.bf16.msra.mxu1 %v2731_v61  ;;  %1978 = vmatprep.subr.bf16.mxu0 %v2736_v62  ;;  %v3638_v61 = vld [vmem:[%s3859_s0 + $0x78] sm:$0xff] }
  0x99   :  { %2031 = vmatprep.subr.bf16.mxu1 %v2739_v63  ;;  %v2806_v62 = vld [vmem:[%s3858_s1 + $0x650] ss:$8 sps:$4 sm:$0xff]  }
  0x9a   :  { %v2809_v63 = vld [vmem:[%s3858_s1 + $0x750] ss:$8 sps:$4 sm:$0xff]  }
  0x9b   :  { %1979 = vmatpush1.bf16.msra.mxu0 %v2734_v0  ;;  %v2814_v0 = vld [vmem:[%s3858_s1 + $0x644] ss:$8 sps:$4 sm:$0xff]  }
  0x9c   :  { %2032 = vmatpush1.bf16.msra.mxu1 %v2737_v1  ;;  %1980 = vmatprep.subr.bf16.mxu0 %v2742_v2  ;;  %v2817_v1 = vld [vmem:[%s3858_s1 + $0x744] ss:$8 sps:$4 sm:$0xff]   ;;  %v2223_v2 = vcombine.high %v3623_v56, %v3628_v59 }
  0x9d   :  { %2033 = vmatprep.subr.bf16.mxu1 %v2745_v3  ;;  %v2225_v3 = vcombine.high %v3633_v60, %v3638_v61 }
  0x9f   :  { %1981 = vmatpush1.bf16.msra.mxu0 %v2740_v4  ;;  %v2812_v4 = vld [vmem:[%s3858_s1 + $0x640] ss:$8 sps:$4 sm:$0xff]  }
  0xa0   :  { %2034 = vmatpush1.bf16.msra.mxu1 %v2743_v5  ;;  %1982 = vmatprep.subr.bf16.mxu0 %v2748_v6  ;;  %v2815_v5 = vld [vmem:[%s3858_s1 + $0x740] ss:$8 sps:$4 sm:$0xff]   ;;  %v2820_v6 = vld [vmem:[%s3858_s1 + $0x634] ss:$8 sps:$4 sm:$0xff]  }
  0xa1   :  { %2035 = vmatprep.subr.bf16.mxu1 %v2751_v7  ;;  %v2823_v7 = vld [vmem:[%s3858_s1 + $0x734] ss:$8 sps:$4 sm:$0xff]  }
  0xa3   :  { %1983 = vmatpush2.bf16.msra.mxu0 %v2746_v8  ;;  %v2818_v8 = vld [vmem:[%s3858_s1 + $0x630] ss:$8 sps:$4 sm:$0xff]  }
  0xa4   :  { %2036 = vmatpush2.bf16.msra.mxu1 %v2749_v9  ;;  %1984 = vmatprep.subr.bf16.mxu0 %v2754_v10  ;;  %v2821_v9 = vld [vmem:[%s3858_s1 + $0x730] ss:$8 sps:$4 sm:$0xff]   ;;  %v2826_v10 = vld [vmem:[%s3858_s1 + $0x624] ss:$8 sps:$4 sm:$0xff]  }
  0xa5   :  { %2037 = vmatprep.subr.bf16.mxu1 %v2757_v11  ;;  %v2829_v11 = vld [vmem:[%s3858_s1 + $0x724] ss:$8 sps:$4 sm:$0xff]  }
  0xa7   :  { %1985 = vmatpush2.bf16.msra.mxu0 %v2752_v12  ;;  %v2824_v12 = vld [vmem:[%s3858_s1 + $0x620] ss:$8 sps:$4 sm:$0xff]  }
  0xa8   :  { %2038 = vmatpush2.bf16.msra.mxu1 %v2755_v13  ;;  %1986 = vmatprep.subr.bf16.mxu0 %v2760_v14  ;;  %v2827_v13 = vld [vmem:[%s3858_s1 + $0x720] ss:$8 sps:$4 sm:$0xff]   ;;  %v2832_v14 = vld [vmem:[%s3858_s1 + $0x614] ss:$8 sps:$4 sm:$0xff]  }
  0xa9   :  { %2039 = vmatprep.subr.bf16.mxu1 %v2763_v15  ;;  %v2835_v15 = vld [vmem:[%s3858_s1 + $0x714] ss:$8 sps:$4 sm:$0xff]  }
  0xab   :  { %1987 = vmatpush2.bf16.msra.mxu0 %v2758_v16  ;;  %v2830_v16 = vld [vmem:[%s3858_s1 + $0x610] ss:$8 sps:$4 sm:$0xff]  }
  0xac   :  { %2040 = vmatpush2.bf16.msra.mxu1 %v2761_v17  ;;  %1988 = vmatprep.subr.bf16.mxu0 %v2766_v18  ;;  %v2833_v17 = vld [vmem:[%s3858_s1 + $0x710] ss:$8 sps:$4 sm:$0xff]   ;;  %v2838_v18 = vld [vmem:[%s3858_s1 + $0x604] ss:$8 sps:$4 sm:$0xff]  }
  0xad   :  { %2041 = vmatprep.subr.bf16.mxu1 %v2769_v19  ;;  %v2841_v19 = vld [vmem:[%s3858_s1 + $0x704] ss:$8 sps:$4 sm:$0xff]  }
  0xaf   :  { %1989 = vmatpush2.bf16.msra.mxu0 %v2764_v20  ;;  %v2836_v20 = vld [vmem:[%s3858_s1 + $0x600] ss:$8 sps:$4 sm:$0xff]  }
  0xb0   :  { %2042 = vmatpush2.bf16.msra.mxu1 %v2767_v21  ;;  %1990 = vmatprep.subr.bf16.mxu0 %v2772_v22  ;;  %v2839_v21 = vld [vmem:[%s3858_s1 + $0x700] ss:$8 sps:$4 sm:$0xff]   ;;  %v2844_v22 = vld [vmem:[%s3858_s1 + $0x6f4] ss:$8 sps:$4 sm:$0xff]  }
  0xb1   :  { %2043 = vmatprep.subr.bf16.mxu1 %v2775_v23  ;;  %v2847_v23 = vld [vmem:[%s3858_s1 + $0x7f4] ss:$8 sps:$4 sm:$0xff]  }
  0xb3   :  { %1991 = vmatpush2.bf16.msra.mxu0 %v2770_v24  ;;  %v2842_v24 = vld [vmem:[%s3858_s1 + $0x6f0] ss:$8 sps:$4 sm:$0xff]  }
  0xb4   :  { %2044 = vmatpush2.bf16.msra.mxu1 %v2773_v25  ;;  %1992 = vmatprep.subr.bf16.mxu0 %v2778_v26  ;;  %v2845_v25 = vld [vmem:[%s3858_s1 + $0x7f0] ss:$8 sps:$4 sm:$0xff]   ;;  %v2850_v26 = vld [vmem:[%s3858_s1 + $0x6e4] ss:$8 sps:$4 sm:$0xff]  }
  0xb5   :  { %2045 = vmatprep.subr.bf16.mxu1 %v2781_v27  ;;  %v2853_v27 = vld [vmem:[%s3858_s1 + $0x7e4] ss:$8 sps:$4 sm:$0xff]  }
  0xb7   :  { %1993 = vmatpush2.bf16.msra.mxu0 %v2776_v28  ;;  %v2848_v28 = vld [vmem:[%s3858_s1 + $0x6e0] ss:$8 sps:$4 sm:$0xff]  }
  0xb8   :  { %2046 = vmatpush2.bf16.msra.mxu1 %v2779_v29  ;;  %1994 = vmatprep.subr.bf16.mxu0 %v2784_v30  ;;  %v2851_v29 = vld [vmem:[%s3858_s1 + $0x7e0] ss:$8 sps:$4 sm:$0xff]   ;;  %v2856_v30 = vld [vmem:[%s3858_s1 + $0x6d4] ss:$8 sps:$4 sm:$0xff]  }
  0xb9   :  { %2047 = vmatprep.subr.bf16.mxu1 %v2787_v31  ;;  %v2859_v31 = vld [vmem:[%s3858_s1 + $0x7d4] ss:$8 sps:$4 sm:$0xff]  }
  0xbb   :  { %1995 = vmatpush2.bf16.msra.mxu0 %v2782_v32  ;;  %v2854_v32 = vld [vmem:[%s3858_s1 + $0x6d0] ss:$8 sps:$4 sm:$0xff]  }
  0xbc   :  { %2048 = vmatpush2.bf16.msra.mxu1 %v2785_v33  ;;  %1996 = vmatprep.subr.bf16.mxu0 %v2790_v34  ;;  %v2857_v33 = vld [vmem:[%s3858_s1 + $0x7d0] ss:$8 sps:$4 sm:$0xff]   ;;  %v2862_v34 = vld [vmem:[%s3858_s1 + $0x6c4] ss:$8 sps:$4 sm:$0xff]  }
  0xbd   :  { %2049 = vmatprep.subr.bf16.mxu1 %v2793_v35  ;;  %v2865_v35 = vld [vmem:[%s3858_s1 + $0x7c4] ss:$8 sps:$4 sm:$0xff]  }
  0xbf   :  { %1997 = vmatpush2.bf16.msra.mxu0 %v2788_v36  ;;  %v2860_v36 = vld [vmem:[%s3858_s1 + $0x6c0] ss:$8 sps:$4 sm:$0xff]  }
  0xc0   :  { %2050 = vmatpush2.bf16.msra.mxu1 %v2791_v37  ;;  %2072 = vmatprep.subr.bf16.mxu0 %v2796_v38  ;;  %v2863_v37 = vld [vmem:[%s3858_s1 + $0x7c0] ss:$8 sps:$4 sm:$0xff]   ;;  %v2868_v38 = vld [vmem:[%s3858_s1 + $0x6b4] ss:$8 sps:$4 sm:$0xff]  }
  0xc1   :  { %2125 = vmatprep.subr.bf16.mxu1 %v2799_v39  ;;  %v2871_v39 = vld [vmem:[%s3858_s1 + $0x7b4] ss:$8 sps:$4 sm:$0xff]  }
  0xc2   :  { %1999 = vmatmul.mubr.bf16.vlgmr.msra.gmra.mxu0 %v2218_v41  ;;  %v2869_v41 = vld [vmem:[%s3858_s1 + $0x7b0] ss:$8 sps:$4 sm:$0xff]  }
  0xc3   :  { %2052 = vmatmul.mubr.bf16.vlgmr.msra.gmra.mxu1 %v2220_v44  ;;  %2073 = vmatpush1.bf16.msra.mxu0 %v2794_v42  ;;  %v2874_v44 = vld [vmem:[%s3858_s1 + $0x6a4] ss:$8 sps:$4 sm:$0xff]   ;;  %v2880_v42 = vld [vmem:[%s3858_s1 + $0x694] ss:$8 sps:$4 sm:$0xff]  }
  0xc4   :  { %2126 = vmatpush1.bf16.msra.mxu1 %v2797_v43  ;;  %2074 = vmatprep.subr.bf16.mxu0 %v2802_v46  ;;  %v2883_v43 = vld [vmem:[%s3858_s1 + $0x794] ss:$8 sps:$4 sm:$0xff]   ;;  %v2878_v46 = vld [vmem:[%s3858_s1 + $0x690] ss:$8 sps:$4 sm:$0xff]  }
  0xc5   :  { %2127 = vmatprep.subr.bf16.mxu1 %v2805_v47  ;;  %2008 = vmatprep.mubr.bf16.mxu0 %v2235_v50  ;;  %v2881_v47 = vld [vmem:[%s3858_s1 + $0x790] ss:$8 sps:$4 sm:$0xff]   ;;  %v2886_v50 = vld [vmem:[%s3858_s1 + $0x684] ss:$8 sps:$4 sm:$0xff]  }
  0xc6   :  { %2061 = vmatprep.mubr.bf16.mxu1 %v2237_v51  ;;  %v2889_v51 = vld [vmem:[%s3858_s1 + $0x784] ss:$8 sps:$4 sm:$0xff]  }
  0xc7   :  { %2075 = vmatpush1.bf16.msra.mxu0 %v2800_v52  ;;  %v2884_v52 = vld [vmem:[%s3858_s1 + $0x680] ss:$8 sps:$4 sm:$0xff]  }
  0xc8   :  { %2128 = vmatpush1.bf16.msra.mxu1 %v2803_v53  ;;  %2076 = vmatprep.subr.bf16.mxu0 %v2808_v54  ;;  %v2887_v53 = vld [vmem:[%s3858_s1 + $0x780] ss:$8 sps:$4 sm:$0xff]   ;;  %v36_v54 = vld [vmem:[%s3859_s0 + $0xb0] sm:$0xff] }
  0xc9   :  { %2129 = vmatprep.subr.bf16.mxu1 %v2811_v55  ;;  %v44_v55 = vld [vmem:[%s3859_s0 + $0xf0] sm:$0xff] }
  0xca   :  { %2009 = vmatmul.mubr.bf16.gmra.mxu0 %v2234_v57  ;;  %v37_v57 = vld [vmem:[%s3859_s0 + $0xb8] sm:$0xff] }
  0xcb   :  { %2062 = vmatmul.mubr.bf16.gmra.mxu1 %v2236_v58  ;;  %2077 = vmatpush1.bf16.msra.mxu0 %v2806_v62  ;;  %v45_v58 = vld [vmem:[%s3859_s0 + $0xf8] sm:$0xff]  ;;  %v2222_v62 = vcombine.low %v3623_v56, %v3628_v59 }
  0xcc   :  { %2130 = vmatpush1.bf16.msra.mxu1 %v2809_v63  ;;  %2078 = vmatprep.subr.bf16.mxu0 %v2814_v0  ;;  %v2224_v63 = vcombine.low %v3633_v60, %v3638_v61  ;;  %v2239_v0 = vcombine.high %v36_v54, %v44_v55 }
  0xcd   :  { %2131 = vmatprep.subr.bf16.mxu1 %v2817_v1  ;;  %2104 = vmatprep.mubr.bf16.mxu0 %v2223_v2  ;;  %v2241_v1 = vcombine.high %v37_v57, %v45_v58  ;;  %v2238_v2 = vcombine.low %v36_v54, %v44_v55 }
  0xce   :  { %2157 = vmatprep.mubr.bf16.mxu1 %v2225_v3  ;;  %v2240_v3 = vcombine.low %v37_v57, %v45_v58 }
  0xcf   :  { %2079 = vmatpush1.bf16.msra.mxu0 %v2812_v4 }
  0xd0   :  { %2132 = vmatpush1.bf16.msra.mxu1 %v2815_v5  ;;  %2080 = vmatprep.subr.bf16.mxu0 %v2820_v6 }
  0xd1   :  { %2133 = vmatprep.subr.bf16.mxu1 %v2823_v7 }
  0xd3   :  { %2081 = vmatpush1.bf16.msra.mxu0 %v2818_v8 }
  0xd4   :  { %2134 = vmatpush1.bf16.msra.mxu1 %v2821_v9  ;;  %2082 = vmatprep.subr.bf16.mxu0 %v2826_v10 }
  0xd5   :  { %2135 = vmatprep.subr.bf16.mxu1 %v2829_v11 }
  0xd7   :  { %2083 = vmatpush1.bf16.msra.mxu0 %v2824_v12 }
  0xd8   :  { %2136 = vmatpush1.bf16.msra.mxu1 %v2827_v13  ;;  %2084 = vmatprep.subr.bf16.mxu0 %v2832_v14 }
  0xd9   :  { %2137 = vmatprep.subr.bf16.mxu1 %v2835_v15 }
  0xdb   :  { %2085 = vmatpush1.bf16.msra.mxu0 %v2830_v16 }
  0xdc   :  { %2138 = vmatpush1.bf16.msra.mxu1 %v2833_v17  ;;  %2086 = vmatprep.subr.bf16.mxu0 %v2838_v18 }
  0xdd   :  { %2139 = vmatprep.subr.bf16.mxu1 %v2841_v19 }
  0xdf   :  { %2087 = vmatpush1.bf16.msra.mxu0 %v2836_v20 }
  0xe0   :  { %2140 = vmatpush1.bf16.msra.mxu1 %v2839_v21  ;;  %2088 = vmatprep.subr.bf16.mxu0 %v2844_v22 }
  0xe1   :  { %2141 = vmatprep.subr.bf16.mxu1 %v2847_v23 }
  0xe3   :  { %2089 = vmatpush2.bf16.msra.mxu0 %v2842_v24 }
  0xe4   :  { %2142 = vmatpush2.bf16.msra.mxu1 %v2845_v25  ;;  %2090 = vmatprep.subr.bf16.mxu0 %v2850_v26 }
  0xe5   :  { %2143 = vmatprep.subr.bf16.mxu1 %v2853_v27 }
  0xe7   :  { %2091 = vmatpush2.bf16.msra.mxu0 %v2848_v28 }
  0xe8   :  { %2144 = vmatpush2.bf16.msra.mxu1 %v2851_v29  ;;  %2092 = vmatprep.subr.bf16.mxu0 %v2856_v30  ;;  %v304_v30 = vlaneseq }
  0xe9   :  { %2145 = vmatprep.subr.bf16.mxu1 %v2859_v31 }
  0xeb   :  { %2093 = vmatpush2.bf16.msra.mxu0 %v2854_v32 }
  0xec   :  { %2146 = vmatpush2.bf16.msra.mxu1 %v2857_v33  ;;  %2094 = vmatprep.subr.bf16.mxu0 %v2862_v34  ;;  %v305_v34 = vshrl.u32 %v304_v30, 7 }
  0xed   :  { %2147 = vmatprep.subr.bf16.mxu1 %v2865_v35 }
  0xef   :  { %2095 = vmatpush2.bf16.msra.mxu0 %v2860_v36 }
  0xf0   :  { %2148 = vmatpush2.bf16.msra.mxu1 %v2863_v37  ;;  %2096 = vmatprep.subr.bf16.mxu0 %v2868_v38  ;;  %v306_v37 = vsub.s32 0, %v305_v34  ;;  %v302_v38 = vld [vmem:[%s3860_s2] sm:$0x3] }
  0xf1   :  { %2149 = vmatprep.subr.bf16.mxu1 %v2871_v39 }
  0xf3   :  { %2097 = vmatpush2.bf16.msra.mxu0 %v2866_v40  ;;  %v310_v40 = vsub.s32 1, %v305_v34 }
  0xf4   :  { %2150 = vmatpush2.bf16.msra.mxu1 %v2869_v41  ;;  %2098 = vmatprep.subr.bf16.mxu0 %v2874_v44  ;;  %v307_v44 = vrot.slane %v302_v38, %v306_v37 }
  0xf5   :  { %2151 = vmatprep.subr.bf16.mxu1 %v2877_v45 }
  0xf7   :  { %2099 = vmatpush2.bf16.msra.mxu0 %v2872_v48  ;;  %v311_v48 = vrot.slane %v302_v38, %v310_v40 }
  0xf8   :  { %2152 = vmatpush2.bf16.msra.mxu1 %v2875_v49  ;;  %2100 = vmatprep.subr.bf16.mxu0 %v2880_v42 }
  0xf9   :  { %2153 = vmatprep.subr.bf16.mxu1 %v2883_v43 }
  0xfb   :  { %2101 = vmatpush2.bf16.msra.mxu0 %v2878_v46 }
  0xfc   :  { %2154 = vmatpush2.bf16.msra.mxu1 %v2881_v47  ;;  %2102 = vmatprep.subr.bf16.mxu0 %v2886_v50 }
  0xfd   :  { %2155 = vmatprep.subr.bf16.mxu1 %v2889_v51 }
  0xff   :  { %2103 = vmatpush2.bf16.msra.mxu0 %v2884_v52 }
 0x100   :  { %2156 = vmatpush2.bf16.msra.mxu1 %v2887_v53 }
 0x102   :  { %2105 = vmatmul.mubr.bf16.vlgmr.msra.gmra.mxu0 %v2222_v62  ;;  %v1788_v4 = vpop.f32.mrf.mxu0 }
 0x103   :  { %2158 = vmatmul.mubr.bf16.vlgmr.msra.gmra.mxu1 %v2224_v63  ;;  %2114 = vmatprep.mubr.bf16.mxu0 %v2239_v0  ;;  %v1841_v5 = vpop.f32.mrf.mxu1  ;;  %v1789_v42 = vadd.f32 %v1788_v4, %v307_v44 }
 0x104   :  { %2167 = vmatprep.mubr.bf16.mxu1 %v2241_v1  ;;  %v1790_v6 = vpop.f32.mrf.mxu0 }
 0x105   :  { %v1843_v7 = vpop.f32.mrf.mxu1  ;;  %v1791_v46 = vadd.f32 %v1790_v6, %v311_v48  ;;  %v1842_v51 = vadd.f32 %v1841_v5, %v1789_v42 }
 0x106   :  { %v1792_v56 = vpop.f32.mrf.mxu0 }
 0x107   :  { %v1845_v59 = vpop.f32.mrf.mxu1  ;;  %v1793_v52 = vadd.f32 %v1792_v56, %v307_v44  ;;  %v1844_v53 = vadd.f32 %v1843_v7, %v1791_v46 }
 0x108   :  { %v1794_v8 = vpop.f32.mrf.mxu0 }
 0x109   :  { %v1847_v61 = vpop.f32.mrf.mxu1  ;;  %v1795_v54 = vadd.f32 %v1794_v8, %v311_v48  ;;  %v1846_v62 = vadd.f32 %v1845_v59, %v1793_v52 }
 0x10a   :  { %2115 = vmatmul.mubr.bf16.gmra.mxu0 %v2238_v2  ;;  %v1798_v60 = vpop.f32.mrf.mxu0 }
 0x10b   :  { %2168 = vmatmul.mubr.bf16.gmra.mxu1 %v2240_v3  ;;  %v1851_v10 = vpop.f32.mrf.mxu1  ;;  %v1799_v63 = vadd.f32 %v1798_v60, %v307_v44  ;;  %v1848_v2 = vadd.f32 %v1847_v61, %v1795_v54 }
 0x10c   :  { %v1800_v9 = vpop.f32.mrf.mxu0 }
 0x10d   :  { %v1853_v12 = vpop.f32.mrf.mxu1  ;;  %v1801_v1 = vadd.f32 %v1800_v9, %v311_v48  ;;  %v1852_v6 = vadd.f32 %v1851_v10, %v1799_v63 }
 0x10e   :  { %v1802_v11 = vpop.f32.mrf.mxu0 }
 0x10f   :  { %v3822_v14 = vpop.f32.mrf.mxu1  ;;  %v1803_v34 = vadd.f32 %v1802_v11, %v307_v44  ;;  %v1854_v56 = vadd.f32 %v1853_v12, %v1801_v1 }
 0x110   :  { %v1804_v13 = vpop.f32.mrf.mxu0 }
 0x111   :  { %v3824_v16 = vpop.f32.mrf.mxu1  ;;  %v1805_v7 = vadd.f32 %v1804_v13, %v311_v48  ;;  %v1856_v59 = vadd.f32 %v3822_v14, %v1803_v34 }
 0x113   :  { %v1858_v11 = vadd.f32 %v3824_v16, %v1805_v7 }
 0x142   :  { %v1894_v15 = vpop.f32.mrf.mxu0 }
 0x143   :  { %v1947_v17 = vpop.f32.mrf.mxu1  ;;  %v1895_v55 = vadd.f32 %v1894_v15, %v1842_v51 }
 0x144   :  { %v1896_v18 = vpop.f32.mrf.mxu0 }
 0x145   :  { %v1949_v19 = vpop.f32.mrf.mxu1  ;;  %v1897_v0 = vadd.f32 %v1896_v18, %v1844_v53  ;;  %v1948_v3 = vadd.f32 %v1947_v17, %v1895_v55 }
 0x146   :  { %v1898_v20 = vpop.f32.mrf.mxu0 }
 0x147   :  { %v1951_v21 = vpop.f32.mrf.mxu1  ;;  %v1899_v30 = vadd.f32 %v1898_v20, %v1846_v62  ;;  %v1950_v38 = vadd.f32 %v1949_v19, %v1897_v0 }
 0x148   :  { %v1900_v22 = vpop.f32.mrf.mxu0 }
 0x149   :  { %v1953_v23 = vpop.f32.mrf.mxu1  ;;  %v1901_v40 = vadd.f32 %v1900_v22, %v1848_v2  ;;  %v1952_v8 = vadd.f32 %v1951_v21, %v1899_v30 }
 0x14a   :  { %v1904_v24 = vpop.f32.mrf.mxu0 }
 0x14b   :  { %v3826_v25 = vpop.f32.mrf.mxu1  ;;  %v1905_v15 = vadd.f32 %v1904_v24, %v1852_v6  ;;  %v1954_v61 = vadd.f32 %v1953_v23, %v1901_v40 }
 0x14c   :  { %v1906_v26 = vpop.f32.mrf.mxu0 }
 0x14d   :  { %v3828_v27 = vpop.f32.mrf.mxu1  ;;  %v1907_v60 = vadd.f32 %v1906_v26, %v1854_v56  ;;  %v1958_v22 = vadd.f32 %v3826_v25, %v1905_v15 }
 0x14e   :  { %v1908_v28 = vpop.f32.mrf.mxu0 }
 0x14f   :  { %v3830_v29 = vpop.f32.mrf.mxu1  ;;  %v1909_v44 = vadd.f32 %v1908_v28, %v1856_v59  ;;  %v1960_v24 = vadd.f32 %v3828_v27, %v1907_v60 }
 0x150   :  { %v3832_v31 = vpop.f32.mrf.mxu0 }
 0x151   :  { %v3834_v32 = vpop.f32.mrf.mxu1  ;;  %v1911_v14 = vadd.f32 %v3832_v31, %v1858_v11 }
 0x182   :  { %v2000_v33 = vpop.f32.mrf.mxu0 }
 0x183   :  { %v2053_v35 = vpop.f32.mrf.mxu1  ;;  %v2001_v5 = vadd.f32 %v2000_v33, %v1948_v3 }
 0x184   :  { %v2002_v36 = vpop.f32.mrf.mxu0 }
 0x185   :  { %v2055_v39 = vpop.f32.mrf.mxu1  ;;  %v2003_v42 = vadd.f32 %v2002_v36, %v1950_v38  ;;  %v2054_v17 = vadd.f32 %v2053_v35, %v2001_v5 }
 0x186   :  { %v2004_v41 = vpop.f32.mrf.mxu0 }
 0x187   :  { %v2057_v45 = vpop.f32.mrf.mxu1  ;;  %v2005_v20 = vadd.f32 %v2004_v41, %v1952_v8  ;;  %v2056_v12 = vadd.f32 %v2055_v39, %v2003_v42  ;;  %v1962_v41 = vadd.f32 %v3830_v29, %v1909_v44 }
 0x188   :  { %v2006_v49 = vpop.f32.mrf.mxu0 }
 0x189   :  { %v2059_v43 = vpop.f32.mrf.mxu1  ;;  %v2007_v13 = vadd.f32 %v2006_v49, %v1954_v61  ;;  %v2058_v36 = vadd.f32 %v2057_v45, %v2005_v20  ;;  %v1964_v49 = vadd.f32 %v3834_v32, %v1911_v14 }
 0x18a   :  { %v2010_v47 = vpop.f32.mrf.mxu0 }
 0x18b   :  { %v2063_v50 = vpop.f32.mrf.mxu1  ;;  %v2011_v23 = vadd.f32 %v2010_v47, %v1958_v22  ;;  %v2060_v46 = vadd.f32 %v2059_v43, %v2007_v13 }
 0x18c   :  { %v2012_v57 = vpop.f32.mrf.mxu0 }
 0x18d   :  { %v2065_v58 = vpop.f32.mrf.mxu1  ;;  %v2013_v16 = vadd.f32 %v2012_v57, %v1960_v24  ;;  %v2064_v53 = vadd.f32 %v2063_v50, %v2011_v23 }
 0x18e   :  { %v2014_v4 = vpop.f32.mrf.mxu0 }
 0x18f   :  { %v2067_v37 = vpop.f32.mrf.mxu1  ;;  %v2015_v31 = vadd.f32 %v2014_v4, %v1962_v41  ;;  %v2066_v45 = vadd.f32 %v2065_v58, %v2013_v16 }
 0x190   :  { %v2016_v18 = vpop.f32.mrf.mxu0 }
 0x191   :  { %v2069_v9 = vpop.f32.mrf.mxu1  ;;  %v2017_v63 = vadd.f32 %v2016_v18, %v1964_v49  ;;  %v2068_v32 = vadd.f32 %v2067_v37, %v2015_v31 }
 0x193   :  { %v2070_v34 = vadd.f32 %v2069_v9, %v2017_v63 }
 0x1c2   :  { %v2106_v10 = vpop.f32.mrf.mxu0 }
 0x1c3   :  { %v2159_v19 = vpop.f32.mrf.mxu1  ;;  %v2107_v21 = vadd.f32 %v2106_v10, %v2054_v17 }
 0x1c4   :  { %v2108_v26 = vpop.f32.mrf.mxu0 }
 0x1c5   :  { %v2161_v33 = vpop.f32.mrf.mxu1  ;;  %v2109_v35 = vadd.f32 %v2108_v26, %v2056_v12  ;;  %v2160_v51 = vadd.f32 %v2159_v19, %v2107_v21 }
 0x1c6   :  { %v2110_v28 = vpop.f32.mrf.mxu0 }
 0x1c7   :  { %v2163_v48 = vpop.f32.mrf.mxu1  ;;  %v2162_v25 = vadd.f32 %v2161_v33, %v2109_v35  ;;  %v2111_v39 = vadd.f32 %v2110_v28, %v2058_v36 }
 0x1c8   :  { %v2112_v52 = vpop.f32.mrf.mxu0 }
 0x1c9   :  { %v2165_v27 = vpop.f32.mrf.mxu1  ;;  %v2502_v54 = vpack.c.bf16 %v2162_v25, %v2160_v51  ;;  %v2113_v55 = vadd.f32 %v2112_v52, %v2060_v46  ;;  %v2164_v29 = vadd.f32 %v2163_v48, %v2111_v39 }
 0x1ca   :  { %v2116_v47 = vpop.f32.mrf.mxu0 }
 0x1cb   :  { %v2169_v62 = vpop.f32.mrf.mxu1  ;;  %2202 = vst [vmem:[%s3861_s3] sm:$0xff] %v2502_v54  ;;  %v2166_v43 = vadd.f32 %v2165_v27, %v2113_v55  ;;  %v2117_v57 = vadd.f32 %v2116_v47, %v2064_v53 }
 0x1cc   :  { %v2118_v0 = vpop.f32.mrf.mxu0 }
 0x1cd   :  { %v2171_v1 = vpop.f32.mrf.mxu1  ;;  %v2503_v2 = vpack.c.bf16 %v2166_v43, %v2164_v29  ;;  %v2119_v3 = vadd.f32 %v2118_v0, %v2066_v45  ;;  %v2170_v58 = vadd.f32 %v2169_v62, %v2117_v57 }
 0x1ce   :  { %v2120_v50 = vpop.f32.mrf.mxu0 }
 0x1cf   :  { %v2173_v30 = vpop.f32.mrf.mxu1  ;;  %2203 = vst [vmem:[%s3861_s3 + $0x8] sm:$0xff] %v2503_v2  ;;  %v2172_v4 = vadd.f32 %v2171_v1, %v2119_v3  ;;  %v2121_v6 = vadd.f32 %v2120_v50, %v2068_v32 }
 0x1d0   :  { %v2122_v38 = vpop.f32.mrf.mxu0 }
 0x1d1   :  { %v2504_v40 = vpack.c.bf16 %v2172_v4, %v2170_v58  ;;  %v2123_v5 = vadd.f32 %v2122_v38, %v2070_v34  ;;  %v2175_v56 = vpop.f32.mrf.mxu1  ;;  %v2174_v37 = vadd.f32 %v2173_v30, %v2121_v6 }
 0x1d3   :  { %2204 = vst [vmem:[%s3861_s3 + $0x10] sm:$0xff] %v2504_v40  ;;  %v2176_v7 = vadd.f32 %v2175_v56, %v2123_v5 }
 0x1d5   :  { %v2505_v8 = vpack.c.bf16 %v2176_v7, %v2174_v37 }
 0x1d7   :  { %2205 = vst [vmem:[%s3861_s3 + $0x18] sm:$0xff] %v2505_v8 }

// kernel: discriminator_forward.14
= control target key start
LH: loop header
LB: loop body
LE: loop exit
PB: predicated region body
PF: predicated region fallthrough
CT: control target
= control target key end

     0   :  { %s551_s6 = smov 0   ;;  %s711_s0 = inlined_call_operand.vmem [shape: bf16[2,9,512], index: 0, kind: input, shape index: {}]   ;;  %s712_s1 = inlined_call_operand.vmem [shape: bf16[2,9,512], index: 1, kind: output, shape index: {}]  }
   0x1 LB: > { %s488_s7 = sadd.s32 4294967295, %s539_s6   ;;  %p492_p0 = scmp.ge.s32.totalorder %s539_s6, 1  ;;  %s539_s6 = sphi %s551_s6, %s11_s6  }
   0x2   : > { %p87_p1 = scmp.lt.s32.totalorder %s539_s6, 3 }
   0x4   : > { %p88_p2 = pnand %p492_p0, %p87_p1 }
   0x5   : > { %p107_p3 = scmp.lt.s32.totalorder (!%p88_p2), %s488_s7, 1 }
   0x6   : > { %91 = sbr.rel (%p88_p2) target bundleno = 123 (0x7b), region = 24 }
   0xb   : > { %s718_s7 = smov (!%p107_p3, %s488_s7), 1  ;;  %vm129_vm0 = vcmask 1040384   ;;  %vm421_vm1 = vsmask.f32 256  ;;  %vm423_vm2 = vcmask 1044484  }
   0xc   : > { %s503_s8 = sshll.u32 %s718_s7, 5  ;;  %vm424_vm3 = vsmask.f32 4352  ;;  %vm681_vm4 = vmand %vm129_vm0, %vm421_vm1 }
   0xd   : > { %s111_s11 = scalar_lea.vmem %s711_s0, %s503_s8  ;;  %s690_s14 = scalar_lea.vmem %s712_s1, %s503_s8  ;;  %vm694_vm5 = vmand %vm423_vm2, %vm424_vm3 }
   0xe   : > { %v117_v0 = vld [vmem:[%s111_s11] sm:$0xff]  ;;  %v118_v1 = vld [vmem:[%s111_s11 + $0x8] sm:$0xff]  ;;  %v119_v2 = vld [vmem:[%s111_s11 + $0x10] sm:$0x11] }
   0xf   : > { %v120_v3 = vld [vmem:[%s111_s11 + $0x18] sm:$0x11]  ;;  %v567_v4 = vunpack.c.l.bf16 %v117_v0  ;;  %v569_v5 = vunpack.c.h.bf16 %v117_v0  ;;  %v571_v6 = vunpack.c.l.bf16 %v118_v1  ;;  %v573_v7 = vunpack.c.h.bf16 %v118_v1  ;;  %vm426_vm6 = vmor %vm694_vm5, %vm681_vm4 }
  0x10   : > { %v575_v8 = vunpack.c.l.bf16 %v119_v2  ;;  %v577_v9 = vunpack.c.h.bf16 %v119_v2  ;;  %v579_v10 = vunpack.c.l.bf16 %v120_v3  ;;  %v581_v11 = vunpack.c.h.bf16 %v120_v3 }
  0x11   : > { %v162_v12 = vmul.f32 %v567_v4, %v567_v4  ;;  %v163_v13 = vmul.f32 %v569_v5, %v569_v5  ;;  %v164_v14 = vmul.f32 %v571_v6, %v571_v6  ;;  %v165_v15 = vmul.f32 %v573_v7, %v573_v7 }
  0x12   : > { %v130_v16 = vsel %vm129_vm0, %v575_v8, 0.0  ;;  %v138_v17 = vsel %vm129_vm0, %v577_v9, 0.0  ;;  %v146_v18 = vsel %vm129_vm0, %v579_v10, 0.0  ;;  %v154_v19 = vsel %vm129_vm0, %v581_v11, 0.0 }
  0x13   : > { %v131_v20 = vadd.f32 %v130_v16, %v567_v4  ;;  %v139_v21 = vadd.f32 %v138_v17, %v569_v5  ;;  %v147_v22 = vadd.f32 %v146_v18, %v571_v6  ;;  %v155_v23 = vadd.f32 %v154_v19, %v573_v7 }
  0x14   : > { %v166_v24 = vmul.f32 %v575_v8, %v575_v8  ;;  %v167_v25 = vmul.f32 %v577_v9, %v577_v9  ;;  %v168_v26 = vmul.f32 %v579_v10, %v579_v10  ;;  %v169_v27 = vmul.f32 %v581_v11, %v581_v11 }
  0x15   : > { %v132_v28 = vrot.slane %v131_v20, 4  ;;  %v140_v29 = vrot.slane %v139_v21, 4  ;;  %v148_v30 = vrot.slane %v147_v22, 4  ;;  %v156_v31 = vrot.slane %v155_v23, 4 }
  0x16   : > { %v170_v32 = vsel %vm129_vm0, %v166_v24, 0.0  ;;  %v178_v33 = vsel %vm129_vm0, %v167_v25, 0.0  ;;  %v186_v34 = vsel %vm129_vm0, %v168_v26, 0.0  ;;  %v194_v35 = vsel %vm129_vm0, %v169_v27, 0.0 }
  0x17   : > { %v133_v36 = vadd.f32 %v132_v28, %v131_v20  ;;  %v141_v37 = vadd.f32 %v140_v29, %v139_v21  ;;  %v149_v38 = vadd.f32 %v148_v30, %v147_v22  ;;  %v157_v39 = vadd.f32 %v156_v31, %v155_v23 }
  0x18   : > { %v171_v40 = vadd.f32 %v170_v32, %v162_v12  ;;  %v179_v41 = vadd.f32 %v178_v33, %v163_v13  ;;  %v187_v42 = vadd.f32 %v186_v34, %v164_v14  ;;  %v195_v43 = vadd.f32 %v194_v35, %v165_v15 }
  0x19   : > { %v134_v44 = vrot.slane %v133_v36, 2  ;;  %v142_v45 = vrot.slane %v141_v37, 2  ;;  %v150_v46 = vrot.slane %v149_v38, 2  ;;  %v158_v47 = vrot.slane %v157_v39, 2 }
  0x1a   : > { %v172_v48 = vrot.slane %v171_v40, 4  ;;  %v180_v49 = vrot.slane %v179_v41, 4  ;;  %v188_v50 = vrot.slane %v187_v42, 4  ;;  %v196_v51 = vrot.slane %v195_v43, 4 }
  0x1b   : > { %v135_v52 = vadd.f32 %v134_v44, %v133_v36  ;;  %v143_v53 = vadd.f32 %v142_v45, %v141_v37  ;;  %v151_v54 = vadd.f32 %v150_v46, %v149_v38  ;;  %v159_v55 = vadd.f32 %v158_v47, %v157_v39 }
  0x1c   : > { %v173_v56 = vadd.f32 %v172_v48, %v171_v40  ;;  %v181_v57 = vadd.f32 %v180_v49, %v179_v41  ;;  %v189_v58 = vadd.f32 %v188_v50, %v187_v42  ;;  %v197_v59 = vadd.f32 %v196_v51, %v195_v43 }
  0x1d   : > { %v136_v60 = vrot.slane %v135_v52, 1  ;;  %v144_v61 = vrot.slane %v143_v53, 1  ;;  %v152_v62 = vrot.slane %v151_v54, 1  ;;  %v160_v63 = vrot.slane %v159_v55, 1 }
  0x1e   : > { %v174_v0 = vrot.slane %v173_v56, 2  ;;  %v182_v1 = vrot.slane %v181_v57, 2  ;;  %v190_v2 = vrot.slane %v189_v58, 2  ;;  %v198_v3 = vrot.slane %v197_v59, 2 }
  0x1f   : > { %v137_v12 = vadd.f32 %v136_v60, %v135_v52  ;;  %v145_v13 = vadd.f32 %v144_v61, %v143_v53  ;;  %v153_v14 = vadd.f32 %v152_v62, %v151_v54  ;;  %v161_v15 = vadd.f32 %v160_v63, %v159_v55 }
  0x20   : > { %v175_v16 = vadd.f32 %v174_v0, %v173_v56  ;;  %v183_v17 = vadd.f32 %v182_v1, %v181_v57  ;;  %v191_v18 = vadd.f32 %v190_v2, %v189_v58  ;;  %v199_v19 = vadd.f32 %v198_v3, %v197_v59 }
  0x21   : > { %v202_v20 = vmul.f32 0.11111111, %v137_v12  ;;  %v203_v21 = vmul.f32 0.11111111, %v145_v13  ;;  %v204_v22 = vmul.f32 0.11111111, %v153_v14 }
  0x22   : > { %v176_v23 = vrot.slane %v175_v16, 1  ;;  %v184_v24 = vrot.slane %v183_v17, 1  ;;  %v192_v25 = vrot.slane %v191_v18, 1  ;;  %v200_v26 = vrot.slane %v199_v19, 1 }
  0x23   : > { %v205_v27 = vmul.f32 0.11111111, %v161_v15  ;;  %v210_v28 = vmul.f32 %v202_v20, %v202_v20  ;;  %v211_v29 = vmul.f32 %v203_v21, %v203_v21  ;;  %v212_v30 = vmul.f32 %v204_v22, %v204_v22 }
  0x24   : > { %v177_v31 = vadd.f32 %v176_v23, %v175_v16  ;;  %v185_v32 = vadd.f32 %v184_v24, %v183_v17  ;;  %v193_v33 = vadd.f32 %v192_v25, %v191_v18  ;;  %v201_v34 = vadd.f32 %v200_v26, %v199_v19 }
  0x25   : > { %v213_v35 = vmul.f32 %v205_v27, %v205_v27  ;;  %v222_v52 = vsub.f32 %v567_v4, %v202_v20  ;;  %v226_v53 = vsub.f32 %v575_v8, %v202_v20  ;;  %v223_v54 = vsub.f32 %v569_v5, %v203_v21 }
  0x26   : > { %v206_v36 = vmul.f32 0.11111111, %v177_v31  ;;  %v207_v37 = vmul.f32 0.11111111, %v185_v32  ;;  %v208_v38 = vmul.f32 0.11111111, %v193_v33  ;;  %v227_v55 = vsub.f32 %v577_v9, %v203_v21 }
  0x27   : > { %v209_v39 = vmul.f32 0.11111111, %v201_v34  ;;  %v224_v56 = vsub.f32 %v571_v6, %v204_v22  ;;  %v228_v57 = vsub.f32 %v579_v10, %v204_v22  ;;  %v225_v59 = vsub.f32 %v573_v7, %v205_v27 }
  0x28   : > { %v214_v40 = vsub.f32 %v206_v36, %v210_v28  ;;  %v215_v41 = vsub.f32 %v207_v37, %v211_v29  ;;  %v216_v42 = vsub.f32 %v208_v38, %v212_v30  ;;  %v229_v60 = vsub.f32 %v581_v11, %v205_v27 }
  0x29   : > { %v217_v43 = vsub.f32 %v209_v39, %v213_v35 }
  0x2a   : > { %v218_v44 = vmax.f32 %v214_v40, 0.0  ;;  %v219_v45 = vmax.f32 %v215_v41, 0.0  ;;  %v220_v46 = vmax.f32 %v216_v42, 0.0 }
  0x2b   : > { %v221_v47 = vmax.f32 %v217_v43, 0.0 }
  0x2c   : > { %v230_v48 = vadd.f32 1e-05, %v218_v44  ;;  %v231_v49 = vadd.f32 1e-05, %v219_v45  ;;  %v232_v50 = vadd.f32 1e-05, %v220_v46 }
  0x2d   : > { %v233_v51 = vadd.f32 1e-05, %v221_v47 }
  0x2e   : > { %517 = vrsqrt.f32 %v230_v48 }
  0x2f   : > { %519 = vrsqrt.f32 %v231_v49 }
  0x30   : > { %521 = vrsqrt.f32 %v232_v50 }
  0x31   : > { %523 = vrsqrt.f32 %v233_v51 }
  0x3b   : > { %v518_v58 = vpop.eup %517 }
  0x3c   : > { %v520_v61 = vpop.eup %519  ;;  %v238_v62 = vmul.f32 %v518_v58, %v222_v52  ;;  %v242_v63 = vmul.f32 %v518_v58, %v226_v53 }
  0x3d   : > { %v522_v0 = vpop.eup %521  ;;  %v239_v4 = vmul.f32 %v520_v61, %v223_v54  ;;  %v243_v1 = vmul.f32 %v520_v61, %v227_v55 }
  0x3e   : > { %v524_v8 = vpop.eup %523  ;;  %v240_v2 = vmul.f32 %v522_v0, %v224_v56  ;;  %v244_v5 = vmul.f32 %v522_v0, %v228_v57  ;;  %v246_v3 = vmul.f32 0.01, %v238_v62  ;;  %v250_v9 = vmul.f32 0.01, %v242_v63 }
  0x3f   : > { %v241_v12 = vmul.f32 %v524_v8, %v225_v59  ;;  %v245_v6 = vmul.f32 %v524_v8, %v229_v60  ;;  %v247_v13 = vmul.f32 0.01, %v239_v4  ;;  %v251_v10 = vmul.f32 0.01, %v243_v1 }
  0x40   : > { %v248_v14 = vmul.f32 0.01, %v240_v2  ;;  %v252_v15 = vmul.f32 0.01, %v244_v5  ;;  %v623_v7 = vmax.f32 %v238_v62, %v246_v3  ;;  %v625_v11 = vmax.f32 %v242_v63, %v250_v9 }
  0x41   : > { %v249_v16 = vmul.f32 0.01, %v241_v12  ;;  %v253_v17 = vmul.f32 0.01, %v245_v6  ;;  %v627_v18 = vmax.f32 %v239_v4, %v247_v13  ;;  %v629_v19 = vmax.f32 %v243_v1, %v251_v10 }
  0x42   : > { %v631_v20 = vmax.f32 %v240_v2, %v248_v14  ;;  %v633_v21 = vmax.f32 %v244_v5, %v252_v15  ;;  %v262_v22 = vsel %vm129_vm0, %v625_v11, 0.0  ;;  %v294_v23 = vmul.f32 %v623_v7, %v623_v7 }
  0x43   : > { %v639_v24 = vmax.f32 %v241_v12, %v249_v16  ;;  %v641_v25 = vmax.f32 %v245_v6, %v253_v17  ;;  %v263_v26 = vadd.f32 %v262_v22, %v623_v7  ;;  %v270_v27 = vsel %vm129_vm0, %v629_v19, 0.0 }
  0x44   : > { %v271_v28 = vadd.f32 %v270_v27, %v627_v18  ;;  %v278_v29 = vsel %vm129_vm0, %v633_v21, 0.0  ;;  %v295_v30 = vmul.f32 %v627_v18, %v627_v18  ;;  %v296_v31 = vmul.f32 %v631_v20, %v631_v20 }
  0x45   : > { %v264_v32 = vrot.slane %v263_v26, 4  ;;  %v279_v33 = vadd.f32 %v278_v29, %v631_v20  ;;  %v286_v34 = vsel %vm129_vm0, %v641_v25, 0.0  ;;  %v297_v35 = vmul.f32 %v639_v24, %v639_v24 }
  0x46   : > { %v272_v36 = vrot.slane %v271_v28, 4  ;;  %v287_v37 = vadd.f32 %v286_v34, %v639_v24  ;;  %v298_v38 = vmul.f32 %v625_v11, %v625_v11  ;;  %v299_v39 = vmul.f32 %v629_v19, %v629_v19 }
  0x47   : > { %v265_v40 = vadd.f32 %v264_v32, %v263_v26  ;;  %v280_v41 = vrot.slane %v279_v33, 4  ;;  %v300_v42 = vmul.f32 %v633_v21, %v633_v21  ;;  %v301_v43 = vmul.f32 %v641_v25, %v641_v25 }
  0x48   : > { %v273_v44 = vadd.f32 %v272_v36, %v271_v28  ;;  %v288_v45 = vrot.slane %v287_v37, 4  ;;  %v302_v46 = vsel %vm129_vm0, %v298_v38, 0.0  ;;  %v310_v47 = vsel %vm129_vm0, %v299_v39, 0.0 }
  0x49   : > { %v266_v48 = vrot.slane %v265_v40, 2  ;;  %v281_v49 = vadd.f32 %v280_v41, %v279_v33  ;;  %v303_v50 = vadd.f32 %v302_v46, %v294_v23  ;;  %v311_v51 = vadd.f32 %v310_v47, %v295_v30 }
  0x4a   : > { %v274_v52 = vrot.slane %v273_v44, 2  ;;  %v289_v53 = vadd.f32 %v288_v45, %v287_v37  ;;  %v318_v54 = vsel %vm129_vm0, %v300_v42, 0.0  ;;  %v326_v55 = vsel %vm129_vm0, %v301_v43, 0.0 }
  0x4b   : > { %v267_v56 = vadd.f32 %v266_v48, %v265_v40  ;;  %v282_v57 = vrot.slane %v281_v49, 2  ;;  %v304_v58 = vrot.slane %v303_v50, 4  ;;  %v312_v59 = vrot.slane %v311_v51, 4 }
  0x4c   : > { %v275_v60 = vadd.f32 %v274_v52, %v273_v44  ;;  %v290_v61 = vrot.slane %v289_v53, 2  ;;  %v319_v62 = vadd.f32 %v318_v54, %v296_v31  ;;  %v327_v63 = vadd.f32 %v326_v55, %v297_v35 }
  0x4d   : > { %v268_v0 = vrot.slane %v267_v56, 1  ;;  %v283_v4 = vadd.f32 %v282_v57, %v281_v49  ;;  %v305_v1 = vadd.f32 %v304_v58, %v303_v50  ;;  %v313_v8 = vadd.f32 %v312_v59, %v311_v51 }
  0x4e   : > { %v276_v2 = vrot.slane %v275_v60, 1  ;;  %v291_v5 = vadd.f32 %v290_v61, %v289_v53  ;;  %v320_v3 = vrot.slane %v319_v62, 4  ;;  %v328_v9 = vrot.slane %v327_v63, 4 }
  0x4f   : > { %v269_v12 = vadd.f32 %v268_v0, %v267_v56  ;;  %v284_v6 = vrot.slane %v283_v4, 1  ;;  %v306_v13 = vrot.slane %v305_v1, 2  ;;  %v314_v10 = vrot.slane %v313_v8, 2 }
  0x50   : > { %v277_v14 = vadd.f32 %v276_v2, %v275_v60  ;;  %v292_v15 = vrot.slane %v291_v5, 1  ;;  %v321_v16 = vadd.f32 %v320_v3, %v319_v62  ;;  %v329_v17 = vadd.f32 %v328_v9, %v327_v63 }
  0x51   : > { %v285_v22 = vadd.f32 %v284_v6, %v283_v4  ;;  %v307_v23 = vadd.f32 %v306_v13, %v305_v1  ;;  %v315_v26 = vadd.f32 %v314_v10, %v313_v8  ;;  %v334_v27 = vmul.f32 0.11111111, %v269_v12 }
  0x52   : > { %v293_v28 = vadd.f32 %v292_v15, %v291_v5  ;;  %v322_v29 = vrot.slane %v321_v16, 2  ;;  %v330_v30 = vrot.slane %v329_v17, 2  ;;  %v335_v31 = vmul.f32 0.11111111, %v277_v14 }
  0x53   : > { %v308_v32 = vrot.slane %v307_v23, 1  ;;  %v316_v33 = vrot.slane %v315_v26, 1  ;;  %v336_v36 = vmul.f32 0.11111111, %v285_v22  ;;  %v342_v40 = vmul.f32 %v334_v27, %v334_v27 }
  0x54   : > { %v323_v34 = vadd.f32 %v322_v29, %v321_v16  ;;  %v331_v35 = vadd.f32 %v330_v30, %v329_v17  ;;  %v337_v37 = vmul.f32 0.11111111, %v293_v28  ;;  %v343_v41 = vmul.f32 %v335_v31, %v335_v31 }
  0x55   : > { %v309_v38 = vadd.f32 %v308_v32, %v307_v23  ;;  %v317_v39 = vadd.f32 %v316_v33, %v315_v26  ;;  %v344_v48 = vmul.f32 %v336_v36, %v336_v36  ;;  %v354_v0 = vsub.f32 %v623_v7, %v334_v27 }
  0x56   : > { %v324_v42 = vrot.slane %v323_v34, 1  ;;  %v332_v43 = vrot.slane %v331_v35, 1  ;;  %v345_v49 = vmul.f32 %v337_v37, %v337_v37  ;;  %v358_v4 = vsub.f32 %v625_v11, %v334_v27 }
  0x57   : > { %v338_v44 = vmul.f32 0.11111111, %v309_v38  ;;  %v339_v45 = vmul.f32 0.11111111, %v317_v39  ;;  %v355_v1 = vsub.f32 %v627_v18, %v335_v31  ;;  %v359_v8 = vsub.f32 %v629_v19, %v335_v31 }
  0x58   : > { %v325_v46 = vadd.f32 %v324_v42, %v323_v34  ;;  %v333_v47 = vadd.f32 %v332_v43, %v331_v35  ;;  %v356_v5 = vsub.f32 %v631_v20, %v336_v36  ;;  %v360_v3 = vsub.f32 %v633_v21, %v336_v36  ;;  %v427_v34 = vld [vmem:[%s690_s14 + $0x10] sm:$0x11]  ;;  %v430_v42 = vld [vmem:[%s690_s14 + $0x18] sm:$0x11] }
  0x59   : > { %v346_v50 = vsub.f32 %v338_v44, %v342_v40  ;;  %v347_v51 = vsub.f32 %v339_v45, %v343_v41  ;;  %v357_v12 = vsub.f32 %v639_v24, %v337_v37  ;;  %v361_v7 = vsub.f32 %v641_v25, %v337_v37 }
  0x5a   : > { %v340_v52 = vmul.f32 0.11111111, %v325_v46  ;;  %v341_v53 = vmul.f32 0.11111111, %v333_v47 }
  0x5b   : > { %v350_v54 = vmax.f32 %v346_v50, 0.0  ;;  %v351_v55 = vmax.f32 %v347_v51, 0.0 }
  0x5c   : > { %v348_v56 = vsub.f32 %v340_v52, %v344_v48  ;;  %v349_v57 = vsub.f32 %v341_v53, %v345_v49 }
  0x5d   : > { %v362_v58 = vadd.f32 1e-05, %v350_v54  ;;  %v363_v59 = vadd.f32 1e-05, %v351_v55 }
  0x5e   : > { %v352_v60 = vmax.f32 %v348_v56, 0.0  ;;  %v353_v61 = vmax.f32 %v349_v57, 0.0 }
  0x5f   : > { %525 = vrsqrt.f32 %v362_v58 }
  0x60   : > { %v364_v62 = vadd.f32 1e-05, %v352_v60  ;;  %v365_v63 = vadd.f32 1e-05, %v353_v61  ;;  %527 = vrsqrt.f32 %v363_v59 }
  0x62   : > { %529 = vrsqrt.f32 %v364_v62 }
  0x63   : > { %531 = vrsqrt.f32 %v365_v63 }
  0x6c   : > { %v526_v2 = vpop.eup %525 }
  0x6d   : > { %v528_v9 = vpop.eup %527  ;;  %v370_v6 = vmul.f32 %v526_v2, %v354_v0  ;;  %v374_v11 = vmul.f32 %v526_v2, %v358_v4 }
  0x6e   : > { %v371_v13 = vmul.f32 %v528_v9, %v355_v1  ;;  %v375_v18 = vmul.f32 %v528_v9, %v359_v8 }
  0x6f   : > { %v530_v10 = vpop.eup %529  ;;  %v378_v19 = vmul.f32 0.01, %v370_v6  ;;  %v382_v14 = vmul.f32 0.01, %v374_v11 }
  0x70   : > { %v532_v21 = vpop.eup %531  ;;  %v372_v24 = vmul.f32 %v530_v10, %v356_v5  ;;  %v376_v25 = vmul.f32 %v530_v10, %v360_v3  ;;  %v379_v15 = vmul.f32 0.01, %v371_v13  ;;  %v383_v16 = vmul.f32 0.01, %v375_v18 }
  0x71   : > { %v373_v22 = vmul.f32 %v532_v21, %v357_v12  ;;  %v377_v23 = vmul.f32 %v532_v21, %v361_v7  ;;  %v386_v26 = vmax.f32 %v370_v6, %v378_v19  ;;  %v390_v27 = vmax.f32 %v374_v11, %v382_v14 }
  0x72   : > { %v380_v28 = vmul.f32 0.01, %v372_v24  ;;  %v384_v29 = vmul.f32 0.01, %v376_v25  ;;  %v387_v30 = vmax.f32 %v371_v13, %v379_v15  ;;  %v391_v31 = vmax.f32 %v375_v18, %v383_v16 }
  0x73   : > { %v381_v32 = vmul.f32 0.01, %v373_v22  ;;  %v385_v33 = vmul.f32 0.01, %v377_v23 }
  0x74   : > { %v388_v35 = vmax.f32 %v372_v24, %v380_v28  ;;  %v392_v36 = vmax.f32 %v376_v25, %v384_v29  ;;  %v505_v37 = vpack.c.bf16 %v387_v30, %v386_v26  ;;  %v507_v38 = vpack.c.bf16 %v391_v31, %v390_v27 }
  0x75   : > { %v389_v39 = vmax.f32 %v373_v22, %v381_v32  ;;  %v393_v40 = vmax.f32 %v377_v23, %v385_v33 }
  0x76   : > { %418 = vst [vmem:[%s690_s14] sm:$0xff] %v505_v37  ;;  %v428_v41 = vsel %vm426_vm6, %v507_v38, %v427_v34 }
  0x77   : > { %v506_v43 = vpack.c.bf16 %v389_v39, %v388_v35  ;;  %v508_v44 = vpack.c.bf16 %v393_v40, %v392_v36  ;;  %429 = vst [vmem:[%s690_s14 + $0x10] sm:$0x11] %v428_v41 }
  0x79   : > { %419 = vst [vmem:[%s690_s14 + $0x8] sm:$0xff] %v506_v43  ;;  %v431_v45 = vsel %vm426_vm6, %v508_v44, %v430_v42 }
  0x7a   : > { %432 = vst [vmem:[%s690_s14 + $0x18] sm:$0x11] %v431_v45 }
  0x7b PF: > { %s11_s6 = sadd.s32 1, %s539_s6  }
  0x7c   : > { %p8_p4 = scmp.ge.s32.totalorder %s11_s6, 4  }
  0x7e   :  { %10 = sbr.rel (!%p8_p4) target bundleno = 1 (0x1), region = 54 }

// kernel: discriminator_forward.13
= control target key start
LH: loop header
LB: loop body
LE: loop exit
PB: predicated region body
PF: predicated region fallthrough
CT: control target
= control target key end

     0   :  { %s10292_s12 = smov 0   ;;  %s10294_s13 = smov 0   ;;  %s12264_s0 = inlined_call_operand.vmem [shape: bf16[24,4096], index: 0, kind: input, shape index: {}]   ;;  %s12265_s1 = inlined_call_operand.vmem [shape: bf16[4096,512], index: 1, kind: input, shape index: {}]   ;;  %s12266_s2 = inlined_call_operand.vmem [shape: f32[1,512], index: 2, kind: input, shape index: {}]   ;;  %s12267_s3 = inlined_call_operand.vmem [shape: bf16[24,512], index: 3, kind: output, shape index: {}]  }
   0x1   :  { %s10296_s14 = smov 0   ;;  %s10298_s15 = smov 0  }
   0x2   :  { %s10300_s16 = smov 0  }
   0x3 LB: > { %s22_s17 = sadd.s32 1, %s10266_s15  ;;  %s8792_s18 = sadd.s32 4294967295, %s10270_s16   ;;  %s10270_s16 = sphi %s10300_s16, %s13_s16   ;;  %s10266_s15 = sphi %s10298_s15, %s12272_s15   ;;  %s10262_s14 = sphi %s10296_s14, %s12271_s14   ;;  %s10258_s13 = sphi %s10294_s13, %s12270_s13   ;;  %s10254_s12 = sphi %s10292_s12, %s12269_s12  }
   0x4   : > { %p23_p0 = scmp.ge.s32.totalorder %s22_s17, 2  ;;  %p65_p1 = scmp.ne.s32.totalorder %s10258_s13, %s10254_s12 }
   0x5   : > { %p66_p2 = scmp.eq.s32.totalorder %s10270_s16, 0  ;;  %p123_p4 = scmp.eq.s32.totalorder %s8792_s18, 1 }
   0x6   : > { %s12274_s17 = smov (%p23_p0, %s22_s17), 0  ;;  %s58_s20 = sadd.s32 1, %s10258_s13 }
   0x7   : > { %p67_p3 = por %p66_p2, %p65_p1  ;;  %s55_s19 = ssub.s32 %s10266_s15, %s12274_s17 }
   0x8   : > { %p56_p5 = scmp.eq.s32.totalorder %s55_s19, 0  ;;  %p10327_p6 = por %p123_p4, %p65_p1 }
   0x9   : > { %p8796_p7 = scmp.ge.s32.totalorder %s10270_s16, 2 }
   0xa   : > { %s10332_s22 = scalar_select %p56_p5, %s10258_s13, %s58_s20  }
   0xb   : > { %155 = sbr.rel (%p8796_p7) target bundleno = 276 (0x114), region = 20 }
  0x10   : > { %158 = sbr.rel (!%p67_p3) target bundleno = 276 (0x114), region = 24  ;;  %s160_s23 = sand.u32 (%p67_p3), 1, %s10258_s13  }
  0x11   : > { %s9386_s24 = sshll.u32 (%p67_p3), %s10266_s15, 3  ;;  %s8797_s25 = sshll.u32 (%p67_p3), %s160_s23, 12 }
  0x12   : > { %s10340_s28 = scalar_lea.vmem (%p67_p3), %s12265_s1, %s9386_s24  ;;  %s10345_s29 = scalar_lea.vmem (%p67_p3), [#allocation2], %s8797_s25 }
  0x13   : > { %v1219_v0 = vld [vmem:[%s10340_s28] sm:$0xff] (%p67_p3)  ;;  %v1221_v1 = vld [vmem:[%s10340_s28 + $0x10] sm:$0xff] (%p67_p3) }
  0x14   : > { %v1223_v2 = vld [vmem:[%s10340_s28 + $0x20] sm:$0xff] (%p67_p3)  ;;  %1220 = vst [vmem:[%s10345_s29] sm:$0xff] (%p67_p3), %v1219_v0  ;;  %1222 = vst [vmem:[%s10345_s29 + $0x8] sm:$0xff] (%p67_p3), %v1221_v1  ;;  %v1225_v3 = vld [vmem:[%s10340_s28 + $0x30] sm:$0xff] (%p67_p3) }
  0x15   : > { %1224 = vst [vmem:[%s10345_s29 + $0x10] sm:$0xff] %v1223_v2  ;;  %v1227_v4 = vld [vmem:[%s10340_s28 + $0x40] sm:$0xff]  ;;  %v1229_v5 = vld [vmem:[%s10340_s28 + $0x50] sm:$0xff]  ;;  %1226 = vst [vmem:[%s10345_s29 + $0x18] sm:$0xff] %v1225_v3 }
  0x16   : > { %1228 = vst [vmem:[%s10345_s29 + $0x20] sm:$0xff] %v1227_v4  ;;  %1230 = vst [vmem:[%s10345_s29 + $0x28] sm:$0xff] %v1229_v5  ;;  %v1231_v6 = vld [vmem:[%s10340_s28 + $0x60] sm:$0xff]  ;;  %v1233_v7 = vld [vmem:[%s10340_s28 + $0x70] sm:$0xff] }
  0x17   : > { %v1235_v8 = vld [vmem:[%s10340_s28 + $0x80] sm:$0xff]  ;;  %1232 = vst [vmem:[%s10345_s29 + $0x30] sm:$0xff] %v1231_v6  ;;  %1234 = vst [vmem:[%s10345_s29 + $0x38] sm:$0xff] %v1233_v7  ;;  %v1237_v9 = vld [vmem:[%s10340_s28 + $0x90] sm:$0xff] }
  0x18   : > { %1236 = vst [vmem:[%s10345_s29 + $0x40] sm:$0xff] %v1235_v8  ;;  %v1239_v10 = vld [vmem:[%s10340_s28 + $0xa0] sm:$0xff]  ;;  %v1241_v11 = vld [vmem:[%s10340_s28 + $0xb0] sm:$0xff]  ;;  %1238 = vst [vmem:[%s10345_s29 + $0x48] sm:$0xff] %v1237_v9 }
  0x19   : > { %1240 = vst [vmem:[%s10345_s29 + $0x50] sm:$0xff] %v1239_v10  ;;  %1242 = vst [vmem:[%s10345_s29 + $0x58] sm:$0xff] %v1241_v11  ;;  %v1243_v12 = vld [vmem:[%s10340_s28 + $0xc0] sm:$0xff]  ;;  %v1245_v13 = vld [vmem:[%s10340_s28 + $0xd0] sm:$0xff] }
  0x1a   : > { %v1247_v14 = vld [vmem:[%s10340_s28 + $0xe0] sm:$0xff]  ;;  %1244 = vst [vmem:[%s10345_s29 + $0x60] sm:$0xff] %v1243_v12  ;;  %1246 = vst [vmem:[%s10345_s29 + $0x68] sm:$0xff] %v1245_v13  ;;  %v1249_v15 = vld [vmem:[%s10340_s28 + $0xf0] sm:$0xff] }
  0x1b   : > { %1248 = vst [vmem:[%s10345_s29 + $0x70] sm:$0xff] %v1247_v14  ;;  %v1251_v16 = vld [vmem:[%s10340_s28 + $0x100] sm:$0xff]  ;;  %v1253_v17 = vld [vmem:[%s10340_s28 + $0x110] sm:$0xff]  ;;  %1250 = vst [vmem:[%s10345_s29 + $0x78] sm:$0xff] %v1249_v15 }
  0x1c   : > { %1252 = vst [vmem:[%s10345_s29 + $0x80] sm:$0xff] %v1251_v16  ;;  %1254 = vst [vmem:[%s10345_s29 + $0x88] sm:$0xff] %v1253_v17  ;;  %v1255_v18 = vld [vmem:[%s10340_s28 + $0x120] sm:$0xff]  ;;  %v1257_v19 = vld [vmem:[%s10340_s28 + $0x130] sm:$0xff] }
  0x1d   : > { %v1259_v20 = vld [vmem:[%s10340_s28 + $0x140] sm:$0xff]  ;;  %1256 = vst [vmem:[%s10345_s29 + $0x90] sm:$0xff] %v1255_v18  ;;  %1258 = vst [vmem:[%s10345_s29 + $0x98] sm:$0xff] %v1257_v19  ;;  %v1261_v21 = vld [vmem:[%s10340_s28 + $0x150] sm:$0xff] }
  0x1e   : > { %1260 = vst [vmem:[%s10345_s29 + $0xa0] sm:$0xff] %v1259_v20  ;;  %v1263_v22 = vld [vmem:[%s10340_s28 + $0x160] sm:$0xff]  ;;  %v1265_v23 = vld [vmem:[%s10340_s28 + $0x170] sm:$0xff]  ;;  %1262 = vst [vmem:[%s10345_s29 + $0xa8] sm:$0xff] %v1261_v21 }
  0x1f   : > { %1264 = vst [vmem:[%s10345_s29 + $0xb0] sm:$0xff] %v1263_v22  ;;  %1266 = vst [vmem:[%s10345_s29 + $0xb8] sm:$0xff] %v1265_v23  ;;  %v1267_v24 = vld [vmem:[%s10340_s28 + $0x180] sm:$0xff]  ;;  %v1269_v25 = vld [vmem:[%s10340_s28 + $0x190] sm:$0xff] }
  0x20   : > { %v1271_v26 = vld [vmem:[%s10340_s28 + $0x1a0] sm:$0xff]  ;;  %1268 = vst [vmem:[%s10345_s29 + $0xc0] sm:$0xff] %v1267_v24  ;;  %1270 = vst [vmem:[%s10345_s29 + $0xc8] sm:$0xff] %v1269_v25  ;;  %v1273_v27 = vld [vmem:[%s10340_s28 + $0x1b0] sm:$0xff] }
  0x21   : > { %1272 = vst [vmem:[%s10345_s29 + $0xd0] sm:$0xff] %v1271_v26  ;;  %v1275_v28 = vld [vmem:[%s10340_s28 + $0x1c0] sm:$0xff]  ;;  %v1277_v29 = vld [vmem:[%s10340_s28 + $0x1d0] sm:$0xff]  ;;  %1274 = vst [vmem:[%s10345_s29 + $0xd8] sm:$0xff] %v1273_v27 }
  0x22   : > { %1276 = vst [vmem:[%s10345_s29 + $0xe0] sm:$0xff] %v1275_v28  ;;  %1278 = vst [vmem:[%s10345_s29 + $0xe8] sm:$0xff] %v1277_v29  ;;  %v1279_v30 = vld [vmem:[%s10340_s28 + $0x1e0] sm:$0xff]  ;;  %v1281_v31 = vld [vmem:[%s10340_s28 + $0x1f0] sm:$0xff] }
  0x23   : > { %v1283_v32 = vld [vmem:[%s10340_s28 + $0x200] sm:$0xff]  ;;  %1280 = vst [vmem:[%s10345_s29 + $0xf0] sm:$0xff] %v1279_v30  ;;  %1282 = vst [vmem:[%s10345_s29 + $0xf8] sm:$0xff] %v1281_v31  ;;  %v1285_v33 = vld [vmem:[%s10340_s28 + $0x210] sm:$0xff] }
  0x24   : > { %1284 = vst [vmem:[%s10345_s29 + $0x100] sm:$0xff] %v1283_v32  ;;  %v1287_v34 = vld [vmem:[%s10340_s28 + $0x220] sm:$0xff]  ;;  %v1289_v35 = vld [vmem:[%s10340_s28 + $0x230] sm:$0xff]  ;;  %1286 = vst [vmem:[%s10345_s29 + $0x108] sm:$0xff] %v1285_v33 }
  0x25   : > { %1288 = vst [vmem:[%s10345_s29 + $0x110] sm:$0xff] %v1287_v34  ;;  %1290 = vst [vmem:[%s10345_s29 + $0x118] sm:$0xff] %v1289_v35  ;;  %v1291_v36 = vld [vmem:[%s10340_s28 + $0x240] sm:$0xff]  ;;  %v1293_v37 = vld [vmem:[%s10340_s28 + $0x250] sm:$0xff] }
  0x26   : > { %v1295_v38 = vld [vmem:[%s10340_s28 + $0x260] sm:$0xff]  ;;  %1292 = vst [vmem:[%s10345_s29 + $0x120] sm:$0xff] %v1291_v36  ;;  %1294 = vst [vmem:[%s10345_s29 + $0x128] sm:$0xff] %v1293_v37  ;;  %v1297_v39 = vld [vmem:[%s10340_s28 + $0x270] sm:$0xff] }
  0x27   : > { %1296 = vst [vmem:[%s10345_s29 + $0x130] sm:$0xff] %v1295_v38  ;;  %v1299_v40 = vld [vmem:[%s10340_s28 + $0x280] sm:$0xff]  ;;  %v1301_v41 = vld [vmem:[%s10340_s28 + $0x290] sm:$0xff]  ;;  %1298 = vst [vmem:[%s10345_s29 + $0x138] sm:$0xff] %v1297_v39 }
  0x28   : > { %1300 = vst [vmem:[%s10345_s29 + $0x140] sm:$0xff] %v1299_v40  ;;  %1302 = vst [vmem:[%s10345_s29 + $0x148] sm:$0xff] %v1301_v41  ;;  %v1303_v42 = vld [vmem:[%s10340_s28 + $0x2a0] sm:$0xff]  ;;  %v1305_v43 = vld [vmem:[%s10340_s28 + $0x2b0] sm:$0xff] }
  0x29   : > { %v1307_v44 = vld [vmem:[%s10340_s28 + $0x2c0] sm:$0xff]  ;;  %1304 = vst [vmem:[%s10345_s29 + $0x150] sm:$0xff] %v1303_v42  ;;  %1306 = vst [vmem:[%s10345_s29 + $0x158] sm:$0xff] %v1305_v43  ;;  %v1309_v45 = vld [vmem:[%s10340_s28 + $0x2d0] sm:$0xff] }
  0x2a   : > { %1308 = vst [vmem:[%s10345_s29 + $0x160] sm:$0xff] %v1307_v44  ;;  %v1311_v46 = vld [vmem:[%s10340_s28 + $0x2e0] sm:$0xff]  ;;  %v1313_v47 = vld [vmem:[%s10340_s28 + $0x2f0] sm:$0xff]  ;;  %1310 = vst [vmem:[%s10345_s29 + $0x168] sm:$0xff] %v1309_v45 }
  0x2b   : > { %1312 = vst [vmem:[%s10345_s29 + $0x170] sm:$0xff] %v1311_v46  ;;  %1314 = vst [vmem:[%s10345_s29 + $0x178] sm:$0xff] %v1313_v47  ;;  %v1315_v48 = vld [vmem:[%s10340_s28 + $0x300] sm:$0xff]  ;;  %v1317_v49 = vld [vmem:[%s10340_s28 + $0x310] sm:$0xff] }
  0x2c   : > { %v1319_v50 = vld [vmem:[%s10340_s28 + $0x320] sm:$0xff]  ;;  %1316 = vst [vmem:[%s10345_s29 + $0x180] sm:$0xff] %v1315_v48  ;;  %1318 = vst [vmem:[%s10345_s29 + $0x188] sm:$0xff] %v1317_v49  ;;  %v1321_v51 = vld [vmem:[%s10340_s28 + $0x330] sm:$0xff] }
  0x2d   : > { %1320 = vst [vmem:[%s10345_s29 + $0x190] sm:$0xff] %v1319_v50  ;;  %v1323_v52 = vld [vmem:[%s10340_s28 + $0x340] sm:$0xff]  ;;  %v1325_v53 = vld [vmem:[%s10340_s28 + $0x350] sm:$0xff]  ;;  %1322 = vst [vmem:[%s10345_s29 + $0x198] sm:$0xff] %v1321_v51 }
  0x2e   : > { %1324 = vst [vmem:[%s10345_s29 + $0x1a0] sm:$0xff] %v1323_v52  ;;  %1326 = vst [vmem:[%s10345_s29 + $0x1a8] sm:$0xff] %v1325_v53  ;;  %v1327_v54 = vld [vmem:[%s10340_s28 + $0x360] sm:$0xff]  ;;  %v1329_v55 = vld [vmem:[%s10340_s28 + $0x370] sm:$0xff] }
  0x2f   : > { %v1331_v56 = vld [vmem:[%s10340_s28 + $0x380] sm:$0xff]  ;;  %1328 = vst [vmem:[%s10345_s29 + $0x1b0] sm:$0xff] %v1327_v54  ;;  %1330 = vst [vmem:[%s10345_s29 + $0x1b8] sm:$0xff] %v1329_v55  ;;  %v1333_v57 = vld [vmem:[%s10340_s28 + $0x390] sm:$0xff] }
  0x30   : > { %1332 = vst [vmem:[%s10345_s29 + $0x1c0] sm:$0xff] %v1331_v56  ;;  %v1335_v58 = vld [vmem:[%s10340_s28 + $0x3a0] sm:$0xff]  ;;  %v1337_v59 = vld [vmem:[%s10340_s28 + $0x3b0] sm:$0xff]  ;;  %1334 = vst [vmem:[%s10345_s29 + $0x1c8] sm:$0xff] %v1333_v57 }
  0x31   : > { %1336 = vst [vmem:[%s10345_s29 + $0x1d0] sm:$0xff] %v1335_v58  ;;  %1338 = vst [vmem:[%s10345_s29 + $0x1d8] sm:$0xff] %v1337_v59  ;;  %v1339_v60 = vld [vmem:[%s10340_s28 + $0x3c0] sm:$0xff]  ;;  %v1341_v61 = vld [vmem:[%s10340_s28 + $0x3d0] sm:$0xff] }
  0x32   : > { %v1343_v62 = vld [vmem:[%s10340_s28 + $0x3e0] sm:$0xff]  ;;  %1340 = vst [vmem:[%s10345_s29 + $0x1e0] sm:$0xff] %v1339_v60  ;;  %1342 = vst [vmem:[%s10345_s29 + $0x1e8] sm:$0xff] %v1341_v61  ;;  %v1345_v63 = vld [vmem:[%s10340_s28 + $0x3f0] sm:$0xff] }
  0x33   : > { %1344 = vst [vmem:[%s10345_s29 + $0x1f0] sm:$0xff] %v1343_v62  ;;  %v1347_v0 = vld [vmem:[%s10340_s28 + $0x400] sm:$0xff]  ;;  %v1349_v1 = vld [vmem:[%s10340_s28 + $0x410] sm:$0xff]  ;;  %1346 = vst [vmem:[%s10345_s29 + $0x1f8] sm:$0xff] %v1345_v63 }
  0x34   : > { %1348 = vst [vmem:[%s10345_s29 + $0x200] sm:$0xff] %v1347_v0  ;;  %1350 = vst [vmem:[%s10345_s29 + $0x208] sm:$0xff] %v1349_v1  ;;  %v1351_v2 = vld [vmem:[%s10340_s28 + $0x420] sm:$0xff]  ;;  %v1353_v3 = vld [vmem:[%s10340_s28 + $0x430] sm:$0xff] }
  0x35   : > { %v1355_v4 = vld [vmem:[%s10340_s28 + $0x440] sm:$0xff]  ;;  %1352 = vst [vmem:[%s10345_s29 + $0x210] sm:$0xff] %v1351_v2  ;;  %1354 = vst [vmem:[%s10345_s29 + $0x218] sm:$0xff] %v1353_v3  ;;  %v1357_v5 = vld [vmem:[%s10340_s28 + $0x450] sm:$0xff] }
  0x36   : > { %1356 = vst [vmem:[%s10345_s29 + $0x220] sm:$0xff] %v1355_v4  ;;  %v1359_v6 = vld [vmem:[%s10340_s28 + $0x460] sm:$0xff]  ;;  %v1361_v7 = vld [vmem:[%s10340_s28 + $0x470] sm:$0xff]  ;;  %1358 = vst [vmem:[%s10345_s29 + $0x228] sm:$0xff] %v1357_v5 }
  0x37   : > { %1360 = vst [vmem:[%s10345_s29 + $0x230] sm:$0xff] %v1359_v6  ;;  %1362 = vst [vmem:[%s10345_s29 + $0x238] sm:$0xff] %v1361_v7  ;;  %v1363_v8 = vld [vmem:[%s10340_s28 + $0x480] sm:$0xff]  ;;  %v1365_v9 = vld [vmem:[%s10340_s28 + $0x490] sm:$0xff] }
  0x38   : > { %v1367_v10 = vld [vmem:[%s10340_s28 + $0x4a0] sm:$0xff]  ;;  %1364 = vst [vmem:[%s10345_s29 + $0x240] sm:$0xff] %v1363_v8  ;;  %1366 = vst [vmem:[%s10345_s29 + $0x248] sm:$0xff] %v1365_v9  ;;  %v1369_v11 = vld [vmem:[%s10340_s28 + $0x4b0] sm:$0xff] }
  0x39   : > { %1368 = vst [vmem:[%s10345_s29 + $0x250] sm:$0xff] %v1367_v10  ;;  %v1371_v12 = vld [vmem:[%s10340_s28 + $0x4c0] sm:$0xff]  ;;  %v1373_v13 = vld [vmem:[%s10340_s28 + $0x4d0] sm:$0xff]  ;;  %1370 = vst [vmem:[%s10345_s29 + $0x258] sm:$0xff] %v1369_v11 }
  0x3a   : > { %1372 = vst [vmem:[%s10345_s29 + $0x260] sm:$0xff] %v1371_v12  ;;  %1374 = vst [vmem:[%s10345_s29 + $0x268] sm:$0xff] %v1373_v13  ;;  %v1375_v14 = vld [vmem:[%s10340_s28 + $0x4e0] sm:$0xff]  ;;  %v1377_v15 = vld [vmem:[%s10340_s28 + $0x4f0] sm:$0xff] }
  0x3b   : > { %v1379_v16 = vld [vmem:[%s10340_s28 + $0x500] sm:$0xff]  ;;  %1376 = vst [vmem:[%s10345_s29 + $0x270] sm:$0xff] %v1375_v14  ;;  %1378 = vst [vmem:[%s10345_s29 + $0x278] sm:$0xff] %v1377_v15  ;;  %v1381_v17 = vld [vmem:[%s10340_s28 + $0x510] sm:$0xff] }
  0x3c   : > { %1380 = vst [vmem:[%s10345_s29 + $0x280] sm:$0xff] %v1379_v16  ;;  %v1383_v18 = vld [vmem:[%s10340_s28 + $0x520] sm:$0xff]  ;;  %v1385_v19 = vld [vmem:[%s10340_s28 + $0x530] sm:$0xff]  ;;  %1382 = vst [vmem:[%s10345_s29 + $0x288] sm:$0xff] %v1381_v17 }
  0x3d   : > { %1384 = vst [vmem:[%s10345_s29 + $0x290] sm:$0xff] %v1383_v18  ;;  %1386 = vst [vmem:[%s10345_s29 + $0x298] sm:$0xff] %v1385_v19  ;;  %v1387_v20 = vld [vmem:[%s10340_s28 + $0x540] sm:$0xff]  ;;  %v1389_v21 = vld [vmem:[%s10340_s28 + $0x550] sm:$0xff] }
  0x3e   : > { %v1391_v22 = vld [vmem:[%s10340_s28 + $0x560] sm:$0xff]  ;;  %1388 = vst [vmem:[%s10345_s29 + $0x2a0] sm:$0xff] %v1387_v20  ;;  %1390 = vst [vmem:[%s10345_s29 + $0x2a8] sm:$0xff] %v1389_v21  ;;  %v1393_v23 = vld [vmem:[%s10340_s28 + $0x570] sm:$0xff] }
  0x3f   : > { %1392 = vst [vmem:[%s10345_s29 + $0x2b0] sm:$0xff] %v1391_v22  ;;  %v1395_v24 = vld [vmem:[%s10340_s28 + $0x580] sm:$0xff]  ;;  %v1397_v25 = vld [vmem:[%s10340_s28 + $0x590] sm:$0xff]  ;;  %1394 = vst [vmem:[%s10345_s29 + $0x2b8] sm:$0xff] %v1393_v23 }
  0x40   : > { %1396 = vst [vmem:[%s10345_s29 + $0x2c0] sm:$0xff] %v1395_v24  ;;  %1398 = vst [vmem:[%s10345_s29 + $0x2c8] sm:$0xff] %v1397_v25  ;;  %v1399_v26 = vld [vmem:[%s10340_s28 + $0x5a0] sm:$0xff]  ;;  %v1401_v27 = vld [vmem:[%s10340_s28 + $0x5b0] sm:$0xff] }
  0x41   : > { %v1403_v28 = vld [vmem:[%s10340_s28 + $0x5c0] sm:$0xff]  ;;  %1400 = vst [vmem:[%s10345_s29 + $0x2d0] sm:$0xff] %v1399_v26  ;;  %1402 = vst [vmem:[%s10345_s29 + $0x2d8] sm:$0xff] %v1401_v27  ;;  %v1405_v29 = vld [vmem:[%s10340_s28 + $0x5d0] sm:$0xff] }
  0x42   : > { %1404 = vst [vmem:[%s10345_s29 + $0x2e0] sm:$0xff] %v1403_v28  ;;  %v1407_v30 = vld [vmem:[%s10340_s28 + $0x5e0] sm:$0xff]  ;;  %v1409_v31 = vld [vmem:[%s10340_s28 + $0x5f0] sm:$0xff]  ;;  %1406 = vst [vmem:[%s10345_s29 + $0x2e8] sm:$0xff] %v1405_v29 }
  0x43   : > { %1408 = vst [vmem:[%s10345_s29 + $0x2f0] sm:$0xff] %v1407_v30  ;;  %1410 = vst [vmem:[%s10345_s29 + $0x2f8] sm:$0xff] %v1409_v31  ;;  %v1411_v32 = vld [vmem:[%s10340_s28 + $0x600] sm:$0xff]  ;;  %v1413_v33 = vld [vmem:[%s10340_s28 + $0x610] sm:$0xff] }
  0x44   : > { %v1415_v34 = vld [vmem:[%s10340_s28 + $0x620] sm:$0xff]  ;;  %1412 = vst [vmem:[%s10345_s29 + $0x300] sm:$0xff] %v1411_v32  ;;  %1414 = vst [vmem:[%s10345_s29 + $0x308] sm:$0xff] %v1413_v33  ;;  %v1417_v35 = vld [vmem:[%s10340_s28 + $0x630] sm:$0xff] }
  0x45   : > { %1416 = vst [vmem:[%s10345_s29 + $0x310] sm:$0xff] %v1415_v34  ;;  %v1419_v36 = vld [vmem:[%s10340_s28 + $0x640] sm:$0xff]  ;;  %v1421_v37 = vld [vmem:[%s10340_s28 + $0x650] sm:$0xff]  ;;  %1418 = vst [vmem:[%s10345_s29 + $0x318] sm:$0xff] %v1417_v35 }
  0x46   : > { %1420 = vst [vmem:[%s10345_s29 + $0x320] sm:$0xff] %v1419_v36  ;;  %1422 = vst [vmem:[%s10345_s29 + $0x328] sm:$0xff] %v1421_v37  ;;  %v1423_v38 = vld [vmem:[%s10340_s28 + $0x660] sm:$0xff]  ;;  %v1425_v39 = vld [vmem:[%s10340_s28 + $0x670] sm:$0xff] }
  0x47   : > { %v1427_v40 = vld [vmem:[%s10340_s28 + $0x680] sm:$0xff]  ;;  %1424 = vst [vmem:[%s10345_s29 + $0x330] sm:$0xff] %v1423_v38  ;;  %1426 = vst [vmem:[%s10345_s29 + $0x338] sm:$0xff] %v1425_v39  ;;  %v1429_v41 = vld [vmem:[%s10340_s28 + $0x690] sm:$0xff] }
  0x48   : > { %1428 = vst [vmem:[%s10345_s29 + $0x340] sm:$0xff] %v1427_v40  ;;  %v1431_v42 = vld [vmem:[%s10340_s28 + $0x6a0] sm:$0xff]  ;;  %v1433_v43 = vld [vmem:[%s10340_s28 + $0x6b0] sm:$0xff]  ;;  %1430 = vst [vmem:[%s10345_s29 + $0x348] sm:$0xff] %v1429_v41 }
  0x49   : > { %1432 = vst [vmem:[%s10345_s29 + $0x350] sm:$0xff] %v1431_v42  ;;  %1434 = vst [vmem:[%s10345_s29 + $0x358] sm:$0xff] %v1433_v43  ;;  %v1435_v44 = vld [vmem:[%s10340_s28 + $0x6c0] sm:$0xff]  ;;  %v1437_v45 = vld [vmem:[%s10340_s28 + $0x6d0] sm:$0xff] }
  0x4a   : > { %v1439_v46 = vld [vmem:[%s10340_s28 + $0x6e0] sm:$0xff]  ;;  %1436 = vst [vmem:[%s10345_s29 + $0x360] sm:$0xff] %v1435_v44  ;;  %1438 = vst [vmem:[%s10345_s29 + $0x368] sm:$0xff] %v1437_v45  ;;  %v1441_v47 = vld [vmem:[%s10340_s28 + $0x6f0] sm:$0xff] }
  0x4b   : > { %1440 = vst [vmem:[%s10345_s29 + $0x370] sm:$0xff] %v1439_v46  ;;  %v1443_v48 = vld [vmem:[%s10340_s28 + $0x700] sm:$0xff]  ;;  %v1445_v49 = vld [vmem:[%s10340_s28 + $0x710] sm:$0xff]  ;;  %1442 = vst [vmem:[%s10345_s29 + $0x378] sm:$0xff] %v1441_v47 }
  0x4c   : > { %1444 = vst [vmem:[%s10345_s29 + $0x380] sm:$0xff] %v1443_v48  ;;  %1446 = vst [vmem:[%s10345_s29 + $0x388] sm:$0xff] %v1445_v49  ;;  %v1447_v50 = vld [vmem:[%s10340_s28 + $0x720] sm:$0xff]  ;;  %v1449_v51 = vld [vmem:[%s10340_s28 + $0x730] sm:$0xff] }
  0x4d   : > { %v1451_v52 = vld [vmem:[%s10340_s28 + $0x740] sm:$0xff]  ;;  %1448 = vst [vmem:[%s10345_s29 + $0x390] sm:$0xff] %v1447_v50  ;;  %1450 = vst [vmem:[%s10345_s29 + $0x398] sm:$0xff] %v1449_v51  ;;  %v1453_v53 = vld [vmem:[%s10340_s28 + $0x750] sm:$0xff] }
  0x4e   : > { %1452 = vst [vmem:[%s10345_s29 + $0x3a0] sm:$0xff] %v1451_v52  ;;  %v1455_v54 = vld [vmem:[%s10340_s28 + $0x760] sm:$0xff]  ;;  %v1457_v55 = vld [vmem:[%s10340_s28 + $0x770] sm:$0xff]  ;;  %1454 = vst [vmem:[%s10345_s29 + $0x3a8] sm:$0xff] %v1453_v53 }
  0x4f   : > { %1456 = vst [vmem:[%s10345_s29 + $0x3b0] sm:$0xff] %v1455_v54  ;;  %1458 = vst [vmem:[%s10345_s29 + $0x3b8] sm:$0xff] %v1457_v55  ;;  %v1459_v56 = vld [vmem:[%s10340_s28 + $0x780] sm:$0xff]  ;;  %v1461_v57 = vld [vmem:[%s10340_s28 + $0x790] sm:$0xff] }
  0x50   : > { %v1463_v58 = vld [vmem:[%s10340_s28 + $0x7a0] sm:$0xff]  ;;  %1460 = vst [vmem:[%s10345_s29 + $0x3c0] sm:$0xff] %v1459_v56  ;;  %1462 = vst [vmem:[%s10345_s29 + $0x3c8] sm:$0xff] %v1461_v57  ;;  %v1465_v59 = vld [vmem:[%s10340_s28 + $0x7b0] sm:$0xff] }
  0x51   : > { %1464 = vst [vmem:[%s10345_s29 + $0x3d0] sm:$0xff] %v1463_v58  ;;  %v1467_v60 = vld [vmem:[%s10340_s28 + $0x7c0] sm:$0xff]  ;;  %v1469_v61 = vld [vmem:[%s10340_s28 + $0x7d0] sm:$0xff]  ;;  %1466 = vst [vmem:[%s10345_s29 + $0x3d8] sm:$0xff] %v1465_v59 }
  0x52   : > { %1468 = vst [vmem:[%s10345_s29 + $0x3e0] sm:$0xff] %v1467_v60  ;;  %1470 = vst [vmem:[%s10345_s29 + $0x3e8] sm:$0xff] %v1469_v61  ;;  %v1471_v62 = vld [vmem:[%s10340_s28 + $0x7e0] sm:$0xff]  ;;  %v1473_v63 = vld [vmem:[%s10340_s28 + $0x7f0] sm:$0xff] }
  0x53   : > { %v1475_v0 = vld [vmem:[%s10340_s28 + $0x800] sm:$0xff]  ;;  %1472 = vst [vmem:[%s10345_s29 + $0x3f0] sm:$0xff] %v1471_v62  ;;  %1474 = vst [vmem:[%s10345_s29 + $0x3f8] sm:$0xff] %v1473_v63  ;;  %v1477_v1 = vld [vmem:[%s10340_s28 + $0x810] sm:$0xff] }
  0x54   : > { %1476 = vst [vmem:[%s10345_s29 + $0x400] sm:$0xff] %v1475_v0  ;;  %v1479_v2 = vld [vmem:[%s10340_s28 + $0x820] sm:$0xff]  ;;  %v1481_v3 = vld [vmem:[%s10340_s28 + $0x830] sm:$0xff]  ;;  %1478 = vst [vmem:[%s10345_s29 + $0x408] sm:$0xff] %v1477_v1 }
  0x55   : > { %1480 = vst [vmem:[%s10345_s29 + $0x410] sm:$0xff] %v1479_v2  ;;  %1482 = vst [vmem:[%s10345_s29 + $0x418] sm:$0xff] %v1481_v3  ;;  %v1483_v4 = vld [vmem:[%s10340_s28 + $0x840] sm:$0xff]  ;;  %v1485_v5 = vld [vmem:[%s10340_s28 + $0x850] sm:$0xff] }
  0x56   : > { %v1487_v6 = vld [vmem:[%s10340_s28 + $0x860] sm:$0xff]  ;;  %1484 = vst [vmem:[%s10345_s29 + $0x420] sm:$0xff] %v1483_v4  ;;  %1486 = vst [vmem:[%s10345_s29 + $0x428] sm:$0xff] %v1485_v5  ;;  %v1489_v7 = vld [vmem:[%s10340_s28 + $0x870] sm:$0xff] }
  0x57   : > { %1488 = vst [vmem:[%s10345_s29 + $0x430] sm:$0xff] %v1487_v6  ;;  %v1491_v8 = vld [vmem:[%s10340_s28 + $0x880] sm:$0xff]  ;;  %v1493_v9 = vld [vmem:[%s10340_s28 + $0x890] sm:$0xff]  ;;  %1490 = vst [vmem:[%s10345_s29 + $0x438] sm:$0xff] %v1489_v7 }
  0x58   : > { %1492 = vst [vmem:[%s10345_s29 + $0x440] sm:$0xff] %v1491_v8  ;;  %1494 = vst [vmem:[%s10345_s29 + $0x448] sm:$0xff] %v1493_v9  ;;  %v1495_v10 = vld [vmem:[%s10340_s28 + $0x8a0] sm:$0xff]  ;;  %v1497_v11 = vld [vmem:[%s10340_s28 + $0x8b0] sm:$0xff] }
  0x59   : > { %v1499_v12 = vld [vmem:[%s10340_s28 + $0x8c0] sm:$0xff]  ;;  %1496 = vst [vmem:[%s10345_s29 + $0x450] sm:$0xff] %v1495_v10  ;;  %1498 = vst [vmem:[%s10345_s29 + $0x458] sm:$0xff] %v1497_v11  ;;  %v1501_v13 = vld [vmem:[%s10340_s28 + $0x8d0] sm:$0xff] }
  0x5a   : > { %1500 = vst [vmem:[%s10345_s29 + $0x460] sm:$0xff] %v1499_v12  ;;  %v1503_v14 = vld [vmem:[%s10340_s28 + $0x8e0] sm:$0xff]  ;;  %v1505_v15 = vld [vmem:[%s10340_s28 + $0x8f0] sm:$0xff]  ;;  %1502 = vst [vmem:[%s10345_s29 + $0x468] sm:$0xff] %v1501_v13 }
  0x5b   : > { %1504 = vst [vmem:[%s10345_s29 + $0x470] sm:$0xff] %v1503_v14  ;;  %1506 = vst [vmem:[%s10345_s29 + $0x478] sm:$0xff] %v1505_v15  ;;  %v1507_v16 = vld [vmem:[%s10340_s28 + $0x900] sm:$0xff]  ;;  %v1509_v17 = vld [vmem:[%s10340_s28 + $0x910] sm:$0xff] }
  0x5c   : > { %v1511_v18 = vld [vmem:[%s10340_s28 + $0x920] sm:$0xff]  ;;  %1508 = vst [vmem:[%s10345_s29 + $0x480] sm:$0xff] %v1507_v16  ;;  %1510 = vst [vmem:[%s10345_s29 + $0x488] sm:$0xff] %v1509_v17  ;;  %v1513_v19 = vld [vmem:[%s10340_s28 + $0x930] sm:$0xff] }
  0x5d   : > { %1512 = vst [vmem:[%s10345_s29 + $0x490] sm:$0xff] %v1511_v18  ;;  %v1515_v20 = vld [vmem:[%s10340_s28 + $0x940] sm:$0xff]  ;;  %v1517_v21 = vld [vmem:[%s10340_s28 + $0x950] sm:$0xff]  ;;  %1514 = vst [vmem:[%s10345_s29 + $0x498] sm:$0xff] %v1513_v19 }
  0x5e   : > { %1516 = vst [vmem:[%s10345_s29 + $0x4a0] sm:$0xff] %v1515_v20  ;;  %1518 = vst [vmem:[%s10345_s29 + $0x4a8] sm:$0xff] %v1517_v21  ;;  %v1519_v22 = vld [vmem:[%s10340_s28 + $0x960] sm:$0xff]  ;;  %v1521_v23 = vld [vmem:[%s10340_s28 + $0x970] sm:$0xff] }
  0x5f   : > { %v1523_v24 = vld [vmem:[%s10340_s28 + $0x980] sm:$0xff]  ;;  %1520 = vst [vmem:[%s10345_s29 + $0x4b0] sm:$0xff] %v1519_v22  ;;  %1522 = vst [vmem:[%s10345_s29 + $0x4b8] sm:$0xff] %v1521_v23  ;;  %v1525_v25 = vld [vmem:[%s10340_s28 + $0x990] sm:$0xff] }
  0x60   : > { %1524 = vst [vmem:[%s10345_s29 + $0x4c0] sm:$0xff] %v1523_v24  ;;  %v1527_v26 = vld [vmem:[%s10340_s28 + $0x9a0] sm:$0xff]  ;;  %v1529_v27 = vld [vmem:[%s10340_s28 + $0x9b0] sm:$0xff]  ;;  %1526 = vst [vmem:[%s10345_s29 + $0x4c8] sm:$0xff] %v1525_v25 }
  0x61   : > { %1528 = vst [vmem:[%s10345_s29 + $0x4d0] sm:$0xff] %v1527_v26  ;;  %1530 = vst [vmem:[%s10345_s29 + $0x4d8] sm:$0xff] %v1529_v27  ;;  %v1531_v28 = vld [vmem:[%s10340_s28 + $0x9c0] sm:$0xff]  ;;  %v1533_v29 = vld [vmem:[%s10340_s28 + $0x9d0] sm:$0xff] }
  0x62   : > { %v1535_v30 = vld [vmem:[%s10340_s28 + $0x9e0] sm:$0xff]  ;;  %1532 = vst [vmem:[%s10345_s29 + $0x4e0] sm:$0xff] %v1531_v28  ;;  %1534 = vst [vmem:[%s10345_s29 + $0x4e8] sm:$0xff] %v1533_v29  ;;  %v1537_v31 = vld [vmem:[%s10340_s28 + $0x9f0] sm:$0xff] }
  0x63   : > { %1536 = vst [vmem:[%s10345_s29 + $0x4f0] sm:$0xff] %v1535_v30  ;;  %v1539_v32 = vld [vmem:[%s10340_s28 + $0xa00] sm:$0xff]  ;;  %v1541_v33 = vld [vmem:[%s10340_s28 + $0xa10] sm:$0xff]  ;;  %1538 = vst [vmem:[%s10345_s29 + $0x4f8] sm:$0xff] %v1537_v31 }
  0x64   : > { %1540 = vst [vmem:[%s10345_s29 + $0x500] sm:$0xff] %v1539_v32  ;;  %1542 = vst [vmem:[%s10345_s29 + $0x508] sm:$0xff] %v1541_v33  ;;  %v1543_v34 = vld [vmem:[%s10340_s28 + $0xa20] sm:$0xff]  ;;  %v1545_v35 = vld [vmem:[%s10340_s28 + $0xa30] sm:$0xff] }
  0x65   : > { %v1547_v36 = vld [vmem:[%s10340_s28 + $0xa40] sm:$0xff]  ;;  %1544 = vst [vmem:[%s10345_s29 + $0x510] sm:$0xff] %v1543_v34  ;;  %1546 = vst [vmem:[%s10345_s29 + $0x518] sm:$0xff] %v1545_v35  ;;  %v1549_v37 = vld [vmem:[%s10340_s28 + $0xa50] sm:$0xff] }
  0x66   : > { %1548 = vst [vmem:[%s10345_s29 + $0x520] sm:$0xff] %v1547_v36  ;;  %v1551_v38 = vld [vmem:[%s10340_s28 + $0xa60] sm:$0xff]  ;;  %v1553_v39 = vld [vmem:[%s10340_s28 + $0xa70] sm:$0xff]  ;;  %1550 = vst [vmem:[%s10345_s29 + $0x528] sm:$0xff] %v1549_v37 }
  0x67   : > { %1552 = vst [vmem:[%s10345_s29 + $0x530] sm:$0xff] %v1551_v38  ;;  %1554 = vst [vmem:[%s10345_s29 + $0x538] sm:$0xff] %v1553_v39  ;;  %v1555_v40 = vld [vmem:[%s10340_s28 + $0xa80] sm:$0xff]  ;;  %v1557_v41 = vld [vmem:[%s10340_s28 + $0xa90] sm:$0xff] }
  0x68   : > { %v1559_v42 = vld [vmem:[%s10340_s28 + $0xaa0] sm:$0xff]  ;;  %1556 = vst [vmem:[%s10345_s29 + $0x540] sm:$0xff] %v1555_v40  ;;  %1558 = vst [vmem:[%s10345_s29 + $0x548] sm:$0xff] %v1557_v41  ;;  %v1561_v43 = vld [vmem:[%s10340_s28 + $0xab0] sm:$0xff] }
  0x69   : > { %1560 = vst [vmem:[%s10345_s29 + $0x550] sm:$0xff] %v1559_v42  ;;  %v1563_v44 = vld [vmem:[%s10340_s28 + $0xac0] sm:$0xff]  ;;  %v1565_v45 = vld [vmem:[%s10340_s28 + $0xad0] sm:$0xff]  ;;  %1562 = vst [vmem:[%s10345_s29 + $0x558] sm:$0xff] %v1561_v43 }
  0x6a   : > { %1564 = vst [vmem:[%s10345_s29 + $0x560] sm:$0xff] %v1563_v44  ;;  %1566 = vst [vmem:[%s10345_s29 + $0x568] sm:$0xff] %v1565_v45  ;;  %v1567_v46 = vld [vmem:[%s10340_s28 + $0xae0] sm:$0xff]  ;;  %v1569_v47 = vld [vmem:[%s10340_s28 + $0xaf0] sm:$0xff] }
  0x6b   : > { %v1571_v48 = vld [vmem:[%s10340_s28 + $0xb00] sm:$0xff]  ;;  %1568 = vst [vmem:[%s10345_s29 + $0x570] sm:$0xff] %v1567_v46  ;;  %1570 = vst [vmem:[%s10345_s29 + $0x578] sm:$0xff] %v1569_v47  ;;  %v1573_v49 = vld [vmem:[%s10340_s28 + $0xb10] sm:$0xff] }
  0x6c   : > { %1572 = vst [vmem:[%s10345_s29 + $0x580] sm:$0xff] %v1571_v48  ;;  %v1575_v50 = vld [vmem:[%s10340_s28 + $0xb20] sm:$0xff]  ;;  %v1577_v51 = vld [vmem:[%s10340_s28 + $0xb30] sm:$0xff]  ;;  %1574 = vst [vmem:[%s10345_s29 + $0x588] sm:$0xff] %v1573_v49 }
  0x6d   : > { %1576 = vst [vmem:[%s10345_s29 + $0x590] sm:$0xff] %v1575_v50  ;;  %1578 = vst [vmem:[%s10345_s29 + $0x598] sm:$0xff] %v1577_v51  ;;  %v1579_v52 = vld [vmem:[%s10340_s28 + $0xb40] sm:$0xff]  ;;  %v1581_v53 = vld [vmem:[%s10340_s28 + $0xb50] sm:$0xff] }
  0x6e   : > { %v1583_v54 = vld [vmem:[%s10340_s28 + $0xb60] sm:$0xff]  ;;  %1580 = vst [vmem:[%s10345_s29 + $0x5a0] sm:$0xff] %v1579_v52  ;;  %1582 = vst [vmem:[%s10345_s29 + $0x5a8] sm:$0xff] %v1581_v53  ;;  %v1585_v55 = vld [vmem:[%s10340_s28 + $0xb70] sm:$0xff] }
  0x6f   : > { %1584 = vst [vmem:[%s10345_s29 + $0x5b0] sm:$0xff] %v1583_v54  ;;  %v1587_v56 = vld [vmem:[%s10340_s28 + $0xb80] sm:$0xff]  ;;  %v1589_v57 = vld [vmem:[%s10340_s28 + $0xb90] sm:$0xff]  ;;  %1586 = vst [vmem:[%s10345_s29 + $0x5b8] sm:$0xff] %v1585_v55 }
  0x70   : > { %1588 = vst [vmem:[%s10345_s29 + $0x5c0] sm:$0xff] %v1587_v56  ;;  %1590 = vst [vmem:[%s10345_s29 + $0x5c8] sm:$0xff] %v1589_v57  ;;  %v1591_v58 = vld [vmem:[%s10340_s28 + $0xba0] sm:$0xff]  ;;  %v1593_v59 = vld [vmem:[%s10340_s28 + $0xbb0] sm:$0xff] }
  0x71   : > { %v1595_v60 = vld [vmem:[%s10340_s28 + $0xbc0] sm:$0xff]  ;;  %1592 = vst [vmem:[%s10345_s29 + $0x5d0] sm:$0xff] %v1591_v58  ;;  %1594 = vst [vmem:[%s10345_s29 + $0x5d8] sm:$0xff] %v1593_v59  ;;  %v1597_v61 = vld [vmem:[%s10340_s28 + $0xbd0] sm:$0xff] }
  0x72   : > { %1596 = vst [vmem:[%s10345_s29 + $0x5e0] sm:$0xff] %v1595_v60  ;;  %v1599_v62 = vld [vmem:[%s10340_s28 + $0xbe0] sm:$0xff]  ;;  %v1601_v63 = vld [vmem:[%s10340_s28 + $0xbf0] sm:$0xff]  ;;  %1598 = vst [vmem:[%s10345_s29 + $0x5e8] sm:$0xff] %v1597_v61 }
  0x73   : > { %1600 = vst [vmem:[%s10345_s29 + $0x5f0] sm:$0xff] %v1599_v62  ;;  %1602 = vst [vmem:[%s10345_s29 + $0x5f8] sm:$0xff] %v1601_v63  ;;  %v1603_v0 = vld [vmem:[%s10340_s28 + $0xc00] sm:$0xff]  ;;  %v1605_v1 = vld [vmem:[%s10340_s28 + $0xc10] sm:$0xff] }
  0x74   : > { %v1607_v2 = vld [vmem:[%s10340_s28 + $0xc20] sm:$0xff]  ;;  %1604 = vst [vmem:[%s10345_s29 + $0x600] sm:$0xff] %v1603_v0  ;;  %1606 = vst [vmem:[%s10345_s29 + $0x608] sm:$0xff] %v1605_v1  ;;  %v1609_v3 = vld [vmem:[%s10340_s28 + $0xc30] sm:$0xff] }
  0x75   : > { %1608 = vst [vmem:[%s10345_s29 + $0x610] sm:$0xff] %v1607_v2  ;;  %v1611_v4 = vld [vmem:[%s10340_s28 + $0xc40] sm:$0xff]  ;;  %v1613_v5 = vld [vmem:[%s10340_s28 + $0xc50] sm:$0xff]  ;;  %1610 = vst [vmem:[%s10345_s29 + $0x618] sm:$0xff] %v1609_v3 }
  0x76   : > { %1612 = vst [vmem:[%s10345_s29 + $0x620] sm:$0xff] %v1611_v4  ;;  %1614 = vst [vmem:[%s10345_s29 + $0x628] sm:$0xff] %v1613_v5  ;;  %v1615_v6 = vld [vmem:[%s10340_s28 + $0xc60] sm:$0xff]  ;;  %v1617_v7 = vld [vmem:[%s10340_s28 + $0xc70] sm:$0xff] }
  0x77   : > { %v1619_v8 = vld [vmem:[%s10340_s28 + $0xc80] sm:$0xff]  ;;  %1616 = vst [vmem:[%s10345_s29 + $0x630] sm:$0xff] %v1615_v6  ;;  %1618 = vst [vmem:[%s10345_s29 + $0x638] sm:$0xff] %v1617_v7  ;;  %v1621_v9 = vld [vmem:[%s10340_s28 + $0xc90] sm:$0xff] }
  0x78   : > { %1620 = vst [vmem:[%s10345_s29 + $0x640] sm:$0xff] %v1619_v8  ;;  %v1623_v10 = vld [vmem:[%s10340_s28 + $0xca0] sm:$0xff]  ;;  %v1625_v11 = vld [vmem:[%s10340_s28 + $0xcb0] sm:$0xff]  ;;  %1622 = vst [vmem:[%s10345_s29 + $0x648] sm:$0xff] %v1621_v9 }
  0x79   : > { %1624 = vst [vmem:[%s10345_s29 + $0x650] sm:$0xff] %v1623_v10  ;;  %1626 = vst [vmem:[%s10345_s29 + $0x658] sm:$0xff] %v1625_v11  ;;  %v1627_v12 = vld [vmem:[%s10340_s28 + $0xcc0] sm:$0xff]  ;;  %v1629_v13 = vld [vmem:[%s10340_s28 + $0xcd0] sm:$0xff] }
  0x7a   : > { %v1631_v14 = vld [vmem:[%s10340_s28 + $0xce0] sm:$0xff]  ;;  %1628 = vst [vmem:[%s10345_s29 + $0x660] sm:$0xff] %v1627_v12  ;;  %1630 = vst [vmem:[%s10345_s29 + $0x668] sm:$0xff] %v1629_v13  ;;  %v1633_v15 = vld [vmem:[%s10340_s28 + $0xcf0] sm:$0xff] }
  0x7b   : > { %1632 = vst [vmem:[%s10345_s29 + $0x670] sm:$0xff] %v1631_v14  ;;  %v1635_v16 = vld [vmem:[%s10340_s28 + $0xd00] sm:$0xff]  ;;  %v1637_v17 = vld [vmem:[%s10340_s28 + $0xd10] sm:$0xff]  ;;  %1634 = vst [vmem:[%s10345_s29 + $0x678] sm:$0xff] %v1633_v15 }
  0x7c   : > { %1636 = vst [vmem:[%s10345_s29 + $0x680] sm:$0xff] %v1635_v16  ;;  %1638 = vst [vmem:[%s10345_s29 + $0x688] sm:$0xff] %v1637_v17  ;;  %v1639_v18 = vld [vmem:[%s10340_s28 + $0xd20] sm:$0xff]  ;;  %v1641_v19 = vld [vmem:[%s10340_s28 + $0xd30] sm:$0xff] }
  0x7d   : > { %v1643_v20 = vld [vmem:[%s10340_s28 + $0xd40] sm:$0xff]  ;;  %1640 = vst [vmem:[%s10345_s29 + $0x690] sm:$0xff] %v1639_v18  ;;  %1642 = vst [vmem:[%s10345_s29 + $0x698] sm:$0xff] %v1641_v19  ;;  %v1645_v21 = vld [vmem:[%s10340_s28 + $0xd50] sm:$0xff] }
  0x7e   : > { %1644 = vst [vmem:[%s10345_s29 + $0x6a0] sm:$0xff] %v1643_v20  ;;  %v1647_v22 = vld [vmem:[%s10340_s28 + $0xd60] sm:$0xff]  ;;  %v1649_v23 = vld [vmem:[%s10340_s28 + $0xd70] sm:$0xff]  ;;  %1646 = vst [vmem:[%s10345_s29 + $0x6a8] sm:$0xff] %v1645_v21 }
  0x7f   : > { %1648 = vst [vmem:[%s10345_s29 + $0x6b0] sm:$0xff] %v1647_v22  ;;  %1650 = vst [vmem:[%s10345_s29 + $0x6b8] sm:$0xff] %v1649_v23  ;;  %v1651_v24 = vld [vmem:[%s10340_s28 + $0xd80] sm:$0xff]  ;;  %v1653_v25 = vld [vmem:[%s10340_s28 + $0xd90] sm:$0xff] }
  0x80   : > { %v1655_v26 = vld [vmem:[%s10340_s28 + $0xda0] sm:$0xff]  ;;  %1652 = vst [vmem:[%s10345_s29 + $0x6c0] sm:$0xff] %v1651_v24  ;;  %1654 = vst [vmem:[%s10345_s29 + $0x6c8] sm:$0xff] %v1653_v25  ;;  %v1657_v27 = vld [vmem:[%s10340_s28 + $0xdb0] sm:$0xff] }
  0x81   : > { %1656 = vst [vmem:[%s10345_s29 + $0x6d0] sm:$0xff] %v1655_v26  ;;  %v1659_v28 = vld [vmem:[%s10340_s28 + $0xdc0] sm:$0xff]  ;;  %v1661_v29 = vld [vmem:[%s10340_s28 + $0xdd0] sm:$0xff]  ;;  %1658 = vst [vmem:[%s10345_s29 + $0x6d8] sm:$0xff] %v1657_v27 }
  0x82   : > { %1660 = vst [vmem:[%s10345_s29 + $0x6e0] sm:$0xff] %v1659_v28  ;;  %1662 = vst [vmem:[%s10345_s29 + $0x6e8] sm:$0xff] %v1661_v29  ;;  %v1663_v30 = vld [vmem:[%s10340_s28 + $0xde0] sm:$0xff]  ;;  %v1665_v31 = vld [vmem:[%s10340_s28 + $0xdf0] sm:$0xff] }
  0x83   : > { %v1667_v32 = vld [vmem:[%s10340_s28 + $0xe00] sm:$0xff]  ;;  %1664 = vst [vmem:[%s10345_s29 + $0x6f0] sm:$0xff] %v1663_v30  ;;  %1666 = vst [vmem:[%s10345_s29 + $0x6f8] sm:$0xff] %v1665_v31  ;;  %v1669_v33 = vld [vmem:[%s10340_s28 + $0xe10] sm:$0xff] }
  0x84   : > { %1668 = vst [vmem:[%s10345_s29 + $0x700] sm:$0xff] %v1667_v32  ;;  %v1671_v34 = vld [vmem:[%s10340_s28 + $0xe20] sm:$0xff]  ;;  %v1673_v35 = vld [vmem:[%s10340_s28 + $0xe30] sm:$0xff]  ;;  %1670 = vst [vmem:[%s10345_s29 + $0x708] sm:$0xff] %v1669_v33 }
  0x85   : > { %1672 = vst [vmem:[%s10345_s29 + $0x710] sm:$0xff] %v1671_v34  ;;  %1674 = vst [vmem:[%s10345_s29 + $0x718] sm:$0xff] %v1673_v35  ;;  %v1675_v36 = vld [vmem:[%s10340_s28 + $0xe40] sm:$0xff]  ;;  %v1677_v37 = vld [vmem:[%s10340_s28 + $0xe50] sm:$0xff] }
  0x86   : > { %v1679_v38 = vld [vmem:[%s10340_s28 + $0xe60] sm:$0xff]  ;;  %1676 = vst [vmem:[%s10345_s29 + $0x720] sm:$0xff] %v1675_v36  ;;  %1678 = vst [vmem:[%s10345_s29 + $0x728] sm:$0xff] %v1677_v37  ;;  %v1681_v39 = vld [vmem:[%s10340_s28 + $0xe70] sm:$0xff] }
  0x87   : > { %1680 = vst [vmem:[%s10345_s29 + $0x730] sm:$0xff] %v1679_v38  ;;  %v1683_v40 = vld [vmem:[%s10340_s28 + $0xe80] sm:$0xff]  ;;  %v1685_v41 = vld [vmem:[%s10340_s28 + $0xe90] sm:$0xff]  ;;  %1682 = vst [vmem:[%s10345_s29 + $0x738] sm:$0xff] %v1681_v39 }
  0x88   : > { %1684 = vst [vmem:[%s10345_s29 + $0x740] sm:$0xff] %v1683_v40  ;;  %1686 = vst [vmem:[%s10345_s29 + $0x748] sm:$0xff] %v1685_v41  ;;  %v1687_v42 = vld [vmem:[%s10340_s28 + $0xea0] sm:$0xff]  ;;  %v1689_v43 = vld [vmem:[%s10340_s28 + $0xeb0] sm:$0xff] }
  0x89   : > { %v1691_v44 = vld [vmem:[%s10340_s28 + $0xec0] sm:$0xff]  ;;  %1688 = vst [vmem:[%s10345_s29 + $0x750] sm:$0xff] %v1687_v42  ;;  %1690 = vst [vmem:[%s10345_s29 + $0x758] sm:$0xff] %v1689_v43  ;;  %v1693_v45 = vld [vmem:[%s10340_s28 + $0xed0] sm:$0xff] }
  0x8a   : > { %1692 = vst [vmem:[%s10345_s29 + $0x760] sm:$0xff] %v1691_v44  ;;  %v1695_v46 = vld [vmem:[%s10340_s28 + $0xee0] sm:$0xff]  ;;  %v1697_v47 = vld [vmem:[%s10340_s28 + $0xef0] sm:$0xff]  ;;  %1694 = vst [vmem:[%s10345_s29 + $0x768] sm:$0xff] %v1693_v45 }
  0x8b   : > { %1696 = vst [vmem:[%s10345_s29 + $0x770] sm:$0xff] %v1695_v46  ;;  %1698 = vst [vmem:[%s10345_s29 + $0x778] sm:$0xff] %v1697_v47  ;;  %v1699_v48 = vld [vmem:[%s10340_s28 + $0xf00] sm:$0xff]  ;;  %v1701_v49 = vld [vmem:[%s10340_s28 + $0xf10] sm:$0xff] }
  0x8c   : > { %v1703_v50 = vld [vmem:[%s10340_s28 + $0xf20] sm:$0xff]  ;;  %1700 = vst [vmem:[%s10345_s29 + $0x780] sm:$0xff] %v1699_v48  ;;  %1702 = vst [vmem:[%s10345_s29 + $0x788] sm:$0xff] %v1701_v49  ;;  %v1705_v51 = vld [vmem:[%s10340_s28 + $0xf30] sm:$0xff] }
  0x8d   : > { %1704 = vst [vmem:[%s10345_s29 + $0x790] sm:$0xff] %v1703_v50  ;;  %v1707_v52 = vld [vmem:[%s10340_s28 + $0xf40] sm:$0xff]  ;;  %v1709_v53 = vld [vmem:[%s10340_s28 + $0xf50] sm:$0xff]  ;;  %1706 = vst [vmem:[%s10345_s29 + $0x798] sm:$0xff] %v1705_v51 }
  0x8e   : > { %1708 = vst [vmem:[%s10345_s29 + $0x7a0] sm:$0xff] %v1707_v52  ;;  %1710 = vst [vmem:[%s10345_s29 + $0x7a8] sm:$0xff] %v1709_v53  ;;  %v1711_v54 = vld [vmem:[%s10340_s28 + $0xf60] sm:$0xff]  ;;  %v1713_v55 = vld [vmem:[%s10340_s28 + $0xf70] sm:$0xff] }
  0x8f   : > { %v1715_v56 = vld [vmem:[%s10340_s28 + $0xf80] sm:$0xff]  ;;  %1712 = vst [vmem:[%s10345_s29 + $0x7b0] sm:$0xff] %v1711_v54  ;;  %1714 = vst [vmem:[%s10345_s29 + $0x7b8] sm:$0xff] %v1713_v55  ;;  %v1717_v57 = vld [vmem:[%s10340_s28 + $0xf90] sm:$0xff] }
  0x90   : > { %1716 = vst [vmem:[%s10345_s29 + $0x7c0] sm:$0xff] %v1715_v56  ;;  %v1719_v58 = vld [vmem:[%s10340_s28 + $0xfa0] sm:$0xff]  ;;  %v1721_v59 = vld [vmem:[%s10340_s28 + $0xfb0] sm:$0xff]  ;;  %1718 = vst [vmem:[%s10345_s29 + $0x7c8] sm:$0xff] %v1717_v57 }
  0x91   : > { %1720 = vst [vmem:[%s10345_s29 + $0x7d0] sm:$0xff] %v1719_v58  ;;  %1722 = vst [vmem:[%s10345_s29 + $0x7d8] sm:$0xff] %v1721_v59  ;;  %v1723_v60 = vld [vmem:[%s10340_s28 + $0xfc0] sm:$0xff]  ;;  %v1725_v61 = vld [vmem:[%s10340_s28 + $0xfd0] sm:$0xff] }
  0x92   : > { %v1727_v62 = vld [vmem:[%s10340_s28 + $0xfe0] sm:$0xff]  ;;  %1724 = vst [vmem:[%s10345_s29 + $0x7e0] sm:$0xff] %v1723_v60  ;;  %1726 = vst [vmem:[%s10345_s29 + $0x7e8] sm:$0xff] %v1725_v61  ;;  %v1729_v63 = vld [vmem:[%s10340_s28 + $0xff0] sm:$0xff] }
  0x93   : > { %1728 = vst [vmem:[%s10345_s29 + $0x7f0] sm:$0xff] %v1727_v62  ;;  %v1731_v0 = vld [vmem:[%s10340_s28 + $0x1000] sm:$0xff]  ;;  %v1733_v1 = vld [vmem:[%s10340_s28 + $0x1010] sm:$0xff]  ;;  %1730 = vst [vmem:[%s10345_s29 + $0x7f8] sm:$0xff] %v1729_v63 }
  0x94   : > { %1732 = vst [vmem:[%s10345_s29 + $0x800] sm:$0xff] %v1731_v0  ;;  %1734 = vst [vmem:[%s10345_s29 + $0x808] sm:$0xff] %v1733_v1  ;;  %v1735_v2 = vld [vmem:[%s10340_s28 + $0x1020] sm:$0xff]  ;;  %v1737_v3 = vld [vmem:[%s10340_s28 + $0x1030] sm:$0xff] }
  0x95   : > { %v1739_v4 = vld [vmem:[%s10340_s28 + $0x1040] sm:$0xff]  ;;  %1736 = vst [vmem:[%s10345_s29 + $0x810] sm:$0xff] %v1735_v2  ;;  %1738 = vst [vmem:[%s10345_s29 + $0x818] sm:$0xff] %v1737_v3  ;;  %v1741_v5 = vld [vmem:[%s10340_s28 + $0x1050] sm:$0xff] }
  0x96   : > { %1740 = vst [vmem:[%s10345_s29 + $0x820] sm:$0xff] %v1739_v4  ;;  %v1743_v6 = vld [vmem:[%s10340_s28 + $0x1060] sm:$0xff]  ;;  %v1745_v7 = vld [vmem:[%s10340_s28 + $0x1070] sm:$0xff]  ;;  %1742 = vst [vmem:[%s10345_s29 + $0x828] sm:$0xff] %v1741_v5 }
  0x97   : > { %1744 = vst [vmem:[%s10345_s29 + $0x830] sm:$0xff] %v1743_v6  ;;  %1746 = vst [vmem:[%s10345_s29 + $0x838] sm:$0xff] %v1745_v7  ;;  %v1747_v8 = vld [vmem:[%s10340_s28 + $0x1080] sm:$0xff]  ;;  %v1749_v9 = vld [vmem:[%s10340_s28 + $0x1090] sm:$0xff] }
  0x98   : > { %v1751_v10 = vld [vmem:[%s10340_s28 + $0x10a0] sm:$0xff]  ;;  %1748 = vst [vmem:[%s10345_s29 + $0x840] sm:$0xff] %v1747_v8  ;;  %1750 = vst [vmem:[%s10345_s29 + $0x848] sm:$0xff] %v1749_v9  ;;  %v1753_v11 = vld [vmem:[%s10340_s28 + $0x10b0] sm:$0xff] }
  0x99   : > { %1752 = vst [vmem:[%s10345_s29 + $0x850] sm:$0xff] %v1751_v10  ;;  %v1755_v12 = vld [vmem:[%s10340_s28 + $0x10c0] sm:$0xff]  ;;  %v1757_v13 = vld [vmem:[%s10340_s28 + $0x10d0] sm:$0xff]  ;;  %1754 = vst [vmem:[%s10345_s29 + $0x858] sm:$0xff] %v1753_v11 }
  0x9a   : > { %1756 = vst [vmem:[%s10345_s29 + $0x860] sm:$0xff] %v1755_v12  ;;  %1758 = vst [vmem:[%s10345_s29 + $0x868] sm:$0xff] %v1757_v13  ;;  %v1759_v14 = vld [vmem:[%s10340_s28 + $0x10e0] sm:$0xff]  ;;  %v1761_v15 = vld [vmem:[%s10340_s28 + $0x10f0] sm:$0xff] }
  0x9b   : > { %v1763_v16 = vld [vmem:[%s10340_s28 + $0x1100] sm:$0xff]  ;;  %1760 = vst [vmem:[%s10345_s29 + $0x870] sm:$0xff] %v1759_v14  ;;  %1762 = vst [vmem:[%s10345_s29 + $0x878] sm:$0xff] %v1761_v15  ;;  %v1765_v17 = vld [vmem:[%s10340_s28 + $0x1110] sm:$0xff] }
  0x9c   : > { %1764 = vst [vmem:[%s10345_s29 + $0x880] sm:$0xff] %v1763_v16  ;;  %v1767_v18 = vld [vmem:[%s10340_s28 + $0x1120] sm:$0xff]  ;;  %v1769_v19 = vld [vmem:[%s10340_s28 + $0x1130] sm:$0xff]  ;;  %1766 = vst [vmem:[%s10345_s29 + $0x888] sm:$0xff] %v1765_v17 }
  0x9d   : > { %1768 = vst [vmem:[%s10345_s29 + $0x890] sm:$0xff] %v1767_v18  ;;  %1770 = vst [vmem:[%s10345_s29 + $0x898] sm:$0xff] %v1769_v19  ;;  %v1771_v20 = vld [vmem:[%s10340_s28 + $0x1140] sm:$0xff]  ;;  %v1773_v21 = vld [vmem:[%s10340_s28 + $0x1150] sm:$0xff] }
  0x9e   : > { %v1775_v22 = vld [vmem:[%s10340_s28 + $0x1160] sm:$0xff]  ;;  %1772 = vst [vmem:[%s10345_s29 + $0x8a0] sm:$0xff] %v1771_v20  ;;  %1774 = vst [vmem:[%s10345_s29 + $0x8a8] sm:$0xff] %v1773_v21  ;;  %v1777_v23 = vld [vmem:[%s10340_s28 + $0x1170] sm:$0xff] }
  0x9f   : > { %1776 = vst [vmem:[%s10345_s29 + $0x8b0] sm:$0xff] %v1775_v22  ;;  %v1779_v24 = vld [vmem:[%s10340_s28 + $0x1180] sm:$0xff]  ;;  %v1781_v25 = vld [vmem:[%s10340_s28 + $0x1190] sm:$0xff]  ;;  %1778 = vst [vmem:[%s10345_s29 + $0x8b8] sm:$0xff] %v1777_v23 }
  0xa0   : > { %1780 = vst [vmem:[%s10345_s29 + $0x8c0] sm:$0xff] %v1779_v24  ;;  %1782 = vst [vmem:[%s10345_s29 + $0x8c8] sm:$0xff] %v1781_v25  ;;  %v1783_v26 = vld [vmem:[%s10340_s28 + $0x11a0] sm:$0xff]  ;;  %v1785_v27 = vld [vmem:[%s10340_s28 + $0x11b0] sm:$0xff] }
  0xa1   : > { %v1787_v28 = vld [vmem:[%s10340_s28 + $0x11c0] sm:$0xff]  ;;  %1784 = vst [vmem:[%s10345_s29 + $0x8d0] sm:$0xff] %v1783_v26  ;;  %1786 = vst [vmem:[%s10345_s29 + $0x8d8] sm:$0xff] %v1785_v27  ;;  %v1789_v29 = vld [vmem:[%s10340_s28 + $0x11d0] sm:$0xff] }
  0xa2   : > { %1788 = vst [vmem:[%s10345_s29 + $0x8e0] sm:$0xff] %v1787_v28  ;;  %v1791_v30 = vld [vmem:[%s10340_s28 + $0x11e0] sm:$0xff]  ;;  %v1793_v31 = vld [vmem:[%s10340_s28 + $0x11f0] sm:$0xff]  ;;  %1790 = vst [vmem:[%s10345_s29 + $0x8e8] sm:$0xff] %v1789_v29 }
  0xa3   : > { %1792 = vst [vmem:[%s10345_s29 + $0x8f0] sm:$0xff] %v1791_v30  ;;  %1794 = vst [vmem:[%s10345_s29 + $0x8f8] sm:$0xff] %v1793_v31  ;;  %v1795_v32 = vld [vmem:[%s10340_s28 + $0x1200] sm:$0xff]  ;;  %v1797_v33 = vld [vmem:[%s10340_s28 + $0x1210] sm:$0xff] }
  0xa4   : > { %v1799_v34 = vld [vmem:[%s10340_s28 + $0x1220] sm:$0xff]  ;;  %1796 = vst [vmem:[%s10345_s29 + $0x900] sm:$0xff] %v1795_v32  ;;  %1798 = vst [vmem:[%s10345_s29 + $0x908] sm:$0xff] %v1797_v33  ;;  %v1801_v35 = vld [vmem:[%s10340_s28 + $0x1230] sm:$0xff] }
  0xa5   : > { %1800 = vst [vmem:[%s10345_s29 + $0x910] sm:$0xff] %v1799_v34  ;;  %v1803_v36 = vld [vmem:[%s10340_s28 + $0x1240] sm:$0xff]  ;;  %v1805_v37 = vld [vmem:[%s10340_s28 + $0x1250] sm:$0xff]  ;;  %1802 = vst [vmem:[%s10345_s29 + $0x918] sm:$0xff] %v1801_v35 }
  0xa6   : > { %1804 = vst [vmem:[%s10345_s29 + $0x920] sm:$0xff] %v1803_v36  ;;  %1806 = vst [vmem:[%s10345_s29 + $0x928] sm:$0xff] %v1805_v37  ;;  %v1807_v38 = vld [vmem:[%s10340_s28 + $0x1260] sm:$0xff]  ;;  %v1809_v39 = vld [vmem:[%s10340_s28 + $0x1270] sm:$0xff] }
  0xa7   : > { %v1811_v40 = vld [vmem:[%s10340_s28 + $0x1280] sm:$0xff]  ;;  %1808 = vst [vmem:[%s10345_s29 + $0x930] sm:$0xff] %v1807_v38  ;;  %1810 = vst [vmem:[%s10345_s29 + $0x938] sm:$0xff] %v1809_v39  ;;  %v1813_v41 = vld [vmem:[%s10340_s28 + $0x1290] sm:$0xff] }
  0xa8   : > { %1812 = vst [vmem:[%s10345_s29 + $0x940] sm:$0xff] %v1811_v40  ;;  %v1815_v42 = vld [vmem:[%s10340_s28 + $0x12a0] sm:$0xff]  ;;  %v1817_v43 = vld [vmem:[%s10340_s28 + $0x12b0] sm:$0xff]  ;;  %1814 = vst [vmem:[%s10345_s29 + $0x948] sm:$0xff] %v1813_v41 }
  0xa9   : > { %1816 = vst [vmem:[%s10345_s29 + $0x950] sm:$0xff] %v1815_v42  ;;  %1818 = vst [vmem:[%s10345_s29 + $0x958] sm:$0xff] %v1817_v43  ;;  %v1819_v44 = vld [vmem:[%s10340_s28 + $0x12c0] sm:$0xff]  ;;  %v1821_v45 = vld [vmem:[%s10340_s28 + $0x12d0] sm:$0xff] }
  0xaa   : > { %v1823_v46 = vld [vmem:[%s10340_s28 + $0x12e0] sm:$0xff]  ;;  %1820 = vst [vmem:[%s10345_s29 + $0x960] sm:$0xff] %v1819_v44  ;;  %1822 = vst [vmem:[%s10345_s29 + $0x968] sm:$0xff] %v1821_v45  ;;  %v1825_v47 = vld [vmem:[%s10340_s28 + $0x12f0] sm:$0xff] }
  0xab   : > { %1824 = vst [vmem:[%s10345_s29 + $0x970] sm:$0xff] %v1823_v46  ;;  %v1827_v48 = vld [vmem:[%s10340_s28 + $0x1300] sm:$0xff]  ;;  %v1829_v49 = vld [vmem:[%s10340_s28 + $0x1310] sm:$0xff]  ;;  %1826 = vst [vmem:[%s10345_s29 + $0x978] sm:$0xff] %v1825_v47 }
  0xac   : > { %1828 = vst [vmem:[%s10345_s29 + $0x980] sm:$0xff] %v1827_v48  ;;  %1830 = vst [vmem:[%s10345_s29 + $0x988] sm:$0xff] %v1829_v49  ;;  %v1831_v50 = vld [vmem:[%s10340_s28 + $0x1320] sm:$0xff]  ;;  %v1833_v51 = vld [vmem:[%s10340_s28 + $0x1330] sm:$0xff] }
  0xad   : > { %v1835_v52 = vld [vmem:[%s10340_s28 + $0x1340] sm:$0xff]  ;;  %1832 = vst [vmem:[%s10345_s29 + $0x990] sm:$0xff] %v1831_v50  ;;  %1834 = vst [vmem:[%s10345_s29 + $0x998] sm:$0xff] %v1833_v51  ;;  %v1837_v53 = vld [vmem:[%s10340_s28 + $0x1350] sm:$0xff] }
  0xae   : > { %1836 = vst [vmem:[%s10345_s29 + $0x9a0] sm:$0xff] %v1835_v52  ;;  %v1839_v54 = vld [vmem:[%s10340_s28 + $0x1360] sm:$0xff]  ;;  %v1841_v55 = vld [vmem:[%s10340_s28 + $0x1370] sm:$0xff]  ;;  %1838 = vst [vmem:[%s10345_s29 + $0x9a8] sm:$0xff] %v1837_v53 }
  0xaf   : > { %1840 = vst [vmem:[%s10345_s29 + $0x9b0] sm:$0xff] %v1839_v54  ;;  %1842 = vst [vmem:[%s10345_s29 + $0x9b8] sm:$0xff] %v1841_v55  ;;  %v1843_v56 = vld [vmem:[%s10340_s28 + $0x1380] sm:$0xff]  ;;  %v1845_v57 = vld [vmem:[%s10340_s28 + $0x1390] sm:$0xff] }
  0xb0   : > { %v1847_v58 = vld [vmem:[%s10340_s28 + $0x13a0] sm:$0xff]  ;;  %1844 = vst [vmem:[%s10345_s29 + $0x9c0] sm:$0xff] %v1843_v56  ;;  %1846 = vst [vmem:[%s10345_s29 + $0x9c8] sm:$0xff] %v1845_v57  ;;  %v1849_v59 = vld [vmem:[%s10340_s28 + $0x13b0] sm:$0xff] }
  0xb1   : > { %1848 = vst [vmem:[%s10345_s29 + $0x9d0] sm:$0xff] %v1847_v58  ;;  %v1851_v60 = vld [vmem:[%s10340_s28 + $0x13c0] sm:$0xff]  ;;  %v1853_v61 = vld [vmem:[%s10340_s28 + $0x13d0] sm:$0xff]  ;;  %1850 = vst [vmem:[%s10345_s29 + $0x9d8] sm:$0xff] %v1849_v59 }
  0xb2   : > { %1852 = vst [vmem:[%s10345_s29 + $0x9e0] sm:$0xff] %v1851_v60  ;;  %1854 = vst [vmem:[%s10345_s29 + $0x9e8] sm:$0xff] %v1853_v61  ;;  %v1855_v62 = vld [vmem:[%s10340_s28 + $0x13e0] sm:$0xff]  ;;  %v1857_v63 = vld [vmem:[%s10340_s28 + $0x13f0] sm:$0xff] }
  0xb3   : > { %v1859_v0 = vld [vmem:[%s10340_s28 + $0x1400] sm:$0xff]  ;;  %1856 = vst [vmem:[%s10345_s29 + $0x9f0] sm:$0xff] %v1855_v62  ;;  %1858 = vst [vmem:[%s10345_s29 + $0x9f8] sm:$0xff] %v1857_v63  ;;  %v1861_v1 = vld [vmem:[%s10340_s28 + $0x1410] sm:$0xff] }
  0xb4   : > { %1860 = vst [vmem:[%s10345_s29 + $0xa00] sm:$0xff] %v1859_v0  ;;  %v1863_v2 = vld [vmem:[%s10340_s28 + $0x1420] sm:$0xff]  ;;  %v1865_v3 = vld [vmem:[%s10340_s28 + $0x1430] sm:$0xff]  ;;  %1862 = vst [vmem:[%s10345_s29 + $0xa08] sm:$0xff] %v1861_v1 }
  0xb5   : > { %1864 = vst [vmem:[%s10345_s29 + $0xa10] sm:$0xff] %v1863_v2  ;;  %1866 = vst [vmem:[%s10345_s29 + $0xa18] sm:$0xff] %v1865_v3  ;;  %v1867_v4 = vld [vmem:[%s10340_s28 + $0x1440] sm:$0xff]  ;;  %v1869_v5 = vld [vmem:[%s10340_s28 + $0x1450] sm:$0xff] }
  0xb6   : > { %v1871_v6 = vld [vmem:[%s10340_s28 + $0x1460] sm:$0xff]  ;;  %1868 = vst [vmem:[%s10345_s29 + $0xa20] sm:$0xff] %v1867_v4  ;;  %1870 = vst [vmem:[%s10345_s29 + $0xa28] sm:$0xff] %v1869_v5  ;;  %v1873_v7 = vld [vmem:[%s10340_s28 + $0x1470] sm:$0xff] }
  0xb7   : > { %1872 = vst [vmem:[%s10345_s29 + $0xa30] sm:$0xff] %v1871_v6  ;;  %v1875_v8 = vld [vmem:[%s10340_s28 + $0x1480] sm:$0xff]  ;;  %v1877_v9 = vld [vmem:[%s10340_s28 + $0x1490] sm:$0xff]  ;;  %1874 = vst [vmem:[%s10345_s29 + $0xa38] sm:$0xff] %v1873_v7 }
  0xb8   : > { %1876 = vst [vmem:[%s10345_s29 + $0xa40] sm:$0xff] %v1875_v8  ;;  %1878 = vst [vmem:[%s10345_s29 + $0xa48] sm:$0xff] %v1877_v9  ;;  %v1879_v10 = vld [vmem:[%s10340_s28 + $0x14a0] sm:$0xff]  ;;  %v1881_v11 = vld [vmem:[%s10340_s28 + $0x14b0] sm:$0xff] }
  0xb9   : > { %v1883_v12 = vld [vmem:[%s10340_s28 + $0x14c0] sm:$0xff]  ;;  %1880 = vst [vmem:[%s10345_s29 + $0xa50] sm:$0xff] %v1879_v10  ;;  %1882 = vst [vmem:[%s10345_s29 + $0xa58] sm:$0xff] %v1881_v11  ;;  %v1885_v13 = vld [vmem:[%s10340_s28 + $0x14d0] sm:$0xff] }
  0xba   : > { %1884 = vst [vmem:[%s10345_s29 + $0xa60] sm:$0xff] %v1883_v12  ;;  %v1887_v14 = vld [vmem:[%s10340_s28 + $0x14e0] sm:$0xff]  ;;  %v1889_v15 = vld [vmem:[%s10340_s28 + $0x14f0] sm:$0xff]  ;;  %1886 = vst [vmem:[%s10345_s29 + $0xa68] sm:$0xff] %v1885_v13 }
  0xbb   : > { %1888 = vst [vmem:[%s10345_s29 + $0xa70] sm:$0xff] %v1887_v14  ;;  %1890 = vst [vmem:[%s10345_s29 + $0xa78] sm:$0xff] %v1889_v15  ;;  %v1891_v16 = vld [vmem:[%s10340_s28 + $0x1500] sm:$0xff]  ;;  %v1893_v17 = vld [vmem:[%s10340_s28 + $0x1510] sm:$0xff] }
  0xbc   : > { %v1895_v18 = vld [vmem:[%s10340_s28 + $0x1520] sm:$0xff]  ;;  %1892 = vst [vmem:[%s10345_s29 + $0xa80] sm:$0xff] %v1891_v16  ;;  %1894 = vst [vmem:[%s10345_s29 + $0xa88] sm:$0xff] %v1893_v17  ;;  %v1897_v19 = vld [vmem:[%s10340_s28 + $0x1530] sm:$0xff] }
  0xbd   : > { %1896 = vst [vmem:[%s10345_s29 + $0xa90] sm:$0xff] %v1895_v18  ;;  %v1899_v20 = vld [vmem:[%s10340_s28 + $0x1540] sm:$0xff]  ;;  %v1901_v21 = vld [vmem:[%s10340_s28 + $0x1550] sm:$0xff]  ;;  %1898 = vst [vmem:[%s10345_s29 + $0xa98] sm:$0xff] %v1897_v19 }
  0xbe   : > { %1900 = vst [vmem:[%s10345_s29 + $0xaa0] sm:$0xff] %v1899_v20  ;;  %1902 = vst [vmem:[%s10345_s29 + $0xaa8] sm:$0xff] %v1901_v21  ;;  %v1903_v22 = vld [vmem:[%s10340_s28 + $0x1560] sm:$0xff]  ;;  %v1905_v23 = vld [vmem:[%s10340_s28 + $0x1570] sm:$0xff] }
  0xbf   : > { %v1907_v24 = vld [vmem:[%s10340_s28 + $0x1580] sm:$0xff]  ;;  %1904 = vst [vmem:[%s10345_s29 + $0xab0] sm:$0xff] %v1903_v22  ;;  %1906 = vst [vmem:[%s10345_s29 + $0xab8] sm:$0xff] %v1905_v23  ;;  %v1909_v25 = vld [vmem:[%s10340_s28 + $0x1590] sm:$0xff] }
  0xc0   : > { %1908 = vst [vmem:[%s10345_s29 + $0xac0] sm:$0xff] %v1907_v24  ;;  %v1911_v26 = vld [vmem:[%s10340_s28 + $0x15a0] sm:$0xff]  ;;  %v1913_v27 = vld [vmem:[%s10340_s28 + $0x15b0] sm:$0xff]  ;;  %1910 = vst [vmem:[%s10345_s29 + $0xac8] sm:$0xff] %v1909_v25 }
  0xc1   : > { %1912 = vst [vmem:[%s10345_s29 + $0xad0] sm:$0xff] %v1911_v26  ;;  %1914 = vst [vmem:[%s10345_s29 + $0xad8] sm:$0xff] %v1913_v27  ;;  %v1915_v28 = vld [vmem:[%s10340_s28 + $0x15c0] sm:$0xff]  ;;  %v1917_v29 = vld [vmem:[%s10340_s28 + $0x15d0] sm:$0xff] }
  0xc2   : > { %v1919_v30 = vld [vmem:[%s10340_s28 + $0x15e0] sm:$0xff]  ;;  %1916 = vst [vmem:[%s10345_s29 + $0xae0] sm:$0xff] %v1915_v28  ;;  %1918 = vst [vmem:[%s10345_s29 + $0xae8] sm:$0xff] %v1917_v29  ;;  %v1921_v31 = vld [vmem:[%s10340_s28 + $0x15f0] sm:$0xff] }
  0xc3   : > { %1920 = vst [vmem:[%s10345_s29 + $0xaf0] sm:$0xff] %v1919_v30  ;;  %v1923_v32 = vld [vmem:[%s10340_s28 + $0x1600] sm:$0xff]  ;;  %v1925_v33 = vld [vmem:[%s10340_s28 + $0x1610] sm:$0xff]  ;;  %1922 = vst [vmem:[%s10345_s29 + $0xaf8] sm:$0xff] %v1921_v31 }
  0xc4   : > { %1924 = vst [vmem:[%s10345_s29 + $0xb00] sm:$0xff] %v1923_v32  ;;  %1926 = vst [vmem:[%s10345_s29 + $0xb08] sm:$0xff] %v1925_v33  ;;  %v1927_v34 = vld [vmem:[%s10340_s28 + $0x1620] sm:$0xff]  ;;  %v1929_v35 = vld [vmem:[%s10340_s28 + $0x1630] sm:$0xff] }
  0xc5   : > { %v1931_v36 = vld [vmem:[%s10340_s28 + $0x1640] sm:$0xff]  ;;  %1928 = vst [vmem:[%s10345_s29 + $0xb10] sm:$0xff] %v1927_v34  ;;  %1930 = vst [vmem:[%s10345_s29 + $0xb18] sm:$0xff] %v1929_v35  ;;  %v1933_v37 = vld [vmem:[%s10340_s28 + $0x1650] sm:$0xff] }
  0xc6   : > { %1932 = vst [vmem:[%s10345_s29 + $0xb20] sm:$0xff] %v1931_v36  ;;  %v1935_v38 = vld [vmem:[%s10340_s28 + $0x1660] sm:$0xff]  ;;  %v1937_v39 = vld [vmem:[%s10340_s28 + $0x1670] sm:$0xff]  ;;  %1934 = vst [vmem:[%s10345_s29 + $0xb28] sm:$0xff] %v1933_v37 }
  0xc7   : > { %1936 = vst [vmem:[%s10345_s29 + $0xb30] sm:$0xff] %v1935_v38  ;;  %1938 = vst [vmem:[%s10345_s29 + $0xb38] sm:$0xff] %v1937_v39  ;;  %v1939_v40 = vld [vmem:[%s10340_s28 + $0x1680] sm:$0xff]  ;;  %v1941_v41 = vld [vmem:[%s10340_s28 + $0x1690] sm:$0xff] }
  0xc8   : > { %v1943_v42 = vld [vmem:[%s10340_s28 + $0x16a0] sm:$0xff]  ;;  %1940 = vst [vmem:[%s10345_s29 + $0xb40] sm:$0xff] %v1939_v40  ;;  %1942 = vst [vmem:[%s10345_s29 + $0xb48] sm:$0xff] %v1941_v41  ;;  %v1945_v43 = vld [vmem:[%s10340_s28 + $0x16b0] sm:$0xff] }
  0xc9   : > { %1944 = vst [vmem:[%s10345_s29 + $0xb50] sm:$0xff] %v1943_v42  ;;  %v1947_v44 = vld [vmem:[%s10340_s28 + $0x16c0] sm:$0xff]  ;;  %v1949_v45 = vld [vmem:[%s10340_s28 + $0x16d0] sm:$0xff]  ;;  %1946 = vst [vmem:[%s10345_s29 + $0xb58] sm:$0xff] %v1945_v43 }
  0xca   : > { %1948 = vst [vmem:[%s10345_s29 + $0xb60] sm:$0xff] %v1947_v44  ;;  %1950 = vst [vmem:[%s10345_s29 + $0xb68] sm:$0xff] %v1949_v45  ;;  %v1951_v46 = vld [vmem:[%s10340_s28 + $0x16e0] sm:$0xff]  ;;  %v1953_v47 = vld [vmem:[%s10340_s28 + $0x16f0] sm:$0xff] }
  0xcb   : > { %v1955_v48 = vld [vmem:[%s10340_s28 + $0x1700] sm:$0xff]  ;;  %1952 = vst [vmem:[%s10345_s29 + $0xb70] sm:$0xff] %v1951_v46  ;;  %1954 = vst [vmem:[%s10345_s29 + $0xb78] sm:$0xff] %v1953_v47  ;;  %v1957_v49 = vld [vmem:[%s10340_s28 + $0x1710] sm:$0xff] }
  0xcc   : > { %1956 = vst [vmem:[%s10345_s29 + $0xb80] sm:$0xff] %v1955_v48  ;;  %v1959_v50 = vld [vmem:[%s10340_s28 + $0x1720] sm:$0xff]  ;;  %v1961_v51 = vld [vmem:[%s10340_s28 + $0x1730] sm:$0xff]  ;;  %1958 = vst [vmem:[%s10345_s29 + $0xb88] sm:$0xff] %v1957_v49 }
  0xcd   : > { %1960 = vst [vmem:[%s10345_s29 + $0xb90] sm:$0xff] %v1959_v50  ;;  %1962 = vst [vmem:[%s10345_s29 + $0xb98] sm:$0xff] %v1961_v51  ;;  %v1963_v52 = vld [vmem:[%s10340_s28 + $0x1740] sm:$0xff]  ;;  %v1965_v53 = vld [vmem:[%s10340_s28 + $0x1750] sm:$0xff] }
  0xce   : > { %v1967_v54 = vld [vmem:[%s10340_s28 + $0x1760] sm:$0xff]  ;;  %1964 = vst [vmem:[%s10345_s29 + $0xba0] sm:$0xff] %v1963_v52  ;;  %1966 = vst [vmem:[%s10345_s29 + $0xba8] sm:$0xff] %v1965_v53  ;;  %v1969_v55 = vld [vmem:[%s10340_s28 + $0x1770] sm:$0xff] }
  0xcf   : > { %1968 = vst [vmem:[%s10345_s29 + $0xbb0] sm:$0xff] %v1967_v54  ;;  %v1971_v56 = vld [vmem:[%s10340_s28 + $0x1780] sm:$0xff]  ;;  %v1973_v57 = vld [vmem:[%s10340_s28 + $0x1790] sm:$0xff]  ;;  %1970 = vst [vmem:[%s10345_s29 + $0xbb8] sm:$0xff] %v1969_v55 }
  0xd0   : > { %1972 = vst [vmem:[%s10345_s29 + $0xbc0] sm:$0xff] %v1971_v56  ;;  %1974 = vst [vmem:[%s10345_s29 + $0xbc8] sm:$0xff] %v1973_v57  ;;  %v1975_v58 = vld [vmem:[%s10340_s28 + $0x17a0] sm:$0xff]  ;;  %v1977_v59 = vld [vmem:[%s10340_s28 + $0x17b0] sm:$0xff] }
  0xd1   : > { %v1979_v60 = vld [vmem:[%s10340_s28 + $0x17c0] sm:$0xff]  ;;  %1976 = vst [vmem:[%s10345_s29 + $0xbd0] sm:$0xff] %v1975_v58  ;;  %1978 = vst [vmem:[%s10345_s29 + $0xbd8] sm:$0xff] %v1977_v59  ;;  %v1981_v61 = vld [vmem:[%s10340_s28 + $0x17d0] sm:$0xff] }
  0xd2   : > { %1980 = vst [vmem:[%s10345_s29 + $0xbe0] sm:$0xff] %v1979_v60  ;;  %v1983_v62 = vld [vmem:[%s10340_s28 + $0x17e0] sm:$0xff]  ;;  %v1985_v63 = vld [vmem:[%s10340_s28 + $0x17f0] sm:$0xff]  ;;  %1982 = vst [vmem:[%s10345_s29 + $0xbe8] sm:$0xff] %v1981_v61 }
  0xd3   : > { %1984 = vst [vmem:[%s10345_s29 + $0xbf0] sm:$0xff] %v1983_v62  ;;  %1986 = vst [vmem:[%s10345_s29 + $0xbf8] sm:$0xff] %v1985_v63  ;;  %v1987_v0 = vld [vmem:[%s10340_s28 + $0x1800] sm:$0xff]  ;;  %v1989_v1 = vld [vmem:[%s10340_s28 + $0x1810] sm:$0xff] }
  0xd4   : > { %v1991_v2 = vld [vmem:[%s10340_s28 + $0x1820] sm:$0xff]  ;;  %1988 = vst [vmem:[%s10345_s29 + $0xc00] sm:$0xff] %v1987_v0  ;;  %1990 = vst [vmem:[%s10345_s29 + $0xc08] sm:$0xff] %v1989_v1  ;;  %v1993_v3 = vld [vmem:[%s10340_s28 + $0x1830] sm:$0xff] }
  0xd5   : > { %1992 = vst [vmem:[%s10345_s29 + $0xc10] sm:$0xff] %v1991_v2  ;;  %v1995_v4 = vld [vmem:[%s10340_s28 + $0x1840] sm:$0xff]  ;;  %v1997_v5 = vld [vmem:[%s10340_s28 + $0x1850] sm:$0xff]  ;;  %1994 = vst [vmem:[%s10345_s29 + $0xc18] sm:$0xff] %v1993_v3 }
  0xd6   : > { %1996 = vst [vmem:[%s10345_s29 + $0xc20] sm:$0xff] %v1995_v4  ;;  %1998 = vst [vmem:[%s10345_s29 + $0xc28] sm:$0xff] %v1997_v5  ;;  %v1999_v6 = vld [vmem:[%s10340_s28 + $0x1860] sm:$0xff]  ;;  %v2001_v7 = vld [vmem:[%s10340_s28 + $0x1870] sm:$0xff] }
  0xd7   : > { %v2003_v8 = vld [vmem:[%s10340_s28 + $0x1880] sm:$0xff]  ;;  %2000 = vst [vmem:[%s10345_s29 + $0xc30] sm:$0xff] %v1999_v6  ;;  %2002 = vst [vmem:[%s10345_s29 + $0xc38] sm:$0xff] %v2001_v7  ;;  %v2005_v9 = vld [vmem:[%s10340_s28 + $0x1890] sm:$0xff] }
  0xd8   : > { %2004 = vst [vmem:[%s10345_s29 + $0xc40] sm:$0xff] %v2003_v8  ;;  %v2007_v10 = vld [vmem:[%s10340_s28 + $0x18a0] sm:$0xff]  ;;  %v2009_v11 = vld [vmem:[%s10340_s28 + $0x18b0] sm:$0xff]  ;;  %2006 = vst [vmem:[%s10345_s29 + $0xc48] sm:$0xff] %v2005_v9 }
  0xd9   : > { %2008 = vst [vmem:[%s10345_s29 + $0xc50] sm:$0xff] %v2007_v10  ;;  %2010 = vst [vmem:[%s10345_s29 + $0xc58] sm:$0xff] %v2009_v11  ;;  %v2011_v12 = vld [vmem:[%s10340_s28 + $0x18c0] sm:$0xff]  ;;  %v2013_v13 = vld [vmem:[%s10340_s28 + $0x18d0] sm:$0xff] }
  0xda   : > { %v2015_v14 = vld [vmem:[%s10340_s28 + $0x18e0] sm:$0xff]  ;;  %2012 = vst [vmem:[%s10345_s29 + $0xc60] sm:$0xff] %v2011_v12  ;;  %2014 = vst [vmem:[%s10345_s29 + $0xc68] sm:$0xff] %v2013_v13  ;;  %v2017_v15 = vld [vmem:[%s10340_s28 + $0x18f0] sm:$0xff] }
  0xdb   : > { %2016 = vst [vmem:[%s10345_s29 + $0xc70] sm:$0xff] %v2015_v14  ;;  %v2019_v16 = vld [vmem:[%s10340_s28 + $0x1900] sm:$0xff]  ;;  %v2021_v17 = vld [vmem:[%s10340_s28 + $0x1910] sm:$0xff]  ;;  %2018 = vst [vmem:[%s10345_s29 + $0xc78] sm:$0xff] %v2017_v15 }
  0xdc   : > { %2020 = vst [vmem:[%s10345_s29 + $0xc80] sm:$0xff] %v2019_v16  ;;  %2022 = vst [vmem:[%s10345_s29 + $0xc88] sm:$0xff] %v2021_v17  ;;  %v2023_v18 = vld [vmem:[%s10340_s28 + $0x1920] sm:$0xff]  ;;  %v2025_v19 = vld [vmem:[%s10340_s28 + $0x1930] sm:$0xff] }
  0xdd   : > { %v2027_v20 = vld [vmem:[%s10340_s28 + $0x1940] sm:$0xff]  ;;  %2024 = vst [vmem:[%s10345_s29 + $0xc90] sm:$0xff] %v2023_v18  ;;  %2026 = vst [vmem:[%s10345_s29 + $0xc98] sm:$0xff] %v2025_v19  ;;  %v2029_v21 = vld [vmem:[%s10340_s28 + $0x1950] sm:$0xff] }
  0xde   : > { %2028 = vst [vmem:[%s10345_s29 + $0xca0] sm:$0xff] %v2027_v20  ;;  %v2031_v22 = vld [vmem:[%s10340_s28 + $0x1960] sm:$0xff]  ;;  %v2033_v23 = vld [vmem:[%s10340_s28 + $0x1970] sm:$0xff]  ;;  %2030 = vst [vmem:[%s10345_s29 + $0xca8] sm:$0xff] %v2029_v21 }
  0xdf   : > { %2032 = vst [vmem:[%s10345_s29 + $0xcb0] sm:$0xff] %v2031_v22  ;;  %2034 = vst [vmem:[%s10345_s29 + $0xcb8] sm:$0xff] %v2033_v23  ;;  %v2035_v24 = vld [vmem:[%s10340_s28 + $0x1980] sm:$0xff]  ;;  %v2037_v25 = vld [vmem:[%s10340_s28 + $0x1990] sm:$0xff] }
  0xe0   : > { %v2039_v26 = vld [vmem:[%s10340_s28 + $0x19a0] sm:$0xff]  ;;  %2036 = vst [vmem:[%s10345_s29 + $0xcc0] sm:$0xff] %v2035_v24  ;;  %2038 = vst [vmem:[%s10345_s29 + $0xcc8] sm:$0xff] %v2037_v25  ;;  %v2041_v27 = vld [vmem:[%s10340_s28 + $0x19b0] sm:$0xff] }
  0xe1   : > { %2040 = vst [vmem:[%s10345_s29 + $0xcd0] sm:$0xff] %v2039_v26  ;;  %v2043_v28 = vld [vmem:[%s10340_s28 + $0x19c0] sm:$0xff]  ;;  %v2045_v29 = vld [vmem:[%s10340_s28 + $0x19d0] sm:$0xff]  ;;  %2042 = vst [vmem:[%s10345_s29 + $0xcd8] sm:$0xff] %v2041_v27 }
  0xe2   : > { %2044 = vst [vmem:[%s10345_s29 + $0xce0] sm:$0xff] %v2043_v28  ;;  %2046 = vst [vmem:[%s10345_s29 + $0xce8] sm:$0xff] %v2045_v29  ;;  %v2047_v30 = vld [vmem:[%s10340_s28 + $0x19e0] sm:$0xff]  ;;  %v2049_v31 = vld [vmem:[%s10340_s28 + $0x19f0] sm:$0xff] }
  0xe3   : > { %v2051_v32 = vld [vmem:[%s10340_s28 + $0x1a00] sm:$0xff]  ;;  %2048 = vst [vmem:[%s10345_s29 + $0xcf0] sm:$0xff] %v2047_v30  ;;  %2050 = vst [vmem:[%s10345_s29 + $0xcf8] sm:$0xff] %v2049_v31  ;;  %v2053_v33 = vld [vmem:[%s10340_s28 + $0x1a10] sm:$0xff] }
  0xe4   : > { %2052 = vst [vmem:[%s10345_s29 + $0xd00] sm:$0xff] %v2051_v32  ;;  %v2055_v34 = vld [vmem:[%s10340_s28 + $0x1a20] sm:$0xff]  ;;  %v2057_v35 = vld [vmem:[%s10340_s28 + $0x1a30] sm:$0xff]  ;;  %2054 = vst [vmem:[%s10345_s29 + $0xd08] sm:$0xff] %v2053_v33 }
  0xe5   : > { %2056 = vst [vmem:[%s10345_s29 + $0xd10] sm:$0xff] %v2055_v34  ;;  %2058 = vst [vmem:[%s10345_s29 + $0xd18] sm:$0xff] %v2057_v35  ;;  %v2059_v36 = vld [vmem:[%s10340_s28 + $0x1a40] sm:$0xff]  ;;  %v2061_v37 = vld [vmem:[%s10340_s28 + $0x1a50] sm:$0xff] }
  0xe6   : > { %v2063_v38 = vld [vmem:[%s10340_s28 + $0x1a60] sm:$0xff]  ;;  %2060 = vst [vmem:[%s10345_s29 + $0xd20] sm:$0xff] %v2059_v36  ;;  %2062 = vst [vmem:[%s10345_s29 + $0xd28] sm:$0xff] %v2061_v37  ;;  %v2065_v39 = vld [vmem:[%s10340_s28 + $0x1a70] sm:$0xff] }
  0xe7   : > { %2064 = vst [vmem:[%s10345_s29 + $0xd30] sm:$0xff] %v2063_v38  ;;  %v2067_v40 = vld [vmem:[%s10340_s28 + $0x1a80] sm:$0xff]  ;;  %v2069_v41 = vld [vmem:[%s10340_s28 + $0x1a90] sm:$0xff]  ;;  %2066 = vst [vmem:[%s10345_s29 + $0xd38] sm:$0xff] %v2065_v39 }
  0xe8   : > { %2068 = vst [vmem:[%s10345_s29 + $0xd40] sm:$0xff] %v2067_v40  ;;  %2070 = vst [vmem:[%s10345_s29 + $0xd48] sm:$0xff] %v2069_v41  ;;  %v2071_v42 = vld [vmem:[%s10340_s28 + $0x1aa0] sm:$0xff]  ;;  %v2073_v43 = vld [vmem:[%s10340_s28 + $0x1ab0] sm:$0xff] }
  0xe9   : > { %v2075_v44 = vld [vmem:[%s10340_s28 + $0x1ac0] sm:$0xff]  ;;  %2072 = vst [vmem:[%s10345_s29 + $0xd50] sm:$0xff] %v2071_v42  ;;  %2074 = vst [vmem:[%s10345_s29 + $0xd58] sm:$0xff] %v2073_v43  ;;  %v2077_v45 = vld [vmem:[%s10340_s28 + $0x1ad0] sm:$0xff] }
  0xea   : > { %2076 = vst [vmem:[%s10345_s29 + $0xd60] sm:$0xff] %v2075_v44  ;;  %v2079_v46 = vld [vmem:[%s10340_s28 + $0x1ae0] sm:$0xff]  ;;  %v2081_v47 = vld [vmem:[%s10340_s28 + $0x1af0] sm:$0xff]  ;;  %2078 = vst [vmem:[%s10345_s29 + $0xd68] sm:$0xff] %v2077_v45 }
  0xeb   : > { %2080 = vst [vmem:[%s10345_s29 + $0xd70] sm:$0xff] %v2079_v46  ;;  %2082 = vst [vmem:[%s10345_s29 + $0xd78] sm:$0xff] %v2081_v47  ;;  %v2083_v48 = vld [vmem:[%s10340_s28 + $0x1b00] sm:$0xff]  ;;  %v2085_v49 = vld [vmem:[%s10340_s28 + $0x1b10] sm:$0xff] }
  0xec   : > { %v2087_v50 = vld [vmem:[%s10340_s28 + $0x1b20] sm:$0xff]  ;;  %2084 = vst [vmem:[%s10345_s29 + $0xd80] sm:$0xff] %v2083_v48  ;;  %2086 = vst [vmem:[%s10345_s29 + $0xd88] sm:$0xff] %v2085_v49  ;;  %v2089_v51 = vld [vmem:[%s10340_s28 + $0x1b30] sm:$0xff] }
  0xed   : > { %2088 = vst [vmem:[%s10345_s29 + $0xd90] sm:$0xff] %v2087_v50  ;;  %v2091_v52 = vld [vmem:[%s10340_s28 + $0x1b40] sm:$0xff]  ;;  %v2093_v53 = vld [vmem:[%s10340_s28 + $0x1b50] sm:$0xff]  ;;  %2090 = vst [vmem:[%s10345_s29 + $0xd98] sm:$0xff] %v2089_v51 }
  0xee   : > { %2092 = vst [vmem:[%s10345_s29 + $0xda0] sm:$0xff] %v2091_v52  ;;  %2094 = vst [vmem:[%s10345_s29 + $0xda8] sm:$0xff] %v2093_v53  ;;  %v2095_v54 = vld [vmem:[%s10340_s28 + $0x1b60] sm:$0xff]  ;;  %v2097_v55 = vld [vmem:[%s10340_s28 + $0x1b70] sm:$0xff] }
  0xef   : > { %v2099_v56 = vld [vmem:[%s10340_s28 + $0x1b80] sm:$0xff]  ;;  %2096 = vst [vmem:[%s10345_s29 + $0xdb0] sm:$0xff] %v2095_v54  ;;  %2098 = vst [vmem:[%s10345_s29 + $0xdb8] sm:$0xff] %v2097_v55  ;;  %v2101_v57 = vld [vmem:[%s10340_s28 + $0x1b90] sm:$0xff] }
  0xf0   : > { %2100 = vst [vmem:[%s10345_s29 + $0xdc0] sm:$0xff] %v2099_v56  ;;  %v2103_v58 = vld [vmem:[%s10340_s28 + $0x1ba0] sm:$0xff]  ;;  %v2105_v59 = vld [vmem:[%s10340_s28 + $0x1bb0] sm:$0xff]  ;;  %2102 = vst [vmem:[%s10345_s29 + $0xdc8] sm:$0xff] %v2101_v57 }
  0xf1   : > { %2104 = vst [vmem:[%s10345_s29 + $0xdd0] sm:$0xff] %v2103_v58  ;;  %2106 = vst [vmem:[%s10345_s29 + $0xdd8] sm:$0xff] %v2105_v59  ;;  %v2107_v60 = vld [vmem:[%s10340_s28 + $0x1bc0] sm:$0xff]  ;;  %v2109_v61 = vld [vmem:[%s10340_s28 + $0x1bd0] sm:$0xff] }
  0xf2   : > { %v2111_v62 = vld [vmem:[%s10340_s28 + $0x1be0] sm:$0xff]  ;;  %2108 = vst [vmem:[%s10345_s29 + $0xde0] sm:$0xff] %v2107_v60  ;;  %2110 = vst [vmem:[%s10345_s29 + $0xde8] sm:$0xff] %v2109_v61  ;;  %v2113_v63 = vld [vmem:[%s10340_s28 + $0x1bf0] sm:$0xff] }
  0xf3   : > { %2112 = vst [vmem:[%s10345_s29 + $0xdf0] sm:$0xff] %v2111_v62  ;;  %v2115_v0 = vld [vmem:[%s10340_s28 + $0x1c00] sm:$0xff]  ;;  %v2117_v1 = vld [vmem:[%s10340_s28 + $0x1c10] sm:$0xff]  ;;  %2114 = vst [vmem:[%s10345_s29 + $0xdf8] sm:$0xff] %v2113_v63 }
  0xf4   : > { %2116 = vst [vmem:[%s10345_s29 + $0xe00] sm:$0xff] %v2115_v0  ;;  %2118 = vst [vmem:[%s10345_s29 + $0xe08] sm:$0xff] %v2117_v1  ;;  %v2119_v2 = vld [vmem:[%s10340_s28 + $0x1c20] sm:$0xff]  ;;  %v2121_v3 = vld [vmem:[%s10340_s28 + $0x1c30] sm:$0xff] }
  0xf5   : > { %v2123_v4 = vld [vmem:[%s10340_s28 + $0x1c40] sm:$0xff]  ;;  %2120 = vst [vmem:[%s10345_s29 + $0xe10] sm:$0xff] %v2119_v2  ;;  %2122 = vst [vmem:[%s10345_s29 + $0xe18] sm:$0xff] %v2121_v3  ;;  %v2125_v5 = vld [vmem:[%s10340_s28 + $0x1c50] sm:$0xff] }
  0xf6   : > { %2124 = vst [vmem:[%s10345_s29 + $0xe20] sm:$0xff] %v2123_v4  ;;  %v2127_v6 = vld [vmem:[%s10340_s28 + $0x1c60] sm:$0xff]  ;;  %v2129_v7 = vld [vmem:[%s10340_s28 + $0x1c70] sm:$0xff]  ;;  %2126 = vst [vmem:[%s10345_s29 + $0xe28] sm:$0xff] %v2125_v5 }
  0xf7   : > { %2128 = vst [vmem:[%s10345_s29 + $0xe30] sm:$0xff] %v2127_v6  ;;  %2130 = vst [vmem:[%s10345_s29 + $0xe38] sm:$0xff] %v2129_v7  ;;  %v2131_v8 = vld [vmem:[%s10340_s28 + $0x1c80] sm:$0xff]  ;;  %v2133_v9 = vld [vmem:[%s10340_s28 + $0x1c90] sm:$0xff] }
  0xf8   : > { %v2135_v10 = vld [vmem:[%s10340_s28 + $0x1ca0] sm:$0xff]  ;;  %2132 = vst [vmem:[%s10345_s29 + $0xe40] sm:$0xff] %v2131_v8  ;;  %2134 = vst [vmem:[%s10345_s29 + $0xe48] sm:$0xff] %v2133_v9  ;;  %v2137_v11 = vld [vmem:[%s10340_s28 + $0x1cb0] sm:$0xff] }
  0xf9   : > { %2136 = vst [vmem:[%s10345_s29 + $0xe50] sm:$0xff] %v2135_v10  ;;  %v2139_v12 = vld [vmem:[%s10340_s28 + $0x1cc0] sm:$0xff]  ;;  %v2141_v13 = vld [vmem:[%s10340_s28 + $0x1cd0] sm:$0xff]  ;;  %2138 = vst [vmem:[%s10345_s29 + $0xe58] sm:$0xff] %v2137_v11 }
  0xfa   : > { %2140 = vst [vmem:[%s10345_s29 + $0xe60] sm:$0xff] %v2139_v12  ;;  %2142 = vst [vmem:[%s10345_s29 + $0xe68] sm:$0xff] %v2141_v13  ;;  %v2143_v14 = vld [vmem:[%s10340_s28 + $0x1ce0] sm:$0xff]  ;;  %v2145_v15 = vld [vmem:[%s10340_s28 + $0x1cf0] sm:$0xff] }
  0xfb   : > { %v2147_v16 = vld [vmem:[%s10340_s28 + $0x1d00] sm:$0xff]  ;;  %2144 = vst [vmem:[%s10345_s29 + $0xe70] sm:$0xff] %v2143_v14  ;;  %2146 = vst [vmem:[%s10345_s29 + $0xe78] sm:$0xff] %v2145_v15  ;;  %v2149_v17 = vld [vmem:[%s10340_s28 + $0x1d10] sm:$0xff] }
  0xfc   : > { %2148 = vst [vmem:[%s10345_s29 + $0xe80] sm:$0xff] %v2147_v16  ;;  %v2151_v18 = vld [vmem:[%s10340_s28 + $0x1d20] sm:$0xff]  ;;  %v2153_v19 = vld [vmem:[%s10340_s28 + $0x1d30] sm:$0xff]  ;;  %2150 = vst [vmem:[%s10345_s29 + $0xe88] sm:$0xff] %v2149_v17 }
  0xfd   : > { %2152 = vst [vmem:[%s10345_s29 + $0xe90] sm:$0xff] %v2151_v18  ;;  %2154 = vst [vmem:[%s10345_s29 + $0xe98] sm:$0xff] %v2153_v19  ;;  %v2155_v20 = vld [vmem:[%s10340_s28 + $0x1d40] sm:$0xff]  ;;  %v2157_v21 = vld [vmem:[%s10340_s28 + $0x1d50] sm:$0xff] }
  0xfe   : > { %v2159_v22 = vld [vmem:[%s10340_s28 + $0x1d60] sm:$0xff]  ;;  %2156 = vst [vmem:[%s10345_s29 + $0xea0] sm:$0xff] %v2155_v20  ;;  %2158 = vst [vmem:[%s10345_s29 + $0xea8] sm:$0xff] %v2157_v21  ;;  %v2161_v23 = vld [vmem:[%s10340_s28 + $0x1d70] sm:$0xff] }
  0xff   : > { %2160 = vst [vmem:[%s10345_s29 + $0xeb0] sm:$0xff] %v2159_v22  ;;  %v2163_v24 = vld [vmem:[%s10340_s28 + $0x1d80] sm:$0xff]  ;;  %v2165_v25 = vld [vmem:[%s10340_s28 + $0x1d90] sm:$0xff]  ;;  %2162 = vst [vmem:[%s10345_s29 + $0xeb8] sm:$0xff] %v2161_v23 }
 0x100   : > { %2164 = vst [vmem:[%s10345_s29 + $0xec0] sm:$0xff] %v2163_v24  ;;  %2166 = vst [vmem:[%s10345_s29 + $0xec8] sm:$0xff] %v2165_v25  ;;  %v2167_v26 = vld [vmem:[%s10340_s28 + $0x1da0] sm:$0xff]  ;;  %v2169_v27 = vld [vmem:[%s10340_s28 + $0x1db0] sm:$0xff] }
 0x101   : > { %v2171_v28 = vld [vmem:[%s10340_s28 + $0x1dc0] sm:$0xff]  ;;  %2168 = vst [vmem:[%s10345_s29 + $0xed0] sm:$0xff] %v2167_v26  ;;  %2170 = vst [vmem:[%s10345_s29 + $0xed8] sm:$0xff] %v2169_v27  ;;  %v2173_v29 = vld [vmem:[%s10340_s28 + $0x1dd0] sm:$0xff] }
 0x102   : > { %2172 = vst [vmem:[%s10345_s29 + $0xee0] sm:$0xff] %v2171_v28  ;;  %v2175_v30 = vld [vmem:[%s10340_s28 + $0x1de0] sm:$0xff]  ;;  %v2177_v31 = vld [vmem:[%s10340_s28 + $0x1df0] sm:$0xff]  ;;  %2174 = vst [vmem:[%s10345_s29 + $0xee8] sm:$0xff] %v2173_v29 }
 0x103   : > { %2176 = vst [vmem:[%s10345_s29 + $0xef0] sm:$0xff] %v2175_v30  ;;  %2178 = vst [vmem:[%s10345_s29 + $0xef8] sm:$0xff] %v2177_v31  ;;  %v2179_v32 = vld [vmem:[%s10340_s28 + $0x1e00] sm:$0xff]  ;;  %v2181_v33 = vld [vmem:[%s10340_s28 + $0x1e10] sm:$0xff] }
 0x104   : > { %v2183_v34 = vld [vmem:[%s10340_s28 + $0x1e20] sm:$0xff]  ;;  %2180 = vst [vmem:[%s10345_s29 + $0xf00] sm:$0xff] %v2179_v32  ;;  %2182 = vst [vmem:[%s10345_s29 + $0xf08] sm:$0xff] %v2181_v33  ;;  %v2185_v35 = vld [vmem:[%s10340_s28 + $0x1e30] sm:$0xff] }
 0x105   : > { %2184 = vst [vmem:[%s10345_s29 + $0xf10] sm:$0xff] %v2183_v34  ;;  %v2187_v36 = vld [vmem:[%s10340_s28 + $0x1e40] sm:$0xff]  ;;  %v2189_v37 = vld [vmem:[%s10340_s28 + $0x1e50] sm:$0xff]  ;;  %2186 = vst [vmem:[%s10345_s29 + $0xf18] sm:$0xff] %v2185_v35 }
 0x106   : > { %2188 = vst [vmem:[%s10345_s29 + $0xf20] sm:$0xff] %v2187_v36  ;;  %2190 = vst [vmem:[%s10345_s29 + $0xf28] sm:$0xff] %v2189_v37  ;;  %v2191_v38 = vld [vmem:[%s10340_s28 + $0x1e60] sm:$0xff]  ;;  %v2193_v39 = vld [vmem:[%s10340_s28 + $0x1e70] sm:$0xff] }
 0x107   : > { %v2195_v40 = vld [vmem:[%s10340_s28 + $0x1e80] sm:$0xff]  ;;  %2192 = vst [vmem:[%s10345_s29 + $0xf30] sm:$0xff] %v2191_v38  ;;  %2194 = vst [vmem:[%s10345_s29 + $0xf38] sm:$0xff] %v2193_v39  ;;  %v2197_v41 = vld [vmem:[%s10340_s28 + $0x1e90] sm:$0xff] }
 0x108   : > { %2196 = vst [vmem:[%s10345_s29 + $0xf40] sm:$0xff] %v2195_v40  ;;  %v2199_v42 = vld [vmem:[%s10340_s28 + $0x1ea0] sm:$0xff]  ;;  %v2201_v43 = vld [vmem:[%s10340_s28 + $0x1eb0] sm:$0xff]  ;;  %2198 = vst [vmem:[%s10345_s29 + $0xf48] sm:$0xff] %v2197_v41 }
 0x109   : > { %2200 = vst [vmem:[%s10345_s29 + $0xf50] sm:$0xff] %v2199_v42  ;;  %2202 = vst [vmem:[%s10345_s29 + $0xf58] sm:$0xff] %v2201_v43  ;;  %v2203_v44 = vld [vmem:[%s10340_s28 + $0x1ec0] sm:$0xff]  ;;  %v2205_v45 = vld [vmem:[%s10340_s28 + $0x1ed0] sm:$0xff] }
 0x10a   : > { %v2207_v46 = vld [vmem:[%s10340_s28 + $0x1ee0] sm:$0xff]  ;;  %2204 = vst [vmem:[%s10345_s29 + $0xf60] sm:$0xff] %v2203_v44  ;;  %2206 = vst [vmem:[%s10345_s29 + $0xf68] sm:$0xff] %v2205_v45  ;;  %v2209_v47 = vld [vmem:[%s10340_s28 + $0x1ef0] sm:$0xff] }
 0x10b   : > { %2208 = vst [vmem:[%s10345_s29 + $0xf70] sm:$0xff] %v2207_v46  ;;  %v2211_v48 = vld [vmem:[%s10340_s28 + $0x1f00] sm:$0xff]  ;;  %v2213_v49 = vld [vmem:[%s10340_s28 + $0x1f10] sm:$0xff]  ;;  %2210 = vst [vmem:[%s10345_s29 + $0xf78] sm:$0xff] %v2209_v47 }
 0x10c   : > { %2212 = vst [vmem:[%s10345_s29 + $0xf80] sm:$0xff] %v2211_v48  ;;  %2214 = vst [vmem:[%s10345_s29 + $0xf88] sm:$0xff] %v2213_v49  ;;  %v2215_v50 = vld [vmem:[%s10340_s28 + $0x1f20] sm:$0xff]  ;;  %v2217_v51 = vld [vmem:[%s10340_s28 + $0x1f30] sm:$0xff] }
 0x10d   : > { %v2219_v52 = vld [vmem:[%s10340_s28 + $0x1f40] sm:$0xff]  ;;  %2216 = vst [vmem:[%s10345_s29 + $0xf90] sm:$0xff] %v2215_v50  ;;  %2218 = vst [vmem:[%s10345_s29 + $0xf98] sm:$0xff] %v2217_v51  ;;  %v2221_v53 = vld [vmem:[%s10340_s28 + $0x1f50] sm:$0xff] }
 0x10e   : > { %2220 = vst [vmem:[%s10345_s29 + $0xfa0] sm:$0xff] %v2219_v52  ;;  %v2223_v54 = vld [vmem:[%s10340_s28 + $0x1f60] sm:$0xff]  ;;  %v2225_v55 = vld [vmem:[%s10340_s28 + $0x1f70] sm:$0xff]  ;;  %2222 = vst [vmem:[%s10345_s29 + $0xfa8] sm:$0xff] %v2221_v53 }
 0x10f   : > { %2224 = vst [vmem:[%s10345_s29 + $0xfb0] sm:$0xff] %v2223_v54  ;;  %2226 = vst [vmem:[%s10345_s29 + $0xfb8] sm:$0xff] %v2225_v55  ;;  %v2227_v56 = vld [vmem:[%s10340_s28 + $0x1f80] sm:$0xff]  ;;  %v2229_v57 = vld [vmem:[%s10340_s28 + $0x1f90] sm:$0xff] }
 0x110   : > { %v2231_v58 = vld [vmem:[%s10340_s28 + $0x1fa0] sm:$0xff]  ;;  %2228 = vst [vmem:[%s10345_s29 + $0xfc0] sm:$0xff] %v2227_v56  ;;  %2230 = vst [vmem:[%s10345_s29 + $0xfc8] sm:$0xff] %v2229_v57  ;;  %v2233_v59 = vld [vmem:[%s10340_s28 + $0x1fb0] sm:$0xff] }
 0x111   : > { %2232 = vst [vmem:[%s10345_s29 + $0xfd0] sm:$0xff] %v2231_v58  ;;  %v2235_v60 = vld [vmem:[%s10340_s28 + $0x1fc0] sm:$0xff]  ;;  %v2237_v61 = vld [vmem:[%s10340_s28 + $0x1fd0] sm:$0xff]  ;;  %2234 = vst [vmem:[%s10345_s29 + $0xfd8] sm:$0xff] %v2233_v59 }
 0x112   : > { %2236 = vst [vmem:[%s10345_s29 + $0xfe0] sm:$0xff] %v2235_v60  ;;  %2238 = vst [vmem:[%s10345_s29 + $0xfe8] sm:$0xff] %v2237_v61  ;;  %v2239_v62 = vld [vmem:[%s10340_s28 + $0x1fe0] sm:$0xff]  ;;  %v2241_v63 = vld [vmem:[%s10340_s28 + $0x1ff0] sm:$0xff] }
 0x113   : > { %2240 = vst [vmem:[%s10345_s29 + $0xff0] sm:$0xff] %v2239_v62  ;;  %2242 = vst [vmem:[%s10345_s29 + $0xff8] sm:$0xff] %v2241_v63 }
 0x114 PF: > { %p8800_p8 = scmp.ge.s32.totalorder %s10270_s16, 1  ;;  %p4340_p9 = scmp.lt.s32.totalorder %s10270_s16, 3 }
 0x116   : > { %p4341_p10 = pnand %p8800_p8, %p4340_p9 }
 0x117   : > { %s4347_s30 = sand.u32 (!%p4341_p10), 1, %s10254_s12   ;;  %s8802_s24 = sshll.u32 (!%p4341_p10), %s10262_s14, 1 }
 0x118   : > { %4344 = sbr.rel (%p4341_p10) target bundleno = 1017 (0x3f9), region = 80  ;;  %s8801_s10 = sshll.u32 (!%p4341_p10), %s4347_s30, 12 }
 0x119   : > { %s11401_s19 = scalar_lea.vmem (!%p4341_p10), [#allocation2], %s8801_s10  ;;  %p4388_p11 = scmp.lt.s32.totalorder (!%p4341_p10), %s8802_s24, 3 }
 0x11d   : > { %v11374_v0 = vld [vmem:[%s12264_s0] sm:$0xff]  ;;  %v11384_v2 = vld [vmem:[%s12264_s0 + $0x8] sm:$0xff]  ;;  %v9432_v8 = vld [vmem:[%s11401_s19 + $0x74] ss:$8 sps:$4 sm:$0xff]   ;;  %s12276_s24 = smov (!%p4388_p11, %s8802_s24), 3  ;;  %s9390_s12 = sshll.u32 (%p10327_p6), %s10262_s14, 3 }
 0x11e   : > { %v11379_v1 = vld [vmem:[%s12264_s0 + $0x80] sm:$0xff]  ;;  %v11395_v5 = vld [vmem:[%s12264_s0 + $0x88] sm:$0xff]  ;;  %v9434_v9 = vld [vmem:[%s11401_s19 + $0x174] ss:$8 sps:$4 sm:$0xff]   ;;  %7798 = vmatprep.subr.bf16.mxu0 %v9432_v8  ;;  %s4390_s27 = scalar_lea.vmem %s12266_s2, %s12276_s24  ;;  %s8649_s5 = scalar_lea.vmem (%p10327_p6), %s12267_s3, %s9390_s12 }
 0x11f   : > { %v8803_v3 = vcombine.low %v11374_v0, %v11379_v1  ;;  %v8804_v4 = vcombine.high %v11374_v0, %v11379_v1  ;;  %v8805_v6 = vcombine.low %v11384_v2, %v11395_v5  ;;  %v8806_v7 = vcombine.high %v11384_v2, %v11395_v5  ;;  %v9436_v10 = vld [vmem:[%s11401_s19 + $0x70] ss:$8 sps:$4 sm:$0xff]   ;;  %7849 = vmatprep.subr.bf16.mxu1 %v9434_v9  ;;  %v9438_v12 = vld [vmem:[%s11401_s19 + $0x64] ss:$8 sps:$4 sm:$0xff]   ;;  %v9442_v14 = vld [vmem:[%s11401_s19 + $0x60] ss:$8 sps:$4 sm:$0xff]  }
 0x120   : > { %v9437_v11 = vld [vmem:[%s11401_s19 + $0x170] ss:$8 sps:$4 sm:$0xff]   ;;  %7799 = vmatpush1.bf16.msra.mxu0 %v9436_v10  ;;  %v9440_v13 = vld [vmem:[%s11401_s19 + $0x164] ss:$8 sps:$4 sm:$0xff]   ;;  %v9443_v15 = vld [vmem:[%s11401_s19 + $0x160] ss:$8 sps:$4 sm:$0xff]  }
 0x121   : > { %7830 = vmatprep.mubr.bf16.mxu0 %v8804_v4  ;;  %7881 = vmatprep.mubr.bf16.mxu1 %v8806_v7  ;;  %v9444_v16 = vld [vmem:[%s11401_s19 + $0x54] ss:$8 sps:$4 sm:$0xff]   ;;  %v9448_v18 = vld [vmem:[%s11401_s19 + $0x50] ss:$8 sps:$4 sm:$0xff]   ;;  %v9450_v20 = vld [vmem:[%s11401_s19 + $0x44] ss:$8 sps:$4 sm:$0xff]  }
 0x122   : > { %7850 = vmatpush1.bf16.msra.mxu1 %v9437_v11  ;;  %7800 = vmatprep.subr.bf16.mxu0 %v9438_v12  ;;  %v9446_v17 = vld [vmem:[%s11401_s19 + $0x154] ss:$8 sps:$4 sm:$0xff]   ;;  %v9449_v19 = vld [vmem:[%s11401_s19 + $0x150] ss:$8 sps:$4 sm:$0xff]   ;;  %v9452_v21 = vld [vmem:[%s11401_s19 + $0x144] ss:$8 sps:$4 sm:$0xff]  }
 0x123   : > { %7851 = vmatprep.subr.bf16.mxu1 %v9440_v13  ;;  %v9454_v22 = vld [vmem:[%s11401_s19 + $0x40] ss:$8 sps:$4 sm:$0xff]   ;;  %v9456_v24 = vld [vmem:[%s11401_s19 + $0x34] ss:$8 sps:$4 sm:$0xff]   ;;  %v9460_v26 = vld [vmem:[%s11401_s19 + $0x30] ss:$8 sps:$4 sm:$0xff]  }
 0x124   : > { %7801 = vmatpush1.bf16.msra.mxu0 %v9442_v14  ;;  %v9455_v23 = vld [vmem:[%s11401_s19 + $0x140] ss:$8 sps:$4 sm:$0xff]   ;;  %v9458_v25 = vld [vmem:[%s11401_s19 + $0x134] ss:$8 sps:$4 sm:$0xff]   ;;  %v9461_v27 = vld [vmem:[%s11401_s19 + $0x130] ss:$8 sps:$4 sm:$0xff]  }
 0x125   : > { %7802 = vmatprep.subr.bf16.mxu0 %v9444_v16  ;;  %v9462_v28 = vld [vmem:[%s11401_s19 + $0x24] ss:$8 sps:$4 sm:$0xff]   ;;  %v9466_v30 = vld [vmem:[%s11401_s19 + $0x20] ss:$8 sps:$4 sm:$0xff]   ;;  %v9468_v32 = vld [vmem:[%s11401_s19 + $0x14] ss:$8 sps:$4 sm:$0xff]  }
 0x126   : > { %7852 = vmatpush1.bf16.msra.mxu1 %v9443_v15  ;;  %v9464_v29 = vld [vmem:[%s11401_s19 + $0x124] ss:$8 sps:$4 sm:$0xff]   ;;  %v9467_v31 = vld [vmem:[%s11401_s19 + $0x120] ss:$8 sps:$4 sm:$0xff]   ;;  %v9470_v33 = vld [vmem:[%s11401_s19 + $0x114] ss:$8 sps:$4 sm:$0xff]  }
 0x127   : > { %7853 = vmatprep.subr.bf16.mxu1 %v9446_v17  ;;  %v9472_v34 = vld [vmem:[%s11401_s19 + $0x10] ss:$8 sps:$4 sm:$0xff]   ;;  %v9474_v36 = vld [vmem:[%s11401_s19 + $0x4] ss:$8 sps:$4 sm:$0xff]   ;;  %v9478_v38 = vld [vmem:[%s11401_s19] ss:$8 sps:$4 sm:$0xff]  }
 0x128   : > { %7803 = vmatpush1.bf16.msra.mxu0 %v9448_v18  ;;  %v9473_v35 = vld [vmem:[%s11401_s19 + $0x110] ss:$8 sps:$4 sm:$0xff]   ;;  %v9476_v37 = vld [vmem:[%s11401_s19 + $0x104] ss:$8 sps:$4 sm:$0xff]   ;;  %v9479_v39 = vld [vmem:[%s11401_s19 + $0x100] ss:$8 sps:$4 sm:$0xff]  }
 0x129   : > { %7804 = vmatprep.subr.bf16.mxu0 %v9450_v20  ;;  %v9480_v40 = vld [vmem:[%s11401_s19 + $0xf4] ss:$8 sps:$4 sm:$0xff]   ;;  %v9484_v42 = vld [vmem:[%s11401_s19 + $0xf0] ss:$8 sps:$4 sm:$0xff]   ;;  %v9486_v44 = vld [vmem:[%s11401_s19 + $0xe4] ss:$8 sps:$4 sm:$0xff]  }
 0x12a   : > { %7854 = vmatpush1.bf16.msra.mxu1 %v9449_v19  ;;  %v9482_v41 = vld [vmem:[%s11401_s19 + $0x1f4] ss:$8 sps:$4 sm:$0xff]   ;;  %v9485_v43 = vld [vmem:[%s11401_s19 + $0x1f0] ss:$8 sps:$4 sm:$0xff]   ;;  %v9488_v45 = vld [vmem:[%s11401_s19 + $0x1e4] ss:$8 sps:$4 sm:$0xff]  }
 0x12b   : > { %7855 = vmatprep.subr.bf16.mxu1 %v9452_v21  ;;  %v9490_v46 = vld [vmem:[%s11401_s19 + $0xe0] ss:$8 sps:$4 sm:$0xff]   ;;  %v9492_v48 = vld [vmem:[%s11401_s19 + $0xd4] ss:$8 sps:$4 sm:$0xff]   ;;  %v9496_v50 = vld [vmem:[%s11401_s19 + $0xd0] ss:$8 sps:$4 sm:$0xff]  }
 0x12c   : > { %7805 = vmatpush1.bf16.msra.mxu0 %v9454_v22  ;;  %v9491_v47 = vld [vmem:[%s11401_s19 + $0x1e0] ss:$8 sps:$4 sm:$0xff]   ;;  %v9494_v49 = vld [vmem:[%s11401_s19 + $0x1d4] ss:$8 sps:$4 sm:$0xff]   ;;  %v9497_v51 = vld [vmem:[%s11401_s19 + $0x1d0] ss:$8 sps:$4 sm:$0xff]  }
 0x12d   : > { %7806 = vmatprep.subr.bf16.mxu0 %v9456_v24  ;;  %v9498_v52 = vld [vmem:[%s11401_s19 + $0xc4] ss:$8 sps:$4 sm:$0xff]   ;;  %v9502_v54 = vld [vmem:[%s11401_s19 + $0xc0] ss:$8 sps:$4 sm:$0xff]   ;;  %v9504_v56 = vld [vmem:[%s11401_s19 + $0xb4] ss:$8 sps:$4 sm:$0xff]  }
 0x12e   : > { %7856 = vmatpush1.bf16.msra.mxu1 %v9455_v23  ;;  %v9500_v53 = vld [vmem:[%s11401_s19 + $0x1c4] ss:$8 sps:$4 sm:$0xff]   ;;  %v9503_v55 = vld [vmem:[%s11401_s19 + $0x1c0] ss:$8 sps:$4 sm:$0xff]   ;;  %v9506_v57 = vld [vmem:[%s11401_s19 + $0x1b4] ss:$8 sps:$4 sm:$0xff]  }
 0x12f   : > { %7857 = vmatprep.subr.bf16.mxu1 %v9458_v25  ;;  %v9508_v58 = vld [vmem:[%s11401_s19 + $0xb0] ss:$8 sps:$4 sm:$0xff]   ;;  %v9510_v60 = vld [vmem:[%s11401_s19 + $0xa4] ss:$8 sps:$4 sm:$0xff]   ;;  %v9514_v62 = vld [vmem:[%s11401_s19 + $0xa0] ss:$8 sps:$4 sm:$0xff]  }
 0x130   : > { %7807 = vmatpush1.bf16.msra.mxu0 %v9460_v26  ;;  %v9509_v59 = vld [vmem:[%s11401_s19 + $0x1b0] ss:$8 sps:$4 sm:$0xff]   ;;  %v9512_v61 = vld [vmem:[%s11401_s19 + $0x1a4] ss:$8 sps:$4 sm:$0xff]   ;;  %v9515_v63 = vld [vmem:[%s11401_s19 + $0x1a0] ss:$8 sps:$4 sm:$0xff]  }
 0x131   : > { %7808 = vmatprep.subr.bf16.mxu0 %v9462_v28  ;;  %v9516_v4 = vld [vmem:[%s11401_s19 + $0x94] ss:$8 sps:$4 sm:$0xff]   ;;  %v9520_v8 = vld [vmem:[%s11401_s19 + $0x90] ss:$8 sps:$4 sm:$0xff]   ;;  %v9522_v10 = vld [vmem:[%s11401_s19 + $0x84] ss:$8 sps:$4 sm:$0xff]  }
 0x132   : > { %7858 = vmatpush1.bf16.msra.mxu1 %v9461_v27  ;;  %v9518_v7 = vld [vmem:[%s11401_s19 + $0x194] ss:$8 sps:$4 sm:$0xff]   ;;  %v9521_v9 = vld [vmem:[%s11401_s19 + $0x190] ss:$8 sps:$4 sm:$0xff]   ;;  %v9524_v11 = vld [vmem:[%s11401_s19 + $0x184] ss:$8 sps:$4 sm:$0xff]  }
 0x133   : > { %7859 = vmatprep.subr.bf16.mxu1 %v9464_v29  ;;  %v9526_v12 = vld [vmem:[%s11401_s19 + $0x80] ss:$8 sps:$4 sm:$0xff]   ;;  %v9530_v14 = vld [vmem:[%s11401_s19 + $0x274] ss:$8 sps:$4 sm:$0xff]   ;;  %v9528_v18 = vld [vmem:[%s11401_s19 + $0x270] ss:$8 sps:$4 sm:$0xff]  }
 0x134   : > { %7809 = vmatpush1.bf16.msra.mxu0 %v9466_v30  ;;  %v9527_v13 = vld [vmem:[%s11401_s19 + $0x180] ss:$8 sps:$4 sm:$0xff]   ;;  %v9533_v15 = vld [vmem:[%s11401_s19 + $0x374] ss:$8 sps:$4 sm:$0xff]   ;;  %v9531_v19 = vld [vmem:[%s11401_s19 + $0x370] ss:$8 sps:$4 sm:$0xff]  }
 0x135   : > { %7810 = vmatprep.subr.bf16.mxu0 %v9468_v32  ;;  %v4426_v16 = vld [vmem:[%s12264_s0 + $0x100] sm:$0xff]  ;;  %v4427_v17 = vld [vmem:[%s12264_s0 + $0x108] sm:$0xff]  ;;  %v9542_v26 = vld [vmem:[%s11401_s19 + $0x254] ss:$8 sps:$4 sm:$0xff]  }
 0x136   : > { %7860 = vmatpush1.bf16.msra.mxu1 %v9467_v31  ;;  %v9536_v20 = vld [vmem:[%s11401_s19 + $0x264] ss:$8 sps:$4 sm:$0xff]   ;;  %v8836_v22 = vcombine.high %v4426_v16, %v4426_v16  ;;  %v8838_v23 = vcombine.high %v4427_v17, %v4427_v17  ;;  %v9534_v24 = vld [vmem:[%s11401_s19 + $0x260] ss:$8 sps:$4 sm:$0xff]   ;;  %v9545_v27 = vld [vmem:[%s11401_s19 + $0x354] ss:$8 sps:$4 sm:$0xff]   ;;  %v8835_v5 = vcombine.low %v4426_v16, %v4426_v16 }
 0x137   : > { %7861 = vmatprep.subr.bf16.mxu1 %v9470_v33  ;;  %v9539_v21 = vld [vmem:[%s11401_s19 + $0x364] ss:$8 sps:$4 sm:$0xff]   ;;  %v9537_v25 = vld [vmem:[%s11401_s19 + $0x360] ss:$8 sps:$4 sm:$0xff]   ;;  %v11492_v0 = vld [vmem:[%s12264_s0 + $0x10] sm:$0xff] }
 0x138   : > { %7811 = vmatpush1.bf16.msra.mxu0 %v9472_v34  ;;  %v11497_v1 = vld [vmem:[%s12264_s0 + $0x90] sm:$0xff]  ;;  %v9548_v28 = vld [vmem:[%s11401_s19 + $0x244] ss:$8 sps:$4 sm:$0xff]   ;;  %v9546_v31 = vld [vmem:[%s11401_s19 + $0x240] ss:$8 sps:$4 sm:$0xff]  }
 0x139   : > { %7812 = vmatprep.subr.bf16.mxu0 %v9474_v36  ;;  %v9540_v2 = vld [vmem:[%s11401_s19 + $0x250] ss:$8 sps:$4 sm:$0xff]   ;;  %v9551_v29 = vld [vmem:[%s11401_s19 + $0x344] ss:$8 sps:$4 sm:$0xff]   ;;  %v8808_v30 = vcombine.high %v11492_v0, %v11497_v1  ;;  %v9549_v32 = vld [vmem:[%s11401_s19 + $0x340] ss:$8 sps:$4 sm:$0xff]  }
 0x13a   : > { %7862 = vmatpush1.bf16.msra.mxu1 %v9473_v35  ;;  %v9554_v33 = vld [vmem:[%s11401_s19 + $0x234] ss:$8 sps:$4 sm:$0xff]   ;;  %v9552_v35 = vld [vmem:[%s11401_s19 + $0x230] ss:$8 sps:$4 sm:$0xff]   ;;  %v9609_v16 = vld [vmem:[%s11401_s19 + $0x2a0] ss:$8 sps:$4 sm:$0xff]  }
 0x13b   : > { %7863 = vmatprep.subr.bf16.mxu1 %v9476_v37  ;;  %v9557_v34 = vld [vmem:[%s11401_s19 + $0x334] ss:$8 sps:$4 sm:$0xff]   ;;  %v9555_v36 = vld [vmem:[%s11401_s19 + $0x330] ss:$8 sps:$4 sm:$0xff]   ;;  %v9560_v37 = vld [vmem:[%s11401_s19 + $0x224] ss:$8 sps:$4 sm:$0xff]  }
 0x13c   : > { %7813 = vmatpush1.bf16.msra.mxu0 %v9478_v38  ;;  %v9563_v38 = vld [vmem:[%s11401_s19 + $0x324] ss:$8 sps:$4 sm:$0xff]  }
 0x13d   : > { %7814 = vmatprep.subr.bf16.mxu0 %v9480_v40  ;;  %v9558_v40 = vld [vmem:[%s11401_s19 + $0x220] ss:$8 sps:$4 sm:$0xff]  }
 0x13e   : > { %7864 = vmatpush1.bf16.msra.mxu1 %v9479_v39  ;;  %v11516_v39 = vld [vmem:[%s12264_s0 + $0x18] sm:$0xff] }
 0x13f   : > { %7865 = vmatprep.subr.bf16.mxu1 %v9482_v41  ;;  %v9561_v41 = vld [vmem:[%s11401_s19 + $0x320] ss:$8 sps:$4 sm:$0xff]  }
 0x140   : > { %7815 = vmatpush2.bf16.msra.mxu0 %v9484_v42  ;;  %v9566_v42 = vld [vmem:[%s11401_s19 + $0x214] ss:$8 sps:$4 sm:$0xff]  }
 0x141   : > { %7816 = vmatprep.subr.bf16.mxu0 %v9486_v44  ;;  %v11525_v44 = vld [vmem:[%s12264_s0 + $0x98] sm:$0xff] }
 0x142   : > { %7866 = vmatpush2.bf16.msra.mxu1 %v9485_v43  ;;  %v9569_v43 = vld [vmem:[%s11401_s19 + $0x314] ss:$8 sps:$4 sm:$0xff]  }
 0x143   : > { %7867 = vmatprep.subr.bf16.mxu1 %v9488_v45  ;;  %v8810_v45 = vcombine.high %v11516_v39, %v11525_v44 }
 0x144   : > { %7817 = vmatpush2.bf16.msra.mxu0 %v9490_v46  ;;  %v9564_v46 = vld [vmem:[%s11401_s19 + $0x210] ss:$8 sps:$4 sm:$0xff]  }
 0x145   : > { %7818 = vmatprep.subr.bf16.mxu0 %v9492_v48  ;;  %v9572_v48 = vld [vmem:[%s11401_s19 + $0x204] ss:$8 sps:$4 sm:$0xff]  }
 0x146   : > { %7868 = vmatpush2.bf16.msra.mxu1 %v9491_v47  ;;  %v9567_v47 = vld [vmem:[%s11401_s19 + $0x310] ss:$8 sps:$4 sm:$0xff]  }
 0x147   : > { %7869 = vmatprep.subr.bf16.mxu1 %v9494_v49  ;;  %v9575_v49 = vld [vmem:[%s11401_s19 + $0x304] ss:$8 sps:$4 sm:$0xff]  }
 0x148   : > { %7819 = vmatpush2.bf16.msra.mxu0 %v9496_v50  ;;  %v9570_v50 = vld [vmem:[%s11401_s19 + $0x200] ss:$8 sps:$4 sm:$0xff]  }
 0x149   : > { %7820 = vmatprep.subr.bf16.mxu0 %v9498_v52  ;;  %v9578_v52 = vld [vmem:[%s11401_s19 + $0x2f4] ss:$8 sps:$4 sm:$0xff]  }
 0x14a   : > { %7870 = vmatpush2.bf16.msra.mxu1 %v9497_v51  ;;  %v9573_v51 = vld [vmem:[%s11401_s19 + $0x300] ss:$8 sps:$4 sm:$0xff]  }
 0x14b   : > { %7871 = vmatprep.subr.bf16.mxu1 %v9500_v53  ;;  %v9581_v53 = vld [vmem:[%s11401_s19 + $0x3f4] ss:$8 sps:$4 sm:$0xff]  }
 0x14c   : > { %7821 = vmatpush2.bf16.msra.mxu0 %v9502_v54  ;;  %v9576_v54 = vld [vmem:[%s11401_s19 + $0x2f0] ss:$8 sps:$4 sm:$0xff]  }
 0x14d   : > { %7822 = vmatprep.subr.bf16.mxu0 %v9504_v56  ;;  %v9584_v56 = vld [vmem:[%s11401_s19 + $0x2e4] ss:$8 sps:$4 sm:$0xff]  }
 0x14e   : > { %7872 = vmatpush2.bf16.msra.mxu1 %v9503_v55  ;;  %v9579_v55 = vld [vmem:[%s11401_s19 + $0x3f0] ss:$8 sps:$4 sm:$0xff]  }
 0x14f   : > { %7873 = vmatprep.subr.bf16.mxu1 %v9506_v57  ;;  %v9587_v57 = vld [vmem:[%s11401_s19 + $0x3e4] ss:$8 sps:$4 sm:$0xff]  }
 0x150   : > { %7823 = vmatpush2.bf16.msra.mxu0 %v9508_v58  ;;  %v9582_v58 = vld [vmem:[%s11401_s19 + $0x2e0] ss:$8 sps:$4 sm:$0xff]  }
 0x151   : > { %7824 = vmatprep.subr.bf16.mxu0 %v9510_v60  ;;  %v9590_v60 = vld [vmem:[%s11401_s19 + $0x2d4] ss:$8 sps:$4 sm:$0xff]  }
 0x152   : > { %7874 = vmatpush2.bf16.msra.mxu1 %v9509_v59  ;;  %v9585_v59 = vld [vmem:[%s11401_s19 + $0x3e0] ss:$8 sps:$4 sm:$0xff]  }
 0x153   : > { %7875 = vmatprep.subr.bf16.mxu1 %v9512_v61  ;;  %v9593_v61 = vld [vmem:[%s11401_s19 + $0x3d4] ss:$8 sps:$4 sm:$0xff]  }
 0x154   : > { %7825 = vmatpush2.bf16.msra.mxu0 %v9514_v62  ;;  %v9588_v62 = vld [vmem:[%s11401_s19 + $0x2d0] ss:$8 sps:$4 sm:$0xff]  }
 0x155   : > { %7826 = vmatprep.subr.bf16.mxu0 %v9516_v4  ;;  %v9596_v4 = vld [vmem:[%s11401_s19 + $0x2c4] ss:$8 sps:$4 sm:$0xff]  }
 0x156   : > { %7876 = vmatpush2.bf16.msra.mxu1 %v9515_v63  ;;  %v9591_v63 = vld [vmem:[%s11401_s19 + $0x3d0] ss:$8 sps:$4 sm:$0xff]  }
 0x157   : > { %7877 = vmatprep.subr.bf16.mxu1 %v9518_v7  ;;  %v9599_v7 = vld [vmem:[%s11401_s19 + $0x3c4] ss:$8 sps:$4 sm:$0xff]  }
 0x158   : > { %7827 = vmatpush2.bf16.msra.mxu0 %v9520_v8  ;;  %v9594_v8 = vld [vmem:[%s11401_s19 + $0x2c0] ss:$8 sps:$4 sm:$0xff]  }
 0x159   : > { %7828 = vmatprep.subr.bf16.mxu0 %v9522_v10  ;;  %v9602_v10 = vld [vmem:[%s11401_s19 + $0x2b4] ss:$8 sps:$4 sm:$0xff]  }
 0x15a   : > { %7878 = vmatpush2.bf16.msra.mxu1 %v9521_v9  ;;  %v9597_v9 = vld [vmem:[%s11401_s19 + $0x3c0] ss:$8 sps:$4 sm:$0xff]  }
 0x15b   : > { %7879 = vmatprep.subr.bf16.mxu1 %v9524_v11  ;;  %v9605_v11 = vld [vmem:[%s11401_s19 + $0x3b4] ss:$8 sps:$4 sm:$0xff]  }
 0x15c   : > { %7829 = vmatpush2.bf16.msra.mxu0 %v9526_v12  ;;  %v9600_v12 = vld [vmem:[%s11401_s19 + $0x2b0] ss:$8 sps:$4 sm:$0xff]  }
 0x15d   : > { %7900 = vmatprep.subr.bf16.mxu0 %v9530_v14  ;;  %v9611_v14 = vld [vmem:[%s11401_s19 + $0x2a4] ss:$8 sps:$4 sm:$0xff]  }
 0x15e   : > { %7880 = vmatpush2.bf16.msra.mxu1 %v9527_v13  ;;  %v9603_v13 = vld [vmem:[%s11401_s19 + $0x3b0] ss:$8 sps:$4 sm:$0xff]  }
 0x15f   : > { %7951 = vmatprep.subr.bf16.mxu1 %v9533_v15  ;;  %7831 = vmatmul.mubr.bf16.vlgmr.msra.gmra.mxu0 %v8803_v3  ;;  %v9543_v3 = vld [vmem:[%s11401_s19 + $0x350] ss:$8 sps:$4 sm:$0xff]   ;;  %v9614_v15 = vld [vmem:[%s11401_s19 + $0x3a4] ss:$8 sps:$4 sm:$0xff]  }
 0x160   : > { %7901 = vmatpush1.bf16.msra.mxu0 %v9528_v18  ;;  %7840 = vmatprep.mubr.bf16.mxu0 %v8836_v22  ;;  %v9618_v18 = vld [vmem:[%s11401_s19 + $0x294] ss:$8 sps:$4 sm:$0xff]   ;;  %v9624_v22 = vld [vmem:[%s11401_s19 + $0x284] ss:$8 sps:$4 sm:$0xff]  }
 0x161   : > { %7882 = vmatmul.mubr.bf16.vlgmr.msra.gmra.mxu1 %v8805_v6  ;;  %7902 = vmatprep.subr.bf16.mxu0 %v9536_v20  ;;  %v8837_v6 = vcombine.low %v4427_v17, %v4427_v17  ;;  %v9612_v17 = vld [vmem:[%s11401_s19 + $0x3a0] ss:$8 sps:$4 sm:$0xff]   ;;  %v9616_v20 = vld [vmem:[%s11401_s19 + $0x290] ss:$8 sps:$4 sm:$0xff]  }
 0x162   : > { %7952 = vmatpush1.bf16.msra.mxu1 %v9531_v19  ;;  %7891 = vmatprep.mubr.bf16.mxu1 %v8838_v23  ;;  %v9621_v19 = vld [vmem:[%s11401_s19 + $0x394] ss:$8 sps:$4 sm:$0xff]   ;;  %v9627_v23 = vld [vmem:[%s11401_s19 + $0x384] ss:$8 sps:$4 sm:$0xff]  }
 0x163   : > { %7953 = vmatprep.subr.bf16.mxu1 %v9539_v21  ;;  %v9619_v21 = vld [vmem:[%s11401_s19 + $0x390] ss:$8 sps:$4 sm:$0xff]  }
 0x164   : > { %7903 = vmatpush1.bf16.msra.mxu0 %v9534_v24  ;;  %v9622_v24 = vld [vmem:[%s11401_s19 + $0x280] ss:$8 sps:$4 sm:$0xff]  }
 0x165   : > { %7904 = vmatprep.subr.bf16.mxu0 %v9542_v26  ;;  %v9630_v26 = vld [vmem:[%s11401_s19 + $0x474] ss:$8 sps:$4 sm:$0xff]  }
 0x166   : > { %7954 = vmatpush1.bf16.msra.mxu1 %v9537_v25  ;;  %v9625_v25 = vld [vmem:[%s11401_s19 + $0x380] ss:$8 sps:$4 sm:$0xff]  }
 0x167   : > { %7955 = vmatprep.subr.bf16.mxu1 %v9545_v27  ;;  %7841 = vmatmul.mubr.bf16.gmra.mxu0 %v8835_v5  ;;  %v9633_v27 = vld [vmem:[%s11401_s19 + $0x574] ss:$8 sps:$4 sm:$0xff]  }
 0x168   : > { %7905 = vmatpush1.bf16.msra.mxu0 %v9540_v2  ;;  %7932 = vmatprep.mubr.bf16.mxu0 %v8808_v30  ;;  %v8807_v2 = vcombine.low %v11492_v0, %v11497_v1  ;;  %v4428_v5 = vld [vmem:[%s12264_s0 + $0x110] sm:$0xff]  ;;  %v9636_v0 = vld [vmem:[%s11401_s19 + $0x464] ss:$8 sps:$4 sm:$0xff]  }
 0x169   : > { %7892 = vmatmul.mubr.bf16.gmra.mxu1 %v8837_v6  ;;  %7906 = vmatprep.subr.bf16.mxu0 %v9548_v28  ;;  %v4429_v6 = vld [vmem:[%s12264_s0 + $0x118] sm:$0xff]  ;;  %v9639_v1 = vld [vmem:[%s11401_s19 + $0x564] ss:$8 sps:$4 sm:$0xff]   ;;  %v8840_v30 = vcombine.high %v4428_v5, %v4428_v5 }
 0x16a   : > { %7956 = vmatpush1.bf16.msra.mxu1 %v9543_v3  ;;  %7983 = vmatprep.mubr.bf16.mxu1 %v8810_v45  ;;  %v8809_v3 = vcombine.low %v11516_v39, %v11525_v44  ;;  %v9628_v28 = vld [vmem:[%s11401_s19 + $0x470] ss:$8 sps:$4 sm:$0xff]   ;;  %v8839_v39 = vcombine.low %v4428_v5, %v4428_v5  ;;  %v9652_v44 = vld [vmem:[%s11401_s19 + $0x444] ss:$8 sps:$4 sm:$0xff]   ;;  %v9710_v5 = vld [vmem:[%s11401_s19 + $0x4a0] ss:$8 sps:$4 sm:$0xff]  }
 0x16b   : > { %7957 = vmatprep.subr.bf16.mxu1 %v9551_v29  ;;  %v9631_v29 = vld [vmem:[%s11401_s19 + $0x570] ss:$8 sps:$4 sm:$0xff]   ;;  %v9655_v45 = vld [vmem:[%s11401_s19 + $0x544] ss:$8 sps:$4 sm:$0xff]  }
 0x16c   : > { %7907 = vmatpush1.bf16.msra.mxu0 %v9546_v31  ;;  %v8842_v31 = vcombine.high %v4429_v6, %v4429_v6 }
 0x16d   : > { %7908 = vmatprep.subr.bf16.mxu0 %v9554_v33  ;;  %v9637_v33 = vld [vmem:[%s11401_s19 + $0x560] ss:$8 sps:$4 sm:$0xff]  }
 0x16e   : > { %7958 = vmatpush1.bf16.msra.mxu1 %v9549_v32  ;;  %v9634_v32 = vld [vmem:[%s11401_s19 + $0x460] ss:$8 sps:$4 sm:$0xff]  }
 0x16f   : > { %7959 = vmatprep.subr.bf16.mxu1 %v9557_v34  ;;  %v9644_v34 = vld [vmem:[%s11401_s19 + $0x454] ss:$8 sps:$4 sm:$0xff]  }
 0x170   : > { %7909 = vmatpush1.bf16.msra.mxu0 %v9552_v35  ;;  %v9647_v35 = vld [vmem:[%s11401_s19 + $0x554] ss:$8 sps:$4 sm:$0xff]  }
 0x171   : > { %7910 = vmatprep.subr.bf16.mxu0 %v9560_v37  ;;  %v9645_v37 = vld [vmem:[%s11401_s19 + $0x550] ss:$8 sps:$4 sm:$0xff]  }
 0x172   : > { %7960 = vmatpush1.bf16.msra.mxu1 %v9555_v36  ;;  %v9642_v36 = vld [vmem:[%s11401_s19 + $0x450] ss:$8 sps:$4 sm:$0xff]  }
 0x173   : > { %7961 = vmatprep.subr.bf16.mxu1 %v9563_v38  ;;  %v11592_v38 = vld [vmem:[%s12264_s0 + $0x20] sm:$0xff] }
 0x174   : > { %7911 = vmatpush1.bf16.msra.mxu0 %v9558_v40  ;;  %v8841_v40 = vcombine.low %v4429_v6, %v4429_v6  ;;  %v9713_v6 = vld [vmem:[%s11401_s19 + $0x5a0] ss:$8 sps:$4 sm:$0xff]  }
 0x175   : > { %7912 = vmatprep.subr.bf16.mxu0 %v9566_v42  ;;  %v11602_v42 = vld [vmem:[%s12264_s0 + $0x28] sm:$0xff] }
 0x176   : > { %7962 = vmatpush1.bf16.msra.mxu1 %v9561_v41  ;;  %v11597_v41 = vld [vmem:[%s12264_s0 + $0xa0] sm:$0xff] }
 0x177   : > { %7963 = vmatprep.subr.bf16.mxu1 %v9569_v43  ;;  %v11607_v43 = vld [vmem:[%s12264_s0 + $0xa8] sm:$0xff] }
 0x178   : > { %7913 = vmatpush1.bf16.msra.mxu0 %v9564_v46  ;;  %v8812_v46 = vcombine.high %v11592_v38, %v11597_v41 }
 0x179   : > { %7914 = vmatprep.subr.bf16.mxu0 %v9572_v48  ;;  %v9650_v48 = vld [vmem:[%s11401_s19 + $0x440] ss:$8 sps:$4 sm:$0xff]  }
 0x17a   : > { %7964 = vmatpush1.bf16.msra.mxu1 %v9567_v47  ;;  %v8814_v47 = vcombine.high %v11602_v42, %v11607_v43 }
 0x17b   : > { %7965 = vmatprep.subr.bf16.mxu1 %v9575_v49  ;;  %v9653_v49 = vld [vmem:[%s11401_s19 + $0x540] ss:$8 sps:$4 sm:$0xff]  }
 0x17c   : > { %7915 = vmatpush1.bf16.msra.mxu0 %v9570_v50  ;;  %v9658_v50 = vld [vmem:[%s11401_s19 + $0x434] ss:$8 sps:$4 sm:$0xff]  }
 0x17d   : > { %7916 = vmatprep.subr.bf16.mxu0 %v9578_v52  ;;  %v9656_v52 = vld [vmem:[%s11401_s19 + $0x430] ss:$8 sps:$4 sm:$0xff]  }
 0x17e   : > { %7966 = vmatpush1.bf16.msra.mxu1 %v9573_v51  ;;  %v9661_v51 = vld [vmem:[%s11401_s19 + $0x534] ss:$8 sps:$4 sm:$0xff]  }
 0x17f   : > { %7967 = vmatprep.subr.bf16.mxu1 %v9581_v53  ;;  %v9659_v53 = vld [vmem:[%s11401_s19 + $0x530] ss:$8 sps:$4 sm:$0xff]  }
 0x180   : > { %7917 = vmatpush2.bf16.msra.mxu0 %v9576_v54  ;;  %v9664_v54 = vld [vmem:[%s11401_s19 + $0x424] ss:$8 sps:$4 sm:$0xff]  }
 0x181   : > { %7918 = vmatprep.subr.bf16.mxu0 %v9584_v56  ;;  %v9662_v56 = vld [vmem:[%s11401_s19 + $0x420] ss:$8 sps:$4 sm:$0xff]  }
 0x182   : > { %7968 = vmatpush2.bf16.msra.mxu1 %v9579_v55  ;;  %v9667_v55 = vld [vmem:[%s11401_s19 + $0x524] ss:$8 sps:$4 sm:$0xff]  }
 0x183   : > { %7969 = vmatprep.subr.bf16.mxu1 %v9587_v57  ;;  %v9665_v57 = vld [vmem:[%s11401_s19 + $0x520] ss:$8 sps:$4 sm:$0xff]  }
 0x184   : > { %7919 = vmatpush2.bf16.msra.mxu0 %v9582_v58  ;;  %v9670_v58 = vld [vmem:[%s11401_s19 + $0x414] ss:$8 sps:$4 sm:$0xff]  }
 0x185   : > { %7920 = vmatprep.subr.bf16.mxu0 %v9590_v60  ;;  %v9668_v60 = vld [vmem:[%s11401_s19 + $0x410] ss:$8 sps:$4 sm:$0xff]  }
 0x186   : > { %7970 = vmatpush2.bf16.msra.mxu1 %v9585_v59  ;;  %v9673_v59 = vld [vmem:[%s11401_s19 + $0x514] ss:$8 sps:$4 sm:$0xff]  }
 0x187   : > { %7971 = vmatprep.subr.bf16.mxu1 %v9593_v61  ;;  %v9671_v61 = vld [vmem:[%s11401_s19 + $0x510] ss:$8 sps:$4 sm:$0xff]  }
 0x188   : > { %7921 = vmatpush2.bf16.msra.mxu0 %v9588_v62  ;;  %v9676_v62 = vld [vmem:[%s11401_s19 + $0x404] ss:$8 sps:$4 sm:$0xff]  }
 0x189   : > { %7922 = vmatprep.subr.bf16.mxu0 %v9596_v4  ;;  %v9674_v4 = vld [vmem:[%s11401_s19 + $0x400] ss:$8 sps:$4 sm:$0xff]  }
 0x18a   : > { %7972 = vmatpush2.bf16.msra.mxu1 %v9591_v63  ;;  %v9679_v63 = vld [vmem:[%s11401_s19 + $0x504] ss:$8 sps:$4 sm:$0xff]  }
 0x18b   : > { %7973 = vmatprep.subr.bf16.mxu1 %v9599_v7  ;;  %v9677_v7 = vld [vmem:[%s11401_s19 + $0x500] ss:$8 sps:$4 sm:$0xff]  }
 0x18c   : > { %7923 = vmatpush2.bf16.msra.mxu0 %v9594_v8  ;;  %v9682_v8 = vld [vmem:[%s11401_s19 + $0x4f4] ss:$8 sps:$4 sm:$0xff]  }
 0x18d   : > { %7924 = vmatprep.subr.bf16.mxu0 %v9602_v10  ;;  %v9680_v10 = vld [vmem:[%s11401_s19 + $0x4f0] ss:$8 sps:$4 sm:$0xff]  }
 0x18e   : > { %7974 = vmatpush2.bf16.msra.mxu1 %v9597_v9  ;;  %v9685_v9 = vld [vmem:[%s11401_s19 + $0x5f4] ss:$8 sps:$4 sm:$0xff]  }
 0x18f   : > { %7975 = vmatprep.subr.bf16.mxu1 %v9605_v11  ;;  %v9683_v11 = vld [vmem:[%s11401_s19 + $0x5f0] ss:$8 sps:$4 sm:$0xff]  }
 0x190   : > { %7925 = vmatpush2.bf16.msra.mxu0 %v9600_v12  ;;  %v9688_v12 = vld [vmem:[%s11401_s19 + $0x4e4] ss:$8 sps:$4 sm:$0xff]  }
 0x191   : > { %7926 = vmatprep.subr.bf16.mxu0 %v9611_v14  ;;  %v9686_v14 = vld [vmem:[%s11401_s19 + $0x4e0] ss:$8 sps:$4 sm:$0xff]  }
 0x192   : > { %7976 = vmatpush2.bf16.msra.mxu1 %v9603_v13  ;;  %v9691_v13 = vld [vmem:[%s11401_s19 + $0x5e4] ss:$8 sps:$4 sm:$0xff]  }
 0x193   : > { %7977 = vmatprep.subr.bf16.mxu1 %v9614_v15  ;;  %v9689_v15 = vld [vmem:[%s11401_s19 + $0x5e0] ss:$8 sps:$4 sm:$0xff]  }
 0x194   : > { %7927 = vmatpush2.bf16.msra.mxu0 %v9609_v16  ;;  %v9694_v16 = vld [vmem:[%s11401_s19 + $0x4d4] ss:$8 sps:$4 sm:$0xff]  }
 0x195   : > { %7928 = vmatprep.subr.bf16.mxu0 %v9618_v18  ;;  %v9692_v18 = vld [vmem:[%s11401_s19 + $0x4d0] ss:$8 sps:$4 sm:$0xff]  }
 0x196   : > { %7978 = vmatpush2.bf16.msra.mxu1 %v9612_v17  ;;  %v9697_v17 = vld [vmem:[%s11401_s19 + $0x5d4] ss:$8 sps:$4 sm:$0xff]  }
 0x197   : > { %7979 = vmatprep.subr.bf16.mxu1 %v9621_v19  ;;  %v9695_v19 = vld [vmem:[%s11401_s19 + $0x5d0] ss:$8 sps:$4 sm:$0xff]  }
 0x198   : > { %7929 = vmatpush2.bf16.msra.mxu0 %v9616_v20  ;;  %v9700_v20 = vld [vmem:[%s11401_s19 + $0x4c4] ss:$8 sps:$4 sm:$0xff]  }
 0x199   : > { %7930 = vmatprep.subr.bf16.mxu0 %v9624_v22  ;;  %v9698_v22 = vld [vmem:[%s11401_s19 + $0x4c0] ss:$8 sps:$4 sm:$0xff]  }
 0x19a   : > { %7980 = vmatpush2.bf16.msra.mxu1 %v9619_v21  ;;  %v9703_v21 = vld [vmem:[%s11401_s19 + $0x5c4] ss:$8 sps:$4 sm:$0xff]  }
 0x19b   : > { %7981 = vmatprep.subr.bf16.mxu1 %v9627_v23  ;;  %v9701_v23 = vld [vmem:[%s11401_s19 + $0x5c0] ss:$8 sps:$4 sm:$0xff]  }
 0x19c   : > { %7931 = vmatpush2.bf16.msra.mxu0 %v9622_v24  ;;  %v9706_v24 = vld [vmem:[%s11401_s19 + $0x4b4] ss:$8 sps:$4 sm:$0xff]  }
 0x19d   : > { %8002 = vmatprep.subr.bf16.mxu0 %v9630_v26  ;;  %v9704_v26 = vld [vmem:[%s11401_s19 + $0x4b0] ss:$8 sps:$4 sm:$0xff]  }
 0x19e   : > { %7982 = vmatpush2.bf16.msra.mxu1 %v9625_v25  ;;  %v9709_v25 = vld [vmem:[%s11401_s19 + $0x5b4] ss:$8 sps:$4 sm:$0xff]  }
 0x19f   : > { %8053 = vmatprep.subr.bf16.mxu1 %v9633_v27  ;;  %7933 = vmatmul.mubr.bf16.vlgmr.msra.gmra.mxu0 %v8807_v2  ;;  %v9707_v27 = vld [vmem:[%s11401_s19 + $0x5b0] ss:$8 sps:$4 sm:$0xff]   ;;  %v9712_v2 = vld [vmem:[%s11401_s19 + $0x4a4] ss:$8 sps:$4 sm:$0xff]  }
 0x1a0   : > { %8003 = vmatpush1.bf16.msra.mxu0 %v9628_v28  ;;  %7942 = vmatprep.mubr.bf16.mxu0 %v8840_v30  ;;  %v9718_v28 = vld [vmem:[%s11401_s19 + $0x494] ss:$8 sps:$4 sm:$0xff]   ;;  %v9724_v30 = vld [vmem:[%s11401_s19 + $0x484] ss:$8 sps:$4 sm:$0xff]  }
 0x1a1   : > { %7984 = vmatmul.mubr.bf16.vlgmr.msra.gmra.mxu1 %v8809_v3  ;;  %8004 = vmatprep.subr.bf16.mxu0 %v9636_v0  ;;  %v9715_v3 = vld [vmem:[%s11401_s19 + $0x5a4] ss:$8 sps:$4 sm:$0xff]   ;;  %v9716_v0 = vld [vmem:[%s11401_s19 + $0x490] ss:$8 sps:$4 sm:$0xff]  }
 0x1a2   : > { %8054 = vmatpush1.bf16.msra.mxu1 %v9631_v29  ;;  %7993 = vmatprep.mubr.bf16.mxu1 %v8842_v31  ;;  %v9721_v29 = vld [vmem:[%s11401_s19 + $0x594] ss:$8 sps:$4 sm:$0xff]   ;;  %v9727_v31 = vld [vmem:[%s11401_s19 + $0x584] ss:$8 sps:$4 sm:$0xff]  }
 0x1a3   : > { %8055 = vmatprep.subr.bf16.mxu1 %v9639_v1  ;;  %v9719_v1 = vld [vmem:[%s11401_s19 + $0x590] ss:$8 sps:$4 sm:$0xff]  }
 0x1a4   : > { %8005 = vmatpush1.bf16.msra.mxu0 %v9634_v32  ;;  %v9722_v32 = vld [vmem:[%s11401_s19 + $0x480] ss:$8 sps:$4 sm:$0xff]  }
 0x1a5   : > { %8006 = vmatprep.subr.bf16.mxu0 %v9644_v34  ;;  %v9730_v34 = vld [vmem:[%s11401_s19 + $0x674] ss:$8 sps:$4 sm:$0xff]  }
 0x1a6   : > { %8056 = vmatpush1.bf16.msra.mxu1 %v9637_v33  ;;  %v9725_v33 = vld [vmem:[%s11401_s19 + $0x580] ss:$8 sps:$4 sm:$0xff]  }
 0x1a7   : > { %8057 = vmatprep.subr.bf16.mxu1 %v9647_v35  ;;  %7943 = vmatmul.mubr.bf16.gmra.mxu0 %v8839_v39  ;;  %v9733_v35 = vld [vmem:[%s11401_s19 + $0x774] ss:$8 sps:$4 sm:$0xff]   ;;  %v8811_v39 = vcombine.low %v11592_v38, %v11597_v41  ;;  %v9739_v38 = vld [vmem:[%s11401_s19 + $0x764] ss:$8 sps:$4 sm:$0xff]  }
 0x1a8   : > { %8007 = vmatpush1.bf16.msra.mxu0 %v9642_v36  ;;  %8034 = vmatprep.mubr.bf16.mxu0 %v8812_v46  ;;  %v9728_v36 = vld [vmem:[%s11401_s19 + $0x670] ss:$8 sps:$4 sm:$0xff]   ;;  %v9736_v46 = vld [vmem:[%s11401_s19 + $0x664] ss:$8 sps:$4 sm:$0xff]  }
 0x1a9   : > { %7994 = vmatmul.mubr.bf16.gmra.mxu1 %v8841_v40  ;;  %8008 = vmatprep.subr.bf16.mxu0 %v9652_v44  ;;  %v8813_v40 = vcombine.low %v11602_v42, %v11607_v43  ;;  %v4430_v44 = vld [vmem:[%s12264_s0 + $0x120] sm:$0xff] }
 0x1aa   : > { %8058 = vmatpush1.bf16.msra.mxu1 %v9645_v37  ;;  %8085 = vmatprep.mubr.bf16.mxu1 %v8814_v47  ;;  %v9731_v37 = vld [vmem:[%s11401_s19 + $0x770] ss:$8 sps:$4 sm:$0xff]   ;;  %v8844_v41 = vcombine.high %v4430_v44, %v4430_v44  ;;  %v9734_v43 = vld [vmem:[%s11401_s19 + $0x660] ss:$8 sps:$4 sm:$0xff]  }
 0x1ab   : > { %8059 = vmatprep.subr.bf16.mxu1 %v9655_v45  ;;  %v4431_v45 = vld [vmem:[%s12264_s0 + $0x128] sm:$0xff] }
 0x1ac   : > { %8009 = vmatpush1.bf16.msra.mxu0 %v9650_v48  ;;  %v8846_v42 = vcombine.high %v4431_v45, %v4431_v45  ;;  %v9737_v47 = vld [vmem:[%s11401_s19 + $0x760] ss:$8 sps:$4 sm:$0xff]   ;;  %v9744_v48 = vld [vmem:[%s11401_s19 + $0x654] ss:$8 sps:$4 sm:$0xff]  }
 0x1ad   : > { %8010 = vmatprep.subr.bf16.mxu0 %v9658_v50  ;;  %v9742_v50 = vld [vmem:[%s11401_s19 + $0x650] ss:$8 sps:$4 sm:$0xff]  }
 0x1ae   : > { %8060 = vmatpush1.bf16.msra.mxu1 %v9653_v49  ;;  %v9747_v49 = vld [vmem:[%s11401_s19 + $0x754] ss:$8 sps:$4 sm:$0xff]  }
 0x1af   : > { %8061 = vmatprep.subr.bf16.mxu1 %v9661_v51  ;;  %v9745_v51 = vld [vmem:[%s11401_s19 + $0x750] ss:$8 sps:$4 sm:$0xff]  }
 0x1b0   : > { %8011 = vmatpush1.bf16.msra.mxu0 %v9656_v52  ;;  %v11690_v52 = vld [vmem:[%s12264_s0 + $0x30] sm:$0xff] }
 0x1b1   : > { %8012 = vmatprep.subr.bf16.mxu0 %v9664_v54  ;;  %v8843_v54 = vcombine.low %v4430_v44, %v4430_v44  ;;  %v4956_v44 = vlaneseq }
 0x1b2   : > { %8062 = vmatpush1.bf16.msra.mxu1 %v9659_v53  ;;  %v11695_v53 = vld [vmem:[%s12264_s0 + $0xb0] sm:$0xff] }
 0x1b3   : > { %8063 = vmatprep.subr.bf16.mxu1 %v9667_v55  ;;  %v8845_v55 = vcombine.low %v4431_v45, %v4431_v45  ;;  %v9818_v45 = vld [vmem:[%s11401_s19 + $0x694] ss:$8 sps:$4 sm:$0xff]  }
 0x1b4   : > { %8013 = vmatpush1.bf16.msra.mxu0 %v9662_v56  ;;  %v11700_v56 = vld [vmem:[%s12264_s0 + $0x38] sm:$0xff] }
 0x1b5   : > { %8014 = vmatprep.subr.bf16.mxu0 %v9670_v58  ;;  %v9752_v58 = vld [vmem:[%s11401_s19 + $0x644] ss:$8 sps:$4 sm:$0xff]  }
 0x1b6   : > { %8064 = vmatpush1.bf16.msra.mxu1 %v9665_v57  ;;  %v11705_v57 = vld [vmem:[%s12264_s0 + $0xb8] sm:$0xff] }
 0x1b7   : > { %8065 = vmatprep.subr.bf16.mxu1 %v9673_v59  ;;  %v9755_v59 = vld [vmem:[%s11401_s19 + $0x744] ss:$8 sps:$4 sm:$0xff]  }
 0x1b8   : > { %8015 = vmatpush1.bf16.msra.mxu0 %v9668_v60  ;;  %v8816_v60 = vcombine.high %v11690_v52, %v11695_v53 }
 0x1b9   : > { %8016 = vmatprep.subr.bf16.mxu0 %v9676_v62  ;;  %v9750_v62 = vld [vmem:[%s11401_s19 + $0x640] ss:$8 sps:$4 sm:$0xff]  }
 0x1ba   : > { %8066 = vmatpush1.bf16.msra.mxu1 %v9671_v61  ;;  %v8818_v61 = vcombine.high %v11700_v56, %v11705_v57 }
 0x1bb   : > { %8067 = vmatprep.subr.bf16.mxu1 %v9679_v63  ;;  %v9753_v63 = vld [vmem:[%s11401_s19 + $0x740] ss:$8 sps:$4 sm:$0xff]  }
 0x1bc   : > { %8017 = vmatpush1.bf16.msra.mxu0 %v9674_v4  ;;  %v9758_v4 = vld [vmem:[%s11401_s19 + $0x634] ss:$8 sps:$4 sm:$0xff]  }
 0x1bd   : > { %8018 = vmatprep.subr.bf16.mxu0 %v9682_v8  ;;  %v9756_v8 = vld [vmem:[%s11401_s19 + $0x630] ss:$8 sps:$4 sm:$0xff]  }
 0x1be   : > { %8068 = vmatpush1.bf16.msra.mxu1 %v9677_v7  ;;  %v9761_v7 = vld [vmem:[%s11401_s19 + $0x734] ss:$8 sps:$4 sm:$0xff]  }
 0x1bf   : > { %8069 = vmatprep.subr.bf16.mxu1 %v9685_v9  ;;  %v9759_v9 = vld [vmem:[%s11401_s19 + $0x730] ss:$8 sps:$4 sm:$0xff]  }
 0x1c0   : > { %8019 = vmatpush2.bf16.msra.mxu0 %v9680_v10  ;;  %v9764_v10 = vld [vmem:[%s11401_s19 + $0x624] ss:$8 sps:$4 sm:$0xff]  }
 0x1c1   : > { %8020 = vmatprep.subr.bf16.mxu0 %v9688_v12  ;;  %v9762_v12 = vld [vmem:[%s11401_s19 + $0x620] ss:$8 sps:$4 sm:$0xff]  }
 0x1c2   : > { %8070 = vmatpush2.bf16.msra.mxu1 %v9683_v11  ;;  %v9767_v11 = vld [vmem:[%s11401_s19 + $0x724] ss:$8 sps:$4 sm:$0xff]  }
 0x1c3   : > { %8071 = vmatprep.subr.bf16.mxu1 %v9691_v13  ;;  %v9765_v13 = vld [vmem:[%s11401_s19 + $0x720] ss:$8 sps:$4 sm:$0xff]  }
 0x1c4   : > { %8021 = vmatpush2.bf16.msra.mxu0 %v9686_v14  ;;  %v9770_v14 = vld [vmem:[%s11401_s19 + $0x614] ss:$8 sps:$4 sm:$0xff]  }
 0x1c5   : > { %8022 = vmatprep.subr.bf16.mxu0 %v9694_v16  ;;  %v9768_v16 = vld [vmem:[%s11401_s19 + $0x610] ss:$8 sps:$4 sm:$0xff]  }
 0x1c6   : > { %8072 = vmatpush2.bf16.msra.mxu1 %v9689_v15  ;;  %v9773_v15 = vld [vmem:[%s11401_s19 + $0x714] ss:$8 sps:$4 sm:$0xff]  }
 0x1c7   : > { %8073 = vmatprep.subr.bf16.mxu1 %v9697_v17  ;;  %v9771_v17 = vld [vmem:[%s11401_s19 + $0x710] ss:$8 sps:$4 sm:$0xff]  }
 0x1c8   : > { %8023 = vmatpush2.bf16.msra.mxu0 %v9692_v18  ;;  %v9776_v18 = vld [vmem:[%s11401_s19 + $0x604] ss:$8 sps:$4 sm:$0xff]  }
 0x1c9   : > { %8024 = vmatprep.subr.bf16.mxu0 %v9700_v20  ;;  %v9774_v20 = vld [vmem:[%s11401_s19 + $0x600] ss:$8 sps:$4 sm:$0xff]  }
 0x1ca   : > { %8074 = vmatpush2.bf16.msra.mxu1 %v9695_v19  ;;  %v9779_v19 = vld [vmem:[%s11401_s19 + $0x704] ss:$8 sps:$4 sm:$0xff]  }
 0x1cb   : > { %8075 = vmatprep.subr.bf16.mxu1 %v9703_v21  ;;  %v9777_v21 = vld [vmem:[%s11401_s19 + $0x700] ss:$8 sps:$4 sm:$0xff]  }
 0x1cc   : > { %8025 = vmatpush2.bf16.msra.mxu0 %v9698_v22  ;;  %v9782_v22 = vld [vmem:[%s11401_s19 + $0x6f4] ss:$8 sps:$4 sm:$0xff]  }
 0x1cd   : > { %8026 = vmatprep.subr.bf16.mxu0 %v9706_v24  ;;  %v9780_v24 = vld [vmem:[%s11401_s19 + $0x6f0] ss:$8 sps:$4 sm:$0xff]  }
 0x1ce   : > { %8076 = vmatpush2.bf16.msra.mxu1 %v9701_v23  ;;  %v9785_v23 = vld [vmem:[%s11401_s19 + $0x7f4] ss:$8 sps:$4 sm:$0xff]  }
 0x1cf   : > { %8077 = vmatprep.subr.bf16.mxu1 %v9709_v25  ;;  %v9783_v25 = vld [vmem:[%s11401_s19 + $0x7f0] ss:$8 sps:$4 sm:$0xff]  }
 0x1d0   : > { %8027 = vmatpush2.bf16.msra.mxu0 %v9704_v26  ;;  %v9788_v26 = vld [vmem:[%s11401_s19 + $0x6e4] ss:$8 sps:$4 sm:$0xff]  }
 0x1d1   : > { %8028 = vmatprep.subr.bf16.mxu0 %v9712_v2  ;;  %v9786_v2 = vld [vmem:[%s11401_s19 + $0x6e0] ss:$8 sps:$4 sm:$0xff]  }
 0x1d2   : > { %8078 = vmatpush2.bf16.msra.mxu1 %v9707_v27  ;;  %v9791_v27 = vld [vmem:[%s11401_s19 + $0x7e4] ss:$8 sps:$4 sm:$0xff]  }
 0x1d3   : > { %8079 = vmatprep.subr.bf16.mxu1 %v9715_v3  ;;  %v9789_v3 = vld [vmem:[%s11401_s19 + $0x7e0] ss:$8 sps:$4 sm:$0xff]  }
 0x1d4   : > { %8029 = vmatpush2.bf16.msra.mxu0 %v9710_v5  ;;  %v9794_v5 = vld [vmem:[%s11401_s19 + $0x6d4] ss:$8 sps:$4 sm:$0xff]  }
 0x1d5   : > { %8030 = vmatprep.subr.bf16.mxu0 %v9718_v28  ;;  %v9792_v28 = vld [vmem:[%s11401_s19 + $0x6d0] ss:$8 sps:$4 sm:$0xff]  }
 0x1d6   : > { %8080 = vmatpush2.bf16.msra.mxu1 %v9713_v6  ;;  %v9797_v6 = vld [vmem:[%s11401_s19 + $0x7d4] ss:$8 sps:$4 sm:$0xff]  }
 0x1d7   : > { %8081 = vmatprep.subr.bf16.mxu1 %v9721_v29  ;;  %v9795_v29 = vld [vmem:[%s11401_s19 + $0x7d0] ss:$8 sps:$4 sm:$0xff]  }
 0x1d8   : > { %8031 = vmatpush2.bf16.msra.mxu0 %v9716_v0  ;;  %v9800_v0 = vld [vmem:[%s11401_s19 + $0x6c4] ss:$8 sps:$4 sm:$0xff]  }
 0x1d9   : > { %8032 = vmatprep.subr.bf16.mxu0 %v9724_v30  ;;  %v9798_v30 = vld [vmem:[%s11401_s19 + $0x6c0] ss:$8 sps:$4 sm:$0xff]  }
 0x1da   : > { %8082 = vmatpush2.bf16.msra.mxu1 %v9719_v1  ;;  %v9803_v1 = vld [vmem:[%s11401_s19 + $0x7c4] ss:$8 sps:$4 sm:$0xff]  }
 0x1db   : > { %8083 = vmatprep.subr.bf16.mxu1 %v9727_v31  ;;  %v9801_v31 = vld [vmem:[%s11401_s19 + $0x7c0] ss:$8 sps:$4 sm:$0xff]  }
 0x1dc   : > { %8033 = vmatpush2.bf16.msra.mxu0 %v9722_v32  ;;  %v9806_v32 = vld [vmem:[%s11401_s19 + $0x6b4] ss:$8 sps:$4 sm:$0xff]  }
 0x1dd   : > { %8104 = vmatprep.subr.bf16.mxu0 %v9730_v34  ;;  %v9804_v34 = vld [vmem:[%s11401_s19 + $0x6b0] ss:$8 sps:$4 sm:$0xff]  }
 0x1de   : > { %8084 = vmatpush2.bf16.msra.mxu1 %v9725_v33  ;;  %v9809_v33 = vld [vmem:[%s11401_s19 + $0x7b4] ss:$8 sps:$4 sm:$0xff]  }
 0x1df   : > { %8155 = vmatprep.subr.bf16.mxu1 %v9733_v35  ;;  %8035 = vmatmul.mubr.bf16.vlgmr.msra.gmra.mxu0 %v8811_v39  ;;  %v9807_v35 = vld [vmem:[%s11401_s19 + $0x7b0] ss:$8 sps:$4 sm:$0xff]   ;;  %v9810_v39 = vld [vmem:[%s11401_s19 + $0x6a0] ss:$8 sps:$4 sm:$0xff]  }
 0x1e0   : > { %8105 = vmatpush1.bf16.msra.mxu0 %v9728_v36  ;;  %8044 = vmatprep.mubr.bf16.mxu0 %v8844_v41  ;;  %v9812_v36 = vld [vmem:[%s11401_s19 + $0x6a4] ss:$8 sps:$4 sm:$0xff]   ;;  %v9819_v41 = vld [vmem:[%s11401_s19 + $0x790] ss:$8 sps:$4 sm:$0xff]  }
 0x1e1   : > { %8086 = vmatmul.mubr.bf16.vlgmr.msra.gmra.mxu1 %v8813_v40  ;;  %8106 = vmatprep.subr.bf16.mxu0 %v9736_v46  ;;  %v9813_v40 = vld [vmem:[%s11401_s19 + $0x7a0] ss:$8 sps:$4 sm:$0xff]   ;;  %v9821_v46 = vld [vmem:[%s11401_s19 + $0x794] ss:$8 sps:$4 sm:$0xff]  }
 0x1e2   : > { %8156 = vmatpush1.bf16.msra.mxu1 %v9731_v37  ;;  %8095 = vmatprep.mubr.bf16.mxu1 %v8846_v42  ;;  %v9815_v37 = vld [vmem:[%s11401_s19 + $0x7a4] ss:$8 sps:$4 sm:$0xff]   ;;  %v4957_v42 = vshrl.u32 %v4956_v44, 7  ;;  %v9858_v44 = vld [vmem:[%s11401_s19 + $0x834] ss:$8 sps:$4 sm:$0xff]  }
 0x1e3   : > { %8157 = vmatprep.subr.bf16.mxu1 %v9739_v38  ;;  %v9816_v38 = vld [vmem:[%s11401_s19 + $0x690] ss:$8 sps:$4 sm:$0xff]  }
 0x1e4   : > { %8107 = vmatpush1.bf16.msra.mxu0 %v9734_v43  ;;  %v9824_v43 = vld [vmem:[%s11401_s19 + $0x684] ss:$8 sps:$4 sm:$0xff]  }
 0x1e5   : > { %8108 = vmatprep.subr.bf16.mxu0 %v9744_v48  ;;  %v9822_v48 = vld [vmem:[%s11401_s19 + $0x680] ss:$8 sps:$4 sm:$0xff]  }
 0x1e6   : > { %8158 = vmatpush1.bf16.msra.mxu1 %v9737_v47  ;;  %v9827_v47 = vld [vmem:[%s11401_s19 + $0x784] ss:$8 sps:$4 sm:$0xff]  }
 0x1e7   : > { %8159 = vmatprep.subr.bf16.mxu1 %v9747_v49  ;;  %8045 = vmatmul.mubr.bf16.gmra.mxu0 %v8843_v54  ;;  %v9825_v49 = vld [vmem:[%s11401_s19 + $0x780] ss:$8 sps:$4 sm:$0xff]   ;;  %v9830_v54 = vld [vmem:[%s11401_s19 + $0x874] ss:$8 sps:$4 sm:$0xff]  }
 0x1e8   : > { %8109 = vmatpush1.bf16.msra.mxu0 %v9742_v50  ;;  %8136 = vmatprep.mubr.bf16.mxu0 %v8816_v60  ;;  %v4954_v50 = vld [vmem:[%s4390_s27] sm:$0x3]  ;;  %v8815_v60 = vcombine.low %v11690_v52, %v11695_v53 }
 0x1e9   : > { %8096 = vmatmul.mubr.bf16.gmra.mxu1 %v8845_v55  ;;  %8110 = vmatprep.subr.bf16.mxu0 %v9752_v58  ;;  %v9833_v55 = vld [vmem:[%s11401_s19 + $0x974] ss:$8 sps:$4 sm:$0xff]   ;;  %v4962_v58 = vsub.s32 1, %v4957_v42 }
 0x1ea   : > { %8160 = vmatpush1.bf16.msra.mxu1 %v9745_v51  ;;  %8187 = vmatprep.mubr.bf16.mxu1 %v8818_v61  ;;  %v4958_v51 = vsub.s32 0, %v4957_v42  ;;  %v8817_v61 = vcombine.low %v11700_v56, %v11705_v57 }
 0x1eb   : > { %8161 = vmatprep.subr.bf16.mxu1 %v9755_v59  ;;  %v4432_v59 = vld [vmem:[%s12264_s0 + $0x130] sm:$0xff] }
 0x1ec   : > { %8111 = vmatpush1.bf16.msra.mxu0 %v9750_v62  ;;  %v4433_v62 = vld [vmem:[%s12264_s0 + $0x138] sm:$0xff]  ;;  %v8848_v52 = vcombine.high %v4432_v59, %v4432_v59 }
 0x1ed   : > { %8112 = vmatprep.subr.bf16.mxu0 %v9758_v4  ;;  %v9828_v4 = vld [vmem:[%s11401_s19 + $0x870] ss:$8 sps:$4 sm:$0xff]   ;;  %v8850_v53 = vcombine.high %v4433_v62, %v4433_v62 }
 0x1ee   : > { %8162 = vmatpush1.bf16.msra.mxu1 %v9753_v63  ;;  %v4959_v63 = vrot.slane %v4954_v50, %v4958_v51 }
 0x1ef   : > { %8163 = vmatprep.subr.bf16.mxu1 %v9761_v7  ;;  %v9831_v7 = vld [vmem:[%s11401_s19 + $0x970] ss:$8 sps:$4 sm:$0xff]  }
 0x1f0   : > { %8113 = vmatpush1.bf16.msra.mxu0 %v9756_v8  ;;  %v9836_v8 = vld [vmem:[%s11401_s19 + $0x864] ss:$8 sps:$4 sm:$0xff]  }
 0x1f1   : > { %8114 = vmatprep.subr.bf16.mxu0 %v9764_v10  ;;  %v4963_v10 = vrot.slane %v4954_v50, %v4962_v58  ;;  %v9864_v50 = vld [vmem:[%s11401_s19 + $0x824] ss:$8 sps:$4 sm:$0xff]  }
 0x1f2   : > { %8164 = vmatpush1.bf16.msra.mxu1 %v9759_v9  ;;  %v9839_v9 = vld [vmem:[%s11401_s19 + $0x964] ss:$8 sps:$4 sm:$0xff]  }
 0x1f3   : > { %8165 = vmatprep.subr.bf16.mxu1 %v9767_v11 }
 0x1f4   : > { %8115 = vmatpush1.bf16.msra.mxu0 %v9762_v12  ;;  %v9834_v12 = vld [vmem:[%s11401_s19 + $0x860] ss:$8 sps:$4 sm:$0xff]  }
 0x1f5   : > { %8116 = vmatprep.subr.bf16.mxu0 %v9770_v14 }
 0x1f6   : > { %8166 = vmatpush1.bf16.msra.mxu1 %v9765_v13  ;;  %v9837_v13 = vld [vmem:[%s11401_s19 + $0x960] ss:$8 sps:$4 sm:$0xff]  }
 0x1f7   : > { %8167 = vmatprep.subr.bf16.mxu1 %v9773_v15 }
 0x1f8   : > { %8117 = vmatpush1.bf16.msra.mxu0 %v9768_v16  ;;  %v9844_v16 = vld [vmem:[%s11401_s19 + $0x854] ss:$8 sps:$4 sm:$0xff]  }
 0x1f9   : > { %8118 = vmatprep.subr.bf16.mxu0 %v9776_v18 }
 0x1fa   : > { %8168 = vmatpush1.bf16.msra.mxu1 %v9771_v17  ;;  %v9847_v17 = vld [vmem:[%s11401_s19 + $0x954] ss:$8 sps:$4 sm:$0xff]  }
 0x1fb   : > { %8169 = vmatprep.subr.bf16.mxu1 %v9779_v19 }
 0x1fc   : > { %8119 = vmatpush1.bf16.msra.mxu0 %v9774_v20  ;;  %v11792_v20 = vld [vmem:[%s12264_s0 + $0x40] sm:$0xff] }
 0x1fd   : > { %8120 = vmatprep.subr.bf16.mxu0 %v9782_v22 }
 0x1fe   : > { %8170 = vmatpush1.bf16.msra.mxu1 %v9777_v21 }
 0x1ff   : > { %8171 = vmatprep.subr.bf16.mxu1 %v9785_v23  ;;  %v8847_v23 = vcombine.low %v4432_v59, %v4432_v59  ;;  %v9862_v59 = vld [vmem:[%s11401_s19 + $0x820] ss:$8 sps:$4 sm:$0xff]  }
 0x200   : > { %8121 = vmatpush2.bf16.msra.mxu0 %v9780_v24  ;;  %v8849_v24 = vcombine.low %v4433_v62, %v4433_v62  ;;  %v9873_v62 = vld [vmem:[%s11401_s19 + $0x914] ss:$8 sps:$4 sm:$0xff]  }
 0x201   : > { %8122 = vmatprep.subr.bf16.mxu0 %v9788_v26  ;;  %v11802_v26 = vld [vmem:[%s12264_s0 + $0x48] sm:$0xff] }
 0x202   : > { %8172 = vmatpush2.bf16.msra.mxu1 %v9783_v25  ;;  %v11797_v25 = vld [vmem:[%s12264_s0 + $0xc0] sm:$0xff] }
 0x203   : > { %8173 = vmatprep.subr.bf16.mxu1 %v9791_v27  ;;  %v11807_v27 = vld [vmem:[%s12264_s0 + $0xc8] sm:$0xff] }
 0x204   : > { %8123 = vmatpush2.bf16.msra.mxu0 %v9786_v2 }
 0x205   : > { %8124 = vmatprep.subr.bf16.mxu0 %v9794_v5  ;;  %v9842_v5 = vld [vmem:[%s11401_s19 + $0x850] ss:$8 sps:$4 sm:$0xff]  }
 0x206   : > { %8174 = vmatpush2.bf16.msra.mxu1 %v9789_v3 }
 0x207   : > { %8175 = vmatprep.subr.bf16.mxu1 %v9797_v6  ;;  %v9845_v6 = vld [vmem:[%s11401_s19 + $0x950] ss:$8 sps:$4 sm:$0xff]  }
 0x208   : > { %8125 = vmatpush2.bf16.msra.mxu0 %v9792_v28 }
 0x209   : > { %8126 = vmatprep.subr.bf16.mxu0 %v9800_v0  ;;  %v9852_v0 = vld [vmem:[%s11401_s19 + $0x844] ss:$8 sps:$4 sm:$0xff]  }
 0x20a   : > { %8176 = vmatpush2.bf16.msra.mxu1 %v9795_v29 }
 0x20b   : > { %8177 = vmatprep.subr.bf16.mxu1 %v9803_v1  ;;  %v9855_v1 = vld [vmem:[%s11401_s19 + $0x944] ss:$8 sps:$4 sm:$0xff]  }
 0x20c   : > { %8127 = vmatpush2.bf16.msra.mxu0 %v9798_v30 }
 0x20d   : > { %8128 = vmatprep.subr.bf16.mxu0 %v9806_v32  ;;  %v8820_v32 = vcombine.high %v11792_v20, %v11797_v25 }
 0x20e   : > { %8178 = vmatpush2.bf16.msra.mxu1 %v9801_v31 }
 0x20f   : > { %8179 = vmatprep.subr.bf16.mxu1 %v9809_v33  ;;  %v8822_v33 = vcombine.high %v11802_v26, %v11807_v27 }
 0x210   : > { %8129 = vmatpush2.bf16.msra.mxu0 %v9804_v34 }
 0x211   : > { %8130 = vmatprep.subr.bf16.mxu0 %v9812_v36 }
 0x212   : > { %8180 = vmatpush2.bf16.msra.mxu1 %v9807_v35 }
 0x213   : > { %8181 = vmatprep.subr.bf16.mxu1 %v9815_v37  ;;  %v9850_v37 = vld [vmem:[%s11401_s19 + $0x840] ss:$8 sps:$4 sm:$0xff]  }
 0x214   : > { %8131 = vmatpush2.bf16.msra.mxu0 %v9810_v39  ;;  %v9853_v39 = vld [vmem:[%s11401_s19 + $0x940] ss:$8 sps:$4 sm:$0xff]  }
 0x215   : > { %8132 = vmatprep.subr.bf16.mxu0 %v9818_v45  ;;  %v9861_v45 = vld [vmem:[%s11401_s19 + $0x934] ss:$8 sps:$4 sm:$0xff]  }
 0x216   : > { %8182 = vmatpush2.bf16.msra.mxu1 %v9813_v40 }
 0x217   : > { %8183 = vmatprep.subr.bf16.mxu1 %v9821_v46 }
 0x218   : > { %8133 = vmatpush2.bf16.msra.mxu0 %v9816_v38 }
 0x219   : > { %8134 = vmatprep.subr.bf16.mxu0 %v9824_v43  ;;  %v9856_v43 = vld [vmem:[%s11401_s19 + $0x830] ss:$8 sps:$4 sm:$0xff]  }
 0x21a   : > { %8184 = vmatpush2.bf16.msra.mxu1 %v9819_v41 }
 0x21b   : > { %8185 = vmatprep.subr.bf16.mxu1 %v9827_v47 }
 0x21c   : > { %8135 = vmatpush2.bf16.msra.mxu0 %v9822_v48 }
 0x21d   : > { %8206 = vmatprep.subr.bf16.mxu0 %v9830_v54  ;;  %v9867_v54 = vld [vmem:[%s11401_s19 + $0x924] ss:$8 sps:$4 sm:$0xff]  }
 0x21e   : > { %8186 = vmatpush2.bf16.msra.mxu1 %v9825_v49  ;;  %v9859_v49 = vld [vmem:[%s11401_s19 + $0x930] ss:$8 sps:$4 sm:$0xff]  }
 0x21f   : > { %8257 = vmatprep.subr.bf16.mxu1 %v9833_v55  ;;  %v7832_v56 = vpop.f32.mrf.mxu0  ;;  %8137 = vmatmul.mubr.bf16.vlgmr.msra.gmra.mxu0 %v8815_v60  ;;  %v9865_v60 = vld [vmem:[%s11401_s19 + $0x920] ss:$8 sps:$4 sm:$0xff]  }
 0x220   : > { %v7833_v11 = vadd.f32 %v7832_v56, %v4959_v63  ;;  %8207 = vmatpush1.bf16.msra.mxu0 %v9828_v4  ;;  %8146 = vmatprep.mubr.bf16.mxu0 %v8848_v52  ;;  %v9871_v4 = vld [vmem:[%s11401_s19 + $0x910] ss:$8 sps:$4 sm:$0xff]   ;;  %v9882_v52 = vld [vmem:[%s11401_s19 + $0x8f4] ss:$8 sps:$4 sm:$0xff]  }
 0x221   : > { %v7883_v57 = vpop.f32.mrf.mxu1  ;;  %8188 = vmatmul.mubr.bf16.vlgmr.msra.gmra.mxu1 %v8817_v61  ;;  %v7834_v14 = vpop.f32.mrf.mxu0  ;;  %8208 = vmatprep.subr.bf16.mxu0 %v9836_v8  ;;  %v9870_v61 = vld [vmem:[%s11401_s19 + $0x814] ss:$8 sps:$4 sm:$0xff]   ;;  %v9879_v8 = vld [vmem:[%s11401_s19 + $0x904] ss:$8 sps:$4 sm:$0xff]   ;;  %v9880_v56 = vld [vmem:[%s11401_s19 + $0x8f0] ss:$8 sps:$4 sm:$0xff]  }
 0x222   : > { %8258 = vmatpush1.bf16.msra.mxu1 %v9831_v7  ;;  %v11787_v18 = vadd.f32 %v7883_v57, %v7833_v11  ;;  %v7835_v19 = vadd.f32 %v7834_v14, %v4963_v10  ;;  %8197 = vmatprep.mubr.bf16.mxu1 %v8850_v53  ;;  %v9876_v7 = vld [vmem:[%s11401_s19 + $0x804] ss:$8 sps:$4 sm:$0xff]   ;;  %v9885_v53 = vld [vmem:[%s11401_s19 + $0x9f4] ss:$8 sps:$4 sm:$0xff]   ;;  %v9883_v57 = vld [vmem:[%s11401_s19 + $0x9f0] ss:$8 sps:$4 sm:$0xff]  }
 0x223   : > { %v7885_v15 = vpop.f32.mrf.mxu1  ;;  %8259 = vmatprep.subr.bf16.mxu1 %v9839_v9  ;;  %v7836_v21 = vpop.f32.mrf.mxu0  ;;  %v9874_v9 = vld [vmem:[%s11401_s19 + $0x800] ss:$8 sps:$4 sm:$0xff]   ;;  %v9888_v11 = vld [vmem:[%s11401_s19 + $0x8e4] ss:$8 sps:$4 sm:$0xff]  }
 0x224   : > { %v11809_v2 = vadd.f32 %v7885_v15, %v7835_v19  ;;  %v7837_v3 = vadd.f32 %v7836_v21, %v4959_v63  ;;  %8209 = vmatpush1.bf16.msra.mxu0 %v9834_v12  ;;  %v9891_v12 = vld [vmem:[%s11401_s19 + $0x9e4] ss:$8 sps:$4 sm:$0xff]   ;;  %v9889_v14 = vld [vmem:[%s11401_s19 + $0x9e0] ss:$8 sps:$4 sm:$0xff]   ;;  %v9894_v15 = vld [vmem:[%s11401_s19 + $0x8d4] ss:$8 sps:$4 sm:$0xff]  }
 0x225   : > { %v7887_v22 = vpop.f32.mrf.mxu1  ;;  %v7838_v28 = vpop.f32.mrf.mxu0  ;;  %8210 = vmatprep.subr.bf16.mxu0 %v9844_v16  ;;  %v9897_v16 = vld [vmem:[%s11401_s19 + $0x9d4] ss:$8 sps:$4 sm:$0xff]   ;;  %v9895_v19 = vld [vmem:[%s11401_s19 + $0x9d0] ss:$8 sps:$4 sm:$0xff]   ;;  %v9900_v21 = vld [vmem:[%s11401_s19 + $0x8c4] ss:$8 sps:$4 sm:$0xff]  }
 0x226   : > { %8260 = vmatpush1.bf16.msra.mxu1 %v9837_v13  ;;  %v11815_v30 = vadd.f32 %v7887_v22, %v7837_v3  ;;  %v7839_v31 = vadd.f32 %v7838_v28, %v4963_v10  ;;  %v9886_v13 = vld [vmem:[%s11401_s19 + $0x8e0] ss:$8 sps:$4 sm:$0xff]   ;;  %v9903_v22 = vld [vmem:[%s11401_s19 + $0x9c4] ss:$8 sps:$4 sm:$0xff]   ;;  %v9906_v3 = vld [vmem:[%s11401_s19 + $0x8b4] ss:$8 sps:$4 sm:$0xff]  }
 0x227   : > { %v7889_v29 = vpop.f32.mrf.mxu1  ;;  %8261 = vmatprep.subr.bf16.mxu1 %v9847_v17  ;;  %8147 = vmatmul.mubr.bf16.gmra.mxu0 %v8847_v23  ;;  %v7842_v34 = vpop.f32.mrf.mxu0  ;;  %v9892_v17 = vld [vmem:[%s11401_s19 + $0x8d0] ss:$8 sps:$4 sm:$0xff]   ;;  %v9898_v23 = vld [vmem:[%s11401_s19 + $0x8c0] ss:$8 sps:$4 sm:$0xff]  }
 0x228   : > { %v11821_v36 = vadd.f32 %v7889_v29, %v7839_v31  ;;  %8211 = vmatpush1.bf16.msra.mxu0 %v9842_v5  ;;  %v7843_v40 = vadd.f32 %v7842_v34, %v4959_v63  ;;  %8238 = vmatprep.mubr.bf16.mxu0 %v8820_v32  ;;  %v9868_v63 = vld [vmem:[%s11401_s19 + $0x810] ss:$8 sps:$4 sm:$0xff]   ;;  %v9909_v5 = vld [vmem:[%s11401_s19 + $0x9b4] ss:$8 sps:$4 sm:$0xff]   ;;  %v9912_v29 = vld [vmem:[%s11401_s19 + $0x8a4] ss:$8 sps:$4 sm:$0xff]  }
 0x229   : > { %8198 = vmatmul.mubr.bf16.gmra.mxu1 %v8849_v24  ;;  %v7893_v35 = vpop.f32.mrf.mxu1  ;;  %8212 = vmatprep.subr.bf16.mxu0 %v9852_v0  ;;  %v7844_v46 = vpop.f32.mrf.mxu0  ;;  %v9901_v24 = vld [vmem:[%s11401_s19 + $0x9c0] ss:$8 sps:$4 sm:$0xff]   ;;  %v9907_v28 = vld [vmem:[%s11401_s19 + $0x9b0] ss:$8 sps:$4 sm:$0xff]   ;;  %v9915_v0 = vld [vmem:[%s11401_s19 + $0x9a4] ss:$8 sps:$4 sm:$0xff]  }
 0x22a   : > { %8262 = vmatpush1.bf16.msra.mxu1 %v9845_v6  ;;  %v7845_v41 = vadd.f32 %v7844_v46, %v4963_v10  ;;  %v11827_v42 = vadd.f32 %v7893_v35, %v7843_v40  ;;  %8289 = vmatprep.mubr.bf16.mxu1 %v8822_v33  ;;  %v9877_v10 = vld [vmem:[%s11401_s19 + $0x900] ss:$8 sps:$4 sm:$0xff]   ;;  %v9904_v6 = vld [vmem:[%s11401_s19 + $0x8b0] ss:$8 sps:$4 sm:$0xff]   ;;  %v9918_v32 = vld [vmem:[%s11401_s19 + $0x894] ss:$8 sps:$4 sm:$0xff]  }
 0x22b   : > { %8263 = vmatprep.subr.bf16.mxu1 %v9855_v1  ;;  %v7895_v38 = vpop.f32.mrf.mxu1  ;;  %v7846_v47 = vpop.f32.mrf.mxu0  ;;  %v9910_v1 = vld [vmem:[%s11401_s19 + $0x8a0] ss:$8 sps:$4 sm:$0xff]   ;;  %v9921_v33 = vld [vmem:[%s11401_s19 + $0x994] ss:$8 sps:$4 sm:$0xff]   ;;  %v9916_v34 = vld [vmem:[%s11401_s19 + $0x890] ss:$8 sps:$4 sm:$0xff]  }
 0x22c   : > { %8213 = vmatpush1.bf16.msra.mxu0 %v9850_v37  ;;  %v11832_v51 = vadd.f32 %v7895_v38, %v7845_v41  ;;  %v9913_v31 = vld [vmem:[%s11401_s19 + $0x9a0] ss:$8 sps:$4 sm:$0xff]   ;;  %v9919_v35 = vld [vmem:[%s11401_s19 + $0x990] ss:$8 sps:$4 sm:$0xff]   ;;  %v9924_v37 = vld [vmem:[%s11401_s19 + $0x884] ss:$8 sps:$4 sm:$0xff]   ;;  %v8819_v38 = vcombine.low %v11792_v20, %v11797_v25  ;;  %v8821_v41 = vcombine.low %v11802_v26, %v11807_v27 }
 0x22d   : > { %v7897_v48 = vpop.f32.mrf.mxu1  ;;  %8214 = vmatprep.subr.bf16.mxu0 %v9858_v44  ;;  %v7847_v55 = vpop.f32.mrf.mxu0  ;;  %v9922_v40 = vld [vmem:[%s11401_s19 + $0x880] ss:$8 sps:$4 sm:$0xff]   ;;  %v9933_v46 = vld [vmem:[%s11401_s19 + $0xb74] ss:$8 sps:$4 sm:$0xff]   ;;  %v9939_v20 = vld [vmem:[%s11401_s19 + $0xb64] ss:$8 sps:$4 sm:$0xff]  }
 0x22e   : > { %8264 = vmatpush1.bf16.msra.mxu1 %v9853_v39  ;;  %v9927_v39 = vld [vmem:[%s11401_s19 + $0x984] ss:$8 sps:$4 sm:$0xff]   ;;  %v9925_v44 = vld [vmem:[%s11401_s19 + $0x980] ss:$8 sps:$4 sm:$0xff]  }
 0x22f   : > { %8265 = vmatprep.subr.bf16.mxu1 %v9861_v45  ;;  %v7898_v58 = vpop.f32.mrf.mxu1  ;;  %v9930_v45 = vld [vmem:[%s11401_s19 + $0xa74] ss:$8 sps:$4 sm:$0xff]   ;;  %v4434_v47 = vld [vmem:[%s12264_s0 + $0x140] sm:$0xff]  ;;  %v4435_v48 = vld [vmem:[%s12264_s0 + $0x148] sm:$0xff] }
 0x230   : > { %8215 = vmatpush1.bf16.msra.mxu0 %v9856_v43  ;;  %v9928_v43 = vld [vmem:[%s11401_s19 + $0xa70] ss:$8 sps:$4 sm:$0xff]   ;;  %v9934_v25 = vld [vmem:[%s11401_s19 + $0xa60] ss:$8 sps:$4 sm:$0xff]   ;;  %v8852_v27 = vcombine.high %v4434_v47, %v4434_v47 }
 0x231   : > { %8216 = vmatprep.subr.bf16.mxu0 %v9864_v50  ;;  %v9936_v50 = vld [vmem:[%s11401_s19 + $0xa64] ss:$8 sps:$4 sm:$0xff]   ;;  %v9937_v26 = vld [vmem:[%s11401_s19 + $0xb60] ss:$8 sps:$4 sm:$0xff]  }
 0x232   : > { %8266 = vmatpush1.bf16.msra.mxu1 %v9859_v49  ;;  %v9931_v49 = vld [vmem:[%s11401_s19 + $0xb70] ss:$8 sps:$4 sm:$0xff]  }
 0x233   : > { %8267 = vmatprep.subr.bf16.mxu1 %v9867_v54  ;;  %v8854_v54 = vcombine.high %v4435_v48, %v4435_v48 }
 0x234   : > { %8217 = vmatpush1.bf16.msra.mxu0 %v9862_v59  ;;  %v9944_v59 = vld [vmem:[%s11401_s19 + $0xa54] ss:$8 sps:$4 sm:$0xff]  }
 0x235   : > { %8218 = vmatprep.subr.bf16.mxu0 %v9870_v61 }
 0x236   : > { %8268 = vmatpush1.bf16.msra.mxu1 %v9865_v60 }
 0x237   : > { %8269 = vmatprep.subr.bf16.mxu1 %v9873_v62 }
 0x238   : > { %8219 = vmatpush1.bf16.msra.mxu0 %v9868_v63  ;;  %v9947_v63 = vld [vmem:[%s11401_s19 + $0xb54] ss:$8 sps:$4 sm:$0xff]  }
 0x239   : > { %8220 = vmatprep.subr.bf16.mxu0 %v9876_v7 }
 0x23a   : > { %8270 = vmatpush1.bf16.msra.mxu1 %v9871_v4  ;;  %v11901_v4 = vld [vmem:[%s12264_s0 + $0x50] sm:$0xff] }
 0x23b   : > { %8271 = vmatprep.subr.bf16.mxu1 %v9879_v8 }
 0x23c   : > { %8221 = vmatpush1.bf16.msra.mxu0 %v9874_v9  ;;  %v9942_v9 = vld [vmem:[%s11401_s19 + $0xa50] ss:$8 sps:$4 sm:$0xff]  }
 0x23d   : > { %8222 = vmatprep.subr.bf16.mxu0 %v9882_v52  ;;  %v11916_v52 = vld [vmem:[%s12264_s0 + $0x58] sm:$0xff] }
 0x23e   : > { %8272 = vmatpush1.bf16.msra.mxu1 %v9877_v10  ;;  %v9945_v10 = vld [vmem:[%s11401_s19 + $0xb50] ss:$8 sps:$4 sm:$0xff]  }
 0x23f   : > { %8273 = vmatprep.subr.bf16.mxu1 %v9885_v53 }
 0x240   : > { %8223 = vmatpush2.bf16.msra.mxu0 %v9880_v56 }
 0x241   : > { %8224 = vmatprep.subr.bf16.mxu0 %v9888_v11  ;;  %v11921_v11 = vld [vmem:[%s12264_s0 + $0xd8] sm:$0xff] }
 0x242   : > { %8274 = vmatpush2.bf16.msra.mxu1 %v9883_v57  ;;  %v8853_v57 = vcombine.low %v4435_v48, %v4435_v48  ;;  %v9976_v48 = vld [vmem:[%s11401_s19 + $0xa04] ss:$8 sps:$4 sm:$0xff]  }
 0x243   : > { %8275 = vmatprep.subr.bf16.mxu1 %v9891_v12 }
 0x244   : > { %8225 = vmatpush2.bf16.msra.mxu0 %v9886_v13 }
 0x245   : > { %8226 = vmatprep.subr.bf16.mxu0 %v9894_v15 }
 0x246   : > { %8276 = vmatpush2.bf16.msra.mxu1 %v9889_v14 }
 0x247   : > { %8277 = vmatprep.subr.bf16.mxu1 %v9897_v16  ;;  %v9952_v16 = vld [vmem:[%s11401_s19 + $0xa44] ss:$8 sps:$4 sm:$0xff]  }
 0x248   : > { %8227 = vmatpush2.bf16.msra.mxu0 %v9892_v17  ;;  %v9955_v17 = vld [vmem:[%s11401_s19 + $0xb44] ss:$8 sps:$4 sm:$0xff]  }
 0x249   : > { %8228 = vmatprep.subr.bf16.mxu0 %v9900_v21 }
 0x24a   : > { %8278 = vmatpush2.bf16.msra.mxu1 %v9895_v19 }
 0x24b   : > { %8279 = vmatprep.subr.bf16.mxu1 %v9903_v22  ;;  %v9950_v22 = vld [vmem:[%s11401_s19 + $0xa40] ss:$8 sps:$4 sm:$0xff]  }
 0x24c   : > { %8229 = vmatpush2.bf16.msra.mxu0 %v9898_v23  ;;  %v9953_v23 = vld [vmem:[%s11401_s19 + $0xb40] ss:$8 sps:$4 sm:$0xff]  }
 0x24d   : > { %8230 = vmatprep.subr.bf16.mxu0 %v9906_v3 }
 0x24e   : > { %8280 = vmatpush2.bf16.msra.mxu1 %v9901_v24 }
 0x24f   : > { %8281 = vmatprep.subr.bf16.mxu1 %v9909_v5 }
 0x250   : > { %8231 = vmatpush2.bf16.msra.mxu0 %v9904_v6 }
 0x251   : > { %8232 = vmatprep.subr.bf16.mxu0 %v9912_v29 }
 0x252   : > { %8282 = vmatpush2.bf16.msra.mxu1 %v9907_v28 }
 0x253   : > { %8283 = vmatprep.subr.bf16.mxu1 %v9915_v0  ;;  %v9958_v0 = vld [vmem:[%s11401_s19 + $0xa34] ss:$8 sps:$4 sm:$0xff]  }
 0x254   : > { %8233 = vmatpush2.bf16.msra.mxu0 %v9910_v1  ;;  %v9961_v1 = vld [vmem:[%s11401_s19 + $0xb34] ss:$8 sps:$4 sm:$0xff]  }
 0x255   : > { %8234 = vmatprep.subr.bf16.mxu0 %v9918_v32 }
 0x256   : > { %8284 = vmatpush2.bf16.msra.mxu1 %v9913_v31 }
 0x257   : > { %8285 = vmatprep.subr.bf16.mxu1 %v9921_v33 }
 0x258   : > { %8235 = vmatpush2.bf16.msra.mxu0 %v9916_v34 }
 0x259   : > { %8236 = vmatprep.subr.bf16.mxu0 %v9924_v37  ;;  %v9959_v37 = vld [vmem:[%s11401_s19 + $0xb30] ss:$8 sps:$4 sm:$0xff]  }
 0x25a   : > { %8286 = vmatpush2.bf16.msra.mxu1 %v9919_v35  ;;  %v9956_v35 = vld [vmem:[%s11401_s19 + $0xa30] ss:$8 sps:$4 sm:$0xff]  }
 0x25b   : > { %8287 = vmatprep.subr.bf16.mxu1 %v9927_v39  ;;  %v9967_v39 = vld [vmem:[%s11401_s19 + $0xb24] ss:$8 sps:$4 sm:$0xff]  }
 0x25c   : > { %8237 = vmatpush2.bf16.msra.mxu0 %v9922_v40 }
 0x25d   : > { %8308 = vmatprep.subr.bf16.mxu0 %v9930_v45  ;;  %v9962_v45 = vld [vmem:[%s11401_s19 + $0xa20] ss:$8 sps:$4 sm:$0xff]  }
 0x25e   : > { %8288 = vmatpush2.bf16.msra.mxu1 %v9925_v44 }
 0x25f   : > { %8359 = vmatprep.subr.bf16.mxu1 %v9933_v46  ;;  %v7934_v55 = vpop.f32.mrf.mxu0  ;;  %8239 = vmatmul.mubr.bf16.vlgmr.msra.gmra.mxu0 %v8819_v38  ;;  %v9965_v46 = vld [vmem:[%s11401_s19 + $0xb20] ss:$8 sps:$4 sm:$0xff]   ;;  %v9970_v38 = vld [vmem:[%s11401_s19 + $0xa14] ss:$8 sps:$4 sm:$0xff]  }
 0x260   : > { %v7935_v60 = vadd.f32 %v7934_v55, %v11787_v18  ;;  %8309 = vmatpush1.bf16.msra.mxu0 %v9928_v43  ;;  %8248 = vmatprep.mubr.bf16.mxu0 %v8852_v27  ;;  %v11911_v18 = vld [vmem:[%s12264_s0 + $0xd0] sm:$0xff]  ;;  %v9988_v55 = vld [vmem:[%s11401_s19 + $0xae4] ss:$8 sps:$4 sm:$0xff]  }
 0x261   : > { %v7985_v58 = vpop.f32.mrf.mxu1  ;;  %8290 = vmatmul.mubr.bf16.vlgmr.msra.gmra.mxu1 %v8821_v41  ;;  %v7936_v61 = vpop.f32.mrf.mxu0  ;;  %8310 = vmatprep.subr.bf16.mxu0 %v9936_v50  ;;  %v8824_v24 = vcombine.high %v11901_v4, %v11911_v18  ;;  %v9973_v41 = vld [vmem:[%s11401_s19 + $0xb14] ss:$8 sps:$4 sm:$0xff]   ;;  %v9968_v43 = vld [vmem:[%s11401_s19 + $0xa10] ss:$8 sps:$4 sm:$0xff]   ;;  %v9974_v50 = vld [vmem:[%s11401_s19 + $0xa00] ss:$8 sps:$4 sm:$0xff]  }
 0x262   : > { %8360 = vmatpush1.bf16.msra.mxu1 %v9931_v49  ;;  %v11903_v7 = vadd.f32 %v7985_v58, %v7935_v60  ;;  %v7937_v8 = vadd.f32 %v7936_v61, %v11809_v2  ;;  %8299 = vmatprep.mubr.bf16.mxu1 %v8854_v54  ;;  %v8851_v2 = vcombine.low %v4434_v47, %v4434_v47  ;;  %v9971_v47 = vld [vmem:[%s11401_s19 + $0xb10] ss:$8 sps:$4 sm:$0xff]   ;;  %v9979_v49 = vld [vmem:[%s11401_s19 + $0xb04] ss:$8 sps:$4 sm:$0xff]   ;;  %v9989_v60 = vld [vmem:[%s11401_s19 + $0xbe0] ss:$8 sps:$4 sm:$0xff]  }
 0x263   : > { %v7987_v62 = vpop.f32.mrf.mxu1  ;;  %8361 = vmatprep.subr.bf16.mxu1 %v9939_v20  ;;  %v7938_v53 = vpop.f32.mrf.mxu0  ;;  %v9977_v20 = vld [vmem:[%s11401_s19 + $0xb00] ss:$8 sps:$4 sm:$0xff]   ;;  %v9980_v27 = vld [vmem:[%s11401_s19 + $0xaf0] ss:$8 sps:$4 sm:$0xff]   ;;  %v9991_v58 = vld [vmem:[%s11401_s19 + $0xbe4] ss:$8 sps:$4 sm:$0xff]  }
 0x264   : > { %v11923_v12 = vadd.f32 %v7987_v62, %v7937_v8  ;;  %v7939_v13 = vadd.f32 %v7938_v53, %v11815_v30  ;;  %8311 = vmatpush1.bf16.msra.mxu0 %v9934_v25  ;;  %v8826_v30 = vcombine.high %v11916_v52, %v11921_v11  ;;  %v9982_v25 = vld [vmem:[%s11401_s19 + $0xaf4] ss:$8 sps:$4 sm:$0xff]   ;;  %v9983_v54 = vld [vmem:[%s11401_s19 + $0xbf0] ss:$8 sps:$4 sm:$0xff]   ;;  %v9998_v53 = vld [vmem:[%s11401_s19 + $0xac0] ss:$8 sps:$4 sm:$0xff]  }
 0x265   : > { %v7989_v56 = vpop.f32.mrf.mxu1  ;;  %v7940_v14 = vpop.f32.mrf.mxu0  ;;  %8312 = vmatprep.subr.bf16.mxu0 %v9944_v59  ;;  %v9986_v59 = vld [vmem:[%s11401_s19 + $0xae0] ss:$8 sps:$4 sm:$0xff]   ;;  %v9994_v61 = vld [vmem:[%s11401_s19 + $0xad4] ss:$8 sps:$4 sm:$0xff]   ;;  %v9995_v8 = vld [vmem:[%s11401_s19 + $0xbd0] ss:$8 sps:$4 sm:$0xff]  }
 0x266   : > { %8362 = vmatpush1.bf16.msra.mxu1 %v9937_v26  ;;  %v11928_v19 = vadd.f32 %v7989_v56, %v7939_v13  ;;  %v7941_v21 = vadd.f32 %v7940_v14, %v11821_v36  ;;  %v9985_v26 = vld [vmem:[%s11401_s19 + $0xbf4] ss:$8 sps:$4 sm:$0xff]   ;;  %v10001_v56 = vld [vmem:[%s11401_s19 + $0xbc0] ss:$8 sps:$4 sm:$0xff]   ;;  %v10004_v13 = vld [vmem:[%s11401_s19 + $0xab0] ss:$8 sps:$4 sm:$0xff]  }
 0x267   : > { %v7991_v15 = vpop.f32.mrf.mxu1  ;;  %8363 = vmatprep.subr.bf16.mxu1 %v9947_v63  ;;  %v7944_v3 = vpop.f32.mrf.mxu0  ;;  %8249 = vmatmul.mubr.bf16.gmra.mxu0 %v8851_v2  ;;  %v9997_v62 = vld [vmem:[%s11401_s19 + $0xbd4] ss:$8 sps:$4 sm:$0xff]   ;;  %v9992_v63 = vld [vmem:[%s11401_s19 + $0xad0] ss:$8 sps:$4 sm:$0xff]  }
 0x268   : > { %v11937_v6 = vadd.f32 %v7991_v15, %v7941_v21  ;;  %v7945_v28 = vadd.f32 %v7944_v3, %v11827_v42  ;;  %8313 = vmatpush1.bf16.msra.mxu0 %v9942_v9  ;;  %8340 = vmatprep.mubr.bf16.mxu0 %v8824_v24  ;;  %v10000_v9 = vld [vmem:[%s11401_s19 + $0xac4] ss:$8 sps:$4 sm:$0xff]   ;;  %v10006_v2 = vld [vmem:[%s11401_s19 + $0xab4] ss:$8 sps:$4 sm:$0xff]   ;;  %v10007_v14 = vld [vmem:[%s11401_s19 + $0xbb0] ss:$8 sps:$4 sm:$0xff]  }
 0x269   : > { %v7995_v5 = vpop.f32.mrf.mxu1  ;;  %8300 = vmatmul.mubr.bf16.gmra.mxu1 %v8853_v57  ;;  %v7946_v36 = vpop.f32.mrf.mxu0  ;;  %8314 = vmatprep.subr.bf16.mxu0 %v9952_v16  ;;  %v10009_v57 = vld [vmem:[%s11401_s19 + $0xbb4] ss:$8 sps:$4 sm:$0xff]   ;;  %v10012_v15 = vld [vmem:[%s11401_s19 + $0xaa4] ss:$8 sps:$4 sm:$0xff]   ;;  %v10013_v21 = vld [vmem:[%s11401_s19 + $0xba0] ss:$8 sps:$4 sm:$0xff]  }
 0x26a   : > { %8364 = vmatpush1.bf16.msra.mxu1 %v9945_v10  ;;  %v7947_v31 = vadd.f32 %v7946_v36, %v11832_v51  ;;  %v11943_v32 = vadd.f32 %v7995_v5, %v7945_v28  ;;  %8391 = vmatprep.mubr.bf16.mxu1 %v8826_v30  ;;  %v9964_v51 = vld [vmem:[%s11401_s19 + $0xa24] ss:$8 sps:$4 sm:$0xff]   ;;  %v10016_v24 = vld [vmem:[%s11401_s19 + $0xa90] ss:$8 sps:$4 sm:$0xff]   ;;  %v10022_v28 = vld [vmem:[%s11401_s19 + $0xa80] ss:$8 sps:$4 sm:$0xff]  }
 0x26b   : > { %v7997_v29 = vpop.f32.mrf.mxu1  ;;  %8365 = vmatprep.subr.bf16.mxu1 %v9955_v17  ;;  %v7948_v42 = vpop.f32.mrf.mxu0  ;;  %v10003_v10 = vld [vmem:[%s11401_s19 + $0xbc4] ss:$8 sps:$4 sm:$0xff]   ;;  %v10010_v17 = vld [vmem:[%s11401_s19 + $0xaa0] ss:$8 sps:$4 sm:$0xff]   ;;  %v10019_v30 = vld [vmem:[%s11401_s19 + $0xb90] ss:$8 sps:$4 sm:$0xff]  }
 0x26c   : > { %v11945_v34 = vadd.f32 %v7997_v29, %v7947_v31  ;;  %8315 = vmatpush1.bf16.msra.mxu0 %v9950_v22  ;;  %v10015_v16 = vld [vmem:[%s11401_s19 + $0xba4] ss:$8 sps:$4 sm:$0xff]   ;;  %v10018_v22 = vld [vmem:[%s11401_s19 + $0xa94] ss:$8 sps:$4 sm:$0xff]   ;;  %v10025_v36 = vld [vmem:[%s11401_s19 + $0xb80] ss:$8 sps:$4 sm:$0xff]   ;;  %v8825_v31 = vcombine.low %v11916_v52, %v11921_v11 }
 0x26d   : > { %v7999_v33 = vpop.f32.mrf.mxu1  ;;  %8316 = vmatprep.subr.bf16.mxu0 %v9958_v0  ;;  %v7949_v40 = vpop.f32.mrf.mxu0  ;;  %v10024_v3 = vld [vmem:[%s11401_s19 + $0xa84] ss:$8 sps:$4 sm:$0xff]   ;;  %v10030_v29 = vld [vmem:[%s11401_s19 + $0xc74] ss:$8 sps:$4 sm:$0xff]  }
 0x26e   : > { %8366 = vmatpush1.bf16.msra.mxu1 %v9953_v23  ;;  %v10021_v23 = vld [vmem:[%s11401_s19 + $0xb94] ss:$8 sps:$4 sm:$0xff]   ;;  %v10027_v5 = vld [vmem:[%s11401_s19 + $0xb84] ss:$8 sps:$4 sm:$0xff]  }
 0x26f   : > { %8367 = vmatprep.subr.bf16.mxu1 %v9961_v1  ;;  %v8000_v44 = vpop.f32.mrf.mxu1  ;;  %v10033_v0 = vld [vmem:[%s11401_s19 + $0xd74] ss:$8 sps:$4 sm:$0xff]   ;;  %v8823_v1 = vcombine.low %v11901_v4, %v11911_v18  ;;  %v10036_v4 = vld [vmem:[%s11401_s19 + $0xc64] ss:$8 sps:$4 sm:$0xff]  }
 0x270   : > { %8317 = vmatpush1.bf16.msra.mxu0 %v9956_v35  ;;  %v4436_v42 = vld [vmem:[%s12264_s0 + $0x150] sm:$0xff]  ;;  %v4437_v33 = vld [vmem:[%s12264_s0 + $0x158] sm:$0xff]  ;;  %v10039_v18 = vld [vmem:[%s11401_s19 + $0xd64] ss:$8 sps:$4 sm:$0xff]  }
 0x271   : > { %8318 = vmatprep.subr.bf16.mxu0 %v9964_v51  ;;  %v10028_v35 = vld [vmem:[%s11401_s19 + $0xc70] ss:$8 sps:$4 sm:$0xff]   ;;  %v8856_v52 = vcombine.high %v4436_v42, %v4436_v42  ;;  %v8858_v11 = vcombine.high %v4437_v33, %v4437_v33  ;;  %v10034_v44 = vld [vmem:[%s11401_s19 + $0xc60] ss:$8 sps:$4 sm:$0xff]  }
 0x272   : > { %8368 = vmatpush1.bf16.msra.mxu1 %v9959_v37  ;;  %v10031_v37 = vld [vmem:[%s11401_s19 + $0xd70] ss:$8 sps:$4 sm:$0xff]  }
 0x273   : > { %8369 = vmatprep.subr.bf16.mxu1 %v9967_v39 }
 0x274   : > { %8319 = vmatpush1.bf16.msra.mxu0 %v9962_v45  ;;  %v10037_v45 = vld [vmem:[%s11401_s19 + $0xd60] ss:$8 sps:$4 sm:$0xff]  }
 0x275   : > { %8320 = vmatprep.subr.bf16.mxu0 %v9970_v38 }
 0x276   : > { %8370 = vmatpush1.bf16.msra.mxu1 %v9965_v46 }
 0x277   : > { %8371 = vmatprep.subr.bf16.mxu1 %v9973_v41  ;;  %v10044_v41 = vld [vmem:[%s11401_s19 + $0xc54] ss:$8 sps:$4 sm:$0xff]  }
 0x278   : > { %8321 = vmatpush1.bf16.msra.mxu0 %v9968_v43  ;;  %v10047_v43 = vld [vmem:[%s11401_s19 + $0xd54] ss:$8 sps:$4 sm:$0xff]  }
 0x279   : > { %8322 = vmatprep.subr.bf16.mxu0 %v9976_v48 }
 0x27a   : > { %8372 = vmatpush1.bf16.msra.mxu1 %v9971_v47 }
 0x27b   : > { %8373 = vmatprep.subr.bf16.mxu1 %v9979_v49 }
 0x27c   : > { %8323 = vmatpush1.bf16.msra.mxu0 %v9974_v50 }
 0x27d   : > { %8324 = vmatprep.subr.bf16.mxu0 %v9982_v25  ;;  %v8857_v25 = vcombine.low %v4437_v33, %v4437_v33  ;;  %v10071_v33 = vld [vmem:[%s11401_s19 + $0xd10] ss:$8 sps:$4 sm:$0xff]  }
 0x27e   : > { %8374 = vmatpush1.bf16.msra.mxu1 %v9977_v20  ;;  %v8855_v20 = vcombine.low %v4436_v42, %v4436_v42  ;;  %v10068_v42 = vld [vmem:[%s11401_s19 + $0xc10] ss:$8 sps:$4 sm:$0xff]  }
 0x27f   : > { %8375 = vmatprep.subr.bf16.mxu1 %v9985_v26  ;;  %v12025_v26 = vld [vmem:[%s12264_s0 + $0xe0] sm:$0xff] }
 0x280   : > { %8325 = vmatpush2.bf16.msra.mxu0 %v9980_v27  ;;  %v12035_v27 = vld [vmem:[%s12264_s0 + $0xe8] sm:$0xff] }
 0x281   : > { %8326 = vmatprep.subr.bf16.mxu0 %v9988_v55 }
 0x282   : > { %8376 = vmatpush2.bf16.msra.mxu1 %v9983_v54 }
 0x283   : > { %8377 = vmatprep.subr.bf16.mxu1 %v9991_v58  ;;  %v10042_v58 = vld [vmem:[%s11401_s19 + $0xc50] ss:$8 sps:$4 sm:$0xff]  }
 0x284   : > { %8327 = vmatpush2.bf16.msra.mxu0 %v9986_v59  ;;  %v10045_v59 = vld [vmem:[%s11401_s19 + $0xd50] ss:$8 sps:$4 sm:$0xff]  }
 0x285   : > { %8328 = vmatprep.subr.bf16.mxu0 %v9994_v61 }
 0x286   : > { %8378 = vmatpush2.bf16.msra.mxu1 %v9989_v60 }
 0x287   : > { %8379 = vmatprep.subr.bf16.mxu1 %v9997_v62  ;;  %v10052_v62 = vld [vmem:[%s11401_s19 + $0xc44] ss:$8 sps:$4 sm:$0xff]  }
 0x288   : > { %8329 = vmatpush2.bf16.msra.mxu0 %v9992_v63  ;;  %v10055_v63 = vld [vmem:[%s11401_s19 + $0xd44] ss:$8 sps:$4 sm:$0xff]  }
 0x289   : > { %8330 = vmatprep.subr.bf16.mxu0 %v10000_v9 }
 0x28a   : > { %8380 = vmatpush2.bf16.msra.mxu1 %v9995_v8 }
 0x28b   : > { %8381 = vmatprep.subr.bf16.mxu1 %v10003_v10 }
 0x28c   : > { %8331 = vmatpush2.bf16.msra.mxu0 %v9998_v53 }
 0x28d   : > { %8332 = vmatprep.subr.bf16.mxu0 %v10006_v2 }
 0x28e   : > { %8382 = vmatpush2.bf16.msra.mxu1 %v10001_v56 }
 0x28f   : > { %8383 = vmatprep.subr.bf16.mxu1 %v10009_v57 }
 0x290   : > { %8333 = vmatpush2.bf16.msra.mxu0 %v10004_v13  ;;  %v10050_v13 = vld [vmem:[%s11401_s19 + $0xc40] ss:$8 sps:$4 sm:$0xff]  }
 0x291   : > { %8334 = vmatprep.subr.bf16.mxu0 %v10012_v15 }
 0x292   : > { %8384 = vmatpush2.bf16.msra.mxu1 %v10007_v14 }
 0x293   : > { %8385 = vmatprep.subr.bf16.mxu1 %v10015_v16  ;;  %v10058_v16 = vld [vmem:[%s11401_s19 + $0xc34] ss:$8 sps:$4 sm:$0xff]  }
 0x294   : > { %8335 = vmatpush2.bf16.msra.mxu0 %v10010_v17  ;;  %v10061_v17 = vld [vmem:[%s11401_s19 + $0xd34] ss:$8 sps:$4 sm:$0xff]  }
 0x295   : > { %8336 = vmatprep.subr.bf16.mxu0 %v10018_v22 }
 0x296   : > { %8386 = vmatpush2.bf16.msra.mxu1 %v10013_v21 }
 0x297   : > { %8387 = vmatprep.subr.bf16.mxu1 %v10021_v23 }
 0x298   : > { %8337 = vmatpush2.bf16.msra.mxu0 %v10016_v24 }
 0x299   : > { %8338 = vmatprep.subr.bf16.mxu0 %v10024_v3  ;;  %v10059_v3 = vld [vmem:[%s11401_s19 + $0xd30] ss:$8 sps:$4 sm:$0xff]  }
 0x29a   : > { %8388 = vmatpush2.bf16.msra.mxu1 %v10019_v30  ;;  %v10056_v30 = vld [vmem:[%s11401_s19 + $0xc30] ss:$8 sps:$4 sm:$0xff]  }
 0x29b   : > { %8389 = vmatprep.subr.bf16.mxu1 %v10027_v5  ;;  %v10067_v5 = vld [vmem:[%s11401_s19 + $0xd24] ss:$8 sps:$4 sm:$0xff]  }
 0x29c   : > { %8339 = vmatpush2.bf16.msra.mxu0 %v10022_v28 }
 0x29d   : > { %8410 = vmatprep.subr.bf16.mxu0 %v10030_v29  ;;  %v10062_v29 = vld [vmem:[%s11401_s19 + $0xc20] ss:$8 sps:$4 sm:$0xff]  }
 0x29e   : > { %8390 = vmatpush2.bf16.msra.mxu1 %v10025_v36 }
 0x29f   : > { %8461 = vmatprep.subr.bf16.mxu1 %v10033_v0  ;;  %v8036_v51 = vpop.f32.mrf.mxu0  ;;  %8341 = vmatmul.mubr.bf16.vlgmr.msra.gmra.mxu0 %v8823_v1  ;;  %v10065_v0 = vld [vmem:[%s11401_s19 + $0xd20] ss:$8 sps:$4 sm:$0xff]   ;;  %v10070_v1 = vld [vmem:[%s11401_s19 + $0xc14] ss:$8 sps:$4 sm:$0xff]  }
 0x2a0   : > { %v8037_v40 = vadd.f32 %v8036_v51, %v11903_v7  ;;  %8411 = vmatpush1.bf16.msra.mxu0 %v10028_v35  ;;  %8350 = vmatprep.mubr.bf16.mxu0 %v8856_v52  ;;  %v12020_v7 = vld [vmem:[%s12264_s0 + $0x60] sm:$0xff]  ;;  %v10082_v52 = vld [vmem:[%s11401_s19 + $0xcf4] ss:$8 sps:$4 sm:$0xff]   ;;  %v10080_v51 = vld [vmem:[%s11401_s19 + $0xcf0] ss:$8 sps:$4 sm:$0xff]  }
 0x2a1   : > { %v8087_v39 = vpop.f32.mrf.mxu1  ;;  %8392 = vmatmul.mubr.bf16.vlgmr.msra.gmra.mxu1 %v8825_v31  ;;  %v8038_v46 = vpop.f32.mrf.mxu0  ;;  %8412 = vmatprep.subr.bf16.mxu0 %v10036_v4  ;;  %v8828_v10 = vcombine.high %v12020_v7, %v12025_v26  ;;  %v10073_v31 = vld [vmem:[%s11401_s19 + $0xd14] ss:$8 sps:$4 sm:$0xff]   ;;  %v10076_v35 = vld [vmem:[%s11401_s19 + $0xc04] ss:$8 sps:$4 sm:$0xff]   ;;  %v10074_v4 = vld [vmem:[%s11401_s19 + $0xc00] ss:$8 sps:$4 sm:$0xff]  }
 0x2a2   : > { %8462 = vmatpush1.bf16.msra.mxu1 %v10031_v37  ;;  %v12014_v47 = vadd.f32 %v8087_v39, %v8037_v40  ;;  %v8039_v48 = vadd.f32 %v8038_v46, %v11923_v12  ;;  %8401 = vmatprep.mubr.bf16.mxu1 %v8858_v11  ;;  %v12030_v12 = vld [vmem:[%s12264_s0 + $0x68] sm:$0xff]  ;;  %v10085_v11 = vld [vmem:[%s11401_s19 + $0xdf4] ss:$8 sps:$4 sm:$0xff]   ;;  %v10083_v39 = vld [vmem:[%s11401_s19 + $0xdf0] ss:$8 sps:$4 sm:$0xff]  }
 0x2a3   : > { %v8089_v38 = vpop.f32.mrf.mxu1  ;;  %8463 = vmatprep.subr.bf16.mxu1 %v10039_v18  ;;  %v8040_v49 = vpop.f32.mrf.mxu0  ;;  %v10079_v37 = vld [vmem:[%s11401_s19 + $0xd04] ss:$8 sps:$4 sm:$0xff]   ;;  %v10077_v18 = vld [vmem:[%s11401_s19 + $0xd00] ss:$8 sps:$4 sm:$0xff]  }
 0x2a4   : > { %v12037_v54 = vadd.f32 %v8089_v38, %v8039_v48  ;;  %v8041_v55 = vadd.f32 %v8040_v49, %v11928_v19  ;;  %8413 = vmatpush1.bf16.msra.mxu0 %v10034_v44  ;;  %v8830_v19 = vcombine.high %v12030_v12, %v12035_v27  ;;  %v10088_v40 = vld [vmem:[%s11401_s19 + $0xce4] ss:$8 sps:$4 sm:$0xff]   ;;  %v10089_v46 = vld [vmem:[%s11401_s19 + $0xde0] ss:$8 sps:$4 sm:$0xff]   ;;  %v10094_v38 = vld [vmem:[%s11401_s19 + $0xcd4] ss:$8 sps:$4 sm:$0xff]  }
 0x2a5   : > { %v8091_v50 = vpop.f32.mrf.mxu1  ;;  %v8042_v60 = vpop.f32.mrf.mxu0  ;;  %8414 = vmatprep.subr.bf16.mxu0 %v10044_v41  ;;  %v10091_v44 = vld [vmem:[%s11401_s19 + $0xde4] ss:$8 sps:$4 sm:$0xff]   ;;  %v10097_v41 = vld [vmem:[%s11401_s19 + $0xdd4] ss:$8 sps:$4 sm:$0xff]   ;;  %v10095_v48 = vld [vmem:[%s11401_s19 + $0xdd0] ss:$8 sps:$4 sm:$0xff]  }
 0x2a6   : > { %8464 = vmatpush1.bf16.msra.mxu1 %v10037_v45  ;;  %v12044_v8 = vadd.f32 %v8091_v50, %v8041_v55  ;;  %v8043_v9 = vadd.f32 %v8042_v60, %v11937_v6  ;;  %v10053_v6 = vld [vmem:[%s11401_s19 + $0xd40] ss:$8 sps:$4 sm:$0xff]   ;;  %v10100_v49 = vld [vmem:[%s11401_s19 + $0xcc4] ss:$8 sps:$4 sm:$0xff]   ;;  %v10106_v55 = vld [vmem:[%s11401_s19 + $0xcb4] ss:$8 sps:$4 sm:$0xff]  }
 0x2a7   : > { %v8093_v61 = vpop.f32.mrf.mxu1  ;;  %8465 = vmatprep.subr.bf16.mxu1 %v10047_v43  ;;  %v8046_v53 = vpop.f32.mrf.mxu0  ;;  %8351 = vmatmul.mubr.bf16.gmra.mxu0 %v8855_v20  ;;  %v10086_v45 = vld [vmem:[%s11401_s19 + $0xce0] ss:$8 sps:$4 sm:$0xff]   ;;  %v10092_v43 = vld [vmem:[%s11401_s19 + $0xcd0] ss:$8 sps:$4 sm:$0xff]   ;;  %v10103_v50 = vld [vmem:[%s11401_s19 + $0xdc4] ss:$8 sps:$4 sm:$0xff]  }
 0x2a8   : > { %v12051_v2 = vadd.f32 %v8093_v61, %v8043_v9  ;;  %v8047_v57 = vadd.f32 %v8046_v53, %v11943_v32  ;;  %8415 = vmatpush1.bf16.msra.mxu0 %v10042_v58  ;;  %8442 = vmatprep.mubr.bf16.mxu0 %v8828_v10  ;;  %v10098_v20 = vld [vmem:[%s11401_s19 + $0xcc0] ss:$8 sps:$4 sm:$0xff]   ;;  %v10109_v58 = vld [vmem:[%s11401_s19 + $0xdb4] ss:$8 sps:$4 sm:$0xff]   ;;  %v10107_v60 = vld [vmem:[%s11401_s19 + $0xdb0] ss:$8 sps:$4 sm:$0xff]  }
 0x2a9   : > { %v8097_v56 = vpop.f32.mrf.mxu1  ;;  %8402 = vmatmul.mubr.bf16.gmra.mxu1 %v8857_v25  ;;  %v8048_v14 = vpop.f32.mrf.mxu0  ;;  %8416 = vmatprep.subr.bf16.mxu0 %v10052_v62  ;;  %v10101_v25 = vld [vmem:[%s11401_s19 + $0xdc0] ss:$8 sps:$4 sm:$0xff]   ;;  %v10112_v61 = vld [vmem:[%s11401_s19 + $0xca4] ss:$8 sps:$4 sm:$0xff]   ;;  %v10118_v10 = vld [vmem:[%s11401_s19 + $0xc94] ss:$8 sps:$4 sm:$0xff]  }
 0x2aa   : > { %8466 = vmatpush1.bf16.msra.mxu1 %v10045_v59  ;;  %v8049_v21 = vadd.f32 %v8048_v14, %v11945_v34  ;;  %v12059_v22 = vadd.f32 %v8097_v56, %v8047_v57  ;;  %8493 = vmatprep.mubr.bf16.mxu1 %v8830_v19  ;;  %v10064_v34 = vld [vmem:[%s11401_s19 + $0xc24] ss:$8 sps:$4 sm:$0xff]   ;;  %v10104_v59 = vld [vmem:[%s11401_s19 + $0xcb0] ss:$8 sps:$4 sm:$0xff]   ;;  %v10113_v9 = vld [vmem:[%s11401_s19 + $0xda0] ss:$8 sps:$4 sm:$0xff]  }
 0x2ab   : > { %v8099_v15 = vpop.f32.mrf.mxu1  ;;  %8467 = vmatprep.subr.bf16.mxu1 %v10055_v63  ;;  %v8050_v32 = vpop.f32.mrf.mxu0  ;;  %v10115_v62 = vld [vmem:[%s11401_s19 + $0xda4] ss:$8 sps:$4 sm:$0xff]   ;;  %v10110_v63 = vld [vmem:[%s11401_s19 + $0xca0] ss:$8 sps:$4 sm:$0xff]   ;;  %v10121_v19 = vld [vmem:[%s11401_s19 + $0xd94] ss:$8 sps:$4 sm:$0xff]  }
 0x2ac   : > { %v12061_v24 = vadd.f32 %v8099_v15, %v8049_v21  ;;  %8417 = vmatpush1.bf16.msra.mxu0 %v10050_v13  ;;  %v10116_v53 = vld [vmem:[%s11401_s19 + $0xc90] ss:$8 sps:$4 sm:$0xff]   ;;  %v10124_v57 = vld [vmem:[%s11401_s19 + $0xc84] ss:$8 sps:$4 sm:$0xff]   ;;  %v10125_v14 = vld [vmem:[%s11401_s19 + $0xd80] ss:$8 sps:$4 sm:$0xff]   ;;  %v8829_v21 = vcombine.low %v12030_v12, %v12035_v27 }
 0x2ad   : > { %v8101_v23 = vpop.f32.mrf.mxu1  ;;  %8418 = vmatprep.subr.bf16.mxu0 %v10058_v16  ;;  %v8051_v28 = vpop.f32.mrf.mxu0  ;;  %v10119_v56 = vld [vmem:[%s11401_s19 + $0xd90] ss:$8 sps:$4 sm:$0xff]   ;;  %v10127_v13 = vld [vmem:[%s11401_s19 + $0xd84] ss:$8 sps:$4 sm:$0xff]   ;;  %v10130_v15 = vld [vmem:[%s11401_s19 + $0xe74] ss:$8 sps:$4 sm:$0xff]  }
 0x2ae   : > { %8468 = vmatpush1.bf16.msra.mxu1 %v10053_v6  ;;  %v10122_v6 = vld [vmem:[%s11401_s19 + $0xc80] ss:$8 sps:$4 sm:$0xff]   ;;  %v10133_v16 = vld [vmem:[%s11401_s19 + $0xf74] ss:$8 sps:$4 sm:$0xff]  }
 0x2af   : > { %8469 = vmatprep.subr.bf16.mxu1 %v10061_v17  ;;  %v8102_v36 = vpop.f32.mrf.mxu1  ;;  %v8827_v17 = vcombine.low %v12020_v7, %v12025_v26  ;;  %v4438_v32 = vld [vmem:[%s12264_s0 + $0x160] sm:$0xff]  ;;  %v4439_v23 = vld [vmem:[%s12264_s0 + $0x168] sm:$0xff] }
 0x2b0   : > { %8419 = vmatpush1.bf16.msra.mxu0 %v10056_v30  ;;  %v10128_v30 = vld [vmem:[%s11401_s19 + $0xe70] ss:$8 sps:$4 sm:$0xff]   ;;  %v10136_v7 = vld [vmem:[%s11401_s19 + $0xe64] ss:$8 sps:$4 sm:$0xff]   ;;  %v8860_v12 = vcombine.high %v4438_v32, %v4438_v32  ;;  %v8862_v27 = vcombine.high %v4439_v23, %v4439_v23  ;;  %v10134_v36 = vld [vmem:[%s11401_s19 + $0xe60] ss:$8 sps:$4 sm:$0xff]  }
 0x2b1   : > { %8420 = vmatprep.subr.bf16.mxu0 %v10064_v34  ;;  %v10139_v26 = vld [vmem:[%s11401_s19 + $0xf64] ss:$8 sps:$4 sm:$0xff]  }
 0x2b2   : > { %8470 = vmatpush1.bf16.msra.mxu1 %v10059_v3  ;;  %v10131_v3 = vld [vmem:[%s11401_s19 + $0xf70] ss:$8 sps:$4 sm:$0xff]  }
 0x2b3   : > { %8471 = vmatprep.subr.bf16.mxu1 %v10067_v5 }
 0x2b4   : > { %8421 = vmatpush1.bf16.msra.mxu0 %v10062_v29  ;;  %v10137_v29 = vld [vmem:[%s11401_s19 + $0xf60] ss:$8 sps:$4 sm:$0xff]  }
 0x2b5   : > { %8422 = vmatprep.subr.bf16.mxu0 %v10070_v1 }
 0x2b6   : > { %8472 = vmatpush1.bf16.msra.mxu1 %v10065_v0 }
 0x2b7   : > { %8473 = vmatprep.subr.bf16.mxu1 %v10073_v31  ;;  %v10144_v31 = vld [vmem:[%s11401_s19 + $0xe54] ss:$8 sps:$4 sm:$0xff]  }
 0x2b8   : > { %8423 = vmatpush1.bf16.msra.mxu0 %v10068_v42  ;;  %v10147_v42 = vld [vmem:[%s11401_s19 + $0xf54] ss:$8 sps:$4 sm:$0xff]  }
 0x2b9   : > { %8424 = vmatprep.subr.bf16.mxu0 %v10076_v35 }
 0x2ba   : > { %8474 = vmatpush1.bf16.msra.mxu1 %v10071_v33 }
 0x2bb   : > { %8475 = vmatprep.subr.bf16.mxu1 %v10079_v37 }
 0x2bc   : > { %8425 = vmatpush1.bf16.msra.mxu0 %v10074_v4 }
 0x2bd   : > { %8426 = vmatprep.subr.bf16.mxu0 %v10082_v52  ;;  %v8861_v52 = vcombine.low %v4439_v23, %v4439_v23  ;;  %v10171_v23 = vld [vmem:[%s11401_s19 + $0xf10] ss:$8 sps:$4 sm:$0xff]  }
 0x2be   : > { %8476 = vmatpush1.bf16.msra.mxu1 %v10077_v18  ;;  %v8859_v18 = vcombine.low %v4438_v32, %v4438_v32  ;;  %v10168_v32 = vld [vmem:[%s11401_s19 + $0xe10] ss:$8 sps:$4 sm:$0xff]  }
 0x2bf   : > { %8477 = vmatprep.subr.bf16.mxu1 %v10085_v11  ;;  %v12141_v11 = vld [vmem:[%s12264_s0 + $0xf0] sm:$0xff] }
 0x2c0   : > { %8427 = vmatpush2.bf16.msra.mxu0 %v10080_v51  ;;  %v12151_v51 = vld [vmem:[%s12264_s0 + $0xf8] sm:$0xff] }
 0x2c1   : > { %8428 = vmatprep.subr.bf16.mxu0 %v10088_v40 }
 0x2c2   : > { %8478 = vmatpush2.bf16.msra.mxu1 %v10083_v39 }
 0x2c3   : > { %8479 = vmatprep.subr.bf16.mxu1 %v10091_v44  ;;  %v10142_v44 = vld [vmem:[%s11401_s19 + $0xe50] ss:$8 sps:$4 sm:$0xff]  }
 0x2c4   : > { %8429 = vmatpush2.bf16.msra.mxu0 %v10086_v45  ;;  %v10145_v45 = vld [vmem:[%s11401_s19 + $0xf50] ss:$8 sps:$4 sm:$0xff]  }
 0x2c5   : > { %8430 = vmatprep.subr.bf16.mxu0 %v10094_v38 }
 0x2c6   : > { %8480 = vmatpush2.bf16.msra.mxu1 %v10089_v46 }
 0x2c7   : > { %8481 = vmatprep.subr.bf16.mxu1 %v10097_v41  ;;  %v10152_v41 = vld [vmem:[%s11401_s19 + $0xe44] ss:$8 sps:$4 sm:$0xff]  }
 0x2c8   : > { %8431 = vmatpush2.bf16.msra.mxu0 %v10092_v43  ;;  %v10155_v43 = vld [vmem:[%s11401_s19 + $0xf44] ss:$8 sps:$4 sm:$0xff]  }
 0x2c9   : > { %8432 = vmatprep.subr.bf16.mxu0 %v10100_v49 }
 0x2ca   : > { %8482 = vmatpush2.bf16.msra.mxu1 %v10095_v48 }
 0x2cb   : > { %8483 = vmatprep.subr.bf16.mxu1 %v10103_v50 }
 0x2cc   : > { %8433 = vmatpush2.bf16.msra.mxu0 %v10098_v20 }
 0x2cd   : > { %8434 = vmatprep.subr.bf16.mxu0 %v10106_v55 }
 0x2ce   : > { %8484 = vmatpush2.bf16.msra.mxu1 %v10101_v25 }
 0x2cf   : > { %8485 = vmatprep.subr.bf16.mxu1 %v10109_v58 }
 0x2d0   : > { %8435 = vmatpush2.bf16.msra.mxu0 %v10104_v59  ;;  %v10150_v59 = vld [vmem:[%s11401_s19 + $0xe40] ss:$8 sps:$4 sm:$0xff]  }
 0x2d1   : > { %8436 = vmatprep.subr.bf16.mxu0 %v10112_v61 }
 0x2d2   : > { %8486 = vmatpush2.bf16.msra.mxu1 %v10107_v60 }
 0x2d3   : > { %8487 = vmatprep.subr.bf16.mxu1 %v10115_v62  ;;  %v10158_v62 = vld [vmem:[%s11401_s19 + $0xe34] ss:$8 sps:$4 sm:$0xff]  }
 0x2d4   : > { %8437 = vmatpush2.bf16.msra.mxu0 %v10110_v63  ;;  %v10161_v63 = vld [vmem:[%s11401_s19 + $0xf34] ss:$8 sps:$4 sm:$0xff]  }
 0x2d5   : > { %8438 = vmatprep.subr.bf16.mxu0 %v10118_v10 }
 0x2d6   : > { %8488 = vmatpush2.bf16.msra.mxu1 %v10113_v9 }
 0x2d7   : > { %8489 = vmatprep.subr.bf16.mxu1 %v10121_v19 }
 0x2d8   : > { %8439 = vmatpush2.bf16.msra.mxu0 %v10116_v53 }
 0x2d9   : > { %8440 = vmatprep.subr.bf16.mxu0 %v10124_v57  ;;  %v10159_v57 = vld [vmem:[%s11401_s19 + $0xf30] ss:$8 sps:$4 sm:$0xff]  }
 0x2da   : > { %8490 = vmatpush2.bf16.msra.mxu1 %v10119_v56  ;;  %v10156_v56 = vld [vmem:[%s11401_s19 + $0xe30] ss:$8 sps:$4 sm:$0xff]  }
 0x2db   : > { %8491 = vmatprep.subr.bf16.mxu1 %v10127_v13  ;;  %v10167_v13 = vld [vmem:[%s11401_s19 + $0xf24] ss:$8 sps:$4 sm:$0xff]  }
 0x2dc   : > { %8441 = vmatpush2.bf16.msra.mxu0 %v10122_v6 }
 0x2dd   : > { %8512 = vmatprep.subr.bf16.mxu0 %v10130_v15  ;;  %v10162_v15 = vld [vmem:[%s11401_s19 + $0xe20] ss:$8 sps:$4 sm:$0xff]  }
 0x2de   : > { %8492 = vmatpush2.bf16.msra.mxu1 %v10125_v14 }
 0x2df   : > { %8563 = vmatprep.subr.bf16.mxu1 %v10133_v16  ;;  %v8138_v34 = vpop.f32.mrf.mxu0  ;;  %8443 = vmatmul.mubr.bf16.vlgmr.msra.gmra.mxu0 %v8827_v17  ;;  %v10165_v16 = vld [vmem:[%s11401_s19 + $0xf20] ss:$8 sps:$4 sm:$0xff]   ;;  %v10170_v17 = vld [vmem:[%s11401_s19 + $0xe14] ss:$8 sps:$4 sm:$0xff]  }
 0x2e0   : > { %v8139_v28 = vadd.f32 %v8138_v34, %v12014_v47  ;;  %8513 = vmatpush1.bf16.msra.mxu0 %v10128_v30  ;;  %8452 = vmatprep.mubr.bf16.mxu0 %v8860_v12  ;;  %v12136_v47 = vld [vmem:[%s12264_s0 + $0x70] sm:$0xff]  ;;  %v10176_v30 = vld [vmem:[%s11401_s19 + $0xe04] ss:$8 sps:$4 sm:$0xff]  }
 0x2e1   : > { %v8189_v5 = vpop.f32.mrf.mxu1  ;;  %8494 = vmatmul.mubr.bf16.vlgmr.msra.gmra.mxu1 %v8829_v21  ;;  %v8140_v0 = vpop.f32.mrf.mxu0  ;;  %8514 = vmatprep.subr.bf16.mxu0 %v10136_v7  ;;  %v8832_v50 = vcombine.high %v12136_v47, %v12141_v11  ;;  %v10173_v21 = vld [vmem:[%s11401_s19 + $0xf14] ss:$8 sps:$4 sm:$0xff]   ;;  %v10174_v7 = vld [vmem:[%s11401_s19 + $0xe00] ss:$8 sps:$4 sm:$0xff]   ;;  %v10180_v34 = vld [vmem:[%s11401_s19 + $0xef0] ss:$8 sps:$4 sm:$0xff]  }
 0x2e2   : > { %8564 = vmatpush1.bf16.msra.mxu1 %v10131_v3  ;;  %v12130_v33 = vadd.f32 %v8189_v5, %v8139_v28  ;;  %v8141_v35 = vadd.f32 %v8140_v0, %v12037_v54  ;;  %8503 = vmatprep.mubr.bf16.mxu1 %v8862_v27  ;;  %v12146_v54 = vld [vmem:[%s12264_s0 + $0x78] sm:$0xff]  ;;  %v10179_v3 = vld [vmem:[%s11401_s19 + $0xf04] ss:$8 sps:$4 sm:$0xff]   ;;  %v10189_v0 = vld [vmem:[%s11401_s19 + $0xfe0] ss:$8 sps:$4 sm:$0xff]  }
 0x2e3   : > { %v8191_v1 = vpop.f32.mrf.mxu1  ;;  %8565 = vmatprep.subr.bf16.mxu1 %v10139_v26  ;;  %v8142_v37 = vpop.f32.mrf.mxu0  ;;  %v10177_v26 = vld [vmem:[%s11401_s19 + $0xf00] ss:$8 sps:$4 sm:$0xff]   ;;  %v10182_v12 = vld [vmem:[%s11401_s19 + $0xef4] ss:$8 sps:$4 sm:$0xff]   ;;  %v10183_v5 = vld [vmem:[%s11401_s19 + $0xff0] ss:$8 sps:$4 sm:$0xff]  }
 0x2e4   : > { %v12153_v39 = vadd.f32 %v8191_v1, %v8141_v35  ;;  %v8143_v40 = vadd.f32 %v8142_v37, %v12044_v8  ;;  %8515 = vmatpush1.bf16.msra.mxu0 %v10134_v36  ;;  %v8834_v8 = vcombine.high %v12146_v54, %v12151_v51  ;;  %v10185_v27 = vld [vmem:[%s11401_s19 + $0xff4] ss:$8 sps:$4 sm:$0xff]   ;;  %v10188_v28 = vld [vmem:[%s11401_s19 + $0xee4] ss:$8 sps:$4 sm:$0xff]   ;;  %v10195_v35 = vld [vmem:[%s11401_s19 + $0xfd0] ss:$8 sps:$4 sm:$0xff]  }
 0x2e5   : > { %v8193_v4 = vpop.f32.mrf.mxu1  ;;  %v8144_v46 = vpop.f32.mrf.mxu0  ;;  %8516 = vmatprep.subr.bf16.mxu0 %v10144_v31  ;;  %v10191_v36 = vld [vmem:[%s11401_s19 + $0xfe4] ss:$8 sps:$4 sm:$0xff]   ;;  %v10194_v1 = vld [vmem:[%s11401_s19 + $0xed4] ss:$8 sps:$4 sm:$0xff]  }
 0x2e6   : > { %8566 = vmatpush1.bf16.msra.mxu1 %v10137_v29  ;;  %v12160_v48 = vadd.f32 %v8193_v4, %v8143_v40  ;;  %v8145_v49 = vadd.f32 %v8144_v46, %v12051_v2  ;;  %v10153_v2 = vld [vmem:[%s11401_s19 + $0xf40] ss:$8 sps:$4 sm:$0xff]   ;;  %v10197_v31 = vld [vmem:[%s11401_s19 + $0xfd4] ss:$8 sps:$4 sm:$0xff]   ;;  %v10200_v37 = vld [vmem:[%s11401_s19 + $0xec4] ss:$8 sps:$4 sm:$0xff]  }
 0x2e7   : > { %v8195_v38 = vpop.f32.mrf.mxu1  ;;  %8567 = vmatprep.subr.bf16.mxu1 %v10147_v42  ;;  %v8148_v20 = vpop.f32.mrf.mxu0  ;;  %8453 = vmatmul.mubr.bf16.gmra.mxu0 %v8859_v18  ;;  %v10186_v29 = vld [vmem:[%s11401_s19 + $0xee0] ss:$8 sps:$4 sm:$0xff]   ;;  %v10192_v42 = vld [vmem:[%s11401_s19 + $0xed0] ss:$8 sps:$4 sm:$0xff]   ;;  %v10203_v4 = vld [vmem:[%s11401_s19 + $0xfc4] ss:$8 sps:$4 sm:$0xff]  }
 0x2e8   : > { %v12167_v55 = vadd.f32 %v8195_v38, %v8145_v49  ;;  %v8149_v58 = vadd.f32 %v8148_v20, %v12059_v22  ;;  %8517 = vmatpush1.bf16.msra.mxu0 %v10142_v44  ;;  %8544 = vmatprep.mubr.bf16.mxu0 %v8832_v50  ;;  %v10198_v18 = vld [vmem:[%s11401_s19 + $0xec0] ss:$8 sps:$4 sm:$0xff]   ;;  %v10206_v40 = vld [vmem:[%s11401_s19 + $0xeb4] ss:$8 sps:$4 sm:$0xff]   ;;  %v10207_v46 = vld [vmem:[%s11401_s19 + $0xfb0] ss:$8 sps:$4 sm:$0xff]  }
 0x2e9   : > { %v8199_v25 = vpop.f32.mrf.mxu1  ;;  %8504 = vmatmul.mubr.bf16.gmra.mxu1 %v8861_v52  ;;  %v8150_v60 = vpop.f32.mrf.mxu0  ;;  %8518 = vmatprep.subr.bf16.mxu0 %v10152_v41  ;;  %v10201_v52 = vld [vmem:[%s11401_s19 + $0xfc0] ss:$8 sps:$4 sm:$0xff]   ;;  %v10209_v44 = vld [vmem:[%s11401_s19 + $0xfb4] ss:$8 sps:$4 sm:$0xff]   ;;  %v10212_v38 = vld [vmem:[%s11401_s19 + $0xea4] ss:$8 sps:$4 sm:$0xff]  }
 0x2ea   : > { %8568 = vmatpush1.bf16.msra.mxu1 %v10145_v45  ;;  %v8151_v9 = vadd.f32 %v8150_v60, %v12061_v24  ;;  %v12175_v10 = vadd.f32 %v8199_v25, %v8149_v58  ;;  %8595 = vmatprep.mubr.bf16.mxu1 %v8834_v8  ;;  %v10164_v24 = vld [vmem:[%s11401_s19 + $0xe24] ss:$8 sps:$4 sm:$0xff]   ;;  %v10204_v45 = vld [vmem:[%s11401_s19 + $0xeb0] ss:$8 sps:$4 sm:$0xff]   ;;  %v10213_v49 = vld [vmem:[%s11401_s19 + $0xfa0] ss:$8 sps:$4 sm:$0xff]  }
 0x2eb   : > { %v8201_v61 = vpop.f32.mrf.mxu1  ;;  %8569 = vmatprep.subr.bf16.mxu1 %v10155_v43  ;;  %v8152_v22 = vpop.f32.mrf.mxu0  ;;  %v10215_v41 = vld [vmem:[%s11401_s19 + $0xfa4] ss:$8 sps:$4 sm:$0xff]   ;;  %v10210_v43 = vld [vmem:[%s11401_s19 + $0xea0] ss:$8 sps:$4 sm:$0xff]   ;;  %v10218_v50 = vld [vmem:[%s11401_s19 + $0xe94] ss:$8 sps:$4 sm:$0xff]  }
 0x2ec   : > { %v12177_v53 = vadd.f32 %v8201_v61, %v8151_v9  ;;  %8519 = vmatpush1.bf16.msra.mxu0 %v10150_v59  ;;  %v10221_v8 = vld [vmem:[%s11401_s19 + $0xf94] ss:$8 sps:$4 sm:$0xff]   ;;  %v10216_v20 = vld [vmem:[%s11401_s19 + $0xe90] ss:$8 sps:$4 sm:$0xff]   ;;  %v10224_v58 = vld [vmem:[%s11401_s19 + $0xe84] ss:$8 sps:$4 sm:$0xff]   ;;  %v8833_v9 = vcombine.low %v12146_v54, %v12151_v51 }
 0x2ed   : > { %v8203_v19 = vpop.f32.mrf.mxu1  ;;  %8520 = vmatprep.subr.bf16.mxu0 %v10158_v62  ;;  %v8153_v6 = vpop.f32.mrf.mxu0  ;;  %v10219_v25 = vld [vmem:[%s11401_s19 + $0xf90] ss:$8 sps:$4 sm:$0xff]   ;;  %v10227_v59 = vld [vmem:[%s11401_s19 + $0xf84] ss:$8 sps:$4 sm:$0xff]   ;;  %v10225_v60 = vld [vmem:[%s11401_s19 + $0xf80] ss:$8 sps:$4 sm:$0xff]  }
 0x2ee   : > { %8570 = vmatpush1.bf16.msra.mxu1 %v10153_v2  ;;  %v10222_v2 = vld [vmem:[%s11401_s19 + $0xe80] ss:$8 sps:$4 sm:$0xff]   ;;  %v4440_v61 = vld [vmem:[%s12264_s0 + $0x170] sm:$0xff]  ;;  %v4441_v62 = vld [vmem:[%s12264_s0 + $0x178] sm:$0xff]  ;;  %s9391_s19 = smul.u32 24, %s4347_s30 }
 0x2ef   : > { %8571 = vmatprep.subr.bf16.mxu1 %v10161_v63  ;;  %v8204_v14 = vpop.f32.mrf.mxu1  ;;  %v8831_v63 = vcombine.low %v12136_v47, %v12141_v11  ;;  %v8864_v22 = vcombine.high %v4440_v61, %v4440_v61  ;;  %v8866_v19 = vcombine.high %v4441_v62, %v4441_v62  ;;  %v8863_v54 = vcombine.low %v4440_v61, %v4440_v61 }
 0x2f0   : > { %8521 = vmatpush1.bf16.msra.mxu0 %v10156_v56  ;;  %v8865_v51 = vcombine.low %v4441_v62, %v4441_v62  ;;  %s4378_s29 = scalar_lea.vmem [#allocation3], %s9391_s19 }
 0x2f1   : > { %8522 = vmatprep.subr.bf16.mxu0 %v10164_v24 }
 0x2f2   : > { %8572 = vmatpush1.bf16.msra.mxu1 %v10159_v57 }
 0x2f3   : > { %8573 = vmatprep.subr.bf16.mxu1 %v10167_v13 }
 0x2f4   : > { %8523 = vmatpush1.bf16.msra.mxu0 %v10162_v15 }
 0x2f5   : > { %8524 = vmatprep.subr.bf16.mxu0 %v10170_v17 }
 0x2f6   : > { %8574 = vmatpush1.bf16.msra.mxu1 %v10165_v16 }
 0x2f7   : > { %8575 = vmatprep.subr.bf16.mxu1 %v10173_v21 }
 0x2f8   : > { %8525 = vmatpush1.bf16.msra.mxu0 %v10168_v32 }
 0x2f9   : > { %8526 = vmatprep.subr.bf16.mxu0 %v10176_v30 }
 0x2fa   : > { %8576 = vmatpush1.bf16.msra.mxu1 %v10171_v23 }
 0x2fb   : > { %8577 = vmatprep.subr.bf16.mxu1 %v10179_v3 }
 0x2fc   : > { %8527 = vmatpush1.bf16.msra.mxu0 %v10174_v7 }
 0x2fd   : > { %8528 = vmatprep.subr.bf16.mxu0 %v10182_v12 }
 0x2fe   : > { %8578 = vmatpush1.bf16.msra.mxu1 %v10177_v26 }
 0x2ff   : > { %8579 = vmatprep.subr.bf16.mxu1 %v10185_v27 }
 0x300   : > { %8529 = vmatpush2.bf16.msra.mxu0 %v10180_v34 }
 0x301   : > { %8530 = vmatprep.subr.bf16.mxu0 %v10188_v28 }
 0x302   : > { %8580 = vmatpush2.bf16.msra.mxu1 %v10183_v5 }
 0x303   : > { %8581 = vmatprep.subr.bf16.mxu1 %v10191_v36 }
 0x304   : > { %8531 = vmatpush2.bf16.msra.mxu0 %v10186_v29 }
 0x305   : > { %8532 = vmatprep.subr.bf16.mxu0 %v10194_v1 }
 0x306   : > { %8582 = vmatpush2.bf16.msra.mxu1 %v10189_v0 }
 0x307   : > { %8583 = vmatprep.subr.bf16.mxu1 %v10197_v31 }
 0x308   : > { %8533 = vmatpush2.bf16.msra.mxu0 %v10192_v42 }
 0x309   : > { %8534 = vmatprep.subr.bf16.mxu0 %v10200_v37 }
 0x30a   : > { %8584 = vmatpush2.bf16.msra.mxu1 %v10195_v35 }
 0x30b   : > { %8585 = vmatprep.subr.bf16.mxu1 %v10203_v4 }
 0x30c   : > { %8535 = vmatpush2.bf16.msra.mxu0 %v10198_v18 }
 0x30d   : > { %8536 = vmatprep.subr.bf16.mxu0 %v10206_v40 }
 0x30e   : > { %8586 = vmatpush2.bf16.msra.mxu1 %v10201_v52 }
 0x30f   : > { %8587 = vmatprep.subr.bf16.mxu1 %v10209_v44 }
 0x310   : > { %8537 = vmatpush2.bf16.msra.mxu0 %v10204_v45 }
 0x311   : > { %8538 = vmatprep.subr.bf16.mxu0 %v10212_v38 }
 0x312   : > { %8588 = vmatpush2.bf16.msra.mxu1 %v10207_v46 }
 0x313   : > { %8589 = vmatprep.subr.bf16.mxu1 %v10215_v41 }
 0x314   : > { %8539 = vmatpush2.bf16.msra.mxu0 %v10210_v43 }
 0x315   : > { %8540 = vmatprep.subr.bf16.mxu0 %v10218_v50 }
 0x316   : > { %8590 = vmatpush2.bf16.msra.mxu1 %v10213_v49 }
 0x317   : > { %8591 = vmatprep.subr.bf16.mxu1 %v10221_v8 }
 0x318   : > { %8541 = vmatpush2.bf16.msra.mxu0 %v10216_v20 }
 0x319   : > { %8542 = vmatprep.subr.bf16.mxu0 %v10224_v58 }
 0x31a   : > { %8592 = vmatpush2.bf16.msra.mxu1 %v10219_v25 }
 0x31b   : > { %8593 = vmatprep.subr.bf16.mxu1 %v10227_v59 }
 0x31c   : > { %8543 = vmatpush2.bf16.msra.mxu0 %v10222_v2 }
 0x31e   : > { %8594 = vmatpush2.bf16.msra.mxu1 %v10225_v60 }
 0x31f   : > { %v8240_v56 = vpop.f32.mrf.mxu0  ;;  %8545 = vmatmul.mubr.bf16.vlgmr.msra.gmra.mxu0 %v8831_v63 }
 0x320   : > { %v8241_v24 = vadd.f32 %v8240_v56, %v12130_v33  ;;  %8554 = vmatprep.mubr.bf16.mxu0 %v8864_v22 }
 0x321   : > { %v8291_v57 = vpop.f32.mrf.mxu1  ;;  %8596 = vmatmul.mubr.bf16.vlgmr.msra.gmra.mxu1 %v8833_v9  ;;  %v8242_v13 = vpop.f32.mrf.mxu0 }
 0x322   : > { %8605 = vmatprep.mubr.bf16.mxu1 %v8866_v19  ;;  %v8292_v14 = vadd.f32 %v8291_v57, %v8241_v24  ;;  %v8243_v47 = vadd.f32 %v8242_v13, %v12153_v39 }
 0x323   : > { %v8293_v6 = vpop.f32.mrf.mxu1  ;;  %v8244_v11 = vpop.f32.mrf.mxu0 }
 0x324   : > { %v8294_v16 = vadd.f32 %v8293_v6, %v8243_v47  ;;  %v8245_v17 = vadd.f32 %v8244_v11, %v12160_v48 }
 0x325   : > { %v8295_v15 = vpop.f32.mrf.mxu1  ;;  %v8246_v21 = vpop.f32.mrf.mxu0 }
 0x326   : > { %v8296_v23 = vadd.f32 %v8295_v15, %v8245_v17  ;;  %v8247_v30 = vadd.f32 %v8246_v21, %v12167_v55 }
 0x327   : > { %v8297_v32 = vpop.f32.mrf.mxu1  ;;  %v8250_v33 = vpop.f32.mrf.mxu0  ;;  %8555 = vmatmul.mubr.bf16.gmra.mxu0 %v8863_v54 }
 0x328   : > { %v8298_v7 = vadd.f32 %v8297_v32, %v8247_v30  ;;  %v8251_v26 = vadd.f32 %v8250_v33, %v12175_v10 }
 0x329   : > { %8606 = vmatmul.mubr.bf16.gmra.mxu1 %v8865_v51  ;;  %v8301_v3 = vpop.f32.mrf.mxu1  ;;  %v8252_v39 = vpop.f32.mrf.mxu0 }
 0x32a   : > { %v8253_v27 = vadd.f32 %v8252_v39, %v12177_v53  ;;  %v8302_v34 = vadd.f32 %v8301_v3, %v8251_v26 }
 0x32b   : > { %v8303_v12 = vpop.f32.mrf.mxu1  ;;  %v8254_v5 = vpop.f32.mrf.mxu0 }
 0x32c   : > { %v8304_v48 = vadd.f32 %v8303_v12, %v8253_v27 }
 0x32d   : > { %v8305_v28 = vpop.f32.mrf.mxu1  ;;  %v8255_v36 = vpop.f32.mrf.mxu0 }
 0x32f   : > { %v8306_v29 = vpop.f32.mrf.mxu1 }
 0x35f   : > { %v8342_v0 = vpop.f32.mrf.mxu0 }
 0x360   : > { %v8343_v55 = vadd.f32 %v8342_v0, %v8292_v14 }
 0x361   : > { %v8393_v1 = vpop.f32.mrf.mxu1  ;;  %v8344_v31 = vpop.f32.mrf.mxu0 }
 0x362   : > { %v8394_v35 = vadd.f32 %v8393_v1, %v8343_v55  ;;  %v8345_v37 = vadd.f32 %v8344_v31, %v8294_v16 }
 0x363   : > { %v8395_v42 = vpop.f32.mrf.mxu1  ;;  %v8346_v4 = vpop.f32.mrf.mxu0 }
 0x364   : > { %v8396_v10 = vadd.f32 %v8395_v42, %v8345_v37  ;;  %v8347_v52 = vadd.f32 %v8346_v4, %v8296_v23 }
 0x365   : > { %v8397_v18 = vpop.f32.mrf.mxu1  ;;  %v8348_v40 = vpop.f32.mrf.mxu0 }
 0x366   : > { %v8398_v53 = vadd.f32 %v8397_v18, %v8347_v52  ;;  %v8349_v45 = vadd.f32 %v8348_v40, %v8298_v7 }
 0x367   : > { %v8399_v44 = vpop.f32.mrf.mxu1  ;;  %v8352_v46 = vpop.f32.mrf.mxu0 }
 0x368   : > { %v8400_v41 = vadd.f32 %v8399_v44, %v8349_v45  ;;  %v8353_v43 = vadd.f32 %v8352_v46, %v8302_v34 }
 0x369   : > { %v8403_v38 = vpop.f32.mrf.mxu1  ;;  %v8354_v49 = vpop.f32.mrf.mxu0 }
 0x36a   : > { %v8355_v8 = vadd.f32 %v8354_v49, %v8304_v48  ;;  %v8404_v20 = vadd.f32 %v8403_v38, %v8353_v43 }
 0x36b   : > { %v8405_v50 = vpop.f32.mrf.mxu1  ;;  %v8356_v25 = vpop.f32.mrf.mxu0 }
 0x36c   : > { %v8406_v59 = vadd.f32 %v8405_v50, %v8355_v8 }
 0x36d   : > { %v8407_v58 = vpop.f32.mrf.mxu1  ;;  %v8357_v2 = vpop.f32.mrf.mxu0 }
 0x36f   : > { %v8408_v60 = vpop.f32.mrf.mxu1 }
 0x39f   : > { %v8444_v61 = vpop.f32.mrf.mxu0 }
 0x3a0   : > { %v8445_v63 = vadd.f32 %v8444_v61, %v8394_v35 }
 0x3a1   : > { %v8495_v62 = vpop.f32.mrf.mxu1  ;;  %v8446_v9 = vpop.f32.mrf.mxu0 }
 0x3a2   : > { %v8496_v19 = vadd.f32 %v8495_v62, %v8445_v63  ;;  %v8447_v30 = vadd.f32 %v8446_v9, %v8396_v10 }
 0x3a3   : > { %v8497_v22 = vpop.f32.mrf.mxu1  ;;  %v8448_v56 = vpop.f32.mrf.mxu0 }
 0x3a4   : > { %v8449_v24 = vadd.f32 %v8448_v56, %v8398_v53  ;;  %v8498_v26 = vadd.f32 %v8497_v22, %v8447_v30 }
 0x3a5   : > { %v8499_v57 = vpop.f32.mrf.mxu1  ;;  %v8450_v13 = vpop.f32.mrf.mxu0 }
 0x3a6   : > { %v8500_v14 = vadd.f32 %v8499_v57, %v8449_v24  ;;  %v8451_v33 = vadd.f32 %v8450_v13, %v8400_v41 }
 0x3a7   : > { %v8501_v6 = vpop.f32.mrf.mxu1  ;;  %v8454_v47 = vpop.f32.mrf.mxu0 }
 0x3a8   : > { %v8455_v15 = vadd.f32 %v8454_v47, %v8404_v20  ;;  %v8502_v5 = vadd.f32 %v8501_v6, %v8451_v33 }
 0x3a9   : > { %v8505_v11 = vpop.f32.mrf.mxu1  ;;  %v8456_v54 = vpop.f32.mrf.mxu0 }
 0x3aa   : > { %v8506_v16 = vadd.f32 %v8505_v11, %v8455_v15  ;;  %v8457_v36 = vadd.f32 %v8456_v54, %v8406_v59 }
 0x3ab   : > { %v8507_v51 = vpop.f32.mrf.mxu1  ;;  %v8458_v17 = vpop.f32.mrf.mxu0 }
 0x3ac   : > { %v8508_v18 = vadd.f32 %v8507_v51, %v8457_v36 }
 0x3ad   : > { %v8509_v21 = vpop.f32.mrf.mxu1  ;;  %v8459_v32 = vpop.f32.mrf.mxu0 }
 0x3af   : > { %v8510_v23 = vpop.f32.mrf.mxu1 }
 0x3df   : > { %v8546_v3 = vpop.f32.mrf.mxu0 }
 0x3e0   : > { %v8547_v39 = vadd.f32 %v8546_v3, %v8496_v19 }
 0x3e1   : > { %v8597_v7 = vpop.f32.mrf.mxu1  ;;  %v8548_v12 = vpop.f32.mrf.mxu0 }
 0x3e2   : > { %v8549_v34 = vadd.f32 %v8548_v12, %v8498_v26  ;;  %v8598_v29 = vadd.f32 %v8597_v7, %v8547_v39 }
 0x3e3   : > { %v8599_v27 = vpop.f32.mrf.mxu1  ;;  %v8550_v28 = vpop.f32.mrf.mxu0 }
 0x3e4   : > { %v8600_v0 = vadd.f32 %v8599_v27, %v8549_v34  ;;  %v8551_v1 = vadd.f32 %v8550_v28, %v8500_v14 }
 0x3e5   : > { %v8601_v48 = vpop.f32.mrf.mxu1  ;;  %v8552_v55 = vpop.f32.mrf.mxu0 }
 0x3e6   : > { %v9387_v42 = vpack.c.bf16 %v8600_v0, %v8598_v29  ;;  %v8553_v35 = vadd.f32 %v8552_v55, %v8502_v5  ;;  %v8602_v10 = vadd.f32 %v8601_v48, %v8551_v1 }
 0x3e7   : > { %v8603_v31 = vpop.f32.mrf.mxu1  ;;  %v8556_v37 = vpop.f32.mrf.mxu0 }
 0x3e8   : > { %8634 = vst [vmem:[%s4378_s29] sm:$0xff] %v9387_v42  ;;  %v8604_v52 = vadd.f32 %v8603_v31, %v8553_v35  ;;  %v8557_v40 = vadd.f32 %v8556_v37, %v8506_v16 }
 0x3e9   : > { %v8607_v4 = vpop.f32.mrf.mxu1  ;;  %v8558_v44 = vpop.f32.mrf.mxu0 }
 0x3ea   : > { %v9388_v45 = vpack.c.bf16 %v8604_v52, %v8602_v10  ;;  %v8559_v46 = vadd.f32 %v8558_v44, %v8508_v18  ;;  %v8608_v43 = vadd.f32 %v8607_v4, %v8557_v40 }
 0x3eb   : > { %v8609_v53 = vpop.f32.mrf.mxu1  ;;  %v8560_v38 = vpop.f32.mrf.mxu0 }
 0x3ec   : > { %8635 = vst [vmem:[%s4378_s29 + $0x8] sm:$0xff] %v9388_v45  ;;  %v8610_v49 = vadd.f32 %v8609_v53, %v8559_v46  ;;  %8643 = sbr.rel (!%p10327_p6) target bundleno = 1017 (0x3f9), region = 88 }
 0x3ed   : > { %v8611_v41 = vpop.f32.mrf.mxu1  ;;  %v8561_v50 = vpop.f32.mrf.mxu0 }
 0x3ee   : > { %v9389_v20 = vpack.c.bf16 %v8610_v49, %v8608_v43 }
 0x3ef   : > { %v8612_v8 = vpop.f32.mrf.mxu1  ;;  %v8682_v25 = vld [vmem:[%s4378_s29] sm:$0xff] (%p10327_p6) }
 0x3f0   : > { %8636 = vst [vmem:[%s4378_s29 + $0x10] sm:$0xff] %v9389_v20  ;;  %8683 = vst [vmem:[%s8649_s5] sm:$0xff] (%p10327_p6), %v8682_v25 }
 0x3f3   : > { %v8684_v58 = vld [vmem:[%s4378_s29 + $0x8] sm:$0xff] }
 0x3f4   : > { %8685 = vst [vmem:[%s8649_s5 + $0x10] sm:$0xff] %v8684_v58 }
 0x3f7   : > { %v8686_v59 = vld [vmem:[%s4378_s29 + $0x10] sm:$0xff] }
 0x3f8   : > { %8687 = vst [vmem:[%s8649_s5 + $0x20] sm:$0xff] %v8686_v59 }
 0x3f9 PF: > { %s13_s16 = sadd.s32 1, %s10270_s16   ;;  %s12269_s12 = smov %s10258_s13 }
 0x3fa   : > { %p10_p12 = scmp.ge.s32.totalorder %s13_s16, 4   ;;  %s12270_s13 = smov %s10332_s22 }
 0x3fb   : > { %s12271_s14 = smov %s10266_s15  ;;  %s12272_s15 = smov %s12274_s17 }
 0x3fc   :  { %12 = sbr.rel (!%p10_p12) target bundleno = 3 (0x3), region = 169 }

// kernel: discriminator_forward.15
= control target key start
LH: loop header
LB: loop body
LE: loop exit
PB: predicated region body
PF: predicated region fallthrough
CT: control target
= control target key end

     0   :  { %s9201_s1 = inlined_call_operand.vmem [shape: bf16[8192,128], index: 1, kind: input, shape index: {}]   ;;  %s9202_s0 = inlined_call_operand.vmem [shape: bf16[8,8192], index: 0, kind: input, shape index: {}]   ;;  %s9203_s2 = inlined_call_operand.vmem [shape: f32[1,128], index: 2, kind: input, shape index: {}]   ;;  %s9204_s3 = inlined_call_operand.vmem [shape: f32[8,128], index: 3, kind: output, shape index: {}]  }
   0x1   :  { %v6940_v0 = vld [vmem:[%s9201_s1 + $0x78] sm:$0xff]   ;;  %v6944_v4 = vld [vmem:[%s9201_s1 + $0x70] sm:$0xff]   ;;  %v6948_v8 = vld [vmem:[%s9201_s1 + $0x68] sm:$0xff]  }
   0x2   :  { %v6941_v1 = vld [vmem:[%s9201_s1 + $0xf8] sm:$0xff]   ;;  %6236 = vmatprep.subr.bf16.mxu0 %v6940_v0  ;;  %v6945_v5 = vld [vmem:[%s9201_s1 + $0xf0] sm:$0xff]   ;;  %v6949_v9 = vld [vmem:[%s9201_s1 + $0xe8] sm:$0xff]  }
   0x3   :  { %v6942_v2 = vld [vmem:[%s9201_s1 + $0x38] sm:$0xff]   ;;  %6258 = vmatprep.subr.bf16.mxu1 %v6941_v1  ;;  %v6946_v6 = vld [vmem:[%s9201_s1 + $0x30] sm:$0xff]   ;;  %v6950_v10 = vld [vmem:[%s9201_s1 + $0x28] sm:$0xff]  }
   0x4   :  { %v6943_v3 = vld [vmem:[%s9201_s1 + $0xb8] sm:$0xff]   ;;  %6237 = vmatpush3.bf16.msra.mxu0 %v6942_v2  ;;  %v6947_v7 = vld [vmem:[%s9201_s1 + $0xb0] sm:$0xff]   ;;  %v6951_v11 = vld [vmem:[%s9201_s1 + $0xa8] sm:$0xff]  }
   0x5   :  { %6259 = vmatpush3.bf16.msra.mxu1 %v6943_v3  ;;  %6238 = vmatprep.subr.bf16.mxu0 %v6944_v4  ;;  %v6952_v12 = vld [vmem:[%s9201_s1 + $0x60] sm:$0xff]   ;;  %v6956_v16 = vld [vmem:[%s9201_s1 + $0x58] sm:$0xff]   ;;  %v6960_v20 = vld [vmem:[%s9201_s1 + $0x50] sm:$0xff]  }
   0x6   :  { %6260 = vmatprep.subr.bf16.mxu1 %v6945_v5  ;;  %v6953_v13 = vld [vmem:[%s9201_s1 + $0xe0] sm:$0xff]   ;;  %v6957_v17 = vld [vmem:[%s9201_s1 + $0xd8] sm:$0xff]   ;;  %v6961_v21 = vld [vmem:[%s9201_s1 + $0xd0] sm:$0xff]  }
   0x7   :  { %v6954_v14 = vld [vmem:[%s9201_s1 + $0x20] sm:$0xff]   ;;  %v6958_v18 = vld [vmem:[%s9201_s1 + $0x18] sm:$0xff]   ;;  %v6962_v22 = vld [vmem:[%s9201_s1 + $0x10] sm:$0xff]  }
   0x8   :  { %6239 = vmatpush3.bf16.msra.mxu0 %v6946_v6  ;;  %v6955_v15 = vld [vmem:[%s9201_s1 + $0xa0] sm:$0xff]   ;;  %v6959_v19 = vld [vmem:[%s9201_s1 + $0x98] sm:$0xff]   ;;  %v6963_v23 = vld [vmem:[%s9201_s1 + $0x90] sm:$0xff]  }
   0x9   :  { %6261 = vmatpush3.bf16.msra.mxu1 %v6947_v7  ;;  %6240 = vmatprep.subr.bf16.mxu0 %v6948_v8  ;;  %v6964_v24 = vld [vmem:[%s9201_s1 + $0x48] sm:$0xff]   ;;  %v6968_v28 = vld [vmem:[%s9201_s1 + $0x40] sm:$0xff]   ;;  %v6976_v38 = vld [vmem:[%s9201_s1 + $0x178] sm:$0xff]  }
   0xa   :  { %6262 = vmatprep.subr.bf16.mxu1 %v6949_v9  ;;  %v6965_v25 = vld [vmem:[%s9201_s1 + $0xc8] sm:$0xff]   ;;  %v6969_v29 = vld [vmem:[%s9201_s1 + $0xc0] sm:$0xff]   ;;  %v6977_v39 = vld [vmem:[%s9201_s1 + $0x1f8] sm:$0xff]  }
   0xb   :  { %v6966_v26 = vld [vmem:[%s9201_s1 + $0x8] sm:$0xff]   ;;  %v6970_v30 = vld [vmem:[%s9201_s1] sm:$0xff]   ;;  %v6978_v40 = vld [vmem:[%s9201_s1 + $0x138] sm:$0xff]  }
   0xc   :  { %6241 = vmatpush3.bf16.msra.mxu0 %v6950_v10  ;;  %v6967_v27 = vld [vmem:[%s9201_s1 + $0x88] sm:$0xff]   ;;  %v6971_v31 = vld [vmem:[%s9201_s1 + $0x80] sm:$0xff]   ;;  %v6979_v41 = vld [vmem:[%s9201_s1 + $0x1b8] sm:$0xff]  }
   0xd   :  { %6263 = vmatpush3.bf16.msra.mxu1 %v6951_v11  ;;  %6242 = vmatprep.subr.bf16.mxu0 %v6952_v12  ;;  %v15_v32 = vld [vmem:[%s9202_s0] sm:$0xff]  ;;  %v16_v33 = vld [vmem:[%s9202_s0 + $0x8] sm:$0xff]  ;;  %v6980_v42 = vld [vmem:[%s9201_s1 + $0x170] sm:$0xff]  }
   0xe   :  { %6264 = vmatprep.subr.bf16.mxu1 %v6953_v13  ;;  %v5660_v34 = vcombine.low %v15_v32, %v15_v32  ;;  %v5661_v35 = vcombine.high %v15_v32, %v15_v32  ;;  %v5662_v36 = vcombine.low %v16_v33, %v16_v33  ;;  %v5663_v37 = vcombine.high %v16_v33, %v16_v33  ;;  %v6981_v43 = vld [vmem:[%s9201_s1 + $0x1f0] sm:$0xff]   ;;  %v6984_v46 = vld [vmem:[%s9201_s1 + $0x168] sm:$0xff]   ;;  %v6988_v50 = vld [vmem:[%s9201_s1 + $0x160] sm:$0xff]  }
   0xf   :  { %v6982_v44 = vld [vmem:[%s9201_s1 + $0x130] sm:$0xff]   ;;  %v6985_v47 = vld [vmem:[%s9201_s1 + $0x1e8] sm:$0xff]   ;;  %v6989_v51 = vld [vmem:[%s9201_s1 + $0x1e0] sm:$0xff]  }
  0x10   :  { %6243 = vmatpush3.bf16.msra.mxu0 %v6954_v14  ;;  %4406 = vmatprep.mubr.bf16.mxu0 %v5661_v35  ;;  %v6983_v45 = vld [vmem:[%s9201_s1 + $0x1b0] sm:$0xff]   ;;  %v6986_v48 = vld [vmem:[%s9201_s1 + $0x128] sm:$0xff]   ;;  %v6990_v52 = vld [vmem:[%s9201_s1 + $0x120] sm:$0xff]  }
  0x11   :  { %6265 = vmatpush3.bf16.msra.mxu1 %v6955_v15  ;;  %6244 = vmatprep.subr.bf16.mxu0 %v6956_v16  ;;  %v6987_v49 = vld [vmem:[%s9201_s1 + $0x1a8] sm:$0xff]   ;;  %v6991_v53 = vld [vmem:[%s9201_s1 + $0x1a0] sm:$0xff]   ;;  %v6992_v54 = vld [vmem:[%s9201_s1 + $0x158] sm:$0xff]  }
  0x12   :  { %6266 = vmatprep.subr.bf16.mxu1 %v6957_v17  ;;  %4446 = vmatprep.mubr.bf16.mxu1 %v5663_v37  ;;  %v6993_v55 = vld [vmem:[%s9201_s1 + $0x1d8] sm:$0xff]   ;;  %v6996_v58 = vld [vmem:[%s9201_s1 + $0x150] sm:$0xff]   ;;  %v7000_v62 = vld [vmem:[%s9201_s1 + $0x148] sm:$0xff]  }
  0x13   :  { %v6994_v56 = vld [vmem:[%s9201_s1 + $0x118] sm:$0xff]   ;;  %v6997_v59 = vld [vmem:[%s9201_s1 + $0x1d0] sm:$0xff]   ;;  %v7001_v63 = vld [vmem:[%s9201_s1 + $0x1c8] sm:$0xff]  }
  0x14   :  { %6245 = vmatpush3.bf16.msra.mxu0 %v6958_v18  ;;  %v6995_v57 = vld [vmem:[%s9201_s1 + $0x198] sm:$0xff]   ;;  %v6998_v60 = vld [vmem:[%s9201_s1 + $0x110] sm:$0xff]   ;;  %v7002_v0 = vld [vmem:[%s9201_s1 + $0x108] sm:$0xff]  }
  0x15   :  { %6267 = vmatpush3.bf16.msra.mxu1 %v6959_v19  ;;  %6246 = vmatprep.subr.bf16.mxu0 %v6960_v20  ;;  %v6999_v61 = vld [vmem:[%s9201_s1 + $0x190] sm:$0xff]   ;;  %v7003_v1 = vld [vmem:[%s9201_s1 + $0x188] sm:$0xff]   ;;  %v7004_v2 = vld [vmem:[%s9201_s1 + $0x140] sm:$0xff]  }
  0x16   :  { %6268 = vmatprep.subr.bf16.mxu1 %v6961_v21  ;;  %v7005_v3 = vld [vmem:[%s9201_s1 + $0x1c0] sm:$0xff]   ;;  %v17_v6 = vld [vmem:[%s9202_s0 + $0x10] sm:$0xff]  ;;  %v18_v9 = vld [vmem:[%s9202_s0 + $0x18] sm:$0xff] }
  0x17   :  { %v7006_v4 = vld [vmem:[%s9201_s1 + $0x100] sm:$0xff]   ;;  %v5664_v7 = vcombine.low %v17_v6, %v17_v6  ;;  %v5665_v8 = vcombine.high %v17_v6, %v17_v6  ;;  %v5666_v10 = vcombine.low %v18_v9, %v18_v9  ;;  %v5667_v11 = vcombine.high %v18_v9, %v18_v9  ;;  %v7012_v12 = vld [vmem:[%s9201_s1 + $0x278] sm:$0xff]   ;;  %v7016_v16 = vld [vmem:[%s9201_s1 + $0x270] sm:$0xff]  }
  0x18   :  { %6247 = vmatpush3.bf16.msra.mxu0 %v6962_v22  ;;  %v7007_v5 = vld [vmem:[%s9201_s1 + $0x180] sm:$0xff]   ;;  %v7013_v13 = vld [vmem:[%s9201_s1 + $0x2f8] sm:$0xff]   ;;  %v7017_v17 = vld [vmem:[%s9201_s1 + $0x2f0] sm:$0xff]  }
  0x19   :  { %6269 = vmatpush3.bf16.msra.mxu1 %v6963_v23  ;;  %6248 = vmatprep.subr.bf16.mxu0 %v6964_v24  ;;  %v7014_v14 = vld [vmem:[%s9201_s1 + $0x238] sm:$0xff]   ;;  %v7018_v18 = vld [vmem:[%s9201_s1 + $0x230] sm:$0xff]   ;;  %v7020_v20 = vld [vmem:[%s9201_s1 + $0x268] sm:$0xff]  }
  0x1a   :  { %6270 = vmatprep.subr.bf16.mxu1 %v6965_v25  ;;  %v7015_v15 = vld [vmem:[%s9201_s1 + $0x2b8] sm:$0xff]   ;;  %v7019_v19 = vld [vmem:[%s9201_s1 + $0x2b0] sm:$0xff]   ;;  %v7021_v21 = vld [vmem:[%s9201_s1 + $0x2e8] sm:$0xff]  }
  0x1b   :  { %v7022_v22 = vld [vmem:[%s9201_s1 + $0x228] sm:$0xff]   ;;  %v7024_v24 = vld [vmem:[%s9201_s1 + $0x260] sm:$0xff]   ;;  %v7032_v32 = vld [vmem:[%s9201_s1 + $0x250] sm:$0xff]  }
  0x1c   :  { %6249 = vmatpush3.bf16.msra.mxu0 %v6966_v26  ;;  %v7023_v23 = vld [vmem:[%s9201_s1 + $0x2a8] sm:$0xff]   ;;  %v7025_v25 = vld [vmem:[%s9201_s1 + $0x2e0] sm:$0xff]   ;;  %v7033_v33 = vld [vmem:[%s9201_s1 + $0x2d0] sm:$0xff]  }
  0x1d   :  { %6271 = vmatpush3.bf16.msra.mxu1 %v6967_v27  ;;  %6250 = vmatprep.subr.bf16.mxu0 %v6968_v28  ;;  %v7026_v26 = vld [vmem:[%s9201_s1 + $0x220] sm:$0xff]   ;;  %v7028_v28 = vld [vmem:[%s9201_s1 + $0x258] sm:$0xff]   ;;  %v7035_v35 = vld [vmem:[%s9201_s1 + $0x290] sm:$0xff]  }
  0x1e   :  { %6272 = vmatprep.subr.bf16.mxu1 %v6969_v29  ;;  %v7027_v27 = vld [vmem:[%s9201_s1 + $0x2a0] sm:$0xff]   ;;  %v7029_v29 = vld [vmem:[%s9201_s1 + $0x2d8] sm:$0xff]   ;;  %v7037_v37 = vld [vmem:[%s9201_s1 + $0x2c8] sm:$0xff]  }
  0x1f   :  { %v7068_v6 = vld [vmem:[%s9201_s1 + $0x350] sm:$0xff]  }
  0x20   :  { %6251 = vmatpush3.bf16.msra.mxu0 %v6970_v30  ;;  %v7030_v30 = vld [vmem:[%s9201_s1 + $0x218] sm:$0xff]   ;;  %v7071_v9 = vld [vmem:[%s9201_s1 + $0x390] sm:$0xff]  }
  0x21   :  { %6273 = vmatpush3.bf16.msra.mxu1 %v6971_v31  ;;  %6280 = vmatprep.subr.bf16.mxu0 %v6976_v38  ;;  %v7031_v31 = vld [vmem:[%s9201_s1 + $0x298] sm:$0xff]   ;;  %v7038_v38 = vld [vmem:[%s9201_s1 + $0x208] sm:$0xff]  }
  0x22   :  { %6302 = vmatprep.subr.bf16.mxu1 %v6977_v39  ;;  %v7039_v39 = vld [vmem:[%s9201_s1 + $0x288] sm:$0xff]  }
  0x23   :  { %4407 = vmatmul.mubr.bf16.vlgmr.msra.gmra.mxu0 %v5660_v34  ;;  %v7034_v34 = vld [vmem:[%s9201_s1 + $0x210] sm:$0xff]  }
  0x24   :  { %4447 = vmatmul.mubr.bf16.vlgmr.msra.gmra.mxu1 %v5662_v36  ;;  %6281 = vmatpush3.bf16.msra.mxu0 %v6978_v40  ;;  %v7036_v36 = vld [vmem:[%s9201_s1 + $0x248] sm:$0xff]   ;;  %v7040_v40 = vld [vmem:[%s9201_s1 + $0x240] sm:$0xff]  }
  0x25   :  { %6303 = vmatpush3.bf16.msra.mxu1 %v6979_v41  ;;  %6282 = vmatprep.subr.bf16.mxu0 %v6980_v42  ;;  %v7041_v41 = vld [vmem:[%s9201_s1 + $0x2c0] sm:$0xff]  }
  0x26   :  { %6304 = vmatprep.subr.bf16.mxu1 %v6981_v43  ;;  %4486 = vmatprep.mubr.bf16.mxu0 %v5665_v8  ;;  %v7042_v42 = vld [vmem:[%s9201_s1 + $0x200] sm:$0xff]   ;;  %v7070_v8 = vld [vmem:[%s9201_s1 + $0x310] sm:$0xff]  }
  0x27   :  { %4526 = vmatprep.mubr.bf16.mxu1 %v5667_v11  ;;  %v7043_v43 = vld [vmem:[%s9201_s1 + $0x280] sm:$0xff]   ;;  %v7073_v11 = vld [vmem:[%s9201_s1 + $0x3c8] sm:$0xff]  }
  0x28   :  { %6283 = vmatpush3.bf16.msra.mxu0 %v6982_v44  ;;  %v19_v44 = vld [vmem:[%s9202_s0 + $0x20] sm:$0xff] }
  0x29   :  { %6305 = vmatpush3.bf16.msra.mxu1 %v6983_v45  ;;  %6284 = vmatprep.subr.bf16.mxu0 %v6984_v46  ;;  %v20_v45 = vld [vmem:[%s9202_s0 + $0x28] sm:$0xff]  ;;  %v5668_v46 = vcombine.low %v19_v44, %v19_v44 }
  0x2a   :  { %6306 = vmatprep.subr.bf16.mxu1 %v6985_v47  ;;  %v5669_v47 = vcombine.high %v19_v44, %v19_v44  ;;  %v7104_v44 = vld [vmem:[%s9201_s1 + $0x450] sm:$0xff]  }
  0x2c   :  { %6285 = vmatpush3.bf16.msra.mxu0 %v6986_v48  ;;  %v5670_v48 = vcombine.low %v20_v45, %v20_v45 }
  0x2d   :  { %6307 = vmatpush3.bf16.msra.mxu1 %v6987_v49  ;;  %6286 = vmatprep.subr.bf16.mxu0 %v6988_v50  ;;  %v5671_v49 = vcombine.high %v20_v45, %v20_v45  ;;  %v7048_v50 = vld [vmem:[%s9201_s1 + $0x378] sm:$0xff]   ;;  %v7105_v45 = vld [vmem:[%s9201_s1 + $0x4d0] sm:$0xff]  }
  0x2e   :  { %6308 = vmatprep.subr.bf16.mxu1 %v6989_v51  ;;  %v7049_v51 = vld [vmem:[%s9201_s1 + $0x3f8] sm:$0xff]  }
  0x30   :  { %6287 = vmatpush3.bf16.msra.mxu0 %v6990_v52  ;;  %v7050_v52 = vld [vmem:[%s9201_s1 + $0x338] sm:$0xff]  }
  0x31   :  { %6309 = vmatpush3.bf16.msra.mxu1 %v6991_v53  ;;  %6288 = vmatprep.subr.bf16.mxu0 %v6992_v54  ;;  %v7051_v53 = vld [vmem:[%s9201_s1 + $0x3b8] sm:$0xff]   ;;  %v7052_v54 = vld [vmem:[%s9201_s1 + $0x370] sm:$0xff]  }
  0x32   :  { %6310 = vmatprep.subr.bf16.mxu1 %v6993_v55  ;;  %v7053_v55 = vld [vmem:[%s9201_s1 + $0x3f0] sm:$0xff]  }
  0x34   :  { %6289 = vmatpush3.bf16.msra.mxu0 %v6994_v56  ;;  %v7054_v56 = vld [vmem:[%s9201_s1 + $0x330] sm:$0xff]  }
  0x35   :  { %6311 = vmatpush3.bf16.msra.mxu1 %v6995_v57  ;;  %6290 = vmatprep.subr.bf16.mxu0 %v6996_v58  ;;  %v7055_v57 = vld [vmem:[%s9201_s1 + $0x3b0] sm:$0xff]   ;;  %v7056_v58 = vld [vmem:[%s9201_s1 + $0x368] sm:$0xff]  }
  0x36   :  { %6312 = vmatprep.subr.bf16.mxu1 %v6997_v59  ;;  %v7057_v59 = vld [vmem:[%s9201_s1 + $0x3e8] sm:$0xff]  }
  0x38   :  { %6291 = vmatpush3.bf16.msra.mxu0 %v6998_v60  ;;  %v7058_v60 = vld [vmem:[%s9201_s1 + $0x328] sm:$0xff]  }
  0x39   :  { %6313 = vmatpush3.bf16.msra.mxu1 %v6999_v61  ;;  %6292 = vmatprep.subr.bf16.mxu0 %v7000_v62  ;;  %v7059_v61 = vld [vmem:[%s9201_s1 + $0x3a8] sm:$0xff]   ;;  %v7060_v62 = vld [vmem:[%s9201_s1 + $0x360] sm:$0xff]  }
  0x3a   :  { %6314 = vmatprep.subr.bf16.mxu1 %v7001_v63  ;;  %v7061_v63 = vld [vmem:[%s9201_s1 + $0x3e0] sm:$0xff]  }
  0x3c   :  { %6293 = vmatpush3.bf16.msra.mxu0 %v7002_v0  ;;  %v7062_v0 = vld [vmem:[%s9201_s1 + $0x320] sm:$0xff]  }
  0x3d   :  { %6315 = vmatpush3.bf16.msra.mxu1 %v7003_v1  ;;  %6294 = vmatprep.subr.bf16.mxu0 %v7004_v2  ;;  %v7063_v1 = vld [vmem:[%s9201_s1 + $0x3a0] sm:$0xff]   ;;  %v7064_v2 = vld [vmem:[%s9201_s1 + $0x358] sm:$0xff]  }
  0x3e   :  { %6316 = vmatprep.subr.bf16.mxu1 %v7005_v3  ;;  %v7065_v3 = vld [vmem:[%s9201_s1 + $0x3d8] sm:$0xff]  }
  0x40   :  { %6295 = vmatpush3.bf16.msra.mxu0 %v7006_v4  ;;  %v7066_v4 = vld [vmem:[%s9201_s1 + $0x318] sm:$0xff]  }
  0x41   :  { %6317 = vmatpush3.bf16.msra.mxu1 %v7007_v5  ;;  %6324 = vmatprep.subr.bf16.mxu0 %v7012_v12  ;;  %v7067_v5 = vld [vmem:[%s9201_s1 + $0x398] sm:$0xff]   ;;  %v7074_v12 = vld [vmem:[%s9201_s1 + $0x308] sm:$0xff]  }
  0x42   :  { %6346 = vmatprep.subr.bf16.mxu1 %v7013_v13  ;;  %v7075_v13 = vld [vmem:[%s9201_s1 + $0x388] sm:$0xff]  }
  0x43   :  { %4487 = vmatmul.mubr.bf16.vlgmr.msra.gmra.mxu0 %v5664_v7  ;;  %v7069_v7 = vld [vmem:[%s9201_s1 + $0x3d0] sm:$0xff]  }
  0x44   :  { %4527 = vmatmul.mubr.bf16.vlgmr.msra.gmra.mxu1 %v5666_v10  ;;  %6325 = vmatpush3.bf16.msra.mxu0 %v7014_v14  ;;  %v7072_v10 = vld [vmem:[%s9201_s1 + $0x348] sm:$0xff]   ;;  %v7076_v14 = vld [vmem:[%s9201_s1 + $0x340] sm:$0xff]  }
  0x45   :  { %6347 = vmatpush3.bf16.msra.mxu1 %v7015_v15  ;;  %6326 = vmatprep.subr.bf16.mxu0 %v7016_v16  ;;  %v7077_v15 = vld [vmem:[%s9201_s1 + $0x3c0] sm:$0xff]  }
  0x46   :  { %6348 = vmatprep.subr.bf16.mxu1 %v7017_v17  ;;  %4566 = vmatprep.mubr.bf16.mxu0 %v5669_v47  ;;  %v7078_v16 = vld [vmem:[%s9201_s1 + $0x300] sm:$0xff]   ;;  %v7107_v47 = vld [vmem:[%s9201_s1 + $0x490] sm:$0xff]  }
  0x47   :  { %4606 = vmatprep.mubr.bf16.mxu1 %v5671_v49  ;;  %v7079_v17 = vld [vmem:[%s9201_s1 + $0x380] sm:$0xff]   ;;  %v7109_v49 = vld [vmem:[%s9201_s1 + $0x4c8] sm:$0xff]  }
  0x48   :  { %6327 = vmatpush3.bf16.msra.mxu0 %v7018_v18  ;;  %v21_v18 = vld [vmem:[%s9202_s0 + $0x30] sm:$0xff] }
  0x49   :  { %6349 = vmatpush3.bf16.msra.mxu1 %v7019_v19  ;;  %6328 = vmatprep.subr.bf16.mxu0 %v7020_v20  ;;  %v22_v19 = vld [vmem:[%s9202_s0 + $0x38] sm:$0xff]  ;;  %v5672_v20 = vcombine.low %v21_v18, %v21_v18 }
  0x4a   :  { %6350 = vmatprep.subr.bf16.mxu1 %v7021_v21  ;;  %v5673_v21 = vcombine.high %v21_v18, %v21_v18  ;;  %v7140_v18 = vld [vmem:[%s9201_s1 + $0x550] sm:$0xff]  }
  0x4c   :  { %6329 = vmatpush3.bf16.msra.mxu0 %v7022_v22  ;;  %v5674_v22 = vcombine.low %v22_v19, %v22_v19 }
  0x4d   :  { %6351 = vmatpush3.bf16.msra.mxu1 %v7023_v23  ;;  %6330 = vmatprep.subr.bf16.mxu0 %v7024_v24  ;;  %v7084_v23 = vld [vmem:[%s9201_s1 + $0x478] sm:$0xff]   ;;  %v5675_v24 = vcombine.high %v22_v19, %v22_v19  ;;  %v7141_v19 = vld [vmem:[%s9201_s1 + $0x5d0] sm:$0xff]  }
  0x4e   :  { %6352 = vmatprep.subr.bf16.mxu1 %v7025_v25  ;;  %v7085_v25 = vld [vmem:[%s9201_s1 + $0x4f8] sm:$0xff]  }
  0x50   :  { %6331 = vmatpush3.bf16.msra.mxu0 %v7026_v26  ;;  %v7086_v26 = vld [vmem:[%s9201_s1 + $0x438] sm:$0xff]  }
  0x51   :  { %6353 = vmatpush3.bf16.msra.mxu1 %v7027_v27  ;;  %6332 = vmatprep.subr.bf16.mxu0 %v7028_v28  ;;  %v7087_v27 = vld [vmem:[%s9201_s1 + $0x4b8] sm:$0xff]   ;;  %v7088_v28 = vld [vmem:[%s9201_s1 + $0x470] sm:$0xff]  }
  0x52   :  { %6354 = vmatprep.subr.bf16.mxu1 %v7029_v29  ;;  %v7089_v29 = vld [vmem:[%s9201_s1 + $0x4f0] sm:$0xff]  }
  0x54   :  { %6333 = vmatpush3.bf16.msra.mxu0 %v7030_v30  ;;  %v7090_v30 = vld [vmem:[%s9201_s1 + $0x430] sm:$0xff]  }
  0x55   :  { %6355 = vmatpush3.bf16.msra.mxu1 %v7031_v31  ;;  %6334 = vmatprep.subr.bf16.mxu0 %v7032_v32  ;;  %v7091_v31 = vld [vmem:[%s9201_s1 + $0x4b0] sm:$0xff]   ;;  %v7092_v32 = vld [vmem:[%s9201_s1 + $0x468] sm:$0xff]  }
  0x56   :  { %6356 = vmatprep.subr.bf16.mxu1 %v7033_v33  ;;  %v7093_v33 = vld [vmem:[%s9201_s1 + $0x4e8] sm:$0xff]  }
  0x58   :  { %6335 = vmatpush3.bf16.msra.mxu0 %v7034_v34  ;;  %v7094_v34 = vld [vmem:[%s9201_s1 + $0x428] sm:$0xff]  }
  0x59   :  { %6357 = vmatpush3.bf16.msra.mxu1 %v7035_v35  ;;  %6336 = vmatprep.subr.bf16.mxu0 %v7036_v36  ;;  %v7095_v35 = vld [vmem:[%s9201_s1 + $0x4a8] sm:$0xff]   ;;  %v7096_v36 = vld [vmem:[%s9201_s1 + $0x460] sm:$0xff]  }
  0x5a   :  { %6358 = vmatprep.subr.bf16.mxu1 %v7037_v37  ;;  %v7097_v37 = vld [vmem:[%s9201_s1 + $0x4e0] sm:$0xff]  }
  0x5c   :  { %6337 = vmatpush3.bf16.msra.mxu0 %v7038_v38  ;;  %v7098_v38 = vld [vmem:[%s9201_s1 + $0x420] sm:$0xff]  }
  0x5d   :  { %6359 = vmatpush3.bf16.msra.mxu1 %v7039_v39  ;;  %6338 = vmatprep.subr.bf16.mxu0 %v7040_v40  ;;  %v7099_v39 = vld [vmem:[%s9201_s1 + $0x4a0] sm:$0xff]   ;;  %v7100_v40 = vld [vmem:[%s9201_s1 + $0x458] sm:$0xff]  }
  0x5e   :  { %6360 = vmatprep.subr.bf16.mxu1 %v7041_v41  ;;  %v7101_v41 = vld [vmem:[%s9201_s1 + $0x4d8] sm:$0xff]  }
  0x60   :  { %6339 = vmatpush3.bf16.msra.mxu0 %v7042_v42  ;;  %v7102_v42 = vld [vmem:[%s9201_s1 + $0x418] sm:$0xff]  }
  0x61   :  { %6361 = vmatpush3.bf16.msra.mxu1 %v7043_v43  ;;  %6368 = vmatprep.subr.bf16.mxu0 %v7048_v50  ;;  %v7103_v43 = vld [vmem:[%s9201_s1 + $0x498] sm:$0xff]   ;;  %v7110_v50 = vld [vmem:[%s9201_s1 + $0x408] sm:$0xff]  }
  0x62   :  { %6390 = vmatprep.subr.bf16.mxu1 %v7049_v51  ;;  %v7111_v51 = vld [vmem:[%s9201_s1 + $0x488] sm:$0xff]  }
  0x63   :  { %4567 = vmatmul.mubr.bf16.vlgmr.msra.gmra.mxu0 %v5668_v46  ;;  %v7106_v46 = vld [vmem:[%s9201_s1 + $0x410] sm:$0xff]  }
  0x64   :  { %4607 = vmatmul.mubr.bf16.vlgmr.msra.gmra.mxu1 %v5670_v48  ;;  %6369 = vmatpush3.bf16.msra.mxu0 %v7050_v52  ;;  %v7108_v48 = vld [vmem:[%s9201_s1 + $0x448] sm:$0xff]   ;;  %v7112_v52 = vld [vmem:[%s9201_s1 + $0x440] sm:$0xff]  }
  0x65   :  { %6391 = vmatpush3.bf16.msra.mxu1 %v7051_v53  ;;  %6370 = vmatprep.subr.bf16.mxu0 %v7052_v54  ;;  %v7113_v53 = vld [vmem:[%s9201_s1 + $0x4c0] sm:$0xff]  }
  0x66   :  { %6392 = vmatprep.subr.bf16.mxu1 %v7053_v55  ;;  %4646 = vmatprep.mubr.bf16.mxu0 %v5673_v21  ;;  %v7114_v54 = vld [vmem:[%s9201_s1 + $0x400] sm:$0xff]   ;;  %v7143_v21 = vld [vmem:[%s9201_s1 + $0x590] sm:$0xff]  }
  0x67   :  { %4686 = vmatprep.mubr.bf16.mxu1 %v5675_v24  ;;  %v7115_v55 = vld [vmem:[%s9201_s1 + $0x480] sm:$0xff]   ;;  %v7146_v24 = vld [vmem:[%s9201_s1 + $0x508] sm:$0xff]  }
  0x68   :  { %6371 = vmatpush3.bf16.msra.mxu0 %v7054_v56  ;;  %v23_v56 = vld [vmem:[%s9202_s0 + $0x40] sm:$0xff] }
  0x69   :  { %6393 = vmatpush3.bf16.msra.mxu1 %v7055_v57  ;;  %6372 = vmatprep.subr.bf16.mxu0 %v7056_v58  ;;  %v5676_v57 = vcombine.low %v23_v56, %v23_v56  ;;  %v5677_v58 = vcombine.high %v23_v56, %v23_v56  ;;  %v7176_v56 = vld [vmem:[%s9201_s1 + $0x650] sm:$0xff]  }
  0x6a   :  { %6394 = vmatprep.subr.bf16.mxu1 %v7057_v59  ;;  %v24_v59 = vld [vmem:[%s9202_s0 + $0x48] sm:$0xff] }
  0x6c   :  { %6373 = vmatpush3.bf16.msra.mxu0 %v7058_v60  ;;  %v5678_v60 = vcombine.low %v24_v59, %v24_v59 }
  0x6d   :  { %6395 = vmatpush3.bf16.msra.mxu1 %v7059_v61  ;;  %6374 = vmatprep.subr.bf16.mxu0 %v7060_v62  ;;  %v5679_v61 = vcombine.high %v24_v59, %v24_v59  ;;  %v7120_v62 = vld [vmem:[%s9201_s1 + $0x578] sm:$0xff]   ;;  %v7179_v59 = vld [vmem:[%s9201_s1 + $0x690] sm:$0xff]  }
  0x6e   :  { %6396 = vmatprep.subr.bf16.mxu1 %v7061_v63  ;;  %v7121_v63 = vld [vmem:[%s9201_s1 + $0x5f8] sm:$0xff]  }
  0x70   :  { %6375 = vmatpush3.bf16.msra.mxu0 %v7062_v0  ;;  %v7122_v0 = vld [vmem:[%s9201_s1 + $0x538] sm:$0xff]  }
  0x71   :  { %6397 = vmatpush3.bf16.msra.mxu1 %v7063_v1  ;;  %6376 = vmatprep.subr.bf16.mxu0 %v7064_v2  ;;  %v7123_v1 = vld [vmem:[%s9201_s1 + $0x5b8] sm:$0xff]   ;;  %v7124_v2 = vld [vmem:[%s9201_s1 + $0x570] sm:$0xff]  }
  0x72   :  { %6398 = vmatprep.subr.bf16.mxu1 %v7065_v3  ;;  %v7125_v3 = vld [vmem:[%s9201_s1 + $0x5f0] sm:$0xff]  }
  0x74   :  { %6377 = vmatpush3.bf16.msra.mxu0 %v7066_v4  ;;  %v7126_v4 = vld [vmem:[%s9201_s1 + $0x530] sm:$0xff]  }
  0x75   :  { %6399 = vmatpush3.bf16.msra.mxu1 %v7067_v5  ;;  %6378 = vmatprep.subr.bf16.mxu0 %v7068_v6  ;;  %v7127_v5 = vld [vmem:[%s9201_s1 + $0x5b0] sm:$0xff]   ;;  %v7128_v6 = vld [vmem:[%s9201_s1 + $0x568] sm:$0xff]  }
  0x76   :  { %6400 = vmatprep.subr.bf16.mxu1 %v7069_v7  ;;  %v7129_v7 = vld [vmem:[%s9201_s1 + $0x5e8] sm:$0xff]  }
  0x78   :  { %6379 = vmatpush3.bf16.msra.mxu0 %v7070_v8  ;;  %v7130_v8 = vld [vmem:[%s9201_s1 + $0x528] sm:$0xff]  }
  0x79   :  { %6401 = vmatpush3.bf16.msra.mxu1 %v7071_v9  ;;  %6380 = vmatprep.subr.bf16.mxu0 %v7072_v10  ;;  %v7131_v9 = vld [vmem:[%s9201_s1 + $0x5a8] sm:$0xff]   ;;  %v7132_v10 = vld [vmem:[%s9201_s1 + $0x560] sm:$0xff]  }
  0x7a   :  { %6402 = vmatprep.subr.bf16.mxu1 %v7073_v11  ;;  %v7133_v11 = vld [vmem:[%s9201_s1 + $0x5e0] sm:$0xff]  }
  0x7c   :  { %6381 = vmatpush3.bf16.msra.mxu0 %v7074_v12  ;;  %v7134_v12 = vld [vmem:[%s9201_s1 + $0x520] sm:$0xff]  }
  0x7d   :  { %6403 = vmatpush3.bf16.msra.mxu1 %v7075_v13  ;;  %6382 = vmatprep.subr.bf16.mxu0 %v7076_v14  ;;  %v7135_v13 = vld [vmem:[%s9201_s1 + $0x5a0] sm:$0xff]   ;;  %v7136_v14 = vld [vmem:[%s9201_s1 + $0x558] sm:$0xff]  }
  0x7e   :  { %6404 = vmatprep.subr.bf16.mxu1 %v7077_v15  ;;  %v7137_v15 = vld [vmem:[%s9201_s1 + $0x5d8] sm:$0xff]  }
  0x80   :  { %6383 = vmatpush3.bf16.msra.mxu0 %v7078_v16  ;;  %v7138_v16 = vld [vmem:[%s9201_s1 + $0x518] sm:$0xff]  }
  0x81   :  { %6405 = vmatpush3.bf16.msra.mxu1 %v7079_v17  ;;  %6412 = vmatprep.subr.bf16.mxu0 %v7084_v23  ;;  %v7139_v17 = vld [vmem:[%s9201_s1 + $0x598] sm:$0xff]   ;;  %v7145_v23 = vld [vmem:[%s9201_s1 + $0x5c8] sm:$0xff]  }
  0x82   :  { %6434 = vmatprep.subr.bf16.mxu1 %v7085_v25  ;;  %v7147_v25 = vld [vmem:[%s9201_s1 + $0x588] sm:$0xff]  }
  0x83   :  { %4647 = vmatmul.mubr.bf16.vlgmr.msra.gmra.mxu0 %v5672_v20  ;;  %v7142_v20 = vld [vmem:[%s9201_s1 + $0x510] sm:$0xff]  }
  0x84   :  { %4687 = vmatmul.mubr.bf16.vlgmr.msra.gmra.mxu1 %v5674_v22  ;;  %6413 = vmatpush3.bf16.msra.mxu0 %v7086_v26  ;;  %v7144_v22 = vld [vmem:[%s9201_s1 + $0x548] sm:$0xff]   ;;  %v7148_v26 = vld [vmem:[%s9201_s1 + $0x540] sm:$0xff]  }
  0x85   :  { %6435 = vmatpush3.bf16.msra.mxu1 %v7087_v27  ;;  %6414 = vmatprep.subr.bf16.mxu0 %v7088_v28  ;;  %v7149_v27 = vld [vmem:[%s9201_s1 + $0x5c0] sm:$0xff]  }
  0x86   :  { %6436 = vmatprep.subr.bf16.mxu1 %v7089_v29  ;;  %4726 = vmatprep.mubr.bf16.mxu0 %v5677_v58  ;;  %v7150_v28 = vld [vmem:[%s9201_s1 + $0x500] sm:$0xff]   ;;  %v7178_v58 = vld [vmem:[%s9201_s1 + $0x610] sm:$0xff]  }
  0x87   :  { %4766 = vmatprep.mubr.bf16.mxu1 %v5679_v61  ;;  %v7151_v29 = vld [vmem:[%s9201_s1 + $0x580] sm:$0xff]   ;;  %v7181_v61 = vld [vmem:[%s9201_s1 + $0x6c8] sm:$0xff]  }
  0x88   :  { %6415 = vmatpush3.bf16.msra.mxu0 %v7090_v30  ;;  %v25_v30 = vld [vmem:[%s9202_s0 + $0x50] sm:$0xff] }
  0x89   :  { %6437 = vmatpush3.bf16.msra.mxu1 %v7091_v31  ;;  %6416 = vmatprep.subr.bf16.mxu0 %v7092_v32  ;;  %v26_v31 = vld [vmem:[%s9202_s0 + $0x58] sm:$0xff]  ;;  %v5680_v32 = vcombine.low %v25_v30, %v25_v30 }
  0x8a   :  { %6438 = vmatprep.subr.bf16.mxu1 %v7093_v33  ;;  %v5681_v33 = vcombine.high %v25_v30, %v25_v30  ;;  %v7199_v30 = vld [vmem:[%s9201_s1 + $0x7b0] sm:$0xff]  }
  0x8c   :  { %6417 = vmatpush3.bf16.msra.mxu0 %v7094_v34  ;;  %v5682_v34 = vcombine.low %v26_v31, %v26_v31 }
  0x8d   :  { %6439 = vmatpush3.bf16.msra.mxu1 %v7095_v35  ;;  %6418 = vmatprep.subr.bf16.mxu0 %v7096_v36  ;;  %v5683_v35 = vcombine.high %v26_v31, %v26_v31  ;;  %v7156_v36 = vld [vmem:[%s9201_s1 + $0x678] sm:$0xff]   ;;  %v7200_v31 = vld [vmem:[%s9201_s1 + $0x768] sm:$0xff]  }
  0x8e   :  { %6440 = vmatprep.subr.bf16.mxu1 %v7097_v37  ;;  %v7157_v37 = vld [vmem:[%s9201_s1 + $0x6f8] sm:$0xff]  }
  0x90   :  { %6419 = vmatpush3.bf16.msra.mxu0 %v7098_v38  ;;  %v7158_v38 = vld [vmem:[%s9201_s1 + $0x638] sm:$0xff]  }
  0x91   :  { %6441 = vmatpush3.bf16.msra.mxu1 %v7099_v39  ;;  %6420 = vmatprep.subr.bf16.mxu0 %v7100_v40  ;;  %v7159_v39 = vld [vmem:[%s9201_s1 + $0x6b8] sm:$0xff]   ;;  %v7160_v40 = vld [vmem:[%s9201_s1 + $0x670] sm:$0xff]  }
  0x92   :  { %6442 = vmatprep.subr.bf16.mxu1 %v7101_v41  ;;  %v7161_v41 = vld [vmem:[%s9201_s1 + $0x6f0] sm:$0xff]  }
  0x94   :  { %6421 = vmatpush3.bf16.msra.mxu0 %v7102_v42  ;;  %v7162_v42 = vld [vmem:[%s9201_s1 + $0x630] sm:$0xff]  }
  0x95   :  { %6443 = vmatpush3.bf16.msra.mxu1 %v7103_v43  ;;  %6422 = vmatprep.subr.bf16.mxu0 %v7104_v44  ;;  %v7163_v43 = vld [vmem:[%s9201_s1 + $0x6b0] sm:$0xff]   ;;  %v7164_v44 = vld [vmem:[%s9201_s1 + $0x668] sm:$0xff]  }
  0x96   :  { %6444 = vmatprep.subr.bf16.mxu1 %v7105_v45  ;;  %v7165_v45 = vld [vmem:[%s9201_s1 + $0x6e8] sm:$0xff]  }
  0x98   :  { %6423 = vmatpush3.bf16.msra.mxu0 %v7106_v46  ;;  %v7166_v46 = vld [vmem:[%s9201_s1 + $0x628] sm:$0xff]  }
  0x99   :  { %6445 = vmatpush3.bf16.msra.mxu1 %v7107_v47  ;;  %6424 = vmatprep.subr.bf16.mxu0 %v7108_v48  ;;  %v7167_v47 = vld [vmem:[%s9201_s1 + $0x6a8] sm:$0xff]   ;;  %v7168_v48 = vld [vmem:[%s9201_s1 + $0x660] sm:$0xff]  }
  0x9a   :  { %6446 = vmatprep.subr.bf16.mxu1 %v7109_v49  ;;  %v7169_v49 = vld [vmem:[%s9201_s1 + $0x6e0] sm:$0xff]  }
  0x9c   :  { %6425 = vmatpush3.bf16.msra.mxu0 %v7110_v50  ;;  %v7170_v50 = vld [vmem:[%s9201_s1 + $0x620] sm:$0xff]  }
  0x9d   :  { %6447 = vmatpush3.bf16.msra.mxu1 %v7111_v51  ;;  %6426 = vmatprep.subr.bf16.mxu0 %v7112_v52  ;;  %v7171_v51 = vld [vmem:[%s9201_s1 + $0x6a0] sm:$0xff]   ;;  %v7172_v52 = vld [vmem:[%s9201_s1 + $0x658] sm:$0xff]  }
  0x9e   :  { %6448 = vmatprep.subr.bf16.mxu1 %v7113_v53  ;;  %v7173_v53 = vld [vmem:[%s9201_s1 + $0x6d8] sm:$0xff]  }
  0xa0   :  { %6427 = vmatpush3.bf16.msra.mxu0 %v7114_v54  ;;  %v7174_v54 = vld [vmem:[%s9201_s1 + $0x618] sm:$0xff]  }
  0xa1   :  { %6449 = vmatpush3.bf16.msra.mxu1 %v7115_v55  ;;  %6456 = vmatprep.subr.bf16.mxu0 %v7120_v62  ;;  %v7175_v55 = vld [vmem:[%s9201_s1 + $0x698] sm:$0xff]   ;;  %v7182_v62 = vld [vmem:[%s9201_s1 + $0x608] sm:$0xff]  }
  0xa2   :  { %6478 = vmatprep.subr.bf16.mxu1 %v7121_v63  ;;  %v7183_v63 = vld [vmem:[%s9201_s1 + $0x688] sm:$0xff]  }
  0xa3   :  { %4727 = vmatmul.mubr.bf16.vlgmr.msra.gmra.mxu0 %v5676_v57  ;;  %v7177_v57 = vld [vmem:[%s9201_s1 + $0x6d0] sm:$0xff]  }
  0xa4   :  { %4767 = vmatmul.mubr.bf16.vlgmr.msra.gmra.mxu1 %v5678_v60  ;;  %6457 = vmatpush3.bf16.msra.mxu0 %v7122_v0  ;;  %v7180_v60 = vld [vmem:[%s9201_s1 + $0x648] sm:$0xff]   ;;  %v7184_v0 = vld [vmem:[%s9201_s1 + $0x640] sm:$0xff]  }
  0xa5   :  { %6479 = vmatpush3.bf16.msra.mxu1 %v7123_v1  ;;  %6458 = vmatprep.subr.bf16.mxu0 %v7124_v2  ;;  %v7185_v1 = vld [vmem:[%s9201_s1 + $0x6c0] sm:$0xff]  }
  0xa6   :  { %6480 = vmatprep.subr.bf16.mxu1 %v7125_v3  ;;  %4806 = vmatprep.mubr.bf16.mxu0 %v5681_v33  ;;  %v7186_v2 = vld [vmem:[%s9201_s1 + $0x600] sm:$0xff]   ;;  %v7202_v33 = vld [vmem:[%s9201_s1 + $0x728] sm:$0xff]  }
  0xa7   :  { %4846 = vmatprep.mubr.bf16.mxu1 %v5683_v35  ;;  %v7187_v3 = vld [vmem:[%s9201_s1 + $0x680] sm:$0xff]  }
  0xa8   :  { %6459 = vmatpush3.bf16.msra.mxu0 %v7126_v4  ;;  %v27_v4 = vld [vmem:[%s9202_s0 + $0x60] sm:$0xff] }
  0xa9   :  { %6481 = vmatpush3.bf16.msra.mxu1 %v7127_v5  ;;  %6460 = vmatprep.subr.bf16.mxu0 %v7128_v6  ;;  %v28_v5 = vld [vmem:[%s9202_s0 + $0x68] sm:$0xff]  ;;  %v7204_v35 = vld [vmem:[%s9201_s1 + $0x760] sm:$0xff]  }
  0xaa   :  { %6482 = vmatprep.subr.bf16.mxu1 %v7129_v7 }
  0xac   :  { %6461 = vmatpush3.bf16.msra.mxu0 %v7130_v8  ;;  %v5684_v8 = vcombine.low %v27_v4, %v27_v4 }
  0xad   :  { %6483 = vmatpush3.bf16.msra.mxu1 %v7131_v9  ;;  %6462 = vmatprep.subr.bf16.mxu0 %v7132_v10  ;;  %v5685_v9 = vcombine.high %v27_v4, %v27_v4  ;;  %v5686_v10 = vcombine.low %v28_v5, %v28_v5 }
  0xae   :  { %6484 = vmatprep.subr.bf16.mxu1 %v7133_v11  ;;  %v7192_v11 = vld [vmem:[%s9201_s1 + $0x778] sm:$0xff]  }
  0xb0   :  { %6463 = vmatpush3.bf16.msra.mxu0 %v7134_v12  ;;  %v5687_v12 = vcombine.high %v28_v5, %v28_v5 }
  0xb1   :  { %6485 = vmatpush3.bf16.msra.mxu1 %v7135_v13  ;;  %6464 = vmatprep.subr.bf16.mxu0 %v7136_v14  ;;  %v7193_v13 = vld [vmem:[%s9201_s1 + $0x7f8] sm:$0xff]  }
  0xb2   :  { %6486 = vmatprep.subr.bf16.mxu1 %v7137_v15 }
  0xb4   :  { %6465 = vmatpush3.bf16.msra.mxu0 %v7138_v16  ;;  %v7194_v16 = vld [vmem:[%s9201_s1 + $0x738] sm:$0xff]  }
  0xb5   :  { %6487 = vmatpush3.bf16.msra.mxu1 %v7139_v17  ;;  %6466 = vmatprep.subr.bf16.mxu0 %v7140_v18 }
  0xb6   :  { %6488 = vmatprep.subr.bf16.mxu1 %v7141_v19  ;;  %v7195_v19 = vld [vmem:[%s9201_s1 + $0x7b8] sm:$0xff]  }
  0xb8   :  { %6467 = vmatpush3.bf16.msra.mxu0 %v7142_v20  ;;  %v5659_v20 = vld [vmem:[%s9203_s2] ss:$0 sm:$0xff] }
  0xb9   :  { %6489 = vmatpush3.bf16.msra.mxu1 %v7143_v21  ;;  %6468 = vmatprep.subr.bf16.mxu0 %v7144_v22 }
  0xba   :  { %6490 = vmatprep.subr.bf16.mxu1 %v7145_v23 }
  0xbc   :  { %6469 = vmatpush3.bf16.msra.mxu0 %v7146_v24  ;;  %v7196_v24 = vld [vmem:[%s9201_s1 + $0x770] sm:$0xff]  }
  0xbd   :  { %6491 = vmatpush3.bf16.msra.mxu1 %v7147_v25  ;;  %6470 = vmatprep.subr.bf16.mxu0 %v7148_v26  ;;  %v7197_v25 = vld [vmem:[%s9201_s1 + $0x7f0] sm:$0xff]  }
  0xbe   :  { %6492 = vmatprep.subr.bf16.mxu1 %v7149_v27 }
  0xc0   :  { %6471 = vmatpush3.bf16.msra.mxu0 %v7150_v28 }
  0xc1   :  { %6493 = vmatpush3.bf16.msra.mxu1 %v7151_v29  ;;  %6500 = vmatprep.subr.bf16.mxu0 %v7156_v36  ;;  %v7198_v29 = vld [vmem:[%s9201_s1 + $0x730] sm:$0xff]   ;;  %v7205_v36 = vld [vmem:[%s9201_s1 + $0x7e0] sm:$0xff]  }
  0xc2   :  { %6522 = vmatprep.subr.bf16.mxu1 %v7157_v37  ;;  %v7206_v37 = vld [vmem:[%s9201_s1 + $0x720] sm:$0xff]  }
  0xc3   :  { %4807 = vmatmul.mubr.bf16.vlgmr.msra.gmra.mxu0 %v5680_v32  ;;  %v7201_v32 = vld [vmem:[%s9201_s1 + $0x7e8] sm:$0xff]  }
  0xc4   :  { %4847 = vmatmul.mubr.bf16.vlgmr.msra.gmra.mxu1 %v5682_v34  ;;  %6501 = vmatpush3.bf16.msra.mxu0 %v7158_v38  ;;  %v7203_v34 = vld [vmem:[%s9201_s1 + $0x7a8] sm:$0xff]   ;;  %v7207_v38 = vld [vmem:[%s9201_s1 + $0x7a0] sm:$0xff]  }
  0xc5   :  { %6523 = vmatpush3.bf16.msra.mxu1 %v7159_v39  ;;  %6502 = vmatprep.subr.bf16.mxu0 %v7160_v40  ;;  %v7208_v39 = vld [vmem:[%s9201_s1 + $0x758] sm:$0xff]  }
  0xc6   :  { %6524 = vmatprep.subr.bf16.mxu1 %v7161_v41  ;;  %4886 = vmatprep.mubr.bf16.mxu0 %v5685_v9  ;;  %v7209_v40 = vld [vmem:[%s9201_s1 + $0x7d8] sm:$0xff]  }
  0xc7   :  { %4926 = vmatprep.mubr.bf16.mxu1 %v5687_v12  ;;  %v7210_v41 = vld [vmem:[%s9201_s1 + $0x718] sm:$0xff]  }
  0xc8   :  { %6503 = vmatpush3.bf16.msra.mxu0 %v7162_v42  ;;  %v7211_v42 = vld [vmem:[%s9201_s1 + $0x798] sm:$0xff]  }
  0xc9   :  { %6525 = vmatpush3.bf16.msra.mxu1 %v7163_v43  ;;  %6504 = vmatprep.subr.bf16.mxu0 %v7164_v44  ;;  %v7212_v43 = vld [vmem:[%s9201_s1 + $0x750] sm:$0xff]  }
  0xca   :  { %6526 = vmatprep.subr.bf16.mxu1 %v7165_v45  ;;  %v7213_v44 = vld [vmem:[%s9201_s1 + $0x7d0] sm:$0xff]  }
  0xcb   :  { %v7214_v45 = vld [vmem:[%s9201_s1 + $0x710] sm:$0xff]  }
  0xcc   :  { %6505 = vmatpush3.bf16.msra.mxu0 %v7166_v46  ;;  %v7215_v46 = vld [vmem:[%s9201_s1 + $0x790] sm:$0xff]  }
  0xcd   :  { %6527 = vmatpush3.bf16.msra.mxu1 %v7167_v47  ;;  %6506 = vmatprep.subr.bf16.mxu0 %v7168_v48  ;;  %v7216_v47 = vld [vmem:[%s9201_s1 + $0x748] sm:$0xff]  }
  0xce   :  { %6528 = vmatprep.subr.bf16.mxu1 %v7169_v49  ;;  %v7217_v48 = vld [vmem:[%s9201_s1 + $0x7c8] sm:$0xff]  }
  0xcf   :  { %v7218_v49 = vld [vmem:[%s9201_s1 + $0x708] sm:$0xff]  }
  0xd0   :  { %6507 = vmatpush3.bf16.msra.mxu0 %v7170_v50  ;;  %v7219_v50 = vld [vmem:[%s9201_s1 + $0x788] sm:$0xff]  }
  0xd1   :  { %6529 = vmatpush3.bf16.msra.mxu1 %v7171_v51  ;;  %6508 = vmatprep.subr.bf16.mxu0 %v7172_v52  ;;  %v7220_v51 = vld [vmem:[%s9201_s1 + $0x740] sm:$0xff]  }
  0xd2   :  { %6530 = vmatprep.subr.bf16.mxu1 %v7173_v53  ;;  %v7221_v52 = vld [vmem:[%s9201_s1 + $0x7c0] sm:$0xff]  }
  0xd3   :  { %v7222_v53 = vld [vmem:[%s9201_s1 + $0x700] sm:$0xff]  }
  0xd4   :  { %6509 = vmatpush3.bf16.msra.mxu0 %v7174_v54  ;;  %v7223_v54 = vld [vmem:[%s9201_s1 + $0x780] sm:$0xff]  }
  0xd5   :  { %6531 = vmatpush3.bf16.msra.mxu1 %v7175_v55  ;;  %6510 = vmatprep.subr.bf16.mxu0 %v7176_v56  ;;  %v29_v55 = vld [vmem:[%s9202_s0 + $0x70] sm:$0xff]  ;;  %v30_v56 = vld [vmem:[%s9202_s0 + $0x78] sm:$0xff] }
  0xd6   :  { %6532 = vmatprep.subr.bf16.mxu1 %v7177_v57 }
  0xd8   :  { %6511 = vmatpush3.bf16.msra.mxu0 %v7178_v58 }
  0xd9   :  { %6533 = vmatpush3.bf16.msra.mxu1 %v7179_v59  ;;  %6512 = vmatprep.subr.bf16.mxu0 %v7180_v60  ;;  %v5688_v59 = vcombine.low %v29_v55, %v29_v55  ;;  %v5689_v60 = vcombine.high %v29_v55, %v29_v55 }
  0xda   :  { %6534 = vmatprep.subr.bf16.mxu1 %v7181_v61  ;;  %v5690_v61 = vcombine.low %v30_v56, %v30_v56 }
  0xdc   :  { %6513 = vmatpush3.bf16.msra.mxu0 %v7182_v62  ;;  %v7228_v62 = vld [vmem:[%s9201_s1 + $0x878] sm:$0xff]  }
  0xdd   :  { %6535 = vmatpush3.bf16.msra.mxu1 %v7183_v63  ;;  %6514 = vmatprep.subr.bf16.mxu0 %v7184_v0  ;;  %v5691_v63 = vcombine.high %v30_v56, %v30_v56  ;;  %v7229_v0 = vld [vmem:[%s9201_s1 + $0x8f8] sm:$0xff]  }
  0xde   :  { %6536 = vmatprep.subr.bf16.mxu1 %v7185_v1 }
  0xe0   :  { %6515 = vmatpush3.bf16.msra.mxu0 %v7186_v2 }
  0xe1   :  { %6537 = vmatpush3.bf16.msra.mxu1 %v7187_v3  ;;  %6544 = vmatprep.subr.bf16.mxu0 %v7192_v11  ;;  %v7230_v3 = vld [vmem:[%s9201_s1 + $0x838] sm:$0xff]   ;;  %v7233_v11 = vld [vmem:[%s9201_s1 + $0x8f0] sm:$0xff]  }
  0xe2   :  { %6566 = vmatprep.subr.bf16.mxu1 %v7193_v13 }
  0xe3   :  { %v6252_v6 = vpop.f32.mrf.mxu0  ;;  %4887 = vmatmul.mubr.bf16.vlgmr.msra.gmra.mxu0 %v5684_v8 }
  0xe4   :  { %v6274_v7 = vpop.f32.mrf.mxu1  ;;  %4927 = vmatmul.mubr.bf16.vlgmr.msra.gmra.mxu1 %v5686_v10  ;;  %6545 = vmatpush3.bf16.msra.mxu0 %v7194_v16  ;;  %v7232_v10 = vld [vmem:[%s9201_s1 + $0x870] sm:$0xff]  }
  0xe5   :  { %v6253_v14 = vpop.f32.mrf.mxu0  ;;  %6567 = vmatpush3.bf16.msra.mxu1 %v7195_v19  ;;  %6546 = vmatprep.subr.bf16.mxu0 %v7196_v24  ;;  %v7235_v16 = vld [vmem:[%s9201_s1 + $0x8b0] sm:$0xff]   ;;  %v7238_v19 = vld [vmem:[%s9201_s1 + $0x828] sm:$0xff]   ;;  %v7243_v24 = vld [vmem:[%s9201_s1 + $0x8a0] sm:$0xff]  }
  0xe6   :  { %v6275_v15 = vpop.f32.mrf.mxu1  ;;  %v6254_v17 = vadd.f32 %v6253_v14, %v6252_v6  ;;  %6568 = vmatprep.subr.bf16.mxu1 %v7197_v25  ;;  %4966 = vmatprep.mubr.bf16.mxu0 %v5689_v60  ;;  %v7231_v6 = vld [vmem:[%s9201_s1 + $0x8b8] sm:$0xff]   ;;  %v7268_v60 = vld [vmem:[%s9201_s1 + $0x970] sm:$0xff]  }
  0xe7   :  { %v6276_v18 = vadd.f32 %v6275_v15, %v6274_v7  ;;  %v6255_v21 = vpop.f32.mrf.mxu0  ;;  %5006 = vmatprep.mubr.bf16.mxu1 %v5691_v63  ;;  %v7234_v15 = vld [vmem:[%s9201_s1 + $0x830] sm:$0xff]   ;;  %v7244_v25 = vld [vmem:[%s9201_s1 + $0x858] sm:$0xff]  }
  0xe8   :  { %v6277_v22 = vpop.f32.mrf.mxu1  ;;  %v4409_v23 = vadd.f32 %v6254_v17, %v5659_v20  ;;  %6547 = vmatpush3.bf16.msra.mxu0 %v7198_v29  ;;  %v7236_v17 = vld [vmem:[%s9201_s1 + $0x868] sm:$0xff]   ;;  %v7240_v21 = vld [vmem:[%s9201_s1 + $0x860] sm:$0xff]   ;;  %v7248_v29 = vld [vmem:[%s9201_s1 + $0x850] sm:$0xff]  }
  0xe9   :  { %v6256_v26 = vpop.f32.mrf.mxu0  ;;  %6569 = vmatpush3.bf16.msra.mxu1 %v7199_v30  ;;  %6548 = vmatprep.subr.bf16.mxu0 %v7200_v31  ;;  %v7239_v20 = vld [vmem:[%s9201_s1 + $0x8a8] sm:$0xff]   ;;  %v7241_v22 = vld [vmem:[%s9201_s1 + $0x8e0] sm:$0xff]   ;;  %v7249_v30 = vld [vmem:[%s9201_s1 + $0x8d0] sm:$0xff]  }
  0xea   :  { %v6278_v27 = vpop.f32.mrf.mxu1  ;;  %v8271_v28 = vadd.f32 %v6276_v18, %v4409_v23  ;;  %6570 = vmatprep.subr.bf16.mxu1 %v7201_v32  ;;  %v7237_v18 = vld [vmem:[%s9201_s1 + $0x8e8] sm:$0xff]   ;;  %v7242_v23 = vld [vmem:[%s9201_s1 + $0x820] sm:$0xff]   ;;  %v7245_v26 = vld [vmem:[%s9201_s1 + $0x8d8] sm:$0xff]  }
  0xeb   :  { %v7246_v27 = vld [vmem:[%s9201_s1 + $0x818] sm:$0xff]   ;;  %v7250_v31 = vld [vmem:[%s9201_s1 + $0x810] sm:$0xff]  }
  0xec   :  { %6549 = vmatpush3.bf16.msra.mxu0 %v7202_v33  ;;  %v7251_v32 = vld [vmem:[%s9201_s1 + $0x890] sm:$0xff]   ;;  %v7252_v33 = vld [vmem:[%s9201_s1 + $0x848] sm:$0xff]  }
  0xed   :  { %6571 = vmatpush3.bf16.msra.mxu1 %v7203_v34  ;;  %6550 = vmatprep.subr.bf16.mxu0 %v7204_v35  ;;  %v7253_v34 = vld [vmem:[%s9201_s1 + $0x8c8] sm:$0xff]   ;;  %v7269_v63 = vld [vmem:[%s9201_s1 + $0x9f0] sm:$0xff]  }
  0xee   :  { %6572 = vmatprep.subr.bf16.mxu1 %v7205_v36  ;;  %v7254_v35 = vld [vmem:[%s9201_s1 + $0x808] sm:$0xff]  }
  0xef   :  { %v7255_v36 = vld [vmem:[%s9201_s1 + $0x888] sm:$0xff]  }
  0xf0   :  { %6551 = vmatpush3.bf16.msra.mxu0 %v7206_v37  ;;  %v7256_v37 = vld [vmem:[%s9201_s1 + $0x840] sm:$0xff]  }
  0xf1   :  { %6573 = vmatpush3.bf16.msra.mxu1 %v7207_v38  ;;  %6552 = vmatprep.subr.bf16.mxu0 %v7208_v39  ;;  %v7257_v38 = vld [vmem:[%s9201_s1 + $0x8c0] sm:$0xff]  }
  0xf2   :  { %6574 = vmatprep.subr.bf16.mxu1 %v7209_v40  ;;  %v7258_v39 = vld [vmem:[%s9201_s1 + $0x800] sm:$0xff]  }
  0xf3   :  { %v7259_v40 = vld [vmem:[%s9201_s1 + $0x880] sm:$0xff]  }
  0xf4   :  { %6553 = vmatpush3.bf16.msra.mxu0 %v7210_v41  ;;  %v31_v41 = vld [vmem:[%s9202_s0 + $0x80] sm:$0xff] }
  0xf5   :  { %6575 = vmatpush3.bf16.msra.mxu1 %v7211_v42  ;;  %6554 = vmatprep.subr.bf16.mxu0 %v7212_v43  ;;  %v5692_v43 = vcombine.low %v31_v41, %v31_v41 }
  0xf6   :  { %6576 = vmatprep.subr.bf16.mxu1 %v7213_v44  ;;  %v5693_v44 = vcombine.high %v31_v41, %v31_v41  ;;  %v7303_v41 = vld [vmem:[%s9201_s1 + $0xab8] sm:$0xff]  }
  0xf8   :  { %6555 = vmatpush3.bf16.msra.mxu0 %v7214_v45  ;;  %v32_v45 = vld [vmem:[%s9202_s0 + $0x88] sm:$0xff] }
  0xf9   :  { %6577 = vmatpush3.bf16.msra.mxu1 %v7215_v46  ;;  %6556 = vmatprep.subr.bf16.mxu0 %v7216_v47  ;;  %v5694_v47 = vcombine.low %v32_v45, %v32_v45 }
  0xfa   :  { %6578 = vmatprep.subr.bf16.mxu1 %v7217_v48  ;;  %v5695_v48 = vcombine.high %v32_v45, %v32_v45 }
  0xfc   :  { %6557 = vmatpush3.bf16.msra.mxu0 %v7218_v49  ;;  %v7264_v49 = vld [vmem:[%s9201_s1 + $0x978] sm:$0xff]  }
  0xfd   :  { %6579 = vmatpush3.bf16.msra.mxu1 %v7219_v50  ;;  %6558 = vmatprep.subr.bf16.mxu0 %v7220_v51  ;;  %v7265_v51 = vld [vmem:[%s9201_s1 + $0x9f8] sm:$0xff]  }
  0xfe   :  { %6580 = vmatprep.subr.bf16.mxu1 %v7221_v52 }
 0x100   :  { %6559 = vmatpush3.bf16.msra.mxu0 %v7222_v53 }
 0x101   :  { %6581 = vmatpush3.bf16.msra.mxu1 %v7223_v54  ;;  %6588 = vmatprep.subr.bf16.mxu0 %v7228_v62  ;;  %v7266_v54 = vld [vmem:[%s9201_s1 + $0x938] sm:$0xff]  }
 0x102   :  { %6610 = vmatprep.subr.bf16.mxu1 %v7229_v0 }
 0x103   :  { %v6296_v57 = vpop.f32.mrf.mxu0  ;;  %4967 = vmatmul.mubr.bf16.vlgmr.msra.gmra.mxu0 %v5688_v59 }
 0x104   :  { %v6318_v58 = vpop.f32.mrf.mxu1  ;;  %5007 = vmatmul.mubr.bf16.vlgmr.msra.gmra.mxu1 %v5690_v61  ;;  %6589 = vmatpush3.bf16.msra.mxu0 %v7230_v3  ;;  %v7272_v3 = vld [vmem:[%s9201_s1 + $0x968] sm:$0xff]  }
 0x105   :  { %v6297_v1 = vpop.f32.mrf.mxu0  ;;  %6611 = vmatpush3.bf16.msra.mxu1 %v7231_v6  ;;  %6590 = vmatprep.subr.bf16.mxu0 %v7232_v10  ;;  %v7275_v6 = vld [vmem:[%s9201_s1 + $0x9a8] sm:$0xff]   ;;  %v7279_v10 = vld [vmem:[%s9201_s1 + $0x9a0] sm:$0xff]  }
 0x106   :  { %v6319_v2 = vpop.f32.mrf.mxu1  ;;  %v6298_v4 = vadd.f32 %v6297_v1, %v6296_v57  ;;  %6612 = vmatprep.subr.bf16.mxu1 %v7233_v11  ;;  %5046 = vmatprep.mubr.bf16.mxu0 %v5693_v44  ;;  %v7267_v57 = vld [vmem:[%s9201_s1 + $0x9b8] sm:$0xff]   ;;  %v7270_v1 = vld [vmem:[%s9201_s1 + $0x930] sm:$0xff]  }
 0x107   :  { %v6320_v5 = vadd.f32 %v6319_v2, %v6318_v58  ;;  %v6299_v7 = vpop.f32.mrf.mxu0  ;;  %5086 = vmatprep.mubr.bf16.mxu1 %v5695_v48  ;;  %v7271_v2 = vld [vmem:[%s9201_s1 + $0x9b0] sm:$0xff]   ;;  %v7280_v11 = vld [vmem:[%s9201_s1 + $0x958] sm:$0xff]  }
 0x108   :  { %v6321_v8 = vpop.f32.mrf.mxu1  ;;  %v4489_v9 = vadd.f32 %v6298_v4, %v8271_v28  ;;  %6591 = vmatpush3.bf16.msra.mxu0 %v7234_v15  ;;  %v7247_v28 = vld [vmem:[%s9201_s1 + $0x898] sm:$0xff]   ;;  %v7273_v4 = vld [vmem:[%s9201_s1 + $0x9e8] sm:$0xff]   ;;  %v7276_v7 = vld [vmem:[%s9201_s1 + $0x960] sm:$0xff]  }
 0x109   :  { %v6300_v12 = vpop.f32.mrf.mxu0  ;;  %6613 = vmatpush3.bf16.msra.mxu1 %v7235_v16  ;;  %6592 = vmatprep.subr.bf16.mxu0 %v7236_v17  ;;  %v7277_v8 = vld [vmem:[%s9201_s1 + $0x9e0] sm:$0xff]   ;;  %v7284_v15 = vld [vmem:[%s9201_s1 + $0x950] sm:$0xff]  }
 0x10a   :  { %v6322_v13 = vpop.f32.mrf.mxu1  ;;  %v8376_v14 = vadd.f32 %v6320_v5, %v4489_v9  ;;  %6614 = vmatprep.subr.bf16.mxu1 %v7237_v18  ;;  %v7274_v5 = vld [vmem:[%s9201_s1 + $0x928] sm:$0xff]   ;;  %v7278_v9 = vld [vmem:[%s9201_s1 + $0x920] sm:$0xff]   ;;  %v7281_v12 = vld [vmem:[%s9201_s1 + $0x9d8] sm:$0xff]  }
 0x10b   :  { %v7282_v13 = vld [vmem:[%s9201_s1 + $0x918] sm:$0xff]   ;;  %v7285_v16 = vld [vmem:[%s9201_s1 + $0x9d0] sm:$0xff]  }
 0x10c   :  { %6593 = vmatpush3.bf16.msra.mxu0 %v7238_v19  ;;  %v7286_v17 = vld [vmem:[%s9201_s1 + $0x910] sm:$0xff]   ;;  %v7288_v19 = vld [vmem:[%s9201_s1 + $0x948] sm:$0xff]  }
 0x10d   :  { %6615 = vmatpush3.bf16.msra.mxu1 %v7239_v20  ;;  %6594 = vmatprep.subr.bf16.mxu0 %v7240_v21  ;;  %v7287_v18 = vld [vmem:[%s9201_s1 + $0x990] sm:$0xff]   ;;  %v7289_v20 = vld [vmem:[%s9201_s1 + $0x9c8] sm:$0xff]  }
 0x10e   :  { %6616 = vmatprep.subr.bf16.mxu1 %v7241_v22  ;;  %v7290_v21 = vld [vmem:[%s9201_s1 + $0x908] sm:$0xff]  }
 0x10f   :  { %v7291_v22 = vld [vmem:[%s9201_s1 + $0x988] sm:$0xff]  }
 0x110   :  { %6595 = vmatpush3.bf16.msra.mxu0 %v7242_v23  ;;  %v7292_v23 = vld [vmem:[%s9201_s1 + $0x940] sm:$0xff]  }
 0x111   :  { %6617 = vmatpush3.bf16.msra.mxu1 %v7243_v24  ;;  %6596 = vmatprep.subr.bf16.mxu0 %v7244_v25  ;;  %v7293_v24 = vld [vmem:[%s9201_s1 + $0x9c0] sm:$0xff]  }
 0x112   :  { %6618 = vmatprep.subr.bf16.mxu1 %v7245_v26  ;;  %v7294_v25 = vld [vmem:[%s9201_s1 + $0x900] sm:$0xff]  }
 0x113   :  { %v7295_v26 = vld [vmem:[%s9201_s1 + $0x980] sm:$0xff]  }
 0x114   :  { %6597 = vmatpush3.bf16.msra.mxu0 %v7246_v27  ;;  %v33_v27 = vld [vmem:[%s9202_s0 + $0x90] sm:$0xff] }
 0x115   :  { %6619 = vmatpush3.bf16.msra.mxu1 %v7247_v28  ;;  %6598 = vmatprep.subr.bf16.mxu0 %v7248_v29  ;;  %v34_v28 = vld [vmem:[%s9202_s0 + $0x98] sm:$0xff] }
 0x116   :  { %6620 = vmatprep.subr.bf16.mxu1 %v7249_v30  ;;  %v5696_v30 = vcombine.low %v33_v27, %v33_v27 }
 0x118   :  { %6599 = vmatpush3.bf16.msra.mxu0 %v7250_v31  ;;  %v5697_v31 = vcombine.high %v33_v27, %v33_v27 }
 0x119   :  { %6621 = vmatpush3.bf16.msra.mxu1 %v7251_v32  ;;  %6600 = vmatprep.subr.bf16.mxu0 %v7252_v33  ;;  %v5698_v32 = vcombine.low %v34_v28, %v34_v28  ;;  %v5699_v33 = vcombine.high %v34_v28, %v34_v28  ;;  %v7339_v28 = vld [vmem:[%s9201_s1 + $0xbb8] sm:$0xff]  }
 0x11a   :  { %6622 = vmatprep.subr.bf16.mxu1 %v7253_v34 }
 0x11c   :  { %6601 = vmatpush3.bf16.msra.mxu0 %v7254_v35  ;;  %v7300_v35 = vld [vmem:[%s9201_s1 + $0xa78] sm:$0xff]  }
 0x11d   :  { %6623 = vmatpush3.bf16.msra.mxu1 %v7255_v36  ;;  %6602 = vmatprep.subr.bf16.mxu0 %v7256_v37  ;;  %v7301_v36 = vld [vmem:[%s9201_s1 + $0xaf8] sm:$0xff]  }
 0x11e   :  { %6624 = vmatprep.subr.bf16.mxu1 %v7257_v38  ;;  %v7302_v38 = vld [vmem:[%s9201_s1 + $0xa38] sm:$0xff]  }
 0x120   :  { %6603 = vmatpush3.bf16.msra.mxu0 %v7258_v39 }
 0x121   :  { %6625 = vmatpush3.bf16.msra.mxu1 %v7259_v40  ;;  %6632 = vmatprep.subr.bf16.mxu0 %v7264_v49 }
 0x122   :  { %6654 = vmatprep.subr.bf16.mxu1 %v7265_v51 }
 0x123   :  { %v6340_v42 = vpop.f32.mrf.mxu0  ;;  %5047 = vmatmul.mubr.bf16.vlgmr.msra.gmra.mxu0 %v5692_v43 }
 0x124   :  { %v6362_v46 = vpop.f32.mrf.mxu1  ;;  %5087 = vmatmul.mubr.bf16.vlgmr.msra.gmra.mxu1 %v5694_v47  ;;  %6633 = vmatpush3.bf16.msra.mxu0 %v7266_v54  ;;  %v7305_v47 = vld [vmem:[%s9201_s1 + $0xaf0] sm:$0xff]   ;;  %v7309_v54 = vld [vmem:[%s9201_s1 + $0xae8] sm:$0xff]  }
 0x125   :  { %v6341_v50 = vpop.f32.mrf.mxu0  ;;  %6655 = vmatpush3.bf16.msra.mxu1 %v7267_v57  ;;  %6634 = vmatprep.subr.bf16.mxu0 %v7268_v60  ;;  %v7312_v57 = vld [vmem:[%s9201_s1 + $0xa60] sm:$0xff]  }
 0x126   :  { %v6342_v52 = vadd.f32 %v6341_v50, %v6340_v42  ;;  %v6363_v53 = vpop.f32.mrf.mxu1  ;;  %6656 = vmatprep.subr.bf16.mxu1 %v7269_v63  ;;  %5126 = vmatprep.mubr.bf16.mxu0 %v5697_v31  ;;  %v7306_v50 = vld [vmem:[%s9201_s1 + $0xa30] sm:$0xff]   ;;  %v7315_v60 = vld [vmem:[%s9201_s1 + $0xaa0] sm:$0xff]   ;;  %v7318_v63 = vld [vmem:[%s9201_s1 + $0xa18] sm:$0xff]  }
 0x127   :  { %v6364_v55 = vadd.f32 %v6363_v53, %v6362_v46  ;;  %v6343_v56 = vpop.f32.mrf.mxu0  ;;  %5166 = vmatprep.mubr.bf16.mxu1 %v5699_v33  ;;  %v7304_v46 = vld [vmem:[%s9201_s1 + $0xa70] sm:$0xff]   ;;  %v7308_v53 = vld [vmem:[%s9201_s1 + $0xa68] sm:$0xff]  }
 0x128   :  { %v4569_v58 = vadd.f32 %v6342_v52, %v8376_v14  ;;  %v6365_v59 = vpop.f32.mrf.mxu1  ;;  %6635 = vmatpush3.bf16.msra.mxu0 %v7270_v1  ;;  %v7283_v14 = vld [vmem:[%s9201_s1 + $0x998] sm:$0xff]   ;;  %v7307_v52 = vld [vmem:[%s9201_s1 + $0xab0] sm:$0xff]   ;;  %v7311_v56 = vld [vmem:[%s9201_s1 + $0xaa8] sm:$0xff]  }
 0x129   :  { %v6344_v61 = vpop.f32.mrf.mxu0  ;;  %6657 = vmatpush3.bf16.msra.mxu1 %v7271_v2  ;;  %6636 = vmatprep.subr.bf16.mxu0 %v7272_v3  ;;  %v7314_v59 = vld [vmem:[%s9201_s1 + $0xa20] sm:$0xff]   ;;  %v7320_v1 = vld [vmem:[%s9201_s1 + $0xa50] sm:$0xff]  }
 0x12a   :  { %v8478_v62 = vadd.f32 %v6364_v55, %v4569_v58  ;;  %v6366_v0 = vpop.f32.mrf.mxu1  ;;  %6658 = vmatprep.subr.bf16.mxu1 %v7273_v4  ;;  %v7310_v55 = vld [vmem:[%s9201_s1 + $0xa28] sm:$0xff]   ;;  %v7313_v58 = vld [vmem:[%s9201_s1 + $0xae0] sm:$0xff]   ;;  %v7316_v61 = vld [vmem:[%s9201_s1 + $0xa58] sm:$0xff]  }
 0x12b   :  { %v7319_v0 = vld [vmem:[%s9201_s1 + $0xa98] sm:$0xff]   ;;  %v7321_v2 = vld [vmem:[%s9201_s1 + $0xad0] sm:$0xff]  }
 0x12c   :  { %6637 = vmatpush3.bf16.msra.mxu0 %v7274_v5  ;;  %v7322_v3 = vld [vmem:[%s9201_s1 + $0xa10] sm:$0xff]   ;;  %v7324_v5 = vld [vmem:[%s9201_s1 + $0xa48] sm:$0xff]  }
 0x12d   :  { %6659 = vmatpush3.bf16.msra.mxu1 %v7275_v6  ;;  %6638 = vmatprep.subr.bf16.mxu0 %v7276_v7  ;;  %v7323_v4 = vld [vmem:[%s9201_s1 + $0xa90] sm:$0xff]   ;;  %v7325_v6 = vld [vmem:[%s9201_s1 + $0xac8] sm:$0xff]  }
 0x12e   :  { %6660 = vmatprep.subr.bf16.mxu1 %v7277_v8  ;;  %v7326_v7 = vld [vmem:[%s9201_s1 + $0xa08] sm:$0xff]   ;;  %v7341_v33 = vld [vmem:[%s9201_s1 + $0xbf0] sm:$0xff]  }
 0x12f   :  { %v7327_v8 = vld [vmem:[%s9201_s1 + $0xa88] sm:$0xff]  }
 0x130   :  { %6639 = vmatpush3.bf16.msra.mxu0 %v7278_v9  ;;  %v7328_v9 = vld [vmem:[%s9201_s1 + $0xa40] sm:$0xff]  }
 0x131   :  { %6661 = vmatpush3.bf16.msra.mxu1 %v7279_v10  ;;  %6640 = vmatprep.subr.bf16.mxu0 %v7280_v11  ;;  %v7329_v10 = vld [vmem:[%s9201_s1 + $0xac0] sm:$0xff]  }
 0x132   :  { %6662 = vmatprep.subr.bf16.mxu1 %v7281_v12  ;;  %v7330_v11 = vld [vmem:[%s9201_s1 + $0xa00] sm:$0xff]  }
 0x133   :  { %v7331_v12 = vld [vmem:[%s9201_s1 + $0xa80] sm:$0xff]  }
 0x134   :  { %6641 = vmatpush3.bf16.msra.mxu0 %v7282_v13  ;;  %v35_v13 = vld [vmem:[%s9202_s0 + $0xa0] sm:$0xff] }
 0x135   :  { %6663 = vmatpush3.bf16.msra.mxu1 %v7283_v14  ;;  %6642 = vmatprep.subr.bf16.mxu0 %v7284_v15  ;;  %v36_v14 = vld [vmem:[%s9202_s0 + $0xa8] sm:$0xff] }
 0x136   :  { %6664 = vmatprep.subr.bf16.mxu1 %v7285_v16 }
 0x138   :  { %6643 = vmatpush3.bf16.msra.mxu0 %v7286_v17  ;;  %v5700_v17 = vcombine.low %v35_v13, %v35_v13 }
 0x139   :  { %6665 = vmatpush3.bf16.msra.mxu1 %v7287_v18  ;;  %6644 = vmatprep.subr.bf16.mxu0 %v7288_v19  ;;  %v5701_v18 = vcombine.high %v35_v13, %v35_v13  ;;  %v5702_v19 = vcombine.low %v36_v14, %v36_v14 }
 0x13a   :  { %6666 = vmatprep.subr.bf16.mxu1 %v7289_v20  ;;  %v7336_v20 = vld [vmem:[%s9201_s1 + $0xb78] sm:$0xff]  }
 0x13c   :  { %6645 = vmatpush3.bf16.msra.mxu0 %v7290_v21  ;;  %v5703_v21 = vcombine.high %v36_v14, %v36_v14 }
 0x13d   :  { %6667 = vmatpush3.bf16.msra.mxu1 %v7291_v22  ;;  %6646 = vmatprep.subr.bf16.mxu0 %v7292_v23  ;;  %v7337_v22 = vld [vmem:[%s9201_s1 + $0xbf8] sm:$0xff]  }
 0x13e   :  { %6668 = vmatprep.subr.bf16.mxu1 %v7293_v24 }
 0x140   :  { %6647 = vmatpush3.bf16.msra.mxu0 %v7294_v25  ;;  %v7338_v25 = vld [vmem:[%s9201_s1 + $0xb38] sm:$0xff]  }
 0x141   :  { %6669 = vmatpush3.bf16.msra.mxu1 %v7295_v26  ;;  %6676 = vmatprep.subr.bf16.mxu0 %v7300_v35 }
 0x142   :  { %6698 = vmatprep.subr.bf16.mxu1 %v7301_v36 }
 0x143   :  { %v6384_v29 = vpop.f32.mrf.mxu0  ;;  %5127 = vmatmul.mubr.bf16.vlgmr.msra.gmra.mxu0 %v5696_v30 }
 0x144   :  { %v6406_v34 = vpop.f32.mrf.mxu1  ;;  %5167 = vmatmul.mubr.bf16.vlgmr.msra.gmra.mxu1 %v5698_v32  ;;  %6677 = vmatpush3.bf16.msra.mxu0 %v7302_v38  ;;  %v7340_v32 = vld [vmem:[%s9201_s1 + $0xb70] sm:$0xff]  }
 0x145   :  { %v6385_v37 = vpop.f32.mrf.mxu0  ;;  %6699 = vmatpush3.bf16.msra.mxu1 %v7303_v41  ;;  %6678 = vmatprep.subr.bf16.mxu0 %v7304_v46  ;;  %v7343_v38 = vld [vmem:[%s9201_s1 + $0xbb0] sm:$0xff]   ;;  %v7346_v41 = vld [vmem:[%s9201_s1 + $0xb28] sm:$0xff]   ;;  %v7351_v46 = vld [vmem:[%s9201_s1 + $0xba0] sm:$0xff]  }
 0x146   :  { %v6386_v39 = vadd.f32 %v6385_v37, %v6384_v29  ;;  %v6407_v40 = vpop.f32.mrf.mxu1  ;;  %6700 = vmatprep.subr.bf16.mxu1 %v7305_v47  ;;  %5206 = vmatprep.mubr.bf16.mxu0 %v5701_v18  ;;  %v7342_v37 = vld [vmem:[%s9201_s1 + $0xb30] sm:$0xff]   ;;  %v7352_v47 = vld [vmem:[%s9201_s1 + $0xb58] sm:$0xff]  }
 0x147   :  { %v6408_v42 = vadd.f32 %v6407_v40, %v6406_v34  ;;  %v6387_v43 = vpop.f32.mrf.mxu0  ;;  %5246 = vmatprep.mubr.bf16.mxu1 %v5703_v21  ;;  %v7345_v40 = vld [vmem:[%s9201_s1 + $0xbe8] sm:$0xff]   ;;  %v7376_v18 = vld [vmem:[%s9201_s1 + $0xc70] sm:$0xff]  }
 0x148   :  { %v4649_v44 = vadd.f32 %v6386_v39, %v8478_v62  ;;  %v6409_v45 = vpop.f32.mrf.mxu1  ;;  %6679 = vmatpush3.bf16.msra.mxu0 %v7306_v50  ;;  %v7317_v62 = vld [vmem:[%s9201_s1 + $0xad8] sm:$0xff]   ;;  %v7344_v39 = vld [vmem:[%s9201_s1 + $0xb68] sm:$0xff]   ;;  %v7348_v43 = vld [vmem:[%s9201_s1 + $0xb60] sm:$0xff]  }
 0x149   :  { %v6388_v48 = vpop.f32.mrf.mxu0  ;;  %6701 = vmatpush3.bf16.msra.mxu1 %v7307_v52  ;;  %6680 = vmatprep.subr.bf16.mxu0 %v7308_v53  ;;  %v7350_v45 = vld [vmem:[%s9201_s1 + $0xb20] sm:$0xff]   ;;  %v7355_v50 = vld [vmem:[%s9201_s1 + $0xb98] sm:$0xff]   ;;  %v7357_v52 = vld [vmem:[%s9201_s1 + $0xbd0] sm:$0xff]  }
 0x14a   :  { %v8586_v49 = vadd.f32 %v6408_v42, %v4649_v44  ;;  %v6410_v51 = vpop.f32.mrf.mxu1  ;;  %6702 = vmatprep.subr.bf16.mxu1 %v7309_v54  ;;  %v7347_v42 = vld [vmem:[%s9201_s1 + $0xba8] sm:$0xff]   ;;  %v7349_v44 = vld [vmem:[%s9201_s1 + $0xbe0] sm:$0xff]   ;;  %v7353_v48 = vld [vmem:[%s9201_s1 + $0xbd8] sm:$0xff]  }
 0x14b   :  { %v7356_v51 = vld [vmem:[%s9201_s1 + $0xb50] sm:$0xff]  }
 0x14c   :  { %6681 = vmatpush3.bf16.msra.mxu0 %v7310_v55  ;;  %v7358_v53 = vld [vmem:[%s9201_s1 + $0xb10] sm:$0xff]   ;;  %v7360_v55 = vld [vmem:[%s9201_s1 + $0xb48] sm:$0xff]  }
 0x14d   :  { %6703 = vmatpush3.bf16.msra.mxu1 %v7311_v56  ;;  %6682 = vmatprep.subr.bf16.mxu0 %v7312_v57  ;;  %v7359_v54 = vld [vmem:[%s9201_s1 + $0xb90] sm:$0xff]   ;;  %v7361_v56 = vld [vmem:[%s9201_s1 + $0xbc8] sm:$0xff]  }
 0x14e   :  { %6704 = vmatprep.subr.bf16.mxu1 %v7313_v58  ;;  %v7362_v57 = vld [vmem:[%s9201_s1 + $0xb08] sm:$0xff]   ;;  %v7377_v21 = vld [vmem:[%s9201_s1 + $0xcf0] sm:$0xff]  }
 0x14f   :  { %v7363_v58 = vld [vmem:[%s9201_s1 + $0xb88] sm:$0xff]  }
 0x150   :  { %6683 = vmatpush3.bf16.msra.mxu0 %v7314_v59  ;;  %v7364_v59 = vld [vmem:[%s9201_s1 + $0xb40] sm:$0xff]  }
 0x151   :  { %6705 = vmatpush3.bf16.msra.mxu1 %v7315_v60  ;;  %6684 = vmatprep.subr.bf16.mxu0 %v7316_v61  ;;  %v7365_v60 = vld [vmem:[%s9201_s1 + $0xbc0] sm:$0xff]  }
 0x152   :  { %6706 = vmatprep.subr.bf16.mxu1 %v7317_v62  ;;  %v7366_v61 = vld [vmem:[%s9201_s1 + $0xb00] sm:$0xff]  }
 0x153   :  { %v7367_v62 = vld [vmem:[%s9201_s1 + $0xb80] sm:$0xff]  }
 0x154   :  { %6685 = vmatpush3.bf16.msra.mxu0 %v7318_v63  ;;  %v37_v63 = vld [vmem:[%s9202_s0 + $0xb0] sm:$0xff] }
 0x155   :  { %6707 = vmatpush3.bf16.msra.mxu1 %v7319_v0  ;;  %6686 = vmatprep.subr.bf16.mxu0 %v7320_v1  ;;  %v5704_v1 = vcombine.low %v37_v63, %v37_v63 }
 0x156   :  { %6708 = vmatprep.subr.bf16.mxu1 %v7321_v2  ;;  %v5705_v2 = vcombine.high %v37_v63, %v37_v63  ;;  %v7411_v63 = vld [vmem:[%s9201_s1 + $0xdb8] sm:$0xff]  }
 0x158   :  { %6687 = vmatpush3.bf16.msra.mxu0 %v7322_v3  ;;  %v38_v3 = vld [vmem:[%s9202_s0 + $0xb8] sm:$0xff] }
 0x159   :  { %6709 = vmatpush3.bf16.msra.mxu1 %v7323_v4  ;;  %6688 = vmatprep.subr.bf16.mxu0 %v7324_v5  ;;  %v5706_v5 = vcombine.low %v38_v3, %v38_v3 }
 0x15a   :  { %6710 = vmatprep.subr.bf16.mxu1 %v7325_v6  ;;  %v5707_v6 = vcombine.high %v38_v3, %v38_v3 }
 0x15c   :  { %6689 = vmatpush3.bf16.msra.mxu0 %v7326_v7  ;;  %v7372_v7 = vld [vmem:[%s9201_s1 + $0xc78] sm:$0xff]  }
 0x15d   :  { %6711 = vmatpush3.bf16.msra.mxu1 %v7327_v8  ;;  %6690 = vmatprep.subr.bf16.mxu0 %v7328_v9  ;;  %v7373_v9 = vld [vmem:[%s9201_s1 + $0xcf8] sm:$0xff]  }
 0x15e   :  { %6712 = vmatprep.subr.bf16.mxu1 %v7329_v10 }
 0x160   :  { %6691 = vmatpush3.bf16.msra.mxu0 %v7330_v11 }
 0x161   :  { %6713 = vmatpush3.bf16.msra.mxu1 %v7331_v12  ;;  %6720 = vmatprep.subr.bf16.mxu0 %v7336_v20  ;;  %v7374_v12 = vld [vmem:[%s9201_s1 + $0xc38] sm:$0xff]  }
 0x162   :  { %6742 = vmatprep.subr.bf16.mxu1 %v7337_v22 }
 0x163   :  { %v6428_v15 = vpop.f32.mrf.mxu0  ;;  %5207 = vmatmul.mubr.bf16.vlgmr.msra.gmra.mxu0 %v5700_v17 }
 0x164   :  { %v6450_v16 = vpop.f32.mrf.mxu1  ;;  %5247 = vmatmul.mubr.bf16.vlgmr.msra.gmra.mxu1 %v5702_v19  ;;  %6721 = vmatpush3.bf16.msra.mxu0 %v7338_v25  ;;  %v7380_v25 = vld [vmem:[%s9201_s1 + $0xc68] sm:$0xff]  }
 0x165   :  { %v6429_v23 = vpop.f32.mrf.mxu0  ;;  %6743 = vmatpush3.bf16.msra.mxu1 %v7339_v28  ;;  %6722 = vmatprep.subr.bf16.mxu0 %v7340_v32  ;;  %v7383_v28 = vld [vmem:[%s9201_s1 + $0xca8] sm:$0xff]   ;;  %v7387_v32 = vld [vmem:[%s9201_s1 + $0xca0] sm:$0xff]  }
 0x166   :  { %v6451_v24 = vpop.f32.mrf.mxu1  ;;  %v6430_v26 = vadd.f32 %v6429_v23, %v6428_v15  ;;  %6744 = vmatprep.subr.bf16.mxu1 %v7341_v33  ;;  %5286 = vmatprep.mubr.bf16.mxu0 %v5705_v2  ;;  %v7375_v15 = vld [vmem:[%s9201_s1 + $0xcb8] sm:$0xff]   ;;  %v7378_v23 = vld [vmem:[%s9201_s1 + $0xc30] sm:$0xff]  }
 0x167   :  { %v6452_v27 = vadd.f32 %v6451_v24, %v6450_v16  ;;  %v6431_v29 = vpop.f32.mrf.mxu0  ;;  %5326 = vmatprep.mubr.bf16.mxu1 %v5707_v6  ;;  %v7379_v24 = vld [vmem:[%s9201_s1 + $0xcb0] sm:$0xff]   ;;  %v7388_v33 = vld [vmem:[%s9201_s1 + $0xc58] sm:$0xff]  }
 0x168   :  { %v6453_v30 = vpop.f32.mrf.mxu1  ;;  %v4729_v31 = vadd.f32 %v6430_v26, %v8586_v49  ;;  %6723 = vmatpush3.bf16.msra.mxu0 %v7342_v37  ;;  %v7354_v49 = vld [vmem:[%s9201_s1 + $0xb18] sm:$0xff]   ;;  %v7381_v26 = vld [vmem:[%s9201_s1 + $0xce8] sm:$0xff]   ;;  %v7384_v29 = vld [vmem:[%s9201_s1 + $0xc60] sm:$0xff]  }
 0x169   :  { %v6432_v34 = vpop.f32.mrf.mxu0  ;;  %6745 = vmatpush3.bf16.msra.mxu1 %v7343_v38  ;;  %6724 = vmatprep.subr.bf16.mxu0 %v7344_v39  ;;  %v7385_v30 = vld [vmem:[%s9201_s1 + $0xce0] sm:$0xff]   ;;  %v7392_v37 = vld [vmem:[%s9201_s1 + $0xc50] sm:$0xff]  }
 0x16a   :  { %v6454_v35 = vpop.f32.mrf.mxu1  ;;  %v8691_v36 = vadd.f32 %v6452_v27, %v4729_v31  ;;  %6746 = vmatprep.subr.bf16.mxu1 %v7345_v40  ;;  %v7382_v27 = vld [vmem:[%s9201_s1 + $0xc28] sm:$0xff]   ;;  %v7386_v31 = vld [vmem:[%s9201_s1 + $0xc20] sm:$0xff]   ;;  %v7389_v34 = vld [vmem:[%s9201_s1 + $0xcd8] sm:$0xff]  }
 0x16b   :  { %v7390_v35 = vld [vmem:[%s9201_s1 + $0xc18] sm:$0xff]   ;;  %v7393_v38 = vld [vmem:[%s9201_s1 + $0xcd0] sm:$0xff]  }
 0x16c   :  { %6725 = vmatpush3.bf16.msra.mxu0 %v7346_v41  ;;  %v7394_v39 = vld [vmem:[%s9201_s1 + $0xc10] sm:$0xff]   ;;  %v7396_v41 = vld [vmem:[%s9201_s1 + $0xc48] sm:$0xff]  }
 0x16d   :  { %6747 = vmatpush3.bf16.msra.mxu1 %v7347_v42  ;;  %6726 = vmatprep.subr.bf16.mxu0 %v7348_v43  ;;  %v7395_v40 = vld [vmem:[%s9201_s1 + $0xc90] sm:$0xff]   ;;  %v7397_v42 = vld [vmem:[%s9201_s1 + $0xcc8] sm:$0xff]  }
 0x16e   :  { %6748 = vmatprep.subr.bf16.mxu1 %v7349_v44  ;;  %v7398_v43 = vld [vmem:[%s9201_s1 + $0xc08] sm:$0xff]  }
 0x16f   :  { %v7399_v44 = vld [vmem:[%s9201_s1 + $0xc88] sm:$0xff]  }
 0x170   :  { %6727 = vmatpush3.bf16.msra.mxu0 %v7350_v45  ;;  %v7400_v45 = vld [vmem:[%s9201_s1 + $0xc40] sm:$0xff]  }
 0x171   :  { %6749 = vmatpush3.bf16.msra.mxu1 %v7351_v46  ;;  %6728 = vmatprep.subr.bf16.mxu0 %v7352_v47  ;;  %v7401_v46 = vld [vmem:[%s9201_s1 + $0xcc0] sm:$0xff]  }
 0x172   :  { %6750 = vmatprep.subr.bf16.mxu1 %v7353_v48  ;;  %v7402_v47 = vld [vmem:[%s9201_s1 + $0xc00] sm:$0xff]  }
 0x173   :  { %v7403_v48 = vld [vmem:[%s9201_s1 + $0xc80] sm:$0xff]  }
 0x174   :  { %6729 = vmatpush3.bf16.msra.mxu0 %v7354_v49  ;;  %v39_v49 = vld [vmem:[%s9202_s0 + $0xc0] sm:$0xff] }
 0x175   :  { %6751 = vmatpush3.bf16.msra.mxu1 %v7355_v50  ;;  %6730 = vmatprep.subr.bf16.mxu0 %v7356_v51  ;;  %v40_v50 = vld [vmem:[%s9202_s0 + $0xc8] sm:$0xff] }
 0x176   :  { %6752 = vmatprep.subr.bf16.mxu1 %v7357_v52  ;;  %v5708_v52 = vcombine.low %v39_v49, %v39_v49 }
 0x178   :  { %6731 = vmatpush3.bf16.msra.mxu0 %v7358_v53  ;;  %v5709_v53 = vcombine.high %v39_v49, %v39_v49  ;;  %v7447_v49 = vld [vmem:[%s9201_s1 + $0xeb8] sm:$0xff]  }
 0x179   :  { %6753 = vmatpush3.bf16.msra.mxu1 %v7359_v54  ;;  %6732 = vmatprep.subr.bf16.mxu0 %v7360_v55  ;;  %v5710_v54 = vcombine.low %v40_v50, %v40_v50  ;;  %v5711_v55 = vcombine.high %v40_v50, %v40_v50 }
 0x17a   :  { %6754 = vmatprep.subr.bf16.mxu1 %v7361_v56 }
 0x17c   :  { %6733 = vmatpush3.bf16.msra.mxu0 %v7362_v57  ;;  %v7408_v57 = vld [vmem:[%s9201_s1 + $0xd78] sm:$0xff]  }
 0x17d   :  { %6755 = vmatpush3.bf16.msra.mxu1 %v7363_v58  ;;  %6734 = vmatprep.subr.bf16.mxu0 %v7364_v59  ;;  %v7409_v58 = vld [vmem:[%s9201_s1 + $0xdf8] sm:$0xff]  }
 0x17e   :  { %6756 = vmatprep.subr.bf16.mxu1 %v7365_v60  ;;  %v7410_v60 = vld [vmem:[%s9201_s1 + $0xd38] sm:$0xff]  }
 0x180   :  { %6735 = vmatpush3.bf16.msra.mxu0 %v7366_v61 }
 0x181   :  { %6757 = vmatpush3.bf16.msra.mxu1 %v7367_v62  ;;  %6764 = vmatprep.subr.bf16.mxu0 %v7372_v7 }
 0x182   :  { %6786 = vmatprep.subr.bf16.mxu1 %v7373_v9 }
 0x183   :  { %v6472_v0 = vpop.f32.mrf.mxu0  ;;  %5287 = vmatmul.mubr.bf16.vlgmr.msra.gmra.mxu0 %v5704_v1 }
 0x184   :  { %v6494_v4 = vpop.f32.mrf.mxu1  ;;  %5327 = vmatmul.mubr.bf16.vlgmr.msra.gmra.mxu1 %v5706_v5  ;;  %6765 = vmatpush3.bf16.msra.mxu0 %v7374_v12  ;;  %v7413_v5 = vld [vmem:[%s9201_s1 + $0xdf0] sm:$0xff]   ;;  %v7417_v12 = vld [vmem:[%s9201_s1 + $0xde8] sm:$0xff]  }
 0x185   :  { %v6473_v8 = vpop.f32.mrf.mxu0  ;;  %6787 = vmatpush3.bf16.msra.mxu1 %v7375_v15  ;;  %6766 = vmatprep.subr.bf16.mxu0 %v7376_v18  ;;  %v7420_v15 = vld [vmem:[%s9201_s1 + $0xd60] sm:$0xff]  }
 0x186   :  { %v6474_v10 = vadd.f32 %v6473_v8, %v6472_v0  ;;  %v6495_v11 = vpop.f32.mrf.mxu1  ;;  %6788 = vmatprep.subr.bf16.mxu1 %v7377_v21  ;;  %5366 = vmatprep.mubr.bf16.mxu0 %v5709_v53  ;;  %v7414_v8 = vld [vmem:[%s9201_s1 + $0xd30] sm:$0xff]   ;;  %v7423_v18 = vld [vmem:[%s9201_s1 + $0xda0] sm:$0xff]   ;;  %v7426_v21 = vld [vmem:[%s9201_s1 + $0xd18] sm:$0xff]  }
 0x187   :  { %v6496_v13 = vadd.f32 %v6495_v11, %v6494_v4  ;;  %v6475_v14 = vpop.f32.mrf.mxu0  ;;  %5406 = vmatprep.mubr.bf16.mxu1 %v5711_v55  ;;  %v7412_v4 = vld [vmem:[%s9201_s1 + $0xd70] sm:$0xff]   ;;  %v7416_v11 = vld [vmem:[%s9201_s1 + $0xd68] sm:$0xff]  }
 0x188   :  { %v4809_v16 = vadd.f32 %v6474_v10, %v8691_v36  ;;  %v6497_v17 = vpop.f32.mrf.mxu1  ;;  %6767 = vmatpush3.bf16.msra.mxu0 %v7378_v23  ;;  %v7391_v36 = vld [vmem:[%s9201_s1 + $0xc98] sm:$0xff]   ;;  %v7415_v10 = vld [vmem:[%s9201_s1 + $0xdb0] sm:$0xff]   ;;  %v7419_v14 = vld [vmem:[%s9201_s1 + $0xda8] sm:$0xff]  }
 0x189   :  { %v6476_v19 = vpop.f32.mrf.mxu0  ;;  %6789 = vmatpush3.bf16.msra.mxu1 %v7379_v24  ;;  %6768 = vmatprep.subr.bf16.mxu0 %v7380_v25  ;;  %v7422_v17 = vld [vmem:[%s9201_s1 + $0xd20] sm:$0xff]   ;;  %v7428_v23 = vld [vmem:[%s9201_s1 + $0xd50] sm:$0xff]  }
 0x18a   :  { %v8793_v20 = vadd.f32 %v6496_v13, %v4809_v16  ;;  %v6498_v22 = vpop.f32.mrf.mxu1  ;;  %6790 = vmatprep.subr.bf16.mxu1 %v7381_v26  ;;  %v7418_v13 = vld [vmem:[%s9201_s1 + $0xd28] sm:$0xff]   ;;  %v7421_v16 = vld [vmem:[%s9201_s1 + $0xde0] sm:$0xff]   ;;  %v7424_v19 = vld [vmem:[%s9201_s1 + $0xd58] sm:$0xff]  }
 0x18b   :  { %v7427_v22 = vld [vmem:[%s9201_s1 + $0xd98] sm:$0xff]   ;;  %v7429_v24 = vld [vmem:[%s9201_s1 + $0xdd0] sm:$0xff]  }
 0x18c   :  { %6769 = vmatpush3.bf16.msra.mxu0 %v7382_v27  ;;  %v7430_v25 = vld [vmem:[%s9201_s1 + $0xd10] sm:$0xff]   ;;  %v7432_v27 = vld [vmem:[%s9201_s1 + $0xd48] sm:$0xff]  }
 0x18d   :  { %6791 = vmatpush3.bf16.msra.mxu1 %v7383_v28  ;;  %6770 = vmatprep.subr.bf16.mxu0 %v7384_v29  ;;  %v7431_v26 = vld [vmem:[%s9201_s1 + $0xd90] sm:$0xff]   ;;  %v7433_v28 = vld [vmem:[%s9201_s1 + $0xdc8] sm:$0xff]  }
 0x18e   :  { %6792 = vmatprep.subr.bf16.mxu1 %v7385_v30  ;;  %v7434_v29 = vld [vmem:[%s9201_s1 + $0xd08] sm:$0xff]   ;;  %v7449_v55 = vld [vmem:[%s9201_s1 + $0xef0] sm:$0xff]  }
 0x18f   :  { %v7435_v30 = vld [vmem:[%s9201_s1 + $0xd88] sm:$0xff]  }
 0x190   :  { %6771 = vmatpush3.bf16.msra.mxu0 %v7386_v31  ;;  %v7436_v31 = vld [vmem:[%s9201_s1 + $0xd40] sm:$0xff]  }
 0x191   :  { %6793 = vmatpush3.bf16.msra.mxu1 %v7387_v32  ;;  %6772 = vmatprep.subr.bf16.mxu0 %v7388_v33  ;;  %v7437_v32 = vld [vmem:[%s9201_s1 + $0xdc0] sm:$0xff]  }
 0x192   :  { %6794 = vmatprep.subr.bf16.mxu1 %v7389_v34  ;;  %v7438_v33 = vld [vmem:[%s9201_s1 + $0xd00] sm:$0xff]  }
 0x193   :  { %v7439_v34 = vld [vmem:[%s9201_s1 + $0xd80] sm:$0xff]  }
 0x194   :  { %6773 = vmatpush3.bf16.msra.mxu0 %v7390_v35  ;;  %v41_v35 = vld [vmem:[%s9202_s0 + $0xd0] sm:$0xff] }
 0x195   :  { %6795 = vmatpush3.bf16.msra.mxu1 %v7391_v36  ;;  %6774 = vmatprep.subr.bf16.mxu0 %v7392_v37  ;;  %v42_v36 = vld [vmem:[%s9202_s0 + $0xd8] sm:$0xff] }
 0x196   :  { %6796 = vmatprep.subr.bf16.mxu1 %v7393_v38  ;;  %v5712_v38 = vcombine.low %v41_v35, %v41_v35 }
 0x198   :  { %6775 = vmatpush3.bf16.msra.mxu0 %v7394_v39  ;;  %v5713_v39 = vcombine.high %v41_v35, %v41_v35 }
 0x199   :  { %6797 = vmatpush3.bf16.msra.mxu1 %v7395_v40  ;;  %6776 = vmatprep.subr.bf16.mxu0 %v7396_v41  ;;  %v5714_v40 = vcombine.low %v42_v36, %v42_v36 }
 0x19a   :  { %6798 = vmatprep.subr.bf16.mxu1 %v7397_v42  ;;  %v7444_v42 = vld [vmem:[%s9201_s1 + $0xe78] sm:$0xff]  }
 0x19c   :  { %6777 = vmatpush3.bf16.msra.mxu0 %v7398_v43  ;;  %v5715_v43 = vcombine.high %v42_v36, %v42_v36  ;;  %v7483_v36 = vld [vmem:[%s9201_s1 + $0xfb8] sm:$0xff]  }
 0x19d   :  { %6799 = vmatpush3.bf16.msra.mxu1 %v7399_v44  ;;  %6778 = vmatprep.subr.bf16.mxu0 %v7400_v45  ;;  %v7445_v44 = vld [vmem:[%s9201_s1 + $0xef8] sm:$0xff]  }
 0x19e   :  { %6800 = vmatprep.subr.bf16.mxu1 %v7401_v46  ;;  %v7446_v46 = vld [vmem:[%s9201_s1 + $0xe38] sm:$0xff]  }
 0x1a0   :  { %6779 = vmatpush3.bf16.msra.mxu0 %v7402_v47 }
 0x1a1   :  { %6801 = vmatpush3.bf16.msra.mxu1 %v7403_v48  ;;  %6808 = vmatprep.subr.bf16.mxu0 %v7408_v57 }
 0x1a2   :  { %6830 = vmatprep.subr.bf16.mxu1 %v7409_v58  ;;  %v7450_v58 = vld [vmem:[%s9201_s1 + $0xe30] sm:$0xff]  }
 0x1a3   :  { %v6516_v51 = vpop.f32.mrf.mxu0  ;;  %5367 = vmatmul.mubr.bf16.vlgmr.msra.gmra.mxu0 %v5708_v52 }
 0x1a4   :  { %v6538_v56 = vpop.f32.mrf.mxu1  ;;  %5407 = vmatmul.mubr.bf16.vlgmr.msra.gmra.mxu1 %v5710_v54  ;;  %6809 = vmatpush3.bf16.msra.mxu0 %v7410_v60  ;;  %v7448_v54 = vld [vmem:[%s9201_s1 + $0xe70] sm:$0xff]  }
 0x1a5   :  { %v6517_v59 = vpop.f32.mrf.mxu0  ;;  %6831 = vmatpush3.bf16.msra.mxu1 %v7411_v63  ;;  %6810 = vmatprep.subr.bf16.mxu0 %v7412_v4  ;;  %v7451_v60 = vld [vmem:[%s9201_s1 + $0xeb0] sm:$0xff]   ;;  %v7454_v63 = vld [vmem:[%s9201_s1 + $0xe28] sm:$0xff]   ;;  %v7459_v4 = vld [vmem:[%s9201_s1 + $0xea0] sm:$0xff]  }
 0x1a6   :  { %v6518_v61 = vadd.f32 %v6517_v59, %v6516_v51  ;;  %v6539_v62 = vpop.f32.mrf.mxu1  ;;  %6832 = vmatprep.subr.bf16.mxu1 %v7413_v5  ;;  %5446 = vmatprep.mubr.bf16.mxu0 %v5713_v39  ;;  %v7460_v5 = vld [vmem:[%s9201_s1 + $0xe58] sm:$0xff]  }
 0x1a7   :  { %v6540_v0 = vadd.f32 %v6539_v62, %v6538_v56  ;;  %v6519_v1 = vpop.f32.mrf.mxu0  ;;  %5486 = vmatprep.mubr.bf16.mxu1 %v5715_v43  ;;  %v7453_v62 = vld [vmem:[%s9201_s1 + $0xee8] sm:$0xff]  }
 0x1a8   :  { %v4889_v2 = vadd.f32 %v6518_v61, %v8793_v20  ;;  %v6541_v3 = vpop.f32.mrf.mxu1  ;;  %6811 = vmatpush3.bf16.msra.mxu0 %v7414_v8  ;;  %v7425_v20 = vld [vmem:[%s9201_s1 + $0xdd8] sm:$0xff]   ;;  %v7452_v61 = vld [vmem:[%s9201_s1 + $0xe68] sm:$0xff]   ;;  %v7456_v1 = vld [vmem:[%s9201_s1 + $0xe60] sm:$0xff]  }
 0x1a9   :  { %v6520_v6 = vpop.f32.mrf.mxu0  ;;  %6833 = vmatpush3.bf16.msra.mxu1 %v7415_v10  ;;  %6812 = vmatprep.subr.bf16.mxu0 %v7416_v11  ;;  %v7458_v3 = vld [vmem:[%s9201_s1 + $0xe20] sm:$0xff]   ;;  %v7463_v8 = vld [vmem:[%s9201_s1 + $0xe98] sm:$0xff]   ;;  %v7465_v10 = vld [vmem:[%s9201_s1 + $0xed0] sm:$0xff]  }
 0x1aa   :  { %v8901_v7 = vadd.f32 %v6540_v0, %v4889_v2  ;;  %v6542_v9 = vpop.f32.mrf.mxu1  ;;  %6834 = vmatprep.subr.bf16.mxu1 %v7417_v12  ;;  %v7455_v0 = vld [vmem:[%s9201_s1 + $0xea8] sm:$0xff]   ;;  %v7457_v2 = vld [vmem:[%s9201_s1 + $0xee0] sm:$0xff]   ;;  %v7461_v6 = vld [vmem:[%s9201_s1 + $0xed8] sm:$0xff]  }
 0x1ab   :  { %v7464_v9 = vld [vmem:[%s9201_s1 + $0xe50] sm:$0xff]  }
 0x1ac   :  { %6813 = vmatpush3.bf16.msra.mxu0 %v7418_v13  ;;  %v7466_v11 = vld [vmem:[%s9201_s1 + $0xe10] sm:$0xff]   ;;  %v7468_v13 = vld [vmem:[%s9201_s1 + $0xe48] sm:$0xff]  }
 0x1ad   :  { %6835 = vmatpush3.bf16.msra.mxu1 %v7419_v14  ;;  %6814 = vmatprep.subr.bf16.mxu0 %v7420_v15  ;;  %v7467_v12 = vld [vmem:[%s9201_s1 + $0xe90] sm:$0xff]   ;;  %v7469_v14 = vld [vmem:[%s9201_s1 + $0xec8] sm:$0xff]  }
 0x1ae   :  { %6836 = vmatprep.subr.bf16.mxu1 %v7421_v16  ;;  %v7470_v15 = vld [vmem:[%s9201_s1 + $0xe08] sm:$0xff]  }
 0x1af   :  { %v7471_v16 = vld [vmem:[%s9201_s1 + $0xe88] sm:$0xff]  }
 0x1b0   :  { %6815 = vmatpush3.bf16.msra.mxu0 %v7422_v17  ;;  %v7472_v17 = vld [vmem:[%s9201_s1 + $0xe40] sm:$0xff]  }
 0x1b1   :  { %6837 = vmatpush3.bf16.msra.mxu1 %v7423_v18  ;;  %6816 = vmatprep.subr.bf16.mxu0 %v7424_v19  ;;  %v7473_v18 = vld [vmem:[%s9201_s1 + $0xec0] sm:$0xff]  }
 0x1b2   :  { %6838 = vmatprep.subr.bf16.mxu1 %v7425_v20  ;;  %v7474_v19 = vld [vmem:[%s9201_s1 + $0xe00] sm:$0xff]  }
 0x1b3   :  { %v7475_v20 = vld [vmem:[%s9201_s1 + $0xe80] sm:$0xff]  }
 0x1b4   :  { %6817 = vmatpush3.bf16.msra.mxu0 %v7426_v21  ;;  %v43_v21 = vld [vmem:[%s9202_s0 + $0xe0] sm:$0xff] }
 0x1b5   :  { %6839 = vmatpush3.bf16.msra.mxu1 %v7427_v22  ;;  %6818 = vmatprep.subr.bf16.mxu0 %v7428_v23  ;;  %v5716_v22 = vcombine.low %v43_v21, %v43_v21  ;;  %v5717_v23 = vcombine.high %v43_v21, %v43_v21 }
 0x1b6   :  { %6840 = vmatprep.subr.bf16.mxu1 %v7429_v24  ;;  %v44_v24 = vld [vmem:[%s9202_s0 + $0xe8] sm:$0xff] }
 0x1b8   :  { %6819 = vmatpush3.bf16.msra.mxu0 %v7430_v25 }
 0x1b9   :  { %6841 = vmatpush3.bf16.msra.mxu1 %v7431_v26  ;;  %6820 = vmatprep.subr.bf16.mxu0 %v7432_v27  ;;  %v5718_v27 = vcombine.low %v44_v24, %v44_v24 }
 0x1ba   :  { %6842 = vmatprep.subr.bf16.mxu1 %v7433_v28  ;;  %v5719_v28 = vcombine.high %v44_v24, %v44_v24 }
 0x1bc   :  { %6821 = vmatpush3.bf16.msra.mxu0 %v7434_v29  ;;  %v7480_v29 = vld [vmem:[%s9201_s1 + $0xf78] sm:$0xff]  }
 0x1bd   :  { %6843 = vmatpush3.bf16.msra.mxu1 %v7435_v30  ;;  %6822 = vmatprep.subr.bf16.mxu0 %v7436_v31  ;;  %v7481_v30 = vld [vmem:[%s9201_s1 + $0xff8] sm:$0xff]  }
 0x1be   :  { %6844 = vmatprep.subr.bf16.mxu1 %v7437_v32 }
 0x1c0   :  { %6823 = vmatpush3.bf16.msra.mxu0 %v7438_v33  ;;  %v7482_v33 = vld [vmem:[%s9201_s1 + $0xf38] sm:$0xff]  }
 0x1c1   :  { %6845 = vmatpush3.bf16.msra.mxu1 %v7439_v34  ;;  %6852 = vmatprep.subr.bf16.mxu0 %v7444_v42 }
 0x1c2   :  { %6874 = vmatprep.subr.bf16.mxu1 %v7445_v44 }
 0x1c3   :  { %v6560_v37 = vpop.f32.mrf.mxu0  ;;  %5447 = vmatmul.mubr.bf16.vlgmr.msra.gmra.mxu0 %v5712_v38 }
 0x1c4   :  { %v6582_v41 = vpop.f32.mrf.mxu1  ;;  %5487 = vmatmul.mubr.bf16.vlgmr.msra.gmra.mxu1 %v5714_v40  ;;  %6853 = vmatpush3.bf16.msra.mxu0 %v7446_v46  ;;  %v7484_v40 = vld [vmem:[%s9201_s1 + $0xf70] sm:$0xff]  }
 0x1c5   :  { %v6561_v45 = vpop.f32.mrf.mxu0  ;;  %6875 = vmatpush3.bf16.msra.mxu1 %v7447_v49  ;;  %6854 = vmatprep.subr.bf16.mxu0 %v7448_v54  ;;  %v7487_v46 = vld [vmem:[%s9201_s1 + $0xfb0] sm:$0xff]   ;;  %v7490_v49 = vld [vmem:[%s9201_s1 + $0xf28] sm:$0xff]   ;;  %v7495_v54 = vld [vmem:[%s9201_s1 + $0xfa0] sm:$0xff]  }
 0x1c6   :  { %v6562_v47 = vadd.f32 %v6561_v45, %v6560_v37  ;;  %v6583_v48 = vpop.f32.mrf.mxu1  ;;  %6876 = vmatprep.subr.bf16.mxu1 %v7449_v55  ;;  %5526 = vmatprep.mubr.bf16.mxu0 %v5717_v23  ;;  %v7486_v45 = vld [vmem:[%s9201_s1 + $0xf30] sm:$0xff]   ;;  %v7496_v55 = vld [vmem:[%s9201_s1 + $0xf58] sm:$0xff]  }
 0x1c7   :  { %v6584_v50 = vadd.f32 %v6583_v48, %v6582_v41  ;;  %v6563_v51 = vpop.f32.mrf.mxu0  ;;  %5566 = vmatprep.mubr.bf16.mxu1 %v5719_v28  ;;  %v7485_v41 = vld [vmem:[%s9201_s1 + $0xff0] sm:$0xff]   ;;  %v7489_v48 = vld [vmem:[%s9201_s1 + $0xfe8] sm:$0xff]  }
 0x1c8   :  { %v4969_v52 = vadd.f32 %v6562_v47, %v8901_v7  ;;  %v6585_v53 = vpop.f32.mrf.mxu1  ;;  %6855 = vmatpush3.bf16.msra.mxu0 %v7450_v58  ;;  %v7462_v7 = vld [vmem:[%s9201_s1 + $0xe18] sm:$0xff]   ;;  %v7488_v47 = vld [vmem:[%s9201_s1 + $0xf68] sm:$0xff]   ;;  %v7492_v51 = vld [vmem:[%s9201_s1 + $0xf60] sm:$0xff]  }
 0x1c9   :  { %v6564_v56 = vpop.f32.mrf.mxu0  ;;  %6877 = vmatpush3.bf16.msra.mxu1 %v7451_v60  ;;  %6856 = vmatprep.subr.bf16.mxu0 %v7452_v61  ;;  %v7494_v53 = vld [vmem:[%s9201_s1 + $0xf20] sm:$0xff]   ;;  %v7499_v58 = vld [vmem:[%s9201_s1 + $0xf98] sm:$0xff]   ;;  %v7501_v60 = vld [vmem:[%s9201_s1 + $0xfd0] sm:$0xff]  }
 0x1ca   :  { %v9006_v57 = vadd.f32 %v6584_v50, %v4969_v52  ;;  %v6586_v59 = vpop.f32.mrf.mxu1  ;;  %6878 = vmatprep.subr.bf16.mxu1 %v7453_v62  ;;  %v7491_v50 = vld [vmem:[%s9201_s1 + $0xfa8] sm:$0xff]   ;;  %v7493_v52 = vld [vmem:[%s9201_s1 + $0xfe0] sm:$0xff]   ;;  %v7497_v56 = vld [vmem:[%s9201_s1 + $0xfd8] sm:$0xff]  }
 0x1cb   :  { %v7500_v59 = vld [vmem:[%s9201_s1 + $0xf50] sm:$0xff]  }
 0x1cc   :  { %6857 = vmatpush3.bf16.msra.mxu0 %v7454_v63  ;;  %v7502_v61 = vld [vmem:[%s9201_s1 + $0xf10] sm:$0xff]   ;;  %v7504_v63 = vld [vmem:[%s9201_s1 + $0xf48] sm:$0xff]  }
 0x1cd   :  { %6879 = vmatpush3.bf16.msra.mxu1 %v7455_v0  ;;  %6858 = vmatprep.subr.bf16.mxu0 %v7456_v1  ;;  %v7503_v62 = vld [vmem:[%s9201_s1 + $0xf90] sm:$0xff]   ;;  %v7505_v0 = vld [vmem:[%s9201_s1 + $0xfc8] sm:$0xff]  }
 0x1ce   :  { %6880 = vmatprep.subr.bf16.mxu1 %v7457_v2  ;;  %v7506_v1 = vld [vmem:[%s9201_s1 + $0xf08] sm:$0xff]  }
 0x1cf   :  { %v7507_v2 = vld [vmem:[%s9201_s1 + $0xf88] sm:$0xff]  }
 0x1d0   :  { %6859 = vmatpush3.bf16.msra.mxu0 %v7458_v3  ;;  %v7508_v3 = vld [vmem:[%s9201_s1 + $0xf40] sm:$0xff]  }
 0x1d1   :  { %6881 = vmatpush3.bf16.msra.mxu1 %v7459_v4  ;;  %6860 = vmatprep.subr.bf16.mxu0 %v7460_v5  ;;  %v7509_v4 = vld [vmem:[%s9201_s1 + $0xfc0] sm:$0xff]  }
 0x1d2   :  { %6882 = vmatprep.subr.bf16.mxu1 %v7461_v6  ;;  %v7510_v5 = vld [vmem:[%s9201_s1 + $0xf00] sm:$0xff]  }
 0x1d3   :  { %v7511_v6 = vld [vmem:[%s9201_s1 + $0xf80] sm:$0xff]  }
 0x1d4   :  { %6861 = vmatpush3.bf16.msra.mxu0 %v7462_v7  ;;  %v45_v7 = vld [vmem:[%s9202_s0 + $0xf0] sm:$0xff] }
 0x1d5   :  { %6883 = vmatpush3.bf16.msra.mxu1 %v7463_v8  ;;  %6862 = vmatprep.subr.bf16.mxu0 %v7464_v9  ;;  %v46_v8 = vld [vmem:[%s9202_s0 + $0xf8] sm:$0xff] }
 0x1d6   :  { %6884 = vmatprep.subr.bf16.mxu1 %v7465_v10  ;;  %v5720_v10 = vcombine.low %v45_v7, %v45_v7 }
 0x1d8   :  { %6863 = vmatpush3.bf16.msra.mxu0 %v7466_v11  ;;  %v5721_v11 = vcombine.high %v45_v7, %v45_v7 }
 0x1d9   :  { %6885 = vmatpush3.bf16.msra.mxu1 %v7467_v12  ;;  %6864 = vmatprep.subr.bf16.mxu0 %v7468_v13  ;;  %v5722_v12 = vcombine.low %v46_v8, %v46_v8  ;;  %v5723_v13 = vcombine.high %v46_v8, %v46_v8 }
 0x1da   :  { %6886 = vmatprep.subr.bf16.mxu1 %v7469_v14 }
 0x1dc   :  { %6865 = vmatpush3.bf16.msra.mxu0 %v7470_v15 }
 0x1dd   :  { %6887 = vmatpush3.bf16.msra.mxu1 %v7471_v16  ;;  %6866 = vmatprep.subr.bf16.mxu0 %v7472_v17 }
 0x1de   :  { %6888 = vmatprep.subr.bf16.mxu1 %v7473_v18 }
 0x1e0   :  { %6867 = vmatpush3.bf16.msra.mxu0 %v7474_v19 }
 0x1e1   :  { %6889 = vmatpush3.bf16.msra.mxu1 %v7475_v20  ;;  %6896 = vmatprep.subr.bf16.mxu0 %v7480_v29 }
 0x1e2   :  { %6918 = vmatprep.subr.bf16.mxu1 %v7481_v30 }
 0x1e3   :  { %v6604_v25 = vpop.f32.mrf.mxu0  ;;  %5527 = vmatmul.mubr.bf16.vlgmr.msra.gmra.mxu0 %v5716_v22 }
 0x1e4   :  { %v6626_v26 = vpop.f32.mrf.mxu1  ;;  %5567 = vmatmul.mubr.bf16.vlgmr.msra.gmra.mxu1 %v5718_v27  ;;  %6897 = vmatpush3.bf16.msra.mxu0 %v7482_v33 }
 0x1e5   :  { %v6605_v31 = vpop.f32.mrf.mxu0  ;;  %6919 = vmatpush3.bf16.msra.mxu1 %v7483_v36  ;;  %6898 = vmatprep.subr.bf16.mxu0 %v7484_v40 }
 0x1e6   :  { %v6627_v32 = vpop.f32.mrf.mxu1  ;;  %v6606_v34 = vadd.f32 %v6605_v31, %v6604_v25  ;;  %6920 = vmatprep.subr.bf16.mxu1 %v7485_v41  ;;  %5606 = vmatprep.mubr.bf16.mxu0 %v5721_v11 }
 0x1e7   :  { %v6628_v35 = vadd.f32 %v6627_v32, %v6626_v26  ;;  %v6607_v37 = vpop.f32.mrf.mxu0  ;;  %5646 = vmatprep.mubr.bf16.mxu1 %v5723_v13 }
 0x1e8   :  { %v6629_v38 = vpop.f32.mrf.mxu1  ;;  %v5049_v39 = vadd.f32 %v6606_v34, %v9006_v57  ;;  %6899 = vmatpush3.bf16.msra.mxu0 %v7486_v45  ;;  %v7498_v57 = vld [vmem:[%s9201_s1 + $0xf18] sm:$0xff]  }
 0x1e9   :  { %v6608_v42 = vpop.f32.mrf.mxu0  ;;  %6921 = vmatpush3.bf16.msra.mxu1 %v7487_v46  ;;  %6900 = vmatprep.subr.bf16.mxu0 %v7488_v47 }
 0x1ea   :  { %v6630_v43 = vpop.f32.mrf.mxu1  ;;  %v9111_v44 = vadd.f32 %v6628_v35, %v5049_v39  ;;  %6922 = vmatprep.subr.bf16.mxu1 %v7489_v48 }
 0x1ec   :  { %6901 = vmatpush3.bf16.msra.mxu0 %v7490_v49 }
 0x1ed   :  { %6923 = vmatpush3.bf16.msra.mxu1 %v7491_v50  ;;  %6902 = vmatprep.subr.bf16.mxu0 %v7492_v51 }
 0x1ee   :  { %6924 = vmatprep.subr.bf16.mxu1 %v7493_v52 }
 0x1f0   :  { %6903 = vmatpush3.bf16.msra.mxu0 %v7494_v53 }
 0x1f1   :  { %6925 = vmatpush3.bf16.msra.mxu1 %v7495_v54  ;;  %6904 = vmatprep.subr.bf16.mxu0 %v7496_v55 }
 0x1f2   :  { %6926 = vmatprep.subr.bf16.mxu1 %v7497_v56 }
 0x1f4   :  { %6905 = vmatpush3.bf16.msra.mxu0 %v7498_v57 }
 0x1f5   :  { %6927 = vmatpush3.bf16.msra.mxu1 %v7499_v58  ;;  %6906 = vmatprep.subr.bf16.mxu0 %v7500_v59 }
 0x1f6   :  { %6928 = vmatprep.subr.bf16.mxu1 %v7501_v60 }
 0x1f8   :  { %6907 = vmatpush3.bf16.msra.mxu0 %v7502_v61 }
 0x1f9   :  { %6929 = vmatpush3.bf16.msra.mxu1 %v7503_v62  ;;  %6908 = vmatprep.subr.bf16.mxu0 %v7504_v63 }
 0x1fa   :  { %6930 = vmatprep.subr.bf16.mxu1 %v7505_v0 }
 0x1fc   :  { %6909 = vmatpush3.bf16.msra.mxu0 %v7506_v1 }
 0x1fd   :  { %6931 = vmatpush3.bf16.msra.mxu1 %v7507_v2  ;;  %6910 = vmatprep.subr.bf16.mxu0 %v7508_v3 }
 0x1fe   :  { %6932 = vmatprep.subr.bf16.mxu1 %v7509_v4 }
 0x200   :  { %6911 = vmatpush3.bf16.msra.mxu0 %v7510_v5 }
 0x201   :  { %6933 = vmatpush3.bf16.msra.mxu1 %v7511_v6 }
 0x203   :  { %v6648_v9 = vpop.f32.mrf.mxu0  ;;  %5607 = vmatmul.mubr.bf16.vlgmr.msra.gmra.mxu0 %v5720_v10 }
 0x204   :  { %v6670_v14 = vpop.f32.mrf.mxu1  ;;  %5647 = vmatmul.mubr.bf16.vlgmr.msra.gmra.mxu1 %v5722_v12 }
 0x205   :  { %v6649_v15 = vpop.f32.mrf.mxu0 }
 0x206   :  { %v6650_v16 = vadd.f32 %v6649_v15, %v6648_v9  ;;  %v6671_v17 = vpop.f32.mrf.mxu1 }
 0x207   :  { %v6672_v18 = vadd.f32 %v6671_v17, %v6670_v14  ;;  %v6651_v19 = vpop.f32.mrf.mxu0 }
 0x208   :  { %v5129_v20 = vadd.f32 %v6650_v16, %v9111_v44  ;;  %v6673_v21 = vpop.f32.mrf.mxu1 }
 0x209   :  { %v6652_v22 = vpop.f32.mrf.mxu0 }
 0x20a   :  { %v5169_v23 = vadd.f32 %v6672_v18, %v5129_v20  ;;  %v6674_v24 = vpop.f32.mrf.mxu1 }
 0x223   :  { %v6692_v25 = vpop.f32.mrf.mxu0 }
 0x224   :  { %v6714_v26 = vpop.f32.mrf.mxu1 }
 0x225   :  { %v6693_v27 = vpop.f32.mrf.mxu0 }
 0x226   :  { %v6694_v28 = vadd.f32 %v6693_v27, %v6692_v25  ;;  %v6715_v29 = vpop.f32.mrf.mxu1 }
 0x227   :  { %v6716_v30 = vadd.f32 %v6715_v29, %v6714_v26  ;;  %v6695_v31 = vpop.f32.mrf.mxu0 }
 0x228   :  { %v5209_v32 = vadd.f32 %v6694_v28, %v5169_v23  ;;  %v6717_v33 = vpop.f32.mrf.mxu1 }
 0x229   :  { %v6696_v34 = vpop.f32.mrf.mxu0 }
 0x22a   :  { %v5249_v35 = vadd.f32 %v6716_v30, %v5209_v32  ;;  %v6718_v36 = vpop.f32.mrf.mxu1 }
 0x243   :  { %v6736_v37 = vpop.f32.mrf.mxu0 }
 0x244   :  { %v6758_v38 = vpop.f32.mrf.mxu1 }
 0x245   :  { %v6737_v39 = vpop.f32.mrf.mxu0 }
 0x246   :  { %v6759_v40 = vpop.f32.mrf.mxu1  ;;  %v6738_v41 = vadd.f32 %v6737_v39, %v6736_v37 }
 0x247   :  { %v6760_v42 = vadd.f32 %v6759_v40, %v6758_v38  ;;  %v6739_v43 = vpop.f32.mrf.mxu0 }
 0x248   :  { %v6761_v44 = vpop.f32.mrf.mxu1  ;;  %v5289_v45 = vadd.f32 %v6738_v41, %v5249_v35 }
 0x249   :  { %v6740_v46 = vpop.f32.mrf.mxu0 }
 0x24a   :  { %v6762_v47 = vpop.f32.mrf.mxu1  ;;  %v5329_v48 = vadd.f32 %v6760_v42, %v5289_v45 }
 0x263   :  { %v6780_v49 = vpop.f32.mrf.mxu0 }
 0x264   :  { %v6802_v50 = vpop.f32.mrf.mxu1 }
 0x265   :  { %v6781_v51 = vpop.f32.mrf.mxu0 }
 0x266   :  { %v6782_v52 = vadd.f32 %v6781_v51, %v6780_v49  ;;  %v6803_v53 = vpop.f32.mrf.mxu1 }
 0x267   :  { %v6804_v54 = vadd.f32 %v6803_v53, %v6802_v50  ;;  %v6783_v55 = vpop.f32.mrf.mxu0 }
 0x268   :  { %v5369_v56 = vadd.f32 %v6782_v52, %v5329_v48  ;;  %v6805_v57 = vpop.f32.mrf.mxu1 }
 0x269   :  { %v6784_v58 = vpop.f32.mrf.mxu0 }
 0x26a   :  { %v5409_v59 = vadd.f32 %v6804_v54, %v5369_v56  ;;  %v6806_v60 = vpop.f32.mrf.mxu1 }
 0x283   :  { %v6824_v61 = vpop.f32.mrf.mxu0 }
 0x284   :  { %v6846_v62 = vpop.f32.mrf.mxu1 }
 0x285   :  { %v6825_v63 = vpop.f32.mrf.mxu0 }
 0x286   :  { %v6847_v0 = vpop.f32.mrf.mxu1  ;;  %v6826_v13 = vadd.f32 %v6825_v63, %v6824_v61 }
 0x287   :  { %v6827_v1 = vpop.f32.mrf.mxu0  ;;  %v6848_v15 = vadd.f32 %v6847_v0, %v6846_v62 }
 0x288   :  { %v6849_v2 = vpop.f32.mrf.mxu1  ;;  %v5449_v14 = vadd.f32 %v6826_v13, %v5409_v59 }
 0x289   :  { %v6828_v3 = vpop.f32.mrf.mxu0 }
 0x28a   :  { %v6850_v4 = vpop.f32.mrf.mxu1  ;;  %v5489_v17 = vadd.f32 %v6848_v15, %v5449_v14 }
 0x2a3   :  { %v6868_v5 = vpop.f32.mrf.mxu0 }
 0x2a4   :  { %v6890_v6 = vpop.f32.mrf.mxu1 }
 0x2a5   :  { %v6869_v7 = vpop.f32.mrf.mxu0 }
 0x2a6   :  { %v6891_v8 = vpop.f32.mrf.mxu1  ;;  %v6870_v16 = vadd.f32 %v6869_v7, %v6868_v5 }
 0x2a7   :  { %v6871_v9 = vpop.f32.mrf.mxu0  ;;  %v6892_v19 = vadd.f32 %v6891_v8, %v6890_v6 }
 0x2a8   :  { %v6893_v10 = vpop.f32.mrf.mxu1  ;;  %v5529_v18 = vadd.f32 %v6870_v16, %v5489_v17 }
 0x2a9   :  { %v6872_v11 = vpop.f32.mrf.mxu0 }
 0x2aa   :  { %v6894_v12 = vpop.f32.mrf.mxu1  ;;  %v5569_v23 = vadd.f32 %v6892_v19, %v5529_v18 }
 0x2c3   :  { %v6912_v20 = vpop.f32.mrf.mxu0 }
 0x2c4   :  { %v6934_v21 = vpop.f32.mrf.mxu1 }
 0x2c5   :  { %v6913_v22 = vpop.f32.mrf.mxu0 }
 0x2c6   :  { %v6914_v24 = vadd.f32 %v6913_v22, %v6912_v20  ;;  %v6935_v25 = vpop.f32.mrf.mxu1 }
 0x2c7   :  { %v6915_v26 = vpop.f32.mrf.mxu0  ;;  %v6936_v28 = vadd.f32 %v6935_v25, %v6934_v21 }
 0x2c8   :  { %v5609_v27 = vadd.f32 %v6914_v24, %v5569_v23  ;;  %v6937_v29 = vpop.f32.mrf.mxu1 }
 0x2c9   :  { %v6916_v30 = vpop.f32.mrf.mxu0 }
 0x2ca   :  { %v5649_v31 = vadd.f32 %v6936_v28, %v5609_v27  ;;  %v6938_v32 = vpop.f32.mrf.mxu1 }
 0x2cc   :  { %5654 = vst [vmem:[%s9204_s3] sm:$0xff] %v5649_v31 }

</bundles_post_ra>
